<compile_context>
chip_gen: v7x
topology: tpu7x:2x2x1
jax: 0.10.0
libtpu: 0.0.40
codegen_flags: <defaults>
</compile_context>

<pallas_src>
import functools

import jax
import jax.numpy as jnp
from jax import lax
from jax.experimental import pallas as pl
from jax.experimental.pallas import tpu as pltpu

_VMEM_LIMIT = 48 * 1024 * 1024   # headroom under v7x's 64 MiB physical VMEM
_MASK_VALUE = -1e30              # finite mask value


def _compiler_params(n_parallel, n_arbitrary=0):
    sem = ("parallel",) * n_parallel + ("arbitrary",) * n_arbitrary
    return pltpu.CompilerParams(dimension_semantics=sem,
                                vmem_limit_bytes=_VMEM_LIMIT)


def _layer_norm_f32(x, gamma, beta, eps=1e-5):
    mu = jnp.mean(x, axis=-1, keepdims=True)
    var = jnp.mean(jnp.square(x - mu), axis=-1, keepdims=True)
    return (x - mu) * lax.rsqrt(var + eps) * gamma + beta


# ----------------------------------------------------------------------------
# Fused pre-LayerNorm + Linear (LN cached in VMEM scratch across output tiles)
# ----------------------------------------------------------------------------
def ln_linear_kernel(x_ref, g_ref, beta_ref, w_ref, b_ref, o_ref, h_sc, *,
                     activation):
    """grid = (B, T/tq, N/tn) with n innermost ('arbitrary').  The LayerNorm of
    the (tq, D) row is computed once per (b, i) under pl.when(n == 0), cached
    as bf16 in VMEM scratch, and reused for every streamed (D, tn) weight tile.
    """
    @pl.when(pl.program_id(2) == 0)
    def _ln():
        x = x_ref[0].astype(jnp.float32)                       # f32 stats (v5e-safe)
        h_sc[...] = _layer_norm_f32(x, g_ref[...], beta_ref[...]).astype(jnp.bfloat16)

    z = jnp.dot(h_sc[...], w_ref[...],
                preferred_element_type=jnp.float32) + b_ref[...]
    if activation == "gelu":                                   # exact erf GELU in f32
        z = 0.5 * z * (1.0 + lax.erf(z * 0.7071067811865476))
    o_ref[0] = z.astype(o_ref.dtype)


def ln_linear(x, gamma, beta, w_t, bias, *, activation=None,
              out_dtype=jnp.bfloat16, tq=128, tn=256):
    B, T, D = x.shape
    N = w_t.shape[1]
    tq = min(tq, T)
    tn = min(tn, N)
    assert T % tq == 0 and N % tn == 0
    return pl.pallas_call(
        functools.partial(ln_linear_kernel, activation=activation),
        out_shape=jax.ShapeDtypeStruct((B, T, N), out_dtype),
        grid=(B, T // tq, N // tn),
        in_specs=[
            pl.BlockSpec((1, tq, D), lambda b, i, n: (b, i, 0)),
            pl.BlockSpec((1, D), lambda b, i, n: (0, 0)),
            pl.BlockSpec((1, D), lambda b, i, n: (0, 0)),
            pl.BlockSpec((D, tn), lambda b, i, n: (0, n)),
            pl.BlockSpec((1, tn), lambda b, i, n: (0, n)),
        ],
        out_specs=pl.BlockSpec((1, tq, tn), lambda b, i, n: (b, i, n)),
        scratch_shapes=[pltpu.VMEM((tq, D), jnp.bfloat16)],     # cached LN row
        compiler_params=_compiler_params(2, 1),
    )(x, gamma, beta, w_t, bias)


# ----------------------------------------------------------------------------
# Plain Linear (+ optional fused residual).  Full-K path (no accumulator) for
# the shapes here; a K-reduction fallback is kept for larger contractions.
# ----------------------------------------------------------------------------
def linear_noacc_kernel(x_ref, w_ref, b_ref, o_ref):
    z = jnp.dot(x_ref[0].astype(jnp.bfloat16), w_ref[...],
                preferred_element_type=jnp.float32) + b_ref[...]
    o_ref[0] = z.astype(o_ref.dtype)


def linear_noacc_res_kernel(x_ref, res_ref, w_ref, b_ref, o_ref):
    z = jnp.dot(x_ref[0].astype(jnp.bfloat16), w_ref[...],
                preferred_element_type=jnp.float32) + b_ref[...]
    o_ref[0] = (res_ref[0] + z).astype(o_ref.dtype)


def linear_acc_kernel(x_ref, w_ref, b_ref, o_ref, acc_ref):
    k = pl.program_id(3)

    @pl.when(k == 0)
    def _init():
        acc_ref[...] = jnp.zeros_like(acc_ref)

    acc_ref[...] += jnp.dot(x_ref[0].astype(jnp.bfloat16), w_ref[...],
                            preferred_element_type=jnp.float32)

    @pl.when(k == pl.num_programs(3) - 1)
    def _epilogue():
        o_ref[0] = (acc_ref[...] + b_ref[...]).astype(o_ref.dtype)


def linear_acc_res_kernel(x_ref, res_ref, w_ref, b_ref, o_ref, acc_ref):
    k = pl.program_id(3)

    @pl.when(k == 0)
    def _init():
        acc_ref[...] = jnp.zeros_like(acc_ref)

    acc_ref[...] += jnp.dot(x_ref[0].astype(jnp.bfloat16), w_ref[...],
                            preferred_element_type=jnp.float32)

    @pl.when(k == pl.num_programs(3) - 1)
    def _epilogue():
        o_ref[0] = (res_ref[0] + acc_ref[...] + b_ref[...]).astype(o_ref.dtype)


def linear(x, w_t, bias, residual=None, *, out_dtype=jnp.float32,
           tq=128, tn=256, tk=1024):
    B, T, K = x.shape
    N = w_t.shape[1]
    tq = min(tq, T)
    tn = min(tn, N)
    tk = min(tk, K)
    assert T % tq == 0 and N % tn == 0 and K % tk == 0
    out_shape = jax.ShapeDtypeStruct((B, T, N), out_dtype)

    if tk == K:
        # Full-K resident: no reduction grid axis, no accumulator scratch.
        grid = (B, T // tq, N // tn)
        x_spec = pl.BlockSpec((1, tq, K), lambda b, i, n: (b, i, 0))
        w_spec = pl.BlockSpec((K, tn), lambda b, i, n: (0, n))
        b_spec = pl.BlockSpec((1, tn), lambda b, i, n: (0, n))
        o_spec = pl.BlockSpec((1, tq, tn), lambda b, i, n: (b, i, n))
        cp = _compiler_params(3)
        if residual is None:
            return pl.pallas_call(
                linear_noacc_kernel, out_shape=out_shape, grid=grid,
                in_specs=[x_spec, w_spec, b_spec], out_specs=o_spec,
                compiler_params=cp,
            )(x, w_t, bias)
        r_spec = pl.BlockSpec((1, tq, tn), lambda b, i, n: (b, i, n))
        return pl.pallas_call(
            linear_noacc_res_kernel, out_shape=out_shape, grid=grid,
            in_specs=[x_spec, r_spec, w_spec, b_spec], out_specs=o_spec,
            compiler_params=cp,
        )(x, residual, w_t, bias)

    # K-reduction fallback for large contractions.
    grid = (B, T // tq, N // tn, K // tk)
    x_spec = pl.BlockSpec((1, tq, tk), lambda b, i, n, k: (b, i, k))
    w_spec = pl.BlockSpec((tk, tn), lambda b, i, n, k: (k, n))
    b_spec = pl.BlockSpec((1, tn), lambda b, i, n, k: (0, n))
    o_spec = pl.BlockSpec((1, tq, tn), lambda b, i, n, k: (b, i, n))
    scratch = [pltpu.VMEM((tq, tn), jnp.float32)]
    cp = _compiler_params(3, 1)
    if residual is None:
        return pl.pallas_call(
            linear_acc_kernel, out_shape=out_shape, grid=grid,
            in_specs=[x_spec, w_spec, b_spec], out_specs=o_spec,
            scratch_shapes=scratch, compiler_params=cp,
        )(x, w_t, bias)
    r_spec = pl.BlockSpec((1, tq, tn), lambda b, i, n, k: (b, i, n))
    return pl.pallas_call(
        linear_acc_res_kernel, out_shape=out_shape, grid=grid,
        in_specs=[x_spec, r_spec, w_spec, b_spec], out_specs=o_spec,
        scratch_shapes=scratch, compiler_params=cp,
    )(x, residual, w_t, bias)


# ----------------------------------------------------------------------------
# Fused to_logits + lm_head (both weights VMEM-resident, no HBM round trip)
# ----------------------------------------------------------------------------
def fused_head_kernel(x_ref, w1_ref, b1_ref, w2_ref, b2_ref, o_ref):
    z1 = jnp.dot(x_ref[0].astype(jnp.bfloat16), w1_ref[...],
                 preferred_element_type=jnp.float32) + b1_ref[...]
    z2 = jnp.dot(z1.astype(jnp.bfloat16), w2_ref[...],
                 preferred_element_type=jnp.float32) + b2_ref[...]
    o_ref[0] = z2.astype(o_ref.dtype)


def fused_head(x, w1_t, b1, w2_t, b2, *, tq=128):
    B, T, D = x.shape
    V1 = w1_t.shape[1]
    V2 = w2_t.shape[1]
    assert w2_t.shape[0] == V1
    tq = min(tq, T)
    assert T % tq == 0
    return pl.pallas_call(
        fused_head_kernel,
        out_shape=jax.ShapeDtypeStruct((B, T, V2), jnp.float32),
        grid=(B, T // tq),
        in_specs=[
            pl.BlockSpec((1, tq, D), lambda b, i: (b, i, 0)),
            pl.BlockSpec((D, V1), lambda b, i: (0, 0)),
            pl.BlockSpec((1, V1), lambda b, i: (0, 0)),
            pl.BlockSpec((V1, V2), lambda b, i: (0, 0)),
            pl.BlockSpec((1, V2), lambda b, i: (0, 0)),
        ],
        out_specs=pl.BlockSpec((1, tq, V2), lambda b, i: (b, i, 0)),
        compiler_params=_compiler_params(2),
    )(x, w1_t, b1, w2_t, b2)


# ----------------------------------------------------------------------------
# Causal flash attention
# ----------------------------------------------------------------------------
def flash_attn_kernel(q_ref, k_ref, v_ref, o_ref, m_sc, l_sc, acc_sc, *,
                      num_heads, head_dim, block_q, block_k):
    """grid = (B, T/tq, T/tkv) with the KV axis as an 'arbitrary' reduction.
    Online-softmax state (m, l, acc) lives in f32 VMEM scratch; heads are
    sliced along the lane axis; 1/sqrt(Dh) is pre-folded into W_q; the causal
    mask is only built/applied on the diagonal tile."""
    qi = pl.program_id(1)
    ki = pl.program_id(2)

    @pl.when(ki == 0)
    def _init():
        m_sc[...] = jnp.full_like(m_sc, _MASK_VALUE)
        l_sc[...] = jnp.zeros_like(l_sc)
        acc_sc[...] = jnp.zeros_like(acc_sc)

    def _step(apply_mask):
        q = q_ref[0].astype(jnp.bfloat16)          # already bf16, scale pre-folded
        k = k_ref[0].astype(jnp.bfloat16)
        v = v_ref[0].astype(jnp.bfloat16)
        if apply_mask:
            # Diagonal tile only (qi == ki, block_q == block_k) -> offsets cancel.
            row = lax.broadcasted_iota(jnp.int32, (block_q, block_k), 0)
            col = lax.broadcasted_iota(jnp.int32, (block_q, block_k), 1)
            mask = row >= col
        for h in range(num_heads):                  # short static unroll
            sl = slice(h * head_dim, (h + 1) * head_dim)
            s = lax.dot_general(q[:, sl], k[:, sl], (((1,), (1,)), ((), ())),
                                preferred_element_type=jnp.float32)   # (tq, tkv)
            if apply_mask:
                s = jnp.where(mask, s, _MASK_VALUE)
            m_prev = m_sc[:, h:h + 1]
            m_cur = jnp.maximum(m_prev, jnp.max(s, axis=-1, keepdims=True))
            alpha = jnp.exp(m_prev - m_cur)
            p = jnp.exp(s - m_cur)
            l_sc[:, h:h + 1] = alpha * l_sc[:, h:h + 1] + jnp.sum(p, axis=-1,
                                                                  keepdims=True)
            acc_sc[:, sl] = alpha * acc_sc[:, sl] + jnp.dot(
                p.astype(jnp.bfloat16), v[:, sl], preferred_element_type=jnp.float32)
            m_sc[:, h:h + 1] = m_cur

    @pl.when(ki < qi)        # fully-unmasked tiles: no mask construction/select
    def _off_diag():
        _step(apply_mask=False)

    @pl.when(ki == qi)       # diagonal tile is the last contributor for this q block
    def _diag_and_epilogue():
        _step(apply_mask=True)
        for h in range(num_heads):
            sl = slice(h * head_dim, (h + 1) * head_dim)
            inv_l = pl.reciprocal(l_sc[:, h:h + 1], approx=True)   # EUP, ~free
            o_ref[0, :, sl] = (acc_sc[:, sl] * inv_l).astype(o_ref.dtype)


def flash_attention(qkv, *, num_heads, tq=128, tkv=128):
    B, T, three_d = qkv.shape
    D = three_d // 3
    Dh = D // num_heads
    tq = min(tq, T)
    tkv = min(tkv, T)
    assert tq == tkv                       # causal tile-skip logic assumes square tiles
    assert T % tq == 0 and D % num_heads == 0
    kern = functools.partial(flash_attn_kernel, num_heads=num_heads, head_dim=Dh,
                             block_q=tq, block_k=tkv)

    # K/V index maps clamp ki to qi: fully-masked tiles (ki > qi) re-use the
    # previous block index so Pallas skips their DMA.
    def k_map(b, qi, ki):
        return (b, jnp.minimum(ki, qi), 1)

    def v_map(b, qi, ki):
        return (b, jnp.minimum(ki, qi), 2)

    # qkv is passed three times with different BlockSpecs so only the needed
    # q / k / v slabs are DMA'd per grid step.
    return pl.pallas_call(
        kern,
        out_shape=jax.ShapeDtypeStruct((B, T, D), jnp.bfloat16),
        grid=(B, T // tq, T // tkv),
        in_specs=[
            pl.BlockSpec((1, tq, D), lambda b, qi, ki: (b, qi, 0)),   # q slab
            pl.BlockSpec((1, tkv, D), k_map),                         # k slab
            pl.BlockSpec((1, tkv, D), v_map),                         # v slab
        ],
        out_specs=pl.BlockSpec((1, tq, D), lambda b, qi, ki: (b, qi, 0)),
        scratch_shapes=[
            pltpu.VMEM((tq, num_heads), jnp.float32),   # running max  m
            pltpu.VMEM((tq, num_heads), jnp.float32),   # running sum  l
            pltpu.VMEM((tq, D), jnp.float32),           # f32 output accumulator
        ],
        compiler_params=_compiler_params(2, 1),
    )(qkv, qkv, qkv)


# ----------------------------------------------------------------------------
# Full forward
# ----------------------------------------------------------------------------
def monai_decoder_only_forward(src, params, *, num_heads,
                               tq=128, tkv=128, tn=256, tkr=1024):
    """src: int32 token ids (B, T) -> logits (B, T, vocab_size)."""
    T = src.shape[1]
    # Embedding gather (glue, plain JAX): token + positional embeddings.
    x = params["tok_emb"][src] + params["pos_emb"][:T][None, :, :]
    # TODO(synk): embedding dropout (p=0.1) is train-mode only; identity at inference.
    for lp in params["layers"]:
        qkv = ln_linear(x, lp["ln1_w"], lp["ln1_b"], lp["w_qkv_t"], lp["b_qkv"],
                        activation=None, out_dtype=jnp.bfloat16, tq=tq, tn=tn)
        attn = flash_attention(qkv, num_heads=num_heads, tq=tq, tkv=tkv)
        x = linear(attn, lp["w_o_t"], lp["b_o"], residual=x,
                   out_dtype=jnp.float32, tq=tq, tn=tn, tk=tkr)
        z = ln_linear(x, lp["ln2_w"], lp["ln2_b"], lp["w_1_t"], lp["b_1"],
                      activation="gelu", out_dtype=jnp.bfloat16, tq=tq, tn=tn)
        x = linear(z, lp["w_2_t"], lp["b_2"], residual=x,
                   out_dtype=jnp.float32, tq=tq, tn=tn, tk=tkr)
    # transformer.to_logits + outer lm_head fused (requires vocab == d_model).
    return fused_head(x, params["w_tl_t"], params["b_tl"],
                      params["w_lm_t"], params["b_lm"], tq=tq)


# ----------------------------------------------------------------------------
# Deterministic parameter init (synthetic, matches module __init__ shapes).
# Weights pre-transposed once to (in, out) and stored bf16; 1/sqrt(Dh) folded
# into the q columns of w_qkv so kernels never rescale q.
# ----------------------------------------------------------------------------
def init_params(key, d_model, num_layers, vocab_size, max_len, num_heads):
    keys = iter(jax.random.split(key, 8 + 8 * num_layers))

    def nrm(shape, scale=0.02):
        return (scale * jax.random.normal(next(keys), shape)).astype(jnp.float32)

    def linear_w(out_f, in_f, col_scale=None):
        w = nrm((out_f, in_f)).T                     # (in, out) layout, transposed once
        if col_scale is not None:
            w = w * col_scale
        return jnp.asarray(w, jnp.bfloat16)

    head_dim = d_model // num_heads
    attn_scale = head_dim ** -0.5
    qkv_col_scale = jnp.concatenate([
        jnp.full((d_model,), attn_scale, jnp.float32),   # q columns get 1/sqrt(Dh)
        jnp.ones((2 * d_model,), jnp.float32)])[None, :]

    params = {
        "tok_emb": nrm((vocab_size, d_model)),
        "pos_emb": nrm((max_len, d_model)),
        "w_tl_t": linear_w(vocab_size, d_model),     # transformer.to_logits
        "b_tl": nrm((1, vocab_size)),
        "w_lm_t": linear_w(vocab_size, d_model),     # outer lm_head
        "b_lm": nrm((1, vocab_size)),
        "layers": [],
    }
    for _ in range(num_layers):
        params["layers"].append({
            "ln1_w": jnp.ones((1, d_model), jnp.float32),
            "ln1_b": jnp.zeros((1, d_model), jnp.float32),
            "w_qkv_t": linear_w(3 * d_model, d_model, col_scale=qkv_col_scale),
            "b_qkv": jnp.zeros((1, 3 * d_model), jnp.float32),   # qkv_bias=False
            "w_o_t": linear_w(d_model, d_model),
            "b_o": nrm((1, d_model)),
            "ln2_w": jnp.ones((1, d_model), jnp.float32),
            "ln2_b": jnp.zeros((1, d_model), jnp.float32),
            "w_1_t": linear_w(4 * d_model, d_model),
            "b_1": nrm((1, 4 * d_model)),
            "w_2_t": linear_w(d_model, 4 * d_model),
            "b_2": nrm((1, d_model)),
        })
    return params


# ----------------------------------------------------------------------------
# Pure-JAX reference (same bf16-matmul / f32-accumulate recipe and the same
# bf16 intermediate-storage points as the kernels; full softmax).
# ----------------------------------------------------------------------------
def reference_forward(src, params, num_heads):
    f32, bf16 = jnp.float32, jnp.bfloat16
    T = src.shape[1]
    x = params["tok_emb"][src] + params["pos_emb"][:T][None, :, :]
    B, _, D = x.shape
    H = num_heads
    Dh = D // H

    def ln(v, g, b):
        mu = jnp.mean(v, -1, keepdims=True)
        var = jnp.mean(jnp.square(v - mu), -1, keepdims=True)
        return (v - mu) * lax.rsqrt(var + 1e-5) * g + b

    def mm(a, w):   # bf16 matmul with f32 accumulation (matches kernels)
        return jnp.dot(a.astype(bf16), w, preferred_element_type=f32)

    mask = jnp.tril(jnp.ones((T, T), bool))
    for lp in params["layers"]:
        h = ln(x, lp["ln1_w"], lp["ln1_b"])
        # 1/sqrt(Dh) is already folded into the q columns of w_qkv_t.
        qkv = (mm(h, lp["w_qkv_t"]) + lp["b_qkv"]).astype(bf16)
        q = qkv[..., 0:D].reshape(B, T, H, Dh).transpose(0, 2, 1, 3)
        k = qkv[..., D:2 * D].reshape(B, T, H, Dh).transpose(0, 2, 1, 3)
        v = qkv[..., 2 * D:].reshape(B, T, H, Dh).transpose(0, 2, 1, 3)
        s = jnp.einsum("bhtd,bhsd->bhts", q, k, preferred_element_type=f32)
        s = jnp.where(mask[None, None], s, jnp.float32(_MASK_VALUE))
        p = jax.nn.softmax(s, axis=-1)
        av = jnp.einsum("bhts,bhsd->bhtd", p.astype(bf16), v,
                        preferred_element_type=f32)
        av = av.transpose(0, 2, 1, 3).reshape(B, T, D).astype(bf16)
        x = x + mm(av, lp["w_o_t"]) + lp["b_o"]
        h2 = ln(x, lp["ln2_w"], lp["ln2_b"])
        z = mm(h2, lp["w_1_t"]) + lp["b_1"]
        z = 0.5 * z * (1.0 + lax.erf(z * 0.7071067811865476))
        z = z.astype(bf16)
        x = x + mm(z, lp["w_2_t"]) + lp["b_2"]
    l1 = mm(x, params["w_tl_t"]) + params["b_tl"]
    return mm(l1, params["w_lm_t"]) + params["b_lm"]


# ----------------------------------------------------------------------------
if __name__ == "__main__":
    # Small shapes consistent with the module.  NOTE: the PyTorch forward only
    # composes when vocab_size == d_model (see header).  nhead is chosen so
    # head_dim = 128, keeping per-head slices lane-dense.
    B, T = 2, 128
    d_model, nhead, num_layers = 256, 2, 2
    vocab_size, max_len = 256, 128
    assert vocab_size == d_model

    key = jax.random.PRNGKey(0)
    k_params, k_tokens = jax.random.split(key)
    params = init_params(k_params, d_model, num_layers, vocab_size, max_len, nhead)
    src = jax.random.randint(k_tokens, (B, T), 0, vocab_size, dtype=jnp.int32)

    fwd = jax.jit(functools.partial(monai_decoder_only_forward, num_heads=nhead))
    out = jax.block_until_ready(fwd(src, params))

    ref = reference_forward(src, params, nhead)
    assert out.shape == (B, T, vocab_size), out.shape
    max_err = float(jnp.max(jnp.abs(out - ref)))
    assert jnp.allclose(out, ref, atol=3e-3, rtol=3e-2), max_err

    print("KERNEL_OK")
</pallas_src>

<mosaic_0001>
module attributes {stable_mosaic.version = 11 : i64} {
  func.func @flash_attn_kernel(%arg0: i32, %arg1: i32, %arg2: i32, %arg3: memref<1x128x256xbf16, #tpu.memory_space<vmem>>, %arg4: memref<1x128x256xbf16, #tpu.memory_space<vmem>>, %arg5: memref<1x128x256xbf16, #tpu.memory_space<vmem>>, %arg6: memref<1x128x256xbf16, #tpu.memory_space<vmem>>, %arg7: memref<128x2xf32, #tpu.memory_space<vmem>>, %arg8: memref<128x2xf32, #tpu.memory_space<vmem>>, %arg9: memref<128x256xf32, #tpu.memory_space<vmem>>) attributes {dimension_semantics = [#tpu.dimension_semantics<parallel>, #tpu.dimension_semantics<parallel>, #tpu.dimension_semantics<arbitrary>], iteration_bounds = array<i64: 2, 1, 1>, scalar_prefetch = 0 : i64, scratch_operands = 3 : i64, tpu.core_type = #tpu.core_type<tc>, window_params = [{transform_indices = @transform_0, window_bounds = array<i64: 1, 128, 256>}, {transform_indices = @transform_1, window_bounds = array<i64: 1, 128, 256>}, {transform_indices = @transform_2, window_bounds = array<i64: 1, 128, 256>}, {transform_indices = @transform_3, window_bounds = array<i64: 1, 128, 256>}]} {
    %c0_i32 = arith.constant 0 : i32
    %0 = arith.cmpi eq, %arg2, %c0_i32 : i32
    %1 = arith.extui %0 : i1 to i32
    %c0_i32_0 = arith.constant 0 : i32
    %2 = arith.cmpi ne, %1, %c0_i32_0 : i32
    scf.if %2 {
      %cst = arith.constant -1.000000e+30 : f32
      %9 = vector.broadcast %cst : f32 to vector<128x2xf32>
      %c0 = arith.constant 0 : index
      %c0_3 = arith.constant 0 : index
      %10 = vector.load %arg7[%c0, %c0_3] : memref<128x2xf32, #tpu.memory_space<vmem>>, vector<128x2xf32>
      tpu.vector_store %arg7[%c0, %c0_3], %9 {strides = array<i32>} : memref<128x2xf32, #tpu.memory_space<vmem>>, vector<128x2xf32>,
      %cst_4 = arith.constant 0.000000e+00 : f32
      %11 = vector.broadcast %cst_4 : f32 to vector<128x2xf32>
      %c0_5 = arith.constant 0 : index
      %c0_6 = arith.constant 0 : index
      %12 = vector.load %arg8[%c0_5, %c0_6] : memref<128x2xf32, #tpu.memory_space<vmem>>, vector<128x2xf32>
      tpu.vector_store %arg8[%c0_5, %c0_6], %11 {strides = array<i32>} : memref<128x2xf32, #tpu.memory_space<vmem>>, vector<128x2xf32>,
      %cst_7 = arith.constant 0.000000e+00 : f32
      %13 = vector.broadcast %cst_7 : f32 to vector<128x256xf32>
      %c0_8 = arith.constant 0 : index
      %c0_9 = arith.constant 0 : index
      %14 = vector.load %arg9[%c0_8, %c0_9] : memref<128x256xf32, #tpu.memory_space<vmem>>, vector<128x256xf32>
      tpu.vector_store %arg9[%c0_8, %c0_9], %13 {strides = array<i32>} : memref<128x256xf32, #tpu.memory_space<vmem>>, vector<128x256xf32>,
    } else {
    }
    %3 = arith.cmpi slt, %arg2, %arg1 : i32
    %4 = arith.extui %3 : i1 to i32
    %c0_i32_1 = arith.constant 0 : i32
    %5 = arith.cmpi ne, %4, %c0_i32_1 : i32
    scf.if %5 {
      %c0 = arith.constant 0 : index
      %c0_3 = arith.constant 0 : index
      %c0_4 = arith.constant 0 : index
      %9 = vector.load %arg3[%c0, %c0_3, %c0_4] : memref<1x128x256xbf16, #tpu.memory_space<vmem>>, vector<1x128x256xbf16>
      %10 = vector.shape_cast %9 : vector<1x128x256xbf16> to vector<128x256xbf16>
      %c0_5 = arith.constant 0 : index
      %c0_6 = arith.constant 0 : index
      %c0_7 = arith.constant 0 : index
      %11 = vector.load %arg4[%c0_5, %c0_6, %c0_7] : memref<1x128x256xbf16, #tpu.memory_space<vmem>>, vector<1x128x256xbf16>
      %12 = vector.shape_cast %11 : vector<1x128x256xbf16> to vector<128x256xbf16>
      %c0_8 = arith.constant 0 : index
      %c0_9 = arith.constant 0 : index
      %c0_10 = arith.constant 0 : index
      %13 = vector.load %arg5[%c0_8, %c0_9, %c0_10] : memref<1x128x256xbf16, #tpu.memory_space<vmem>>, vector<1x128x256xbf16>
      %14 = vector.shape_cast %13 : vector<1x128x256xbf16> to vector<128x256xbf16>
      %15 = vector.extract_strided_slice %10 {offsets = [0, 0], sizes = [128, 128], strides = [1, 1]} : vector<128x256xbf16> to vector<128x128xbf16>
      %16 = vector.extract_strided_slice %12 {offsets = [0, 0], sizes = [128, 128], strides = [1, 1]} : vector<128x256xbf16> to vector<128x128xbf16>
      %cst = arith.constant dense<0.000000e+00> : vector<128x128xf32>
      %17 = tpu.matmul %15, %16, %cst {dimension_numbers = #tpu.dot_dimension_numbers<[1], [1], [0], [0], [0, 0, 1, 0], [], []>} : vector<128x128xbf16>, vector<128x128xbf16>, vector<128x128xf32> -> vector<128x128xf32>
      %c0_11 = arith.constant 0 : index
      %c0_12 = arith.constant 0 : index
      %18 = vector.load %arg7[%c0_11, %c0_12] : memref<128x2xf32, #tpu.memory_space<vmem>>, vector<128x1xf32>
      %cst_13 = arith.constant dense<0xFF800000> : vector<128xf32>
      %19 = vector.multi_reduction <maximumf>, %17, %cst_13 [1] : vector<128x128xf32> to vector<128xf32>
      %20 = vector.shape_cast %19 : vector<128xf32> to vector<128x1xf32>
      %21 = arith.maximumf %18, %20 : vector<128x1xf32>
      %22 = arith.subf %18, %21 : vector<128x1xf32>
      %23 = math.exp %22 : vector<128x1xf32>
      %24 = vector.broadcast %21 : vector<128x1xf32> to vector<128x128xf32>
      %25 = arith.subf %17, %24 : vector<128x128xf32>
      %26 = math.exp %25 : vector<128x128xf32>
      %c0_14 = arith.constant 0 : index
      %c0_15 = arith.constant 0 : index
      %27 = vector.load %arg8[%c0_14, %c0_15] : memref<128x2xf32, #tpu.memory_space<vmem>>, vector<128x1xf32>
      %28 = arith.mulf %23, %27 : vector<128x1xf32>
      %cst_16 = arith.constant dense<0.000000e+00> : vector<128xf32>
      %29 = vector.multi_reduction <add>, %26, %cst_16 [1] : vector<128x128xf32> to vector<128xf32>
      %30 = vector.shape_cast %29 : vector<128xf32> to vector<128x1xf32>
      %31 = arith.addf %28, %30 : vector<128x1xf32>
      %c0_17 = arith.constant 0 : index
      %c0_18 = arith.constant 0 : index
      %32 = vector.load %arg8[%c0_17, %c0_18] : memref<128x2xf32, #tpu.memory_space<vmem>>, vector<128x1xf32>
      tpu.vector_store %arg8[%c0_17, %c0_18], %31 {strides = array<i32>} : memref<128x2xf32, #tpu.memory_space<vmem>>, vector<128x1xf32>,
      %c0_19 = arith.constant 0 : index
      %c0_20 = arith.constant 0 : index
      %33 = vector.load %arg9[%c0_19, %c0_20] : memref<128x256xf32, #tpu.memory_space<vmem>>, vector<128x128xf32>
      %34 = vector.broadcast %23 : vector<128x1xf32> to vector<128x128xf32>
      %35 = arith.mulf %34, %33 : vector<128x128xf32>
      %36 = arith.truncf %26 : vector<128x128xf32> to vector<128x128xbf16>
      %37 = vector.extract_strided_slice %14 {offsets = [0, 0], sizes = [128, 128], strides = [1, 1]} : vector<128x256xbf16> to vector<128x128xbf16>
      %cst_21 = arith.constant dense<0.000000e+00> : vector<128x128xf32>
      %38 = tpu.matmul %36, %37, %cst_21 {dimension_numbers = #tpu.dot_dimension_numbers<[1], [0], [0], [1], [0, 0, 1, 1], [], []>} : vector<128x128xbf16>, vector<128x128xbf16>, vector<128x128xf32> -> vector<128x128xf32>
      %39 = arith.addf %35, %38 : vector<128x128xf32>
      %c0_22 = arith.constant 0 : index
      %c0_23 = arith.constant 0 : index
      %40 = vector.load %arg9[%c0_22, %c0_23] : memref<128x256xf32, #tpu.memory_space<vmem>>, vector<128x128xf32>
      tpu.vector_store %arg9[%c0_22, %c0_23], %39 {strides = array<i32>} : memref<128x256xf32, #tpu.memory_space<vmem>>, vector<128x128xf32>,
      %c0_24 = arith.constant 0 : index
      %c0_25 = arith.constant 0 : index
      %41 = vector.load %arg7[%c0_24, %c0_25] : memref<128x2xf32, #tpu.memory_space<vmem>>, vector<128x1xf32>
      tpu.vector_store %arg7[%c0_24, %c0_25], %21 {strides = array<i32>} : memref<128x2xf32, #tpu.memory_space<vmem>>, vector<128x1xf32>,
      %42 = vector.extract_strided_slice %10 {offsets = [0, 128], sizes = [128, 128], strides = [1, 1]} : vector<128x256xbf16> to vector<128x128xbf16>
      %43 = vector.extract_strided_slice %12 {offsets = [0, 128], sizes = [128, 128], strides = [1, 1]} : vector<128x256xbf16> to vector<128x128xbf16>
      %cst_26 = arith.constant dense<0.000000e+00> : vector<128x128xf32>
      %44 = tpu.matmul %42, %43, %cst_26 {dimension_numbers = #tpu.dot_dimension_numbers<[1], [1], [0], [0], [0, 0, 1, 0], [], []>} : vector<128x128xbf16>, vector<128x128xbf16>, vector<128x128xf32> -> vector<128x128xf32>
      %c0_27 = arith.constant 0 : index
      %c1 = arith.constant 1 : index
      %45 = vector.load %arg7[%c0_27, %c1] : memref<128x2xf32, #tpu.memory_space<vmem>>, vector<128x1xf32>
      %cst_28 = arith.constant dense<0xFF800000> : vector<128xf32>
      %46 = vector.multi_reduction <maximumf>, %44, %cst_28 [1] : vector<128x128xf32> to vector<128xf32>
      %47 = vector.shape_cast %46 : vector<128xf32> to vector<128x1xf32>
      %48 = arith.maximumf %45, %47 : vector<128x1xf32>
      %49 = arith.subf %45, %48 : vector<128x1xf32>
      %50 = math.exp %49 : vector<128x1xf32>
      %51 = vector.broadcast %48 : vector<128x1xf32> to vector<128x128xf32>
      %52 = arith.subf %44, %51 : vector<128x128xf32>
      %53 = math.exp %52 : vector<128x128xf32>
      %c0_29 = arith.constant 0 : index
      %c1_30 = arith.constant 1 : index
      %54 = vector.load %arg8[%c0_29, %c1_30] : memref<128x2xf32, #tpu.memory_space<vmem>>, vector<128x1xf32>
      %55 = arith.mulf %50, %54 : vector<128x1xf32>
      %cst_31 = arith.constant dense<0.000000e+00> : vector<128xf32>
      %56 = vector.multi_reduction <add>, %53, %cst_31 [1] : vector<128x128xf32> to vector<128xf32>
      %57 = vector.shape_cast %56 : vector<128xf32> to vector<128x1xf32>
      %58 = arith.addf %55, %57 : vector<128x1xf32>
      %c0_32 = arith.constant 0 : index
      %c1_33 = arith.constant 1 : index
      %59 = vector.load %arg8[%c0_32, %c1_33] : memref<128x2xf32, #tpu.memory_space<vmem>>, vector<128x1xf32>
      tpu.vector_store %arg8[%c0_32, %c1_33], %58 {strides = array<i32>} : memref<128x2xf32, #tpu.memory_space<vmem>>, vector<128x1xf32>,
      %c0_34 = arith.constant 0 : index
      %c128 = arith.constant 128 : index
      %60 = vector.load %arg9[%c0_34, %c128] : memref<128x256xf32, #tpu.memory_space<vmem>>, vector<128x128xf32>
      %61 = vector.broadcast %50 : vector<128x1xf32> to vector<128x128xf32>
      %62 = arith.mulf %61, %60 : vector<128x128xf32>
      %63 = arith.truncf %53 : vector<128x128xf32> to vector<128x128xbf16>
      %64 = vector.extract_strided_slice %14 {offsets = [0, 128], sizes = [128, 128], strides = [1, 1]} : vector<128x256xbf16> to vector<128x128xbf16>
      %cst_35 = arith.constant dense<0.000000e+00> : vector<128x128xf32>
      %65 = tpu.matmul %63, %64, %cst_35 {dimension_numbers = #tpu.dot_dimension_numbers<[1], [0], [0], [1], [0, 0, 1, 1], [], []>} : vector<128x128xbf16>, vector<128x128xbf16>, vector<128x128xf32> -> vector<128x128xf32>
      %66 = arith.addf %62, %65 : vector<128x128xf32>
      %c0_36 = arith.constant 0 : index
      %c128_37 = arith.constant 128 : index
      %67 = vector.load %arg9[%c0_36, %c128_37] : memref<128x256xf32, #tpu.memory_space<vmem>>, vector<128x128xf32>
      tpu.vector_store %arg9[%c0_36, %c128_37], %66 {strides = array<i32>} : memref<128x256xf32, #tpu.memory_space<vmem>>, vector<128x128xf32>,
      %c0_38 = arith.constant 0 : index
      %c1_39 = arith.constant 1 : index
      %68 = vector.load %arg7[%c0_38, %c1_39] : memref<128x2xf32, #tpu.memory_space<vmem>>, vector<128x1xf32>
      tpu.vector_store %arg7[%c0_38, %c1_39], %48 {strides = array<i32>} : memref<128x2xf32, #tpu.memory_space<vmem>>, vector<128x1xf32>,
    } else {
    }
    %6 = arith.cmpi eq, %arg2, %arg1 : i32
    %7 = arith.extui %6 : i1 to i32
    %c0_i32_2 = arith.constant 0 : i32
    %8 = arith.cmpi ne, %7, %c0_i32_2 : i32
    scf.if %8 {
      %c0 = arith.constant 0 : index
      %c0_3 = arith.constant 0 : index
      %c0_4 = arith.constant 0 : index
      %9 = vector.load %arg3[%c0, %c0_3, %c0_4] : memref<1x128x256xbf16, #tpu.memory_space<vmem>>, vector<1x128x256xbf16>
      %10 = vector.shape_cast %9 : vector<1x128x256xbf16> to vector<128x256xbf16>
      %c0_5 = arith.constant 0 : index
      %c0_6 = arith.constant 0 : index
      %c0_7 = arith.constant 0 : index
      %11 = vector.load %arg4[%c0_5, %c0_6, %c0_7] : memref<1x128x256xbf16, #tpu.memory_space<vmem>>, vector<1x128x256xbf16>
      %12 = vector.shape_cast %11 : vector<1x128x256xbf16> to vector<128x256xbf16>
      %c0_8 = arith.constant 0 : index
      %c0_9 = arith.constant 0 : index
      %c0_10 = arith.constant 0 : index
      %13 = vector.load %arg5[%c0_8, %c0_9, %c0_10] : memref<1x128x256xbf16, #tpu.memory_space<vmem>>, vector<1x128x256xbf16>
      %14 = vector.shape_cast %13 : vector<1x128x256xbf16> to vector<128x256xbf16>
      %15 = tpu.iota {dimensions = array<i32: 0>} : vector<128x128xi32>
      %16 = tpu.iota {dimensions = array<i32: 1>} : vector<128x128xi32>
      %17 = arith.cmpi sge, %15, %16 : vector<128x128xi32>
      %18 = vector.extract_strided_slice %10 {offsets = [0, 0], sizes = [128, 128], strides = [1, 1]} : vector<128x256xbf16> to vector<128x128xbf16>
      %19 = vector.extract_strided_slice %12 {offsets = [0, 0], sizes = [128, 128], strides = [1, 1]} : vector<128x256xbf16> to vector<128x128xbf16>
      %cst = arith.constant dense<0.000000e+00> : vector<128x128xf32>
      %20 = tpu.matmul %18, %19, %cst {dimension_numbers = #tpu.dot_dimension_numbers<[1], [1], [0], [0], [0, 0, 1, 0], [], []>} : vector<128x128xbf16>, vector<128x128xbf16>, vector<128x128xf32> -> vector<128x128xf32>
      %cst_11 = arith.constant -1.000000e+30 : f32
      %21 = vector.broadcast %cst_11 : f32 to vector<128x128xf32>
      %22 = arith.select %17, %20, %21 : vector<128x128xi1>, vector<128x128xf32>
      %c0_12 = arith.constant 0 : index
      %c0_13 = arith.constant 0 : index
      %23 = vector.load %arg7[%c0_12, %c0_13] : memref<128x2xf32, #tpu.memory_space<vmem>>, vector<128x1xf32>
      %cst_14 = arith.constant dense<0xFF800000> : vector<128xf32>
      %24 = vector.multi_reduction <maximumf>, %22, %cst_14 [1] : vector<128x128xf32> to vector<128xf32>
      %25 = vector.shape_cast %24 : vector<128xf32> to vector<128x1xf32>
      %26 = arith.maximumf %23, %25 : vector<128x1xf32>
      %27 = arith.subf %23, %26 : vector<128x1xf32>
      %28 = math.exp %27 : vector<128x1xf32>
      %29 = vector.broadcast %26 : vector<128x1xf32> to vector<128x128xf32>
      %30 = arith.subf %22, %29 : vector<128x128xf32>
      %31 = math.exp %30 : vector<128x128xf32>
      %c0_15 = arith.constant 0 : index
      %c0_16 = arith.constant 0 : index
      %32 = vector.load %arg8[%c0_15, %c0_16] : memref<128x2xf32, #tpu.memory_space<vmem>>, vector<128x1xf32>
      %33 = arith.mulf %28, %32 : vector<128x1xf32>
      %cst_17 = arith.constant dense<0.000000e+00> : vector<128xf32>
      %34 = vector.multi_reduction <add>, %31, %cst_17 [1] : vector<128x128xf32> to vector<128xf32>
      %35 = vector.shape_cast %34 : vector<128xf32> to vector<128x1xf32>
      %36 = arith.addf %33, %35 : vector<128x1xf32>
      %c0_18 = arith.constant 0 : index
      %c0_19 = arith.constant 0 : index
      %37 = vector.load %arg8[%c0_18, %c0_19] : memref<128x2xf32, #tpu.memory_space<vmem>>, vector<128x1xf32>
      tpu.vector_store %arg8[%c0_18, %c0_19], %36 {strides = array<i32>} : memref<128x2xf32, #tpu.memory_space<vmem>>, vector<128x1xf32>,
      %c0_20 = arith.constant 0 : index
      %c0_21 = arith.constant 0 : index
      %38 = vector.load %arg9[%c0_20, %c0_21] : memref<128x256xf32, #tpu.memory_space<vmem>>, vector<128x128xf32>
      %39 = vector.broadcast %28 : vector<128x1xf32> to vector<128x128xf32>
      %40 = arith.mulf %39, %38 : vector<128x128xf32>
      %41 = arith.truncf %31 : vector<128x128xf32> to vector<128x128xbf16>
      %42 = vector.extract_strided_slice %14 {offsets = [0, 0], sizes = [128, 128], strides = [1, 1]} : vector<128x256xbf16> to vector<128x128xbf16>
      %cst_22 = arith.constant dense<0.000000e+00> : vector<128x128xf32>
      %43 = tpu.matmul %41, %42, %cst_22 {dimension_numbers = #tpu.dot_dimension_numbers<[1], [0], [0], [1], [0, 0, 1, 1], [], []>} : vector<128x128xbf16>, vector<128x128xbf16>, vector<128x128xf32> -> vector<128x128xf32>
      %44 = arith.addf %40, %43 : vector<128x128xf32>
      %c0_23 = arith.constant 0 : index
      %c0_24 = arith.constant 0 : index
      %45 = vector.load %arg9[%c0_23, %c0_24] : memref<128x256xf32, #tpu.memory_space<vmem>>, vector<128x128xf32>
      tpu.vector_store %arg9[%c0_23, %c0_24], %44 {strides = array<i32>} : memref<128x256xf32, #tpu.memory_space<vmem>>, vector<128x128xf32>,
      %c0_25 = arith.constant 0 : index
      %c0_26 = arith.constant 0 : index
      %46 = vector.load %arg7[%c0_25, %c0_26] : memref<128x2xf32, #tpu.memory_space<vmem>>, vector<128x1xf32>
      tpu.vector_store %arg7[%c0_25, %c0_26], %26 {strides = array<i32>} : memref<128x2xf32, #tpu.memory_space<vmem>>, vector<128x1xf32>,
      %47 = vector.extract_strided_slice %10 {offsets = [0, 128], sizes = [128, 128], strides = [1, 1]} : vector<128x256xbf16> to vector<128x128xbf16>
      %48 = vector.extract_strided_slice %12 {offsets = [0, 128], sizes = [128, 128], strides = [1, 1]} : vector<128x256xbf16> to vector<128x128xbf16>
      %cst_27 = arith.constant dense<0.000000e+00> : vector<128x128xf32>
      %49 = tpu.matmul %47, %48, %cst_27 {dimension_numbers = #tpu.dot_dimension_numbers<[1], [1], [0], [0], [0, 0, 1, 0], [], []>} : vector<128x128xbf16>, vector<128x128xbf16>, vector<128x128xf32> -> vector<128x128xf32>
      %cst_28 = arith.constant -1.000000e+30 : f32
      %50 = vector.broadcast %cst_28 : f32 to vector<128x128xf32>
      %51 = arith.select %17, %49, %50 : vector<128x128xi1>, vector<128x128xf32>
      %c0_29 = arith.constant 0 : index
      %c1 = arith.constant 1 : index
      %52 = vector.load %arg7[%c0_29, %c1] : memref<128x2xf32, #tpu.memory_space<vmem>>, vector<128x1xf32>
      %cst_30 = arith.constant dense<0xFF800000> : vector<128xf32>
      %53 = vector.multi_reduction <maximumf>, %51, %cst_30 [1] : vector<128x128xf32> to vector<128xf32>
      %54 = vector.shape_cast %53 : vector<128xf32> to vector<128x1xf32>
      %55 = arith.maximumf %52, %54 : vector<128x1xf32>
      %56 = arith.subf %52, %55 : vector<128x1xf32>
      %57 = math.exp %56 : vector<128x1xf32>
      %58 = vector.broadcast %55 : vector<128x1xf32> to vector<128x128xf32>
      %59 = arith.subf %51, %58 : vector<128x128xf32>
      %60 = math.exp %59 : vector<128x128xf32>
      %c0_31 = arith.constant 0 : index
      %c1_32 = arith.constant 1 : index
      %61 = vector.load %arg8[%c0_31, %c1_32] : memref<128x2xf32, #tpu.memory_space<vmem>>, vector<128x1xf32>
      %62 = arith.mulf %57, %61 : vector<128x1xf32>
      %cst_33 = arith.constant dense<0.000000e+00> : vector<128xf32>
      %63 = vector.multi_reduction <add>, %60, %cst_33 [1] : vector<128x128xf32> to vector<128xf32>
      %64 = vector.shape_cast %63 : vector<128xf32> to vector<128x1xf32>
      %65 = arith.addf %62, %64 : vector<128x1xf32>
      %c0_34 = arith.constant 0 : index
      %c1_35 = arith.constant 1 : index
      %66 = vector.load %arg8[%c0_34, %c1_35] : memref<128x2xf32, #tpu.memory_space<vmem>>, vector<128x1xf32>
      tpu.vector_store %arg8[%c0_34, %c1_35], %65 {strides = array<i32>} : memref<128x2xf32, #tpu.memory_space<vmem>>, vector<128x1xf32>,
      %c0_36 = arith.constant 0 : index
      %c128 = arith.constant 128 : index
      %67 = vector.load %arg9[%c0_36, %c128] : memref<128x256xf32, #tpu.memory_space<vmem>>, vector<128x128xf32>
      %68 = vector.broadcast %57 : vector<128x1xf32> to vector<128x128xf32>
      %69 = arith.mulf %68, %67 : vector<128x128xf32>
      %70 = arith.truncf %60 : vector<128x128xf32> to vector<128x128xbf16>
      %71 = vector.extract_strided_slice %14 {offsets = [0, 128], sizes = [128, 128], strides = [1, 1]} : vector<128x256xbf16> to vector<128x128xbf16>
      %cst_37 = arith.constant dense<0.000000e+00> : vector<128x128xf32>
      %72 = tpu.matmul %70, %71, %cst_37 {dimension_numbers = #tpu.dot_dimension_numbers<[1], [0], [0], [1], [0, 0, 1, 1], [], []>} : vector<128x128xbf16>, vector<128x128xbf16>, vector<128x128xf32> -> vector<128x128xf32>
      %73 = arith.addf %69, %72 : vector<128x128xf32>
      %c0_38 = arith.constant 0 : index
      %c128_39 = arith.constant 128 : index
      %74 = vector.load %arg9[%c0_38, %c128_39] : memref<128x256xf32, #tpu.memory_space<vmem>>, vector<128x128xf32>
      tpu.vector_store %arg9[%c0_38, %c128_39], %73 {strides = array<i32>} : memref<128x256xf32, #tpu.memory_space<vmem>>, vector<128x128xf32>,
      %c0_40 = arith.constant 0 : index
      %c1_41 = arith.constant 1 : index
      %75 = vector.load %arg7[%c0_40, %c1_41] : memref<128x2xf32, #tpu.memory_space<vmem>>, vector<128x1xf32>
      tpu.vector_store %arg7[%c0_40, %c1_41], %55 {strides = array<i32>} : memref<128x2xf32, #tpu.memory_space<vmem>>, vector<128x1xf32>,
      %c0_42 = arith.constant 0 : index
      %c0_43 = arith.constant 0 : index
      %76 = vector.load %arg8[%c0_42, %c0_43] : memref<128x2xf32, #tpu.memory_space<vmem>>, vector<128x1xf32>
      %77 = tpu.reciprocal %76 {approx = true} : vector<128x1xf32> -> vector<128x1xf32>
      %c0_44 = arith.constant 0 : index
      %c0_45 = arith.constant 0 : index
      %78 = vector.load %arg9[%c0_44, %c0_45] : memref<128x256xf32, #tpu.memory_space<vmem>>, vector<128x128xf32>
      %79 = vector.broadcast %77 : vector<128x1xf32> to vector<128x128xf32>
      %80 = arith.mulf %78, %79 : vector<128x128xf32>
      %81 = arith.truncf %80 : vector<128x128xf32> to vector<128x128xbf16>
      %c0_46 = arith.constant 0 : index
      %c0_47 = arith.constant 0 : index
      %c0_48 = arith.constant 0 : index
      %82 = vector.load %arg6[%c0_46, %c0_47, %c0_48] : memref<1x128x256xbf16, #tpu.memory_space<vmem>>, vector<1x128x128xbf16>
      %83 = vector.shape_cast %82 : vector<1x128x128xbf16> to vector<128x128xbf16>
      %84 = vector.shape_cast %81 : vector<128x128xbf16> to vector<1x128x128xbf16>
      tpu.vector_store %arg6[%c0_46, %c0_47, %c0_48], %84 {strides = array<i32>} : memref<1x128x256xbf16, #tpu.memory_space<vmem>>, vector<1x128x128xbf16>,
      %c0_49 = arith.constant 0 : index
      %c1_50 = arith.constant 1 : index
      %85 = vector.load %arg8[%c0_49, %c1_50] : memref<128x2xf32, #tpu.memory_space<vmem>>, vector<128x1xf32>
      %86 = tpu.reciprocal %85 {approx = true} : vector<128x1xf32> -> vector<128x1xf32>
      %c0_51 = arith.constant 0 : index
      %c128_52 = arith.constant 128 : index
      %87 = vector.load %arg9[%c0_51, %c128_52] : memref<128x256xf32, #tpu.memory_space<vmem>>, vector<128x128xf32>
      %88 = vector.broadcast %86 : vector<128x1xf32> to vector<128x128xf32>
      %89 = arith.mulf %87, %88 : vector<128x128xf32>
      %90 = arith.truncf %89 : vector<128x128xf32> to vector<128x128xbf16>
      %c0_53 = arith.constant 0 : index
      %c0_54 = arith.constant 0 : index
      %c128_55 = arith.constant 128 : index
      %91 = vector.load %arg6[%c0_53, %c0_54, %c128_55] : memref<1x128x256xbf16, #tpu.memory_space<vmem>>, vector<1x128x128xbf16>
      %92 = vector.shape_cast %91 : vector<1x128x128xbf16> to vector<128x128xbf16>
      %93 = vector.shape_cast %90 : vector<128x128xbf16> to vector<1x128x128xbf16>
      tpu.vector_store %arg6[%c0_53, %c0_54, %c128_55], %93 {strides = array<i32>} : memref<1x128x256xbf16, #tpu.memory_space<vmem>>, vector<1x128x128xbf16>,
    } else {
    }
    return
  }
  func.func @transform_0(%arg0: i32, %arg1: i32, %arg2: i32) -> (i32, i32, i32) {
    %c0_i32 = arith.constant 0 : i32
    %c0_i32_0 = arith.constant 0 : i32
    return %arg0, %arg1, %c0_i32 : i32, i32, i32
  }
  func.func @transform_1(%arg0: i32, %arg1: i32, %arg2: i32) -> (i32, i32, i32) {
    %0 = arith.minsi %arg2, %arg1 : i32
    %c1_i32 = arith.constant 1 : i32
    %c0_i32 = arith.constant 0 : i32
    return %arg0, %0, %c1_i32 : i32, i32, i32
  }
  func.func @transform_2(%arg0: i32, %arg1: i32, %arg2: i32) -> (i32, i32, i32) {
    %0 = arith.minsi %arg2, %arg1 : i32
    %c2_i32 = arith.constant 2 : i32
    %c0_i32 = arith.constant 0 : i32
    return %arg0, %0, %c2_i32 : i32, i32, i32
  }
  func.func @transform_3(%arg0: i32, %arg1: i32, %arg2: i32) -> (i32, i32, i32) {
    %c0_i32 = arith.constant 0 : i32
    %c0_i32_0 = arith.constant 0 : i32
    return %arg0, %arg1, %c0_i32 : i32, i32, i32
  }
}

module attributes {stable_mosaic.version = 11 : i64} {
  func.func @linear_noacc_res_kernel(%arg0: i32, %arg1: i32, %arg2: i32, %arg3: memref<1x128x256xbf16, #tpu.memory_space<vmem>>, %arg4: memref<1x128x256xf32, #tpu.memory_space<vmem>>, %arg5: memref<256x256xbf16, #tpu.memory_space<vmem>>, %arg6: memref<1x256xf32, #tpu.memory_space<vmem>>, %arg7: memref<1x128x256xf32, #tpu.memory_space<vmem>>) attributes {dimension_semantics = [#tpu.dimension_semantics<parallel>, #tpu.dimension_semantics<parallel>, #tpu.dimension_semantics<parallel>], iteration_bounds = array<i64: 2, 1, 1>, scalar_prefetch = 0 : i64, scratch_operands = 0 : i64, tpu.core_type = #tpu.core_type<tc>, window_params = [{transform_indices = @transform_0, window_bounds = array<i64: 1, 128, 256>}, {transform_indices = @transform_1, window_bounds = array<i64: 1, 128, 256>}, {transform_indices = @transform_2, window_bounds = array<i64: 256, 256>}, {transform_indices = @transform_3, window_bounds = array<i64: 1, 256>}, {transform_indices = @transform_4, window_bounds = array<i64: 1, 128, 256>}]} {
    %c0 = arith.constant 0 : index
    %c0_0 = arith.constant 0 : index
    %c0_1 = arith.constant 0 : index
    %0 = vector.load %arg3[%c0, %c0_0, %c0_1] : memref<1x128x256xbf16, #tpu.memory_space<vmem>>, vector<1x128x256xbf16>
    %1 = vector.shape_cast %0 : vector<1x128x256xbf16> to vector<128x256xbf16>
    %c0_2 = arith.constant 0 : index
    %c0_3 = arith.constant 0 : index
    %2 = vector.load %arg5[%c0_2, %c0_3] : memref<256x256xbf16, #tpu.memory_space<vmem>>, vector<256x256xbf16>
    %cst = arith.constant dense<0.000000e+00> : vector<128x256xf32>
    %3 = tpu.matmul %1, %2, %cst {dimension_numbers = #tpu.dot_dimension_numbers<[1], [0], [0], [1], [0, 0, 1, 1], [], []>} : vector<128x256xbf16>, vector<256x256xbf16>, vector<128x256xf32> -> vector<128x256xf32>
    %c0_4 = arith.constant 0 : index
    %c0_5 = arith.constant 0 : index
    %4 = vector.load %arg6[%c0_4, %c0_5] : memref<1x256xf32, #tpu.memory_space<vmem>>, vector<1x256xf32>
    %5 = vector.broadcast %4 : vector<1x256xf32> to vector<128x256xf32>
    %6 = arith.addf %3, %5 : vector<128x256xf32>
    %c0_6 = arith.constant 0 : index
    %c0_7 = arith.constant 0 : index
    %c0_8 = arith.constant 0 : index
    %7 = vector.load %arg4[%c0_6, %c0_7, %c0_8] : memref<1x128x256xf32, #tpu.memory_space<vmem>>, vector<1x128x256xf32>
    %8 = vector.shape_cast %7 : vector<1x128x256xf32> to vector<128x256xf32>
    %9 = arith.addf %8, %6 : vector<128x256xf32>
    %c0_9 = arith.constant 0 : index
    %c0_10 = arith.constant 0 : index
    %c0_11 = arith.constant 0 : index
    %10 = vector.load %arg7[%c0_9, %c0_10, %c0_11] : memref<1x128x256xf32, #tpu.memory_space<vmem>>, vector<1x128x256xf32>
    %11 = vector.shape_cast %10 : vector<1x128x256xf32> to vector<128x256xf32>
    %12 = vector.shape_cast %9 : vector<128x256xf32> to vector<1x128x256xf32>
    tpu.vector_store %arg7[%c0_9, %c0_10, %c0_11], %12 {strides = array<i32>} : memref<1x128x256xf32, #tpu.memory_space<vmem>>, vector<1x128x256xf32>,
    return
  }
  func.func @transform_0(%arg0: i32, %arg1: i32, %arg2: i32) -> (i32, i32, i32) {
    %c0_i32 = arith.constant 0 : i32
    %c0_i32_0 = arith.constant 0 : i32
    return %arg0, %arg1, %c0_i32 : i32, i32, i32
  }
  func.func @transform_1(%arg0: i32, %arg1: i32, %arg2: i32) -> (i32, i32, i32) {
    %c0_i32 = arith.constant 0 : i32
    return %arg0, %arg1, %arg2 : i32, i32, i32
  }
  func.func @transform_2(%arg0: i32, %arg1: i32, %arg2: i32) -> (i32, i32) {
    %c0_i32 = arith.constant 0 : i32
    %c0_i32_0 = arith.constant 0 : i32
    return %c0_i32, %arg2 : i32, i32
  }
  func.func @transform_3(%arg0: i32, %arg1: i32, %arg2: i32) -> (i32, i32) {
    %c0_i32 = arith.constant 0 : i32
    %c0_i32_0 = arith.constant 0 : i32
    return %c0_i32, %arg2 : i32, i32
  }
  func.func @transform_4(%arg0: i32, %arg1: i32, %arg2: i32) -> (i32, i32, i32) {
    %c0_i32 = arith.constant 0 : i32
    return %arg0, %arg1, %arg2 : i32, i32, i32
  }
}

module attributes {stable_mosaic.version = 11 : i64} {
  func.func @ln_linear_kernel(%arg0: i32, %arg1: i32, %arg2: i32, %arg3: memref<1x128x256xf32, #tpu.memory_space<vmem>>, %arg4: memref<1x256xf32, #tpu.memory_space<vmem>>, %arg5: memref<1x256xf32, #tpu.memory_space<vmem>>, %arg6: memref<256x256xbf16, #tpu.memory_space<vmem>>, %arg7: memref<1x256xf32, #tpu.memory_space<vmem>>, %arg8: memref<1x128x256xbf16, #tpu.memory_space<vmem>>, %arg9: memref<128x256xbf16, #tpu.memory_space<vmem>>) attributes {dimension_semantics = [#tpu.dimension_semantics<parallel>, #tpu.dimension_semantics<parallel>, #tpu.dimension_semantics<arbitrary>], iteration_bounds = array<i64: 2, 1, 3>, scalar_prefetch = 0 : i64, scratch_operands = 1 : i64, tpu.core_type = #tpu.core_type<tc>, window_params = [{transform_indices = @transform_0, window_bounds = array<i64: 1, 128, 256>}, {pipeline_mode = #tpu.pipeline_mode<synchronous>, transform_indices = @transform_1, window_bounds = array<i64: 1, 256>}, {pipeline_mode = #tpu.pipeline_mode<synchronous>, transform_indices = @transform_2, window_bounds = array<i64: 1, 256>}, {transform_indices = @transform_3, window_bounds = array<i64: 256, 256>}, {transform_indices = @transform_4, window_bounds = array<i64: 1, 256>}, {transform_indices = @transform_5, window_bounds = array<i64: 1, 128, 256>}]} {
    %c0_i32 = arith.constant 0 : i32
    %0 = arith.cmpi eq, %arg2, %c0_i32 : i32
    %1 = arith.extui %0 : i1 to i32
    %c0_i32_0 = arith.constant 0 : i32
    %2 = arith.cmpi ne, %1, %c0_i32_0 : i32
    scf.if %2 {
      %c0_9 = arith.constant 0 : index
      %c0_10 = arith.constant 0 : index
      %c0_11 = arith.constant 0 : index
      %13 = vector.load %arg3[%c0_9, %c0_10, %c0_11] : memref<1x128x256xf32, #tpu.memory_space<vmem>>, vector<1x128x256xf32>
      %14 = vector.shape_cast %13 : vector<1x128x256xf32> to vector<128x256xf32>
      %c0_12 = arith.constant 0 : index
      %c0_13 = arith.constant 0 : index
      %15 = vector.load %arg4[%c0_12, %c0_13] : memref<1x256xf32, #tpu.memory_space<vmem>>, vector<1x256xf32>
      %c0_14 = arith.constant 0 : index
      %c0_15 = arith.constant 0 : index
      %16 = vector.load %arg5[%c0_14, %c0_15] : memref<1x256xf32, #tpu.memory_space<vmem>>, vector<1x256xf32>
      %cst_16 = arith.constant dense<0.000000e+00> : vector<128xf32>
      %17 = vector.multi_reduction <add>, %14, %cst_16 [1] : vector<128x256xf32> to vector<128xf32>
      %18 = vector.shape_cast %17 : vector<128xf32> to vector<128x1xf32>
      %cst_17 = arith.constant 2.560000e+02 : f32
      %19 = vector.broadcast %cst_17 : f32 to vector<128x1xf32>
      %20 = arith.divf %18, %19 : vector<128x1xf32>
      %21 = vector.broadcast %20 : vector<128x1xf32> to vector<128x256xf32>
      %22 = arith.subf %14, %21 : vector<128x256xf32>
      %23 = arith.mulf %22, %22 : vector<128x256xf32>
      %cst_18 = arith.constant dense<0.000000e+00> : vector<128xf32>
      %24 = vector.multi_reduction <add>, %23, %cst_18 [1] : vector<128x256xf32> to vector<128xf32>
      %25 = vector.shape_cast %24 : vector<128xf32> to vector<128x1xf32>
      %cst_19 = arith.constant 2.560000e+02 : f32
      %26 = vector.broadcast %cst_19 : f32 to vector<128x1xf32>
      %27 = arith.divf %25, %26 : vector<128x1xf32>
      %28 = vector.broadcast %20 : vector<128x1xf32> to vector<128x256xf32>
      %29 = arith.subf %14, %28 : vector<128x256xf32>
      %cst_20 = arith.constant 9.99999974E-6 : f32
      %30 = vector.broadcast %cst_20 : f32 to vector<128x1xf32>
      %31 = arith.addf %27, %30 : vector<128x1xf32>
      %32 = math.rsqrt %31 : vector<128x1xf32>
      %33 = vector.broadcast %32 : vector<128x1xf32> to vector<128x256xf32>
      %34 = arith.mulf %29, %33 : vector<128x256xf32>
      %35 = vector.broadcast %15 : vector<1x256xf32> to vector<128x256xf32>
      %36 = arith.mulf %34, %35 : vector<128x256xf32>
      %37 = vector.broadcast %16 : vector<1x256xf32> to vector<128x256xf32>
      %38 = arith.addf %36, %37 : vector<128x256xf32>
      %39 = arith.truncf %38 : vector<128x256xf32> to vector<128x256xbf16>
      %c0_21 = arith.constant 0 : index
      %c0_22 = arith.constant 0 : index
      %40 = vector.load %arg9[%c0_21, %c0_22] : memref<128x256xbf16, #tpu.memory_space<vmem>>, vector<128x256xbf16>
      tpu.vector_store %arg9[%c0_21, %c0_22], %39 {strides = array<i32>} : memref<128x256xbf16, #tpu.memory_space<vmem>>, vector<128x256xbf16>,
    } else {
    }
    %c0 = arith.constant 0 : index
    %c0_1 = arith.constant 0 : index
    %3 = vector.load %arg9[%c0, %c0_1] : memref<128x256xbf16, #tpu.memory_space<vmem>>, vector<128x256xbf16>
    %c0_2 = arith.constant 0 : index
    %c0_3 = arith.constant 0 : index
    %4 = vector.load %arg6[%c0_2, %c0_3] : memref<256x256xbf16, #tpu.memory_space<vmem>>, vector<256x256xbf16>
    %cst = arith.constant dense<0.000000e+00> : vector<128x256xf32>
    %5 = tpu.matmul %3, %4, %cst {dimension_numbers = #tpu.dot_dimension_numbers<[1], [0], [0], [1], [0, 0, 1, 1], [], []>} : vector<128x256xbf16>, vector<256x256xbf16>, vector<128x256xf32> -> vector<128x256xf32>
    %c0_4 = arith.constant 0 : index
    %c0_5 = arith.constant 0 : index
    %6 = vector.load %arg7[%c0_4, %c0_5] : memref<1x256xf32, #tpu.memory_space<vmem>>, vector<1x256xf32>
    %7 = vector.broadcast %6 : vector<1x256xf32> to vector<128x256xf32>
    %8 = arith.addf %5, %7 : vector<128x256xf32>
    %9 = arith.truncf %8 : vector<128x256xf32> to vector<128x256xbf16>
    %c0_6 = arith.constant 0 : index
    %c0_7 = arith.constant 0 : index
    %c0_8 = arith.constant 0 : index
    %10 = vector.load %arg8[%c0_6, %c0_7, %c0_8] : memref<1x128x256xbf16, #tpu.memory_space<vmem>>, vector<1x128x256xbf16>
    %11 = vector.shape_cast %10 : vector<1x128x256xbf16> to vector<128x256xbf16>
    %12 = vector.shape_cast %9 : vector<128x256xbf16> to vector<1x128x256xbf16>
    tpu.vector_store %arg8[%c0_6, %c0_7, %c0_8], %12 {strides = array<i32>} : memref<1x128x256xbf16, #tpu.memory_space<vmem>>, vector<1x128x256xbf16>,
    return
  }
  func.func @transform_0(%arg0: i32, %arg1: i32, %arg2: i32) -> (i32, i32, i32) {
    %c0_i32 = arith.constant 0 : i32
    %c0_i32_0 = arith.constant 0 : i32
    return %arg0, %arg1, %c0_i32 : i32, i32, i32
  }
  func.func @transform_1(%arg0: i32, %arg1: i32, %arg2: i32) -> (i32, i32) {
    %c0_i32 = arith.constant 0 : i32
    %c0_i32_0 = arith.constant 0 : i32
    %c0_i32_1 = arith.constant 0 : i32
    return %c0_i32, %c0_i32_0 : i32, i32
  }
  func.func @transform_2(%arg0: i32, %arg1: i32, %arg2: i32) -> (i32, i32) {
    %c0_i32 = arith.constant 0 : i32
    %c0_i32_0 = arith.constant 0 : i32
    %c0_i32_1 = arith.constant 0 : i32
    return %c0_i32, %c0_i32_0 : i32, i32
  }
  func.func @transform_3(%arg0: i32, %arg1: i32, %arg2: i32) -> (i32, i32) {
    %c0_i32 = arith.constant 0 : i32
    %c0_i32_0 = arith.constant 0 : i32
    return %c0_i32, %arg2 : i32, i32
  }
  func.func @transform_4(%arg0: i32, %arg1: i32, %arg2: i32) -> (i32, i32) {
    %c0_i32 = arith.constant 0 : i32
    %c0_i32_0 = arith.constant 0 : i32
    return %c0_i32, %arg2 : i32, i32
  }
  func.func @transform_5(%arg0: i32, %arg1: i32, %arg2: i32) -> (i32, i32, i32) {
    %c0_i32 = arith.constant 0 : i32
    return %arg0, %arg1, %arg2 : i32, i32, i32
  }
}

module attributes {stable_mosaic.version = 11 : i64} {
  func.func @ln_linear_kernel(%arg0: i32, %arg1: i32, %arg2: i32, %arg3: memref<1x128x256xf32, #tpu.memory_space<vmem>>, %arg4: memref<1x256xf32, #tpu.memory_space<vmem>>, %arg5: memref<1x256xf32, #tpu.memory_space<vmem>>, %arg6: memref<256x256xbf16, #tpu.memory_space<vmem>>, %arg7: memref<1x256xf32, #tpu.memory_space<vmem>>, %arg8: memref<1x128x256xbf16, #tpu.memory_space<vmem>>, %arg9: memref<128x256xbf16, #tpu.memory_space<vmem>>) attributes {dimension_semantics = [#tpu.dimension_semantics<parallel>, #tpu.dimension_semantics<parallel>, #tpu.dimension_semantics<arbitrary>], iteration_bounds = array<i64: 2, 1, 4>, scalar_prefetch = 0 : i64, scratch_operands = 1 : i64, tpu.core_type = #tpu.core_type<tc>, window_params = [{transform_indices = @transform_0, window_bounds = array<i64: 1, 128, 256>}, {pipeline_mode = #tpu.pipeline_mode<synchronous>, transform_indices = @transform_1, window_bounds = array<i64: 1, 256>}, {pipeline_mode = #tpu.pipeline_mode<synchronous>, transform_indices = @transform_2, window_bounds = array<i64: 1, 256>}, {transform_indices = @transform_3, window_bounds = array<i64: 256, 256>}, {transform_indices = @transform_4, window_bounds = array<i64: 1, 256>}, {transform_indices = @transform_5, window_bounds = array<i64: 1, 128, 256>}]} {
    %c0_i32 = arith.constant 0 : i32
    %0 = arith.cmpi eq, %arg2, %c0_i32 : i32
    %1 = arith.extui %0 : i1 to i32
    %c0_i32_0 = arith.constant 0 : i32
    %2 = arith.cmpi ne, %1, %c0_i32_0 : i32
    scf.if %2 {
      %c0_12 = arith.constant 0 : index
      %c0_13 = arith.constant 0 : index
      %c0_14 = arith.constant 0 : index
      %21 = vector.load %arg3[%c0_12, %c0_13, %c0_14] : memref<1x128x256xf32, #tpu.memory_space<vmem>>, vector<1x128x256xf32>
      %22 = vector.shape_cast %21 : vector<1x128x256xf32> to vector<128x256xf32>
      %c0_15 = arith.constant 0 : index
      %c0_16 = arith.constant 0 : index
      %23 = vector.load %arg4[%c0_15, %c0_16] : memref<1x256xf32, #tpu.memory_space<vmem>>, vector<1x256xf32>
      %c0_17 = arith.constant 0 : index
      %c0_18 = arith.constant 0 : index
      %24 = vector.load %arg5[%c0_17, %c0_18] : memref<1x256xf32, #tpu.memory_space<vmem>>, vector<1x256xf32>
      %cst_19 = arith.constant dense<0.000000e+00> : vector<128xf32>
      %25 = vector.multi_reduction <add>, %22, %cst_19 [1] : vector<128x256xf32> to vector<128xf32>
      %26 = vector.shape_cast %25 : vector<128xf32> to vector<128x1xf32>
      %cst_20 = arith.constant 2.560000e+02 : f32
      %27 = vector.broadcast %cst_20 : f32 to vector<128x1xf32>
      %28 = arith.divf %26, %27 : vector<128x1xf32>
      %29 = vector.broadcast %28 : vector<128x1xf32> to vector<128x256xf32>
      %30 = arith.subf %22, %29 : vector<128x256xf32>
      %31 = arith.mulf %30, %30 : vector<128x256xf32>
      %cst_21 = arith.constant dense<0.000000e+00> : vector<128xf32>
      %32 = vector.multi_reduction <add>, %31, %cst_21 [1] : vector<128x256xf32> to vector<128xf32>
      %33 = vector.shape_cast %32 : vector<128xf32> to vector<128x1xf32>
      %cst_22 = arith.constant 2.560000e+02 : f32
      %34 = vector.broadcast %cst_22 : f32 to vector<128x1xf32>
      %35 = arith.divf %33, %34 : vector<128x1xf32>
      %36 = vector.broadcast %28 : vector<128x1xf32> to vector<128x256xf32>
      %37 = arith.subf %22, %36 : vector<128x256xf32>
      %cst_23 = arith.constant 9.99999974E-6 : f32
      %38 = vector.broadcast %cst_23 : f32 to vector<128x1xf32>
      %39 = arith.addf %35, %38 : vector<128x1xf32>
      %40 = math.rsqrt %39 : vector<128x1xf32>
      %41 = vector.broadcast %40 : vector<128x1xf32> to vector<128x256xf32>
      %42 = arith.mulf %37, %41 : vector<128x256xf32>
      %43 = vector.broadcast %23 : vector<1x256xf32> to vector<128x256xf32>
      %44 = arith.mulf %42, %43 : vector<128x256xf32>
      %45 = vector.broadcast %24 : vector<1x256xf32> to vector<128x256xf32>
      %46 = arith.addf %44, %45 : vector<128x256xf32>
      %47 = arith.truncf %46 : vector<128x256xf32> to vector<128x256xbf16>
      %c0_24 = arith.constant 0 : index
      %c0_25 = arith.constant 0 : index
      %48 = vector.load %arg9[%c0_24, %c0_25] : memref<128x256xbf16, #tpu.memory_space<vmem>>, vector<128x256xbf16>
      tpu.vector_store %arg9[%c0_24, %c0_25], %47 {strides = array<i32>} : memref<128x256xbf16, #tpu.memory_space<vmem>>, vector<128x256xbf16>,
    } else {
    }
    %c0 = arith.constant 0 : index
    %c0_1 = arith.constant 0 : index
    %3 = vector.load %arg9[%c0, %c0_1] : memref<128x256xbf16, #tpu.memory_space<vmem>>, vector<128x256xbf16>
    %c0_2 = arith.constant 0 : index
    %c0_3 = arith.constant 0 : index
    %4 = vector.load %arg6[%c0_2, %c0_3] : memref<256x256xbf16, #tpu.memory_space<vmem>>, vector<256x256xbf16>
    %cst = arith.constant dense<0.000000e+00> : vector<128x256xf32>
    %5 = tpu.matmul %3, %4, %cst {dimension_numbers = #tpu.dot_dimension_numbers<[1], [0], [0], [1], [0, 0, 1, 1], [], []>} : vector<128x256xbf16>, vector<256x256xbf16>, vector<128x256xf32> -> vector<128x256xf32>
    %c0_4 = arith.constant 0 : index
    %c0_5 = arith.constant 0 : index
    %6 = vector.load %arg7[%c0_4, %c0_5] : memref<1x256xf32, #tpu.memory_space<vmem>>, vector<1x256xf32>
    %7 = vector.broadcast %6 : vector<1x256xf32> to vector<128x256xf32>
    %8 = arith.addf %5, %7 : vector<128x256xf32>
    %cst_6 = arith.constant 5.000000e-01 : f32
    %9 = vector.broadcast %cst_6 : f32 to vector<128x256xf32>
    %10 = arith.mulf %9, %8 : vector<128x256xf32>
    %cst_7 = arith.constant 0.707106769 : f32
    %11 = vector.broadcast %cst_7 : f32 to vector<128x256xf32>
    %12 = arith.mulf %8, %11 : vector<128x256xf32>
    %13 = math.erf %12 : vector<128x256xf32>
    %cst_8 = arith.constant 1.000000e+00 : f32
    %14 = vector.broadcast %cst_8 : f32 to vector<128x256xf32>
    %15 = arith.addf %14, %13 : vector<128x256xf32>
    %16 = arith.mulf %10, %15 : vector<128x256xf32>
    %17 = arith.truncf %16 : vector<128x256xf32> to vector<128x256xbf16>
    %c0_9 = arith.constant 0 : index
    %c0_10 = arith.constant 0 : index
    %c0_11 = arith.constant 0 : index
    %18 = vector.load %arg8[%c0_9, %c0_10, %c0_11] : memref<1x128x256xbf16, #tpu.memory_space<vmem>>, vector<1x128x256xbf16>
    %19 = vector.shape_cast %18 : vector<1x128x256xbf16> to vector<128x256xbf16>
    %20 = vector.shape_cast %17 : vector<128x256xbf16> to vector<1x128x256xbf16>
    tpu.vector_store %arg8[%c0_9, %c0_10, %c0_11], %20 {strides = array<i32>} : memref<1x128x256xbf16, #tpu.memory_space<vmem>>, vector<1x128x256xbf16>,
    return
  }
  func.func @transform_0(%arg0: i32, %arg1: i32, %arg2: i32) -> (i32, i32, i32) {
    %c0_i32 = arith.constant 0 : i32
    %c0_i32_0 = arith.constant 0 : i32
    return %arg0, %arg1, %c0_i32 : i32, i32, i32
  }
  func.func @transform_1(%arg0: i32, %arg1: i32, %arg2: i32) -> (i32, i32) {
    %c0_i32 = arith.constant 0 : i32
    %c0_i32_0 = arith.constant 0 : i32
    %c0_i32_1 = arith.constant 0 : i32
    return %c0_i32, %c0_i32_0 : i32, i32
  }
  func.func @transform_2(%arg0: i32, %arg1: i32, %arg2: i32) -> (i32, i32) {
    %c0_i32 = arith.constant 0 : i32
    %c0_i32_0 = arith.constant 0 : i32
    %c0_i32_1 = arith.constant 0 : i32
    return %c0_i32, %c0_i32_0 : i32, i32
  }
  func.func @transform_3(%arg0: i32, %arg1: i32, %arg2: i32) -> (i32, i32) {
    %c0_i32 = arith.constant 0 : i32
    %c0_i32_0 = arith.constant 0 : i32
    return %c0_i32, %arg2 : i32, i32
  }
  func.func @transform_4(%arg0: i32, %arg1: i32, %arg2: i32) -> (i32, i32) {
    %c0_i32 = arith.constant 0 : i32
    %c0_i32_0 = arith.constant 0 : i32
    return %c0_i32, %arg2 : i32, i32
  }
  func.func @transform_5(%arg0: i32, %arg1: i32, %arg2: i32) -> (i32, i32, i32) {
    %c0_i32 = arith.constant 0 : i32
    return %arg0, %arg1, %arg2 : i32, i32, i32
  }
}

module attributes {stable_mosaic.version = 11 : i64} {
  func.func @linear_noacc_res_kernel(%arg0: i32, %arg1: i32, %arg2: i32, %arg3: memref<1x128x1024xbf16, #tpu.memory_space<vmem>>, %arg4: memref<1x128x256xf32, #tpu.memory_space<vmem>>, %arg5: memref<1024x256xbf16, #tpu.memory_space<vmem>>, %arg6: memref<1x256xf32, #tpu.memory_space<vmem>>, %arg7: memref<1x128x256xf32, #tpu.memory_space<vmem>>) attributes {dimension_semantics = [#tpu.dimension_semantics<parallel>, #tpu.dimension_semantics<parallel>, #tpu.dimension_semantics<parallel>], iteration_bounds = array<i64: 2, 1, 1>, scalar_prefetch = 0 : i64, scratch_operands = 0 : i64, tpu.core_type = #tpu.core_type<tc>, window_params = [{transform_indices = @transform_0, window_bounds = array<i64: 1, 128, 1024>}, {transform_indices = @transform_1, window_bounds = array<i64: 1, 128, 256>}, {transform_indices = @transform_2, window_bounds = array<i64: 1024, 256>}, {transform_indices = @transform_3, window_bounds = array<i64: 1, 256>}, {transform_indices = @transform_4, window_bounds = array<i64: 1, 128, 256>}]} {
    %c0 = arith.constant 0 : index
    %c0_0 = arith.constant 0 : index
    %c0_1 = arith.constant 0 : index
    %0 = vector.load %arg3[%c0, %c0_0, %c0_1] : memref<1x128x1024xbf16, #tpu.memory_space<vmem>>, vector<1x128x1024xbf16>
    %1 = vector.shape_cast %0 : vector<1x128x1024xbf16> to vector<128x1024xbf16>
    %c0_2 = arith.constant 0 : index
    %c0_3 = arith.constant 0 : index
    %2 = vector.load %arg5[%c0_2, %c0_3] : memref<1024x256xbf16, #tpu.memory_space<vmem>>, vector<1024x256xbf16>
    %cst = arith.constant dense<0.000000e+00> : vector<128x256xf32>
    %3 = tpu.matmul %1, %2, %cst {dimension_numbers = #tpu.dot_dimension_numbers<[1], [0], [0], [1], [0, 0, 1, 1], [], []>} : vector<128x1024xbf16>, vector<1024x256xbf16>, vector<128x256xf32> -> vector<128x256xf32>
    %c0_4 = arith.constant 0 : index
    %c0_5 = arith.constant 0 : index
    %4 = vector.load %arg6[%c0_4, %c0_5] : memref<1x256xf32, #tpu.memory_space<vmem>>, vector<1x256xf32>
    %5 = vector.broadcast %4 : vector<1x256xf32> to vector<128x256xf32>
    %6 = arith.addf %3, %5 : vector<128x256xf32>
    %c0_6 = arith.constant 0 : index
    %c0_7 = arith.constant 0 : index
    %c0_8 = arith.constant 0 : index
    %7 = vector.load %arg4[%c0_6, %c0_7, %c0_8] : memref<1x128x256xf32, #tpu.memory_space<vmem>>, vector<1x128x256xf32>
    %8 = vector.shape_cast %7 : vector<1x128x256xf32> to vector<128x256xf32>
    %9 = arith.addf %8, %6 : vector<128x256xf32>
    %c0_9 = arith.constant 0 : index
    %c0_10 = arith.constant 0 : index
    %c0_11 = arith.constant 0 : index
    %10 = vector.load %arg7[%c0_9, %c0_10, %c0_11] : memref<1x128x256xf32, #tpu.memory_space<vmem>>, vector<1x128x256xf32>
    %11 = vector.shape_cast %10 : vector<1x128x256xf32> to vector<128x256xf32>
    %12 = vector.shape_cast %9 : vector<128x256xf32> to vector<1x128x256xf32>
    tpu.vector_store %arg7[%c0_9, %c0_10, %c0_11], %12 {strides = array<i32>} : memref<1x128x256xf32, #tpu.memory_space<vmem>>, vector<1x128x256xf32>,
    return
  }
  func.func @transform_0(%arg0: i32, %arg1: i32, %arg2: i32) -> (i32, i32, i32) {
    %c0_i32 = arith.constant 0 : i32
    %c0_i32_0 = arith.constant 0 : i32
    return %arg0, %arg1, %c0_i32 : i32, i32, i32
  }
  func.func @transform_1(%arg0: i32, %arg1: i32, %arg2: i32) -> (i32, i32, i32) {
    %c0_i32 = arith.constant 0 : i32
    return %arg0, %arg1, %arg2 : i32, i32, i32
  }
  func.func @transform_2(%arg0: i32, %arg1: i32, %arg2: i32) -> (i32, i32) {
    %c0_i32 = arith.constant 0 : i32
    %c0_i32_0 = arith.constant 0 : i32
    return %c0_i32, %arg2 : i32, i32
  }
  func.func @transform_3(%arg0: i32, %arg1: i32, %arg2: i32) -> (i32, i32) {
    %c0_i32 = arith.constant 0 : i32
    %c0_i32_0 = arith.constant 0 : i32
    return %c0_i32, %arg2 : i32, i32
  }
  func.func @transform_4(%arg0: i32, %arg1: i32, %arg2: i32) -> (i32, i32, i32) {
    %c0_i32 = arith.constant 0 : i32
    return %arg0, %arg1, %arg2 : i32, i32, i32
  }
}

module attributes {stable_mosaic.version = 11 : i64} {
  func.func @fused_head_kernel(%arg0: i32, %arg1: i32, %arg2: memref<1x128x256xf32, #tpu.memory_space<vmem>>, %arg3: memref<256x256xbf16, #tpu.memory_space<vmem>>, %arg4: memref<1x256xf32, #tpu.memory_space<vmem>>, %arg5: memref<256x256xbf16, #tpu.memory_space<vmem>>, %arg6: memref<1x256xf32, #tpu.memory_space<vmem>>, %arg7: memref<1x128x256xf32, #tpu.memory_space<vmem>>) attributes {dimension_semantics = [#tpu.dimension_semantics<parallel>, #tpu.dimension_semantics<parallel>], iteration_bounds = array<i64: 2, 1>, scalar_prefetch = 0 : i64, scratch_operands = 0 : i64, tpu.core_type = #tpu.core_type<tc>, window_params = [{transform_indices = @transform_0, window_bounds = array<i64: 1, 128, 256>}, {pipeline_mode = #tpu.pipeline_mode<synchronous>, transform_indices = @transform_1, window_bounds = array<i64: 256, 256>}, {pipeline_mode = #tpu.pipeline_mode<synchronous>, transform_indices = @transform_2, window_bounds = array<i64: 1, 256>}, {pipeline_mode = #tpu.pipeline_mode<synchronous>, transform_indices = @transform_3, window_bounds = array<i64: 256, 256>}, {pipeline_mode = #tpu.pipeline_mode<synchronous>, transform_indices = @transform_4, window_bounds = array<i64: 1, 256>}, {transform_indices = @transform_5, window_bounds = array<i64: 1, 128, 256>}]} {
    %c0 = arith.constant 0 : index
    %c0_0 = arith.constant 0 : index
    %c0_1 = arith.constant 0 : index
    %0 = vector.load %arg2[%c0, %c0_0, %c0_1] : memref<1x128x256xf32, #tpu.memory_space<vmem>>, vector<1x128x256xf32>
    %1 = vector.shape_cast %0 : vector<1x128x256xf32> to vector<128x256xf32>
    %2 = arith.truncf %1 : vector<128x256xf32> to vector<128x256xbf16>
    %c0_2 = arith.constant 0 : index
    %c0_3 = arith.constant 0 : index
    %3 = vector.load %arg3[%c0_2, %c0_3] : memref<256x256xbf16, #tpu.memory_space<vmem>>, vector<256x256xbf16>
    %cst = arith.constant dense<0.000000e+00> : vector<128x256xf32>
    %4 = tpu.matmul %2, %3, %cst {dimension_numbers = #tpu.dot_dimension_numbers<[1], [0], [0], [1], [0, 0, 1, 1], [], []>} : vector<128x256xbf16>, vector<256x256xbf16>, vector<128x256xf32> -> vector<128x256xf32>
    %c0_4 = arith.constant 0 : index
    %c0_5 = arith.constant 0 : index
    %5 = vector.load %arg4[%c0_4, %c0_5] : memref<1x256xf32, #tpu.memory_space<vmem>>, vector<1x256xf32>
    %6 = vector.broadcast %5 : vector<1x256xf32> to vector<128x256xf32>
    %7 = arith.addf %4, %6 : vector<128x256xf32>
    %8 = arith.truncf %7 : vector<128x256xf32> to vector<128x256xbf16>
    %c0_6 = arith.constant 0 : index
    %c0_7 = arith.constant 0 : index
    %9 = vector.load %arg5[%c0_6, %c0_7] : memref<256x256xbf16, #tpu.memory_space<vmem>>, vector<256x256xbf16>
    %cst_8 = arith.constant dense<0.000000e+00> : vector<128x256xf32>
    %10 = tpu.matmul %8, %9, %cst_8 {dimension_numbers = #tpu.dot_dimension_numbers<[1], [0], [0], [1], [0, 0, 1, 1], [], []>} : vector<128x256xbf16>, vector<256x256xbf16>, vector<128x256xf32> -> vector<128x256xf32>
    %c0_9 = arith.constant 0 : index
    %c0_10 = arith.constant 0 : index
    %11 = vector.load %arg6[%c0_9, %c0_10] : memref<1x256xf32, #tpu.memory_space<vmem>>, vector<1x256xf32>
    %12 = vector.broadcast %11 : vector<1x256xf32> to vector<128x256xf32>
    %13 = arith.addf %10, %12 : vector<128x256xf32>
    %c0_11 = arith.constant 0 : index
    %c0_12 = arith.constant 0 : index
    %c0_13 = arith.constant 0 : index
    %14 = vector.load %arg7[%c0_11, %c0_12, %c0_13] : memref<1x128x256xf32, #tpu.memory_space<vmem>>, vector<1x128x256xf32>
    %15 = vector.shape_cast %14 : vector<1x128x256xf32> to vector<128x256xf32>
    %16 = vector.shape_cast %13 : vector<128x256xf32> to vector<1x128x256xf32>
    tpu.vector_store %arg7[%c0_11, %c0_12, %c0_13], %16 {strides = array<i32>} : memref<1x128x256xf32, #tpu.memory_space<vmem>>, vector<1x128x256xf32>,
    return
  }
  func.func @transform_0(%arg0: i32, %arg1: i32) -> (i32, i32, i32) {
    %c0_i32 = arith.constant 0 : i32
    %c0_i32_0 = arith.constant 0 : i32
    return %arg0, %arg1, %c0_i32 : i32, i32, i32
  }
  func.func @transform_1(%arg0: i32, %arg1: i32) -> (i32, i32) {
    %c0_i32 = arith.constant 0 : i32
    %c0_i32_0 = arith.constant 0 : i32
    %c0_i32_1 = arith.constant 0 : i32
    return %c0_i32, %c0_i32_0 : i32, i32
  }
  func.func @transform_2(%arg0: i32, %arg1: i32) -> (i32, i32) {
    %c0_i32 = arith.constant 0 : i32
    %c0_i32_0 = arith.constant 0 : i32
    %c0_i32_1 = arith.constant 0 : i32
    return %c0_i32, %c0_i32_0 : i32, i32
  }
  func.func @transform_3(%arg0: i32, %arg1: i32) -> (i32, i32) {
    %c0_i32 = arith.constant 0 : i32
    %c0_i32_0 = arith.constant 0 : i32
    %c0_i32_1 = arith.constant 0 : i32
    return %c0_i32, %c0_i32_0 : i32, i32
  }
  func.func @transform_4(%arg0: i32, %arg1: i32) -> (i32, i32) {
    %c0_i32 = arith.constant 0 : i32
    %c0_i32_0 = arith.constant 0 : i32
    %c0_i32_1 = arith.constant 0 : i32
    return %c0_i32, %c0_i32_0 : i32, i32
  }
  func.func @transform_5(%arg0: i32, %arg1: i32) -> (i32, i32, i32) {
    %c0_i32 = arith.constant 0 : i32
    %c0_i32_0 = arith.constant 0 : i32
    return %arg0, %arg1, %c0_i32 : i32, i32, i32
  }
}

</mosaic_0001>

<bundles_post_ra>
// kernel: monai_decoder_only_forward.13
= control target key start
LH: loop header
LB: loop body
LE: loop exit
PB: predicated region body
PF: predicated region fallthrough
CT: control target
= control target key end

     0   :  { %s1271_s15 = smov 0   ;;  %s1273_s16 = smov 0   ;;  %s1536_s0 = inlined_call_operand.vmem [shape: bf16[2,128,256], index: 0, kind: input, shape index: {}]   ;;  %s1537_s1 = inlined_call_operand.vmem [shape: f32[2,128,256], index: 1, kind: input, shape index: {}]   ;;  %s1538_s2 = inlined_call_operand.vmem [shape: bf16[256,256], index: 2, kind: input, shape index: {}]   ;;  %s1539_s3 = inlined_call_operand.vmem [shape: f32[1,256], index: 3, kind: input, shape index: {}]   ;;  %s1540_s4 = inlined_call_operand.vmem [shape: f32[2,128,256], index: 4, kind: output, shape index: {}]  }
   0x1   :  { %s1275_s17 = smov 0  }
   0x2 LB: > { %s33_s18 = sadd.s32 1, %s1240_s16  ;;  %p1034_p0 = scmp.ge.s32.totalorder %s1244_s17, 1  ;;  %s1244_s17 = sphi %s1275_s17, %s14_s17   ;;  %s1240_s16 = sphi %s1273_s16, %s1542_s16   ;;  %s1236_s15 = sphi %s1271_s15, %s1541_s15  }
   0x3   : > { %p35_p1 = scmp.ge.s32.totalorder %s33_s18, 2  ;;  %p239_p2 = scmp.lt.s32.totalorder %s1244_s17, 3 }
   0x5   : > { %s1544_s18 = smov (%p35_p1, %s33_s18), 0  ;;  %p240_p3 = pnand %p1034_p0, %p239_p2 }
   0x6   : > { %v1150_v0 = vld [vmem:[%s1538_s2 + $0x4] ss:$8 sps:$4 sm:$0xff] (!%p240_p3)   ;;  %v1152_v1 = vld [vmem:[%s1538_s2] ss:$8 sps:$4 sm:$0xff] (!%p240_p3)   ;;  %v1153_v2 = vld [vmem:[%s1538_s2 + $0x14] ss:$8 sps:$4 sm:$0xff] (!%p240_p3)   ;;  %v406_v48 = vlaneseq (!%p240_p3) }
   0x7   : > { %243 = sbr.rel (%p240_p3) target bundleno = 315 (0x13b), region = 36  ;;  %656 = vmatprep.subr.bf16.mxu0 (!%p240_p3), %v1150_v0  ;;  %1094 = vmatprep.subr.bf16.mxu1 (!%p240_p3), %v1150_v0  ;;  %v1155_v3 = vld [vmem:[%s1538_s2 + $0x10] ss:$8 sps:$4 sm:$0xff] (!%p240_p3)   ;;  %v1156_v4 = vld [vmem:[%s1538_s2 + $0x24] ss:$8 sps:$4 sm:$0xff] (!%p240_p3)   ;;  %p303_p4 = scmp.lt.s32.totalorder (!%p240_p3), %s1236_s15, 1 }
   0x8   : > { %657 = vmatpush1.bf16.msra.mxu0 (!%p240_p3), %v1152_v1  ;;  %1110 = vmatpush1.bf16.msra.mxu1 (!%p240_p3), %v1152_v1  ;;  %v1158_v5 = vld [vmem:[%s1538_s2 + $0x20] ss:$8 sps:$4 sm:$0xff] (!%p240_p3)   ;;  %v1159_v6 = vld [vmem:[%s1538_s2 + $0x34] ss:$8 sps:$4 sm:$0xff] (!%p240_p3)   ;;  %v1161_v7 = vld [vmem:[%s1538_s2 + $0x30] ss:$8 sps:$4 sm:$0xff] (!%p240_p3)  }
   0x9   : > { %658 = vmatprep.subr.bf16.mxu0 (!%p240_p3), %v1153_v2  ;;  %1095 = vmatprep.subr.bf16.mxu1 (!%p240_p3), %v1153_v2  ;;  %v1162_v8 = vld [vmem:[%s1538_s2 + $0x44] ss:$8 sps:$4 sm:$0xff] (!%p240_p3)   ;;  %v1164_v9 = vld [vmem:[%s1538_s2 + $0x40] ss:$8 sps:$4 sm:$0xff] (!%p240_p3)   ;;  %v1165_v10 = vld [vmem:[%s1538_s2 + $0x54] ss:$8 sps:$4 sm:$0xff] (!%p240_p3)  }
   0xa   : > { %v1167_v11 = vld [vmem:[%s1538_s2 + $0x50] ss:$8 sps:$4 sm:$0xff] (!%p240_p3)   ;;  %v1168_v12 = vld [vmem:[%s1538_s2 + $0x64] ss:$8 sps:$4 sm:$0xff] (!%p240_p3)   ;;  %v1170_v14 = vld [vmem:[%s1538_s2 + $0x60] ss:$8 sps:$4 sm:$0xff] (!%p240_p3)  }
   0xb   : > { %v1171_v16 = vld [vmem:[%s1538_s2 + $0x74] ss:$8 sps:$4 sm:$0xff] (!%p240_p3)   ;;  %v1173_v17 = vld [vmem:[%s1538_s2 + $0x70] ss:$8 sps:$4 sm:$0xff] (!%p240_p3)   ;;  %v1174_v18 = vld [vmem:[%s1538_s2 + $0x84] ss:$8 sps:$4 sm:$0xff] (!%p240_p3)  }
   0xc   : > { %659 = vmatpush1.bf16.msra.mxu0 (!%p240_p3), %v1155_v3  ;;  %1111 = vmatpush1.bf16.msra.mxu1 (!%p240_p3), %v1155_v3  ;;  %v1176_v19 = vld [vmem:[%s1538_s2 + $0x80] ss:$8 sps:$4 sm:$0xff] (!%p240_p3)   ;;  %v1177_v20 = vld [vmem:[%s1538_s2 + $0x94] ss:$8 sps:$4 sm:$0xff] (!%p240_p3)   ;;  %v1179_v21 = vld [vmem:[%s1538_s2 + $0x90] ss:$8 sps:$4 sm:$0xff] (!%p240_p3)  }
   0xd   : > { %660 = vmatprep.subr.bf16.mxu0 (!%p240_p3), %v1156_v4  ;;  %1096 = vmatprep.subr.bf16.mxu1 (!%p240_p3), %v1156_v4  ;;  %v1180_v22 = vld [vmem:[%s1538_s2 + $0xa4] ss:$8 sps:$4 sm:$0xff] (!%p240_p3)   ;;  %v1182_v23 = vld [vmem:[%s1538_s2 + $0xa0] ss:$8 sps:$4 sm:$0xff] (!%p240_p3)   ;;  %v1183_v24 = vld [vmem:[%s1538_s2 + $0xb4] ss:$8 sps:$4 sm:$0xff] (!%p240_p3)  }
   0xe   : > { %s1546_s15 = smov (!%p303_p4, %s1236_s15), 1  ;;  %v1185_v25 = vld [vmem:[%s1538_s2 + $0xb0] ss:$8 sps:$4 sm:$0xff]   ;;  %v1186_v26 = vld [vmem:[%s1538_s2 + $0xc4] ss:$8 sps:$4 sm:$0xff]   ;;  %v407_v49 = vshrl.u32 %v406_v48, 7 }
   0xf   : > { %s1091_s19 = sshll.u32 %s1546_s15, 7  ;;  %v1188_v27 = vld [vmem:[%s1538_s2 + $0xc0] ss:$8 sps:$4 sm:$0xff]   ;;  %v1189_v28 = vld [vmem:[%s1538_s2 + $0xd4] ss:$8 sps:$4 sm:$0xff]   ;;  %s1092_s22 = sshll.u32 %s1546_s15, 8 }
  0x10   : > { %661 = vmatpush1.bf16.msra.mxu0 %v1158_v5  ;;  %1112 = vmatpush1.bf16.msra.mxu1 %v1158_v5  ;;  %s1335_s24 = scalar_lea.vmem %s1536_s0, %s1091_s19  ;;  %v1191_v29 = vld [vmem:[%s1538_s2 + $0xd0] ss:$8 sps:$4 sm:$0xff]   ;;  %v1192_v30 = vld [vmem:[%s1538_s2 + $0xe4] ss:$8 sps:$4 sm:$0xff]   ;;  %v1194_v31 = vld [vmem:[%s1538_s2 + $0xe0] ss:$8 sps:$4 sm:$0xff]   ;;  %s1420_s28 = scalar_lea.vmem %s1537_s1, %s1092_s22 }
  0x11   : > { %662 = vmatprep.subr.bf16.mxu0 %v1159_v6  ;;  %1097 = vmatprep.subr.bf16.mxu1 %v1159_v6  ;;  %v1200_v13 = vld [vmem:[%s1335_s24 + $0x4] ss:$8 sps:$4 sm:$0xff]   ;;  %v1195_v32 = vld [vmem:[%s1538_s2 + $0xf4] ss:$8 sps:$4 sm:$0xff]   ;;  %v1197_v33 = vld [vmem:[%s1538_s2 + $0xf0] ss:$8 sps:$4 sm:$0xff]   ;;  %s1435_s29 = scalar_lea.vmem %s1540_s4, %s1092_s22 }
  0x12   : > { %v1203_v15 = vld [vmem:[%s1335_s24 + $0x44] ss:$8 sps:$4 sm:$0xff]   ;;  %688 = vmatprep.mubr.bf16.mxu0 %v1200_v13  ;;  %v1198_v34 = vld [vmem:[%s1335_s24] ss:$8 sps:$4 sm:$0xff]   ;;  %v1204_v36 = vld [vmem:[%s1335_s24 + $0x14] ss:$8 sps:$4 sm:$0xff]  }
  0x13   : > { %728 = vmatprep.mubr.bf16.mxu1 %v1203_v15  ;;  %v1201_v35 = vld [vmem:[%s1335_s24 + $0x40] ss:$8 sps:$4 sm:$0xff]   ;;  %v1206_v37 = vld [vmem:[%s1335_s24 + $0x54] ss:$8 sps:$4 sm:$0xff]   ;;  %v1208_v38 = vld [vmem:[%s1335_s24 + $0x10] ss:$8 sps:$4 sm:$0xff]  }
  0x14   : > { %663 = vmatpush1.bf16.msra.mxu0 %v1161_v7  ;;  %1113 = vmatpush1.bf16.msra.mxu1 %v1161_v7  ;;  %v1209_v39 = vld [vmem:[%s1335_s24 + $0x50] ss:$8 sps:$4 sm:$0xff]   ;;  %v1210_v40 = vld [vmem:[%s1335_s24 + $0x24] ss:$8 sps:$4 sm:$0xff]   ;;  %v1214_v42 = vld [vmem:[%s1335_s24 + $0x20] ss:$8 sps:$4 sm:$0xff]  }
  0x15   : > { %664 = vmatprep.subr.bf16.mxu0 %v1162_v8  ;;  %1098 = vmatprep.subr.bf16.mxu1 %v1162_v8  ;;  %v1212_v41 = vld [vmem:[%s1335_s24 + $0x64] ss:$8 sps:$4 sm:$0xff]   ;;  %v1215_v43 = vld [vmem:[%s1335_s24 + $0x60] ss:$8 sps:$4 sm:$0xff]   ;;  %v1216_v44 = vld [vmem:[%s1335_s24 + $0x34] ss:$8 sps:$4 sm:$0xff]  }
  0x16   : > { %v1218_v45 = vld [vmem:[%s1335_s24 + $0x74] ss:$8 sps:$4 sm:$0xff]   ;;  %v1220_v46 = vld [vmem:[%s1335_s24 + $0x30] ss:$8 sps:$4 sm:$0xff]   ;;  %v408_v50 = vsub.s32 0, %v407_v49  ;;  %v412_v52 = vsub.s32 1, %v407_v49 }
  0x17   : > { %v1221_v47 = vld [vmem:[%s1335_s24 + $0x70] ss:$8 sps:$4 sm:$0xff]   ;;  %v404_v51 = vld [vmem:[%s1539_s3] sm:$0x3]  ;;  %v770_v62 = vld [vmem:[%s1420_s28 + $0x8] sm:$0xff] }
  0x18   : > { %665 = vmatpush1.bf16.msra.mxu0 %v1164_v9  ;;  %1114 = vmatpush1.bf16.msra.mxu1 %v1164_v9  ;;  %v1422_v53 = vrot.slane %v404_v51, %v408_v50  ;;  %v1424_v54 = vrot.slane %v404_v51, %v412_v52  ;;  %v769_v56 = vld [vmem:[%s1420_s28] sm:$0xff]  ;;  %v786_v0 = vld [vmem:[%s1420_s28 + $0x88] sm:$0xff]  ;;  %v771_v4 = vld [vmem:[%s1420_s28 + $0x10] sm:$0xff] }
  0x19   : > { %666 = vmatprep.subr.bf16.mxu0 %v1165_v10  ;;  %1099 = vmatprep.subr.bf16.mxu1 %v1165_v10  ;;  %v785_v58 = vld [vmem:[%s1420_s28 + $0x80] sm:$0xff]  ;;  %v787_v6 = vld [vmem:[%s1420_s28 + $0x90] sm:$0xff] }
  0x1c   : > { %667 = vmatpush1.bf16.msra.mxu0 %v1167_v11  ;;  %1115 = vmatpush1.bf16.msra.mxu1 %v1167_v11 }
  0x1d   : > { %668 = vmatprep.subr.bf16.mxu0 %v1168_v12  ;;  %1100 = vmatprep.subr.bf16.mxu1 %v1168_v12  ;;  %v772_v12 = vld [vmem:[%s1420_s28 + $0x18] sm:$0xff] }
  0x20   : > { %669 = vmatpush1.bf16.msra.mxu0 %v1170_v14  ;;  %1116 = vmatpush1.bf16.msra.mxu1 %v1170_v14  ;;  %v788_v14 = vld [vmem:[%s1420_s28 + $0x98] sm:$0xff] }
  0x21   : > { %670 = vmatprep.subr.bf16.mxu0 %v1171_v16  ;;  %1101 = vmatprep.subr.bf16.mxu1 %v1171_v16 }
  0x24   : > { %671 = vmatpush1.bf16.msra.mxu0 %v1173_v17  ;;  %1117 = vmatpush1.bf16.msra.mxu1 %v1173_v17 }
  0x25   : > { %672 = vmatprep.subr.bf16.mxu0 %v1174_v18  ;;  %1102 = vmatprep.subr.bf16.mxu1 %v1174_v18 }
  0x28   : > { %673 = vmatpush1.bf16.msra.mxu0 %v1176_v19  ;;  %1118 = vmatpush1.bf16.msra.mxu1 %v1176_v19 }
  0x29   : > { %674 = vmatprep.subr.bf16.mxu0 %v1177_v20  ;;  %1103 = vmatprep.subr.bf16.mxu1 %v1177_v20 }
  0x2c   : > { %675 = vmatpush1.bf16.msra.mxu0 %v1179_v21  ;;  %1119 = vmatpush1.bf16.msra.mxu1 %v1179_v21 }
  0x2d   : > { %676 = vmatprep.subr.bf16.mxu0 %v1180_v22  ;;  %1104 = vmatprep.subr.bf16.mxu1 %v1180_v22 }
  0x30   : > { %677 = vmatpush1.bf16.msra.mxu0 %v1182_v23  ;;  %1120 = vmatpush1.bf16.msra.mxu1 %v1182_v23 }
  0x31   : > { %678 = vmatprep.subr.bf16.mxu0 %v1183_v24  ;;  %1105 = vmatprep.subr.bf16.mxu1 %v1183_v24  ;;  %v773_v24 = vld [vmem:[%s1420_s28 + $0x20] sm:$0xff] }
  0x34   : > { %679 = vmatpush1.bf16.msra.mxu0 %v1185_v25  ;;  %1121 = vmatpush1.bf16.msra.mxu1 %v1185_v25 }
  0x35   : > { %680 = vmatprep.subr.bf16.mxu0 %v1186_v26  ;;  %1106 = vmatprep.subr.bf16.mxu1 %v1186_v26  ;;  %v789_v26 = vld [vmem:[%s1420_s28 + $0xa0] sm:$0xff] }
  0x38   : > { %681 = vmatpush1.bf16.msra.mxu0 %v1188_v27  ;;  %1122 = vmatpush1.bf16.msra.mxu1 %v1188_v27 }
  0x39   : > { %682 = vmatprep.subr.bf16.mxu0 %v1189_v28  ;;  %1107 = vmatprep.subr.bf16.mxu1 %v1189_v28 }
  0x3c   : > { %683 = vmatpush1.bf16.msra.mxu0 %v1191_v29  ;;  %1123 = vmatpush1.bf16.msra.mxu1 %v1191_v29 }
  0x3d   : > { %684 = vmatprep.subr.bf16.mxu0 %v1192_v30  ;;  %1108 = vmatprep.subr.bf16.mxu1 %v1192_v30  ;;  %v774_v30 = vld [vmem:[%s1420_s28 + $0x28] sm:$0xff] }
  0x40   : > { %685 = vmatpush1.bf16.msra.mxu0 %v1194_v31  ;;  %1124 = vmatpush1.bf16.msra.mxu1 %v1194_v31 }
  0x41   : > { %686 = vmatprep.subr.bf16.mxu0 %v1195_v32  ;;  %1109 = vmatprep.subr.bf16.mxu1 %v1195_v32  ;;  %v790_v32 = vld [vmem:[%s1420_s28 + $0xa8] sm:$0xff] }
  0x44   : > { %687 = vmatpush1.bf16.msra.mxu0 %v1197_v33  ;;  %1125 = vmatpush1.bf16.msra.mxu1 %v1197_v33 }
  0x47   : > { %689 = vmatmul.mubr.bf16.vlgmr.msra.gmra.mrb[0].mxu0 %v1198_v34  ;;  %729 = vmatmul.mubr.bf16.vlgmr.msra.gmra.mrb[0].mxu1 %v1201_v35 }
  0x48   : > { %698 = vmatprep.mubr.bf16.mxu0 %v1204_v36  ;;  %738 = vmatprep.mubr.bf16.mxu1 %v1206_v37  ;;  %v775_v36 = vld [vmem:[%s1420_s28 + $0x30] sm:$0xff] }
  0x4f   : > { %699 = vmatmul.mubr.bf16.gmra.mrb[4].mxu0 %v1208_v38  ;;  %739 = vmatmul.mubr.bf16.gmra.mrb[4].mxu1 %v1209_v39  ;;  %v791_v38 = vld [vmem:[%s1420_s28 + $0xb0] sm:$0xff] }
  0x50   : > { %708 = vmatprep.mubr.bf16.mxu0 %v1210_v40  ;;  %748 = vmatprep.mubr.bf16.mxu1 %v1212_v41 }
  0x57   : > { %709 = vmatmul.mubr.bf16.gmra.mrb[8].mxu0 %v1214_v42  ;;  %749 = vmatmul.mubr.bf16.gmra.mrb[8].mxu1 %v1215_v43 }
  0x58   : > { %718 = vmatprep.mubr.bf16.mxu0 %v1216_v44  ;;  %758 = vmatprep.mubr.bf16.mxu1 %v1218_v45  ;;  %v776_v44 = vld [vmem:[%s1420_s28 + $0x38] sm:$0xff] }
  0x5f   : > { %719 = vmatmul.mubr.bf16.gmra.mrb[12].mxu0 %v1220_v46  ;;  %759 = vmatmul.mubr.bf16.gmra.mrb[12].mxu1 %v1221_v47  ;;  %v792_v46 = vld [vmem:[%s1420_s28 + $0xb8] sm:$0xff] }
 0x11a   : > { %v690_v55 = vpop.f32.mrb[0].mxu0  ;;  %v730_v57 = vpop.f32.mrb[0].mxu1 }
 0x11b   : > { %v691_v59 = vadd.f32 %v690_v55, %v1422_v53  ;;  %v731_v60 = vadd.f32 %v730_v57, %v1422_v53  ;;  %v692_v61 = vpop.f32.mrb[1].mxu0  ;;  %v732_v63 = vpop.f32.mrb[1].mxu1 }
 0x11c   : > { %v693_v1 = vadd.f32 %v692_v61, %v1424_v54  ;;  %v733_v2 = vadd.f32 %v732_v63, %v1424_v54  ;;  %v694_v3 = vpop.f32.mrb[2].mxu0  ;;  %v734_v5 = vpop.f32.mrb[2].mxu1 }
 0x11d   : > { %v801_v7 = vadd.f32 %v769_v56, %v691_v59  ;;  %v817_v8 = vadd.f32 %v785_v58, %v731_v60  ;;  %v695_v9 = vadd.f32 %v694_v3, %v1422_v53  ;;  %v735_v10 = vadd.f32 %v734_v5, %v1422_v53  ;;  %v696_v11 = vpop.f32.mrb[3].mxu0  ;;  %v736_v13 = vpop.f32.mrb[3].mxu1  ;;  %v777_v58 = vld [vmem:[%s1420_s28 + $0x40] sm:$0xff] }
 0x11e   : > { %v802_v15 = vadd.f32 %v770_v62, %v693_v1  ;;  %v818_v16 = vadd.f32 %v786_v0, %v733_v2  ;;  %v697_v17 = vadd.f32 %v696_v11, %v1424_v54  ;;  %v737_v18 = vadd.f32 %v736_v13, %v1424_v54  ;;  %v793_v60 = vld [vmem:[%s1420_s28 + $0xc0] sm:$0xff]  ;;  %v778_v0 = vld [vmem:[%s1420_s28 + $0x48] sm:$0xff] }
 0x11f   : > { %833 = vst [vmem:[%s1435_s29] sm:$0xff] %v801_v7  ;;  %849 = vst [vmem:[%s1435_s29 + $0x80] sm:$0xff] %v817_v8  ;;  %v803_v19 = vadd.f32 %v771_v4, %v695_v9  ;;  %v819_v20 = vadd.f32 %v787_v6, %v735_v10  ;;  %v794_v2 = vld [vmem:[%s1420_s28 + $0xc8] sm:$0xff]  ;;  %v779_v6 = vld [vmem:[%s1420_s28 + $0x50] sm:$0xff] }
 0x120   : > { %834 = vst [vmem:[%s1435_s29 + $0x8] sm:$0xff] %v802_v15  ;;  %850 = vst [vmem:[%s1435_s29 + $0x88] sm:$0xff] %v818_v16  ;;  %v804_v21 = vadd.f32 %v772_v12, %v697_v17  ;;  %v820_v22 = vadd.f32 %v788_v14, %v737_v18  ;;  %v795_v8 = vld [vmem:[%s1420_s28 + $0xd0] sm:$0xff]  ;;  %v780_v14 = vld [vmem:[%s1420_s28 + $0x58] sm:$0xff] }
 0x121   : > { %835 = vst [vmem:[%s1435_s29 + $0x10] sm:$0xff] %v803_v19  ;;  %851 = vst [vmem:[%s1435_s29 + $0x90] sm:$0xff] %v819_v20  ;;  %v796_v16 = vld [vmem:[%s1420_s28 + $0xd8] sm:$0xff] }
 0x122   : > { %836 = vst [vmem:[%s1435_s29 + $0x18] sm:$0xff] %v804_v21  ;;  %852 = vst [vmem:[%s1435_s29 + $0x98] sm:$0xff] %v820_v22  ;;  %v700_v23 = vpop.f32.mrb[4].mxu0  ;;  %v740_v25 = vpop.f32.mrb[4].mxu1 }
 0x123   : > { %v701_v27 = vadd.f32 %v700_v23, %v1422_v53  ;;  %v741_v28 = vadd.f32 %v740_v25, %v1422_v53  ;;  %v702_v29 = vpop.f32.mrb[5].mxu0  ;;  %v742_v31 = vpop.f32.mrb[5].mxu1 }
 0x124   : > { %v703_v33 = vadd.f32 %v702_v29, %v1424_v54  ;;  %v743_v34 = vadd.f32 %v742_v31, %v1424_v54  ;;  %v704_v35 = vpop.f32.mrb[6].mxu0  ;;  %v744_v37 = vpop.f32.mrb[6].mxu1 }
 0x125   : > { %v805_v39 = vadd.f32 %v773_v24, %v701_v27  ;;  %v821_v40 = vadd.f32 %v789_v26, %v741_v28  ;;  %v705_v41 = vadd.f32 %v704_v35, %v1422_v53  ;;  %v745_v42 = vadd.f32 %v744_v37, %v1422_v53  ;;  %v706_v43 = vpop.f32.mrb[7].mxu0  ;;  %v746_v45 = vpop.f32.mrb[7].mxu1  ;;  %v781_v26 = vld [vmem:[%s1420_s28 + $0x60] sm:$0xff] }
 0x126   : > { %v806_v47 = vadd.f32 %v774_v30, %v703_v33  ;;  %v822_v48 = vadd.f32 %v790_v32, %v743_v34  ;;  %v707_v49 = vadd.f32 %v706_v43, %v1424_v54  ;;  %v747_v50 = vadd.f32 %v746_v45, %v1424_v54  ;;  %v797_v28 = vld [vmem:[%s1420_s28 + $0xe0] sm:$0xff]  ;;  %v782_v32 = vld [vmem:[%s1420_s28 + $0x68] sm:$0xff] }
 0x127   : > { %837 = vst [vmem:[%s1435_s29 + $0x20] sm:$0xff] %v805_v39  ;;  %853 = vst [vmem:[%s1435_s29 + $0xa0] sm:$0xff] %v821_v40  ;;  %v807_v51 = vadd.f32 %v775_v36, %v705_v41  ;;  %v823_v52 = vadd.f32 %v791_v38, %v745_v42  ;;  %v798_v34 = vld [vmem:[%s1420_s28 + $0xe8] sm:$0xff]  ;;  %v783_v38 = vld [vmem:[%s1420_s28 + $0x70] sm:$0xff] }
 0x128   : > { %838 = vst [vmem:[%s1435_s29 + $0x28] sm:$0xff] %v806_v47  ;;  %854 = vst [vmem:[%s1435_s29 + $0xa8] sm:$0xff] %v822_v48  ;;  %v808_v55 = vadd.f32 %v776_v44, %v707_v49  ;;  %v824_v56 = vadd.f32 %v792_v46, %v747_v50  ;;  %v799_v40 = vld [vmem:[%s1420_s28 + $0xf0] sm:$0xff]  ;;  %v784_v46 = vld [vmem:[%s1420_s28 + $0x78] sm:$0xff] }
 0x129   : > { %839 = vst [vmem:[%s1435_s29 + $0x30] sm:$0xff] %v807_v51  ;;  %855 = vst [vmem:[%s1435_s29 + $0xb0] sm:$0xff] %v823_v52  ;;  %v800_v48 = vld [vmem:[%s1420_s28 + $0xf8] sm:$0xff] }
 0x12a   : > { %840 = vst [vmem:[%s1435_s29 + $0x38] sm:$0xff] %v808_v55  ;;  %856 = vst [vmem:[%s1435_s29 + $0xb8] sm:$0xff] %v824_v56  ;;  %v710_v57 = vpop.f32.mrb[8].mxu0  ;;  %v750_v59 = vpop.f32.mrb[8].mxu1 }
 0x12b   : > { %v711_v61 = vadd.f32 %v710_v57, %v1422_v53  ;;  %v751_v62 = vadd.f32 %v750_v59, %v1422_v53  ;;  %v712_v63 = vpop.f32.mrb[9].mxu0  ;;  %v752_v1 = vpop.f32.mrb[9].mxu1 }
 0x12c   : > { %v713_v3 = vadd.f32 %v712_v63, %v1424_v54  ;;  %v753_v4 = vadd.f32 %v752_v1, %v1424_v54  ;;  %v714_v5 = vpop.f32.mrb[10].mxu0  ;;  %v754_v7 = vpop.f32.mrb[10].mxu1 }
 0x12d   : > { %v809_v9 = vadd.f32 %v777_v58, %v711_v61  ;;  %v825_v10 = vadd.f32 %v793_v60, %v751_v62  ;;  %v715_v11 = vadd.f32 %v714_v5, %v1422_v53  ;;  %v755_v12 = vadd.f32 %v754_v7, %v1422_v53  ;;  %v716_v13 = vpop.f32.mrb[11].mxu0  ;;  %v756_v15 = vpop.f32.mrb[11].mxu1 }
 0x12e   : > { %v810_v17 = vadd.f32 %v778_v0, %v713_v3  ;;  %v826_v18 = vadd.f32 %v794_v2, %v753_v4  ;;  %v717_v19 = vadd.f32 %v716_v13, %v1424_v54  ;;  %v757_v20 = vadd.f32 %v756_v15, %v1424_v54 }
 0x12f   : > { %841 = vst [vmem:[%s1435_s29 + $0x40] sm:$0xff] %v809_v9  ;;  %857 = vst [vmem:[%s1435_s29 + $0xc0] sm:$0xff] %v825_v10  ;;  %v811_v21 = vadd.f32 %v779_v6, %v715_v11  ;;  %v827_v22 = vadd.f32 %v795_v8, %v755_v12 }
 0x130   : > { %842 = vst [vmem:[%s1435_s29 + $0x48] sm:$0xff] %v810_v17  ;;  %858 = vst [vmem:[%s1435_s29 + $0xc8] sm:$0xff] %v826_v18  ;;  %v812_v23 = vadd.f32 %v780_v14, %v717_v19  ;;  %v828_v24 = vadd.f32 %v796_v16, %v757_v20 }
 0x131   : > { %843 = vst [vmem:[%s1435_s29 + $0x50] sm:$0xff] %v811_v21  ;;  %859 = vst [vmem:[%s1435_s29 + $0xd0] sm:$0xff] %v827_v22 }
 0x132   : > { %844 = vst [vmem:[%s1435_s29 + $0x58] sm:$0xff] %v812_v23  ;;  %860 = vst [vmem:[%s1435_s29 + $0xd8] sm:$0xff] %v828_v24  ;;  %v720_v25 = vpop.f32.mrb[12].mxu0  ;;  %v760_v27 = vpop.f32.mrb[12].mxu1 }
 0x133   : > { %v721_v29 = vadd.f32 %v720_v25, %v1422_v53  ;;  %v761_v30 = vadd.f32 %v760_v27, %v1422_v53  ;;  %v722_v31 = vpop.f32.mrb[13].mxu0  ;;  %v762_v33 = vpop.f32.mrb[13].mxu1 }
 0x134   : > { %v723_v35 = vadd.f32 %v722_v31, %v1424_v54  ;;  %v763_v36 = vadd.f32 %v762_v33, %v1424_v54  ;;  %v724_v37 = vpop.f32.mrb[14].mxu0  ;;  %v764_v39 = vpop.f32.mrb[14].mxu1 }
 0x135   : > { %v813_v41 = vadd.f32 %v781_v26, %v721_v29  ;;  %v829_v42 = vadd.f32 %v797_v28, %v761_v30  ;;  %v725_v43 = vadd.f32 %v724_v37, %v1422_v53  ;;  %v765_v44 = vadd.f32 %v764_v39, %v1422_v53  ;;  %v726_v45 = vpop.f32.mrb[15].mxu0  ;;  %v766_v47 = vpop.f32.mrb[15].mxu1 }
 0x136   : > { %v814_v49 = vadd.f32 %v782_v32, %v723_v35  ;;  %v830_v50 = vadd.f32 %v798_v34, %v763_v36  ;;  %v727_v51 = vadd.f32 %v726_v45, %v1424_v54  ;;  %v767_v52 = vadd.f32 %v766_v47, %v1424_v54 }
 0x137   : > { %845 = vst [vmem:[%s1435_s29 + $0x60] sm:$0xff] %v813_v41  ;;  %861 = vst [vmem:[%s1435_s29 + $0xe0] sm:$0xff] %v829_v42  ;;  %v815_v55 = vadd.f32 %v783_v38, %v725_v43  ;;  %v831_v56 = vadd.f32 %v799_v40, %v765_v44 }
 0x138   : > { %846 = vst [vmem:[%s1435_s29 + $0x68] sm:$0xff] %v814_v49  ;;  %862 = vst [vmem:[%s1435_s29 + $0xe8] sm:$0xff] %v830_v50  ;;  %v816_v53 = vadd.f32 %v784_v46, %v727_v51  ;;  %v832_v57 = vadd.f32 %v800_v48, %v767_v52 }
 0x139   : > { %847 = vst [vmem:[%s1435_s29 + $0x70] sm:$0xff] %v815_v55  ;;  %863 = vst [vmem:[%s1435_s29 + $0xf0] sm:$0xff] %v831_v56 }
 0x13a   : > { %848 = vst [vmem:[%s1435_s29 + $0x78] sm:$0xff] %v816_v53  ;;  %864 = vst [vmem:[%s1435_s29 + $0xf8] sm:$0xff] %v832_v57 }
 0x13b PF: > { %s14_s17 = sadd.s32 1, %s1244_s17   ;;  %s1541_s15 = smov %s1240_s16 }
 0x13c   : > { %p11_p5 = scmp.ge.s32.totalorder %s14_s17, 4   ;;  %s1542_s16 = smov %s1544_s18 }
 0x13e   :  { %13 = sbr.rel (!%p11_p5) target bundleno = 2 (0x2), region = 75 }

// kernel: monai_decoder_only_forward.11
= control target key start
LH: loop header
LB: loop body
LE: loop exit
PB: predicated region body
PF: predicated region fallthrough
CT: control target
= control target key end

     0   :  { %s2617_s0 = inlined_call_operand.vmem [shape: f32[2,128,256], index: 0, kind: input, shape index: {}]   ;;  %s2618_s1 = inlined_call_operand.vmem [shape: f32[1,256], index: 1, kind: input, shape index: {}]   ;;  %s2619_s2 = inlined_call_operand.vmem [shape: f32[1,256], index: 2, kind: input, shape index: {}]   ;;  %s2620_s3 = inlined_call_operand.vmem [shape: bf16[256,768], index: 3, kind: input, shape index: {}]   ;;  %s2621_s4 = inlined_call_operand.vmem [shape: f32[1,768], index: 4, kind: input, shape index: {}]   ;;  %s2622_s5 = inlined_call_operand.vmem [shape: bf16[2,128,768], index: 5, kind: output, shape index: {}]  }
   0x1   :  { %2623 = sst [smem:[#allocation5_spill]] %s2620_s3 }
   0x2   :  { %s1905_s18 = smov 0   ;;  %s1907_s19 = smov 0  }
   0x3   :  { %s1909_s20 = smov 0   ;;  %s1911_s21 = smov 0  }
   0x4   :  { %s1913_s22 = smov 0   ;;  %s1915_s23 = smov 0  }
   0x5   :  { %s1917_s24 = smov 0   ;;  %s1919_s25 = smov 0  }
   0x6   :  { %s1921_s26 = smov 0  }
   0x7 LB: > { %s1533_s27 = sadd.s32 4294967295, %s1873_s26   ;;  %s27_s28 = sadd.s32 1, %s1865_s24  ;;  %s1873_s26 = sphi %s1921_s26, %s15_s26   ;;  %s1869_s25 = sphi %s1919_s25, %s2633_s25   ;;  %s1865_s24 = sphi %s1917_s24, %s2632_s24   ;;  %s1861_s23 = sphi %s1915_s23, %s2631_s23   ;;  %s1857_s22 = sphi %s1913_s22, %s2630_s22   ;;  %s1853_s21 = sphi %s1911_s21, %s2629_s21   ;;  %s1849_s20 = sphi %s1909_s20, %s2628_s20   ;;  %s1845_s19 = sphi %s1907_s19, %s2627_s19   ;;  %s1841_s18 = sphi %s1905_s18, %s2626_s18  }
   0x8   : > { %p28_p0 = scmp.ge.s32.totalorder %s27_s28, 3  ;;  %s34_s29 = sadd.s32 1, %s1869_s25 }
   0x9   : > { %s111_s30 = sadd.s32 1, %s1853_s21  ;;  %p118_p1 = scmp.ne.s32.totalorder %s1853_s21, %s1849_s20 }
   0xa   : > { %s2635_s28 = smov (%p28_p0, %s27_s28), 0  ;;  %s2637_s29 = smov (!%p28_p0, %s34_s29), %s1869_s25 }
   0xb   : > { %s108_s6 = ssub.s32 %s1865_s24, %s2635_s28  ;;  %p119_p2 = scmp.eq.s32.totalorder %s1873_s26, 0 }
   0xc   : > { %p36_p3 = scmp.ge.s32.totalorder %s2637_s29, 2  ;;  %p109_p4 = scmp.eq.s32.totalorder %s108_s6, 0 }
   0xd   : > { %p120_p5 = por %p119_p2, %p118_p1  ;;  %s167_s7 = sadd.s32 1, %s1845_s19 }
   0xe   : > { %s2639_s29 = smov (%p36_p3, %s2637_s29), 0  ;;  %p177_p6 = scmp.ne.s32.totalorder %s1845_s19, %s1841_s18 }
   0xf   : > { %s1966_s8 = scalar_select %p109_p4, %s1853_s21, %s111_s30  }
  0x10   : > { %s160_s9 = ssub.s32 %s1869_s25, %s2639_s29  ;;  %p178_p7 = scmp.eq.s32.totalorder %s1533_s27, 5 }
  0x11   : > { %s164_s10 = sor.u32 %s160_s9, %s108_s6  ;;  %p1536_p10 = scmp.ge.s32.totalorder %s1873_s26, 6 }
  0x12   : > { %p165_p8 = scmp.eq.s32.totalorder %s164_s10, 0  ;;  %p1972_p9 = por %p178_p7, %p177_p6 }
  0x13   : > { %206 = sbr.rel (%p1536_p10) target bundleno = 52 (0x34), region = 24 }
  0x14   : > { %s1977_s12 = scalar_select %p165_p8, %s1845_s19, %s167_s7  }
  0x1a   : > { %223 = sbr.rel (!%p120_p5) target bundleno = 52 (0x34), region = 32  ;;  %s225_s13 = sand.u32 (%p120_p5), 1, %s1853_s21  }
  0x1b   : > { %s1600_s14 = sshll.u32 (%p120_p5), %s1865_s24, 3  ;;  %s1537_s15 = sshll.u32 (%p120_p5), %s225_s13, 8 }
  0x1c   : > { %s2625_s3 = sld [smem:[#allocation5_spill]] (%p120_p5)  ;;  %s1990_s30 = scalar_lea.vmem (%p120_p5), [#allocation3], %s1537_s15 }
  0x22   : > { %s1985_s27 = scalar_lea.vmem %s2625_s3, %s1600_s14 }
  0x23   : > { %v320_v0 = vld [vmem:[%s1985_s27] sm:$0xff]  ;;  %v322_v1 = vld [vmem:[%s1985_s27 + $0x18] sm:$0xff]  ;;  %v324_v2 = vld [vmem:[%s1985_s27 + $0x30] sm:$0xff] }
  0x24   : > { %321 = vst [vmem:[%s1990_s30] sm:$0xff] %v320_v0  ;;  %323 = vst [vmem:[%s1990_s30 + $0x8] sm:$0xff] %v322_v1  ;;  %v326_v3 = vld [vmem:[%s1985_s27 + $0x48] sm:$0xff]  ;;  %v328_v4 = vld [vmem:[%s1985_s27 + $0x60] sm:$0xff] }
  0x25   : > { %325 = vst [vmem:[%s1990_s30 + $0x10] sm:$0xff] %v324_v2  ;;  %v330_v5 = vld [vmem:[%s1985_s27 + $0x78] sm:$0xff]  ;;  %327 = vst [vmem:[%s1990_s30 + $0x18] sm:$0xff] %v326_v3  ;;  %v332_v6 = vld [vmem:[%s1985_s27 + $0x90] sm:$0xff] }
  0x26   : > { %329 = vst [vmem:[%s1990_s30 + $0x20] sm:$0xff] %v328_v4  ;;  %331 = vst [vmem:[%s1990_s30 + $0x28] sm:$0xff] %v330_v5  ;;  %v334_v7 = vld [vmem:[%s1985_s27 + $0xa8] sm:$0xff]  ;;  %v336_v8 = vld [vmem:[%s1985_s27 + $0xc0] sm:$0xff] }
  0x27   : > { %333 = vst [vmem:[%s1990_s30 + $0x30] sm:$0xff] %v332_v6  ;;  %335 = vst [vmem:[%s1990_s30 + $0x38] sm:$0xff] %v334_v7  ;;  %v338_v9 = vld [vmem:[%s1985_s27 + $0xd8] sm:$0xff]  ;;  %v340_v10 = vld [vmem:[%s1985_s27 + $0xf0] sm:$0xff] }
  0x28   : > { %337 = vst [vmem:[%s1990_s30 + $0x40] sm:$0xff] %v336_v8  ;;  %v342_v11 = vld [vmem:[%s1985_s27 + $0x108] sm:$0xff]  ;;  %339 = vst [vmem:[%s1990_s30 + $0x48] sm:$0xff] %v338_v9  ;;  %v344_v12 = vld [vmem:[%s1985_s27 + $0x120] sm:$0xff] }
  0x29   : > { %341 = vst [vmem:[%s1990_s30 + $0x50] sm:$0xff] %v340_v10  ;;  %343 = vst [vmem:[%s1990_s30 + $0x58] sm:$0xff] %v342_v11  ;;  %v346_v13 = vld [vmem:[%s1985_s27 + $0x138] sm:$0xff]  ;;  %v348_v14 = vld [vmem:[%s1985_s27 + $0x150] sm:$0xff] }
  0x2a   : > { %345 = vst [vmem:[%s1990_s30 + $0x60] sm:$0xff] %v344_v12  ;;  %347 = vst [vmem:[%s1990_s30 + $0x68] sm:$0xff] %v346_v13  ;;  %v350_v15 = vld [vmem:[%s1985_s27 + $0x168] sm:$0xff]  ;;  %v352_v16 = vld [vmem:[%s1985_s27 + $0x180] sm:$0xff] }
  0x2b   : > { %349 = vst [vmem:[%s1990_s30 + $0x70] sm:$0xff] %v348_v14  ;;  %v354_v17 = vld [vmem:[%s1985_s27 + $0x198] sm:$0xff]  ;;  %351 = vst [vmem:[%s1990_s30 + $0x78] sm:$0xff] %v350_v15  ;;  %v356_v18 = vld [vmem:[%s1985_s27 + $0x1b0] sm:$0xff] }
  0x2c   : > { %353 = vst [vmem:[%s1990_s30 + $0x80] sm:$0xff] %v352_v16  ;;  %355 = vst [vmem:[%s1990_s30 + $0x88] sm:$0xff] %v354_v17  ;;  %v358_v19 = vld [vmem:[%s1985_s27 + $0x1c8] sm:$0xff]  ;;  %v360_v20 = vld [vmem:[%s1985_s27 + $0x1e0] sm:$0xff] }
  0x2d   : > { %357 = vst [vmem:[%s1990_s30 + $0x90] sm:$0xff] %v356_v18  ;;  %359 = vst [vmem:[%s1990_s30 + $0x98] sm:$0xff] %v358_v19  ;;  %v362_v21 = vld [vmem:[%s1985_s27 + $0x1f8] sm:$0xff]  ;;  %v364_v22 = vld [vmem:[%s1985_s27 + $0x210] sm:$0xff] }
  0x2e   : > { %361 = vst [vmem:[%s1990_s30 + $0xa0] sm:$0xff] %v360_v20  ;;  %v366_v23 = vld [vmem:[%s1985_s27 + $0x228] sm:$0xff]  ;;  %363 = vst [vmem:[%s1990_s30 + $0xa8] sm:$0xff] %v362_v21  ;;  %v368_v24 = vld [vmem:[%s1985_s27 + $0x240] sm:$0xff] }
  0x2f   : > { %365 = vst [vmem:[%s1990_s30 + $0xb0] sm:$0xff] %v364_v22  ;;  %367 = vst [vmem:[%s1990_s30 + $0xb8] sm:$0xff] %v366_v23  ;;  %v370_v25 = vld [vmem:[%s1985_s27 + $0x258] sm:$0xff]  ;;  %v372_v26 = vld [vmem:[%s1985_s27 + $0x270] sm:$0xff] }
  0x30   : > { %369 = vst [vmem:[%s1990_s30 + $0xc0] sm:$0xff] %v368_v24  ;;  %371 = vst [vmem:[%s1990_s30 + $0xc8] sm:$0xff] %v370_v25  ;;  %v374_v27 = vld [vmem:[%s1985_s27 + $0x288] sm:$0xff]  ;;  %v376_v28 = vld [vmem:[%s1985_s27 + $0x2a0] sm:$0xff] }
  0x31   : > { %373 = vst [vmem:[%s1990_s30 + $0xd0] sm:$0xff] %v372_v26  ;;  %v378_v29 = vld [vmem:[%s1985_s27 + $0x2b8] sm:$0xff]  ;;  %375 = vst [vmem:[%s1990_s30 + $0xd8] sm:$0xff] %v374_v27  ;;  %v380_v30 = vld [vmem:[%s1985_s27 + $0x2d0] sm:$0xff] }
  0x32   : > { %377 = vst [vmem:[%s1990_s30 + $0xe0] sm:$0xff] %v376_v28  ;;  %379 = vst [vmem:[%s1990_s30 + $0xe8] sm:$0xff] %v378_v29  ;;  %v382_v31 = vld [vmem:[%s1985_s27 + $0x2e8] sm:$0xff] }
  0x33   : > { %381 = vst [vmem:[%s1990_s30 + $0xf0] sm:$0xff] %v380_v30  ;;  %383 = vst [vmem:[%s1990_s30 + $0xf8] sm:$0xff] %v382_v31 }
  0x34 PF: > { %p1540_p11 = scmp.ge.s32.totalorder %s1873_s26, 1  ;;  %p396_p12 = scmp.lt.s32.totalorder %s1873_s26, 7 }
  0x36   : > { %p397_p13 = pnand %p1540_p11, %p396_p12 }
  0x37   : > { %s403_s6 = sand.u32 (!%p397_p13), 1, %s1849_s20   ;;  %s440_s7 = sand.u32 (!%p397_p13), 1, %s1841_s18  }
  0x38   : > { %400 = sbr.rel (%p397_p13) target bundleno = 742 (0x2e6), region = 74  ;;  %s1541_s9 = sshll.u32 (!%p397_p13), %s403_s6, 8 }
  0x39   : > { %s1542_s10 = sshll.u32 (!%p397_p13), %s440_s7, 7  ;;  %p444_p0 = scmp.lt.s32.totalorder (!%p397_p13), %s1861_s23, 1 }
  0x3a   : > { %s2059_s13 = sshll.u32 (!%p397_p13), %s1857_s22, 1  ;;  %s2075_s7 = scalar_lea.vmem (!%p397_p13), [#allocation3], %s1541_s9 }
  0x3b   : > { %p456_p1 = scmp.lt.s32.totalorder (!%p397_p13), %s2059_s13, 5  ;;  %s2077_s3 = scalar_lea.vmem (!%p397_p13), [#allocation4], %s1542_s10 }
  0x3c   : > { %p1546_p2 = scmp.ne.s32.totalorder (!%p397_p13), %s1857_s22, 0 }
  0x3f   : > { %s445_s14 = scalar_select %p444_p0, %s1861_s23, 1 }
  0x40   : > { %s2064_s15 = scalar_select %p456_p1, %s2059_s13, 5 }
  0x41   : > { %s1601_s16 = sshll.u32 %s445_s14, 8  ;;  %465 = sbr.rel (%p1546_p2) target bundleno = 424 (0x1a8), region = 82 }
  0x42   : > { %s2069_s30 = scalar_lea.vmem %s2617_s0, %s1601_s16  ;;  %s458_s6 = scalar_lea.vmem %s2621_s4, %s2064_s15 }
  0x43   : > { %v2081_v32 = vld [vmem:[%s2069_s30] sm:$0xff] (!%p1546_p2)  ;;  %v2084_v33 = vld [vmem:[%s2069_s30 + $0x8] sm:$0xff] (!%p1546_p2)  ;;  %v2095_v37 = vld [vmem:[%s2069_s30 + $0x10] sm:$0xff] (!%p1546_p2) }
  0x44   : > { %v2087_v34 = vld [vmem:[%s2069_s30 + $0x20] sm:$0xff] (!%p1546_p2)  ;;  %v500_v35 = vadd.f32 (!%p1546_p2), %v2084_v33, %v2081_v32  ;;  %v2092_v36 = vld [vmem:[%s2069_s30 + $0x28] sm:$0xff] (!%p1546_p2)  ;;  %v2098_v38 = vld [vmem:[%s2069_s30 + $0x18] sm:$0xff] (!%p1546_p2) }
  0x45   : > { %v506_v39 = vadd.f32 (!%p1546_p2), %v2092_v36, %v2087_v34  ;;  %v2103_v40 = vld [vmem:[%s2069_s30 + $0x30] sm:$0xff] (!%p1546_p2)  ;;  %v2106_v41 = vld [vmem:[%s2069_s30 + $0x38] sm:$0xff] (!%p1546_p2)  ;;  %v503_v42 = vadd.f32 (!%p1546_p2), %v2098_v38, %v2095_v37  ;;  %v2113_v44 = vld [vmem:[%s2069_s30 + $0x40] sm:$0xff] (!%p1546_p2) }
  0x46   : > { %501 = vadd.xlane.f32.xlu0 (!%p1546_p2), %v500_v35  ;;  %v509_v43 = vadd.f32 (!%p1546_p2), %v2106_v41, %v2103_v40  ;;  %v2116_v45 = vld [vmem:[%s2069_s30 + $0x48] sm:$0xff] (!%p1546_p2)  ;;  %v2119_v46 = vld [vmem:[%s2069_s30 + $0x50] sm:$0xff] (!%p1546_p2)  ;;  %v2122_v47 = vld [vmem:[%s2069_s30 + $0x58] sm:$0xff] (!%p1546_p2) }
  0x47   : > { %507 = vadd.xlane.f32.xlu1 (!%p1546_p2), %v506_v39  ;;  %v512_v48 = vadd.f32 (!%p1546_p2), %v2116_v45, %v2113_v44  ;;  %v515_v49 = vadd.f32 (!%p1546_p2), %v2122_v47, %v2119_v46  ;;  %v2129_v50 = vld [vmem:[%s2069_s30 + $0x60] sm:$0xff] (!%p1546_p2)  ;;  %v2132_v51 = vld [vmem:[%s2069_s30 + $0x68] sm:$0xff] (!%p1546_p2)  ;;  %v2135_v52 = vld [vmem:[%s2069_s30 + $0x70] sm:$0xff] (!%p1546_p2) }
  0x48   : > { %v2138_v53 = vld [vmem:[%s2069_s30 + $0x78] sm:$0xff]  ;;  %v518_v54 = vadd.f32 %v2132_v51, %v2129_v50  ;;  %v2145_v56 = vld [vmem:[%s2069_s30 + $0x80] sm:$0xff]  ;;  %v2148_v57 = vld [vmem:[%s2069_s30 + $0x88] sm:$0xff] }
  0x49   : > { %v521_v55 = vadd.f32 %v2138_v53, %v2135_v52  ;;  %v2151_v58 = vld [vmem:[%s2069_s30 + $0x90] sm:$0xff]  ;;  %v2154_v59 = vld [vmem:[%s2069_s30 + $0x98] sm:$0xff]  ;;  %v524_v60 = vadd.f32 %v2148_v57, %v2145_v56  ;;  %v2161_v62 = vld [vmem:[%s2069_s30 + $0xa0] sm:$0xff] }
  0x4a   : > { %504 = vadd.xlane.f32.xlu0 %v503_v42  ;;  %v527_v61 = vadd.f32 %v2154_v59, %v2151_v58  ;;  %v2164_v63 = vld [vmem:[%s2069_s30 + $0xa8] sm:$0xff]  ;;  %v2167_v0 = vld [vmem:[%s2069_s30 + $0xb0] sm:$0xff]  ;;  %v2170_v1 = vld [vmem:[%s2069_s30 + $0xb8] sm:$0xff] }
  0x4b   : > { %510 = vadd.xlane.f32.xlu1 %v509_v43  ;;  %v530_v2 = vadd.f32 %v2164_v63, %v2161_v62  ;;  %v533_v3 = vadd.f32 %v2170_v1, %v2167_v0  ;;  %v2177_v4 = vld [vmem:[%s2069_s30 + $0xc0] sm:$0xff]  ;;  %v2180_v5 = vld [vmem:[%s2069_s30 + $0xc8] sm:$0xff]  ;;  %v2183_v6 = vld [vmem:[%s2069_s30 + $0xd0] sm:$0xff] }
  0x4c   : > { %v2186_v7 = vld [vmem:[%s2069_s30 + $0xd8] sm:$0xff]  ;;  %v536_v8 = vadd.f32 %v2180_v5, %v2177_v4  ;;  %v2193_v10 = vld [vmem:[%s2069_s30 + $0xe0] sm:$0xff]  ;;  %v2196_v11 = vld [vmem:[%s2069_s30 + $0xe8] sm:$0xff] }
  0x4d   : > { %v539_v9 = vadd.f32 %v2186_v7, %v2183_v6  ;;  %v2199_v12 = vld [vmem:[%s2069_s30 + $0xf0] sm:$0xff]  ;;  %v2202_v13 = vld [vmem:[%s2069_s30 + $0xf8] sm:$0xff]  ;;  %v542_v14 = vadd.f32 %v2196_v11, %v2193_v10 }
  0x4e   : > { %513 = vadd.xlane.f32.xlu0 %v512_v48  ;;  %v545_v15 = vadd.f32 %v2202_v13, %v2199_v12 }
  0x4f   : > { %516 = vadd.xlane.f32.xlu1 %v515_v49 }
  0x52   : > { %519 = vadd.xlane.f32.xlu0 %v518_v54 }
  0x53   : > { %522 = vadd.xlane.f32.xlu1 %v521_v55 }
  0x56   : > { %525 = vadd.xlane.f32.xlu0 %v524_v60 }
  0x57   : > { %528 = vadd.xlane.f32.xlu1 %v527_v61 }
  0x5a   : > { %531 = vadd.xlane.f32.xlu0 %v530_v2 }
  0x5b   : > { %534 = vadd.xlane.f32.xlu1 %v533_v3 }
  0x5e   : > { %537 = vadd.xlane.f32.xlu0 %v536_v8 }
  0x5f   : > { %540 = vadd.xlane.f32.xlu1 %v539_v9 }
  0x62   : > { %543 = vadd.xlane.f32.xlu0 %v542_v14 }
  0x63   : > { %546 = vadd.xlane.f32.xlu1 %v545_v15 }
  0xd3   : > { %v502_v16 = vpop.xlane.xlu0 %501 }
  0xd4   : > { %v549_v17 = vmul.f32 0.00390625, %v502_v16  ;;  %v508_v18 = vpop.xlane.xlu1 %507 }
  0xd5   : > { %v551_v19 = vmul.f32 0.00390625, %v508_v18 }
  0xd6   : > { %v2209_v20 = vsub.f32 %v2081_v32, %v549_v17  ;;  %v2212_v21 = vsub.f32 %v2084_v33, %v549_v17 }
  0xd7   : > { %v2215_v22 = vsub.f32 %v2087_v34, %v551_v19  ;;  %v2218_v23 = vsub.f32 %v2092_v36, %v551_v19  ;;  %v505_v24 = vpop.xlane.xlu0 %504 }
  0xd8   : > { %v550_v25 = vmul.f32 0.00390625, %v505_v24  ;;  %v511_v26 = vpop.xlane.xlu1 %510  ;;  %v597_v27 = vmul.f32 %v2209_v20, %v2209_v20  ;;  %v598_v28 = vmul.f32 %v2212_v21, %v2212_v21 }
  0xd9   : > { %v552_v29 = vmul.f32 0.00390625, %v511_v26  ;;  %v601_v30 = vmul.f32 %v2215_v22, %v2215_v22  ;;  %v602_v31 = vmul.f32 %v2218_v23, %v2218_v23 }
  0xda   : > { %v2229_v32 = vsub.f32 %v2095_v37, %v550_v25  ;;  %v2232_v33 = vsub.f32 %v2098_v38, %v550_v25  ;;  %v629_v34 = vadd.f32 %v598_v28, %v597_v27 }
  0xdb   : > { %v2235_v35 = vsub.f32 %v2103_v40, %v552_v29  ;;  %v2238_v36 = vsub.f32 %v2106_v41, %v552_v29  ;;  %v514_v39 = vpop.xlane.xlu0 %513  ;;  %v635_v48 = vadd.f32 %v602_v31, %v601_v30 }
  0xdc   : > { %v553_v42 = vmul.f32 0.00390625, %v514_v39  ;;  %630 = vadd.xlane.f32.xlu0 %v629_v34  ;;  %v517_v43 = vpop.xlane.xlu1 %516  ;;  %v599_v49 = vmul.f32 %v2229_v32, %v2229_v32  ;;  %v600_v37 = vmul.f32 %v2232_v33, %v2232_v33 }
  0xdd   : > { %v554_v38 = vmul.f32 0.00390625, %v517_v43  ;;  %v603_v54 = vmul.f32 %v2235_v35, %v2235_v35  ;;  %v604_v40 = vmul.f32 %v2238_v36, %v2238_v36 }
  0xde   : > { %v2249_v41 = vsub.f32 %v2113_v44, %v553_v42  ;;  %v2252_v55 = vsub.f32 %v2116_v45, %v553_v42  ;;  %v632_v60 = vadd.f32 %v600_v37, %v599_v49 }
  0xdf   : > { %v2255_v61 = vsub.f32 %v2119_v46, %v554_v38  ;;  %v2258_v2 = vsub.f32 %v2122_v47, %v554_v38  ;;  %v520_v3 = vpop.xlane.xlu0 %519  ;;  %v638_v14 = vadd.f32 %v604_v40, %v603_v54 }
  0xe0   : > { %v555_v8 = vmul.f32 0.00390625, %v520_v3  ;;  %636 = vadd.xlane.f32.xlu0 %v635_v48  ;;  %633 = vadd.xlane.f32.xlu1 %v632_v60  ;;  %v523_v9 = vpop.xlane.xlu1 %522  ;;  %v605_v44 = vmul.f32 %v2249_v41, %v2249_v41  ;;  %v606_v45 = vmul.f32 %v2252_v55, %v2252_v55 }
  0xe1   : > { %v556_v15 = vmul.f32 0.00390625, %v523_v9  ;;  %v607_v46 = vmul.f32 %v2255_v61, %v2255_v61  ;;  %v608_v47 = vmul.f32 %v2258_v2, %v2258_v2 }
  0xe2   : > { %v2269_v16 = vsub.f32 %v2129_v50, %v555_v8  ;;  %v2272_v17 = vsub.f32 %v2132_v51, %v555_v8  ;;  %v641_v18 = vadd.f32 %v606_v45, %v605_v44 }
  0xe3   : > { %v2275_v19 = vsub.f32 %v2135_v52, %v556_v15  ;;  %v2278_v24 = vsub.f32 %v2138_v53, %v556_v15  ;;  %v526_v25 = vpop.xlane.xlu0 %525  ;;  %v644_v28 = vadd.f32 %v608_v47, %v607_v46 }
  0xe4   : > { %v557_v26 = vmul.f32 0.00390625, %v526_v25  ;;  %639 = vadd.xlane.f32.xlu1 %v638_v14  ;;  %642 = vadd.xlane.f32.xlu0 %v641_v18  ;;  %v529_v27 = vpop.xlane.xlu1 %528  ;;  %v609_v50 = vmul.f32 %v2269_v16, %v2269_v16  ;;  %v610_v51 = vmul.f32 %v2272_v17, %v2272_v17 }
  0xe5   : > { %v558_v29 = vmul.f32 0.00390625, %v529_v27  ;;  %v611_v52 = vmul.f32 %v2275_v19, %v2275_v19  ;;  %v612_v53 = vmul.f32 %v2278_v24, %v2278_v24 }
  0xe6   : > { %v2289_v30 = vsub.f32 %v2145_v56, %v557_v26  ;;  %v2292_v31 = vsub.f32 %v2148_v57, %v557_v26  ;;  %v647_v34 = vadd.f32 %v610_v51, %v609_v50 }
  0xe7   : > { %v2295_v39 = vsub.f32 %v2151_v58, %v558_v29  ;;  %v2298_v42 = vsub.f32 %v2154_v59, %v558_v29  ;;  %v532_v43 = vpop.xlane.xlu0 %531  ;;  %v650_v37 = vadd.f32 %v612_v53, %v611_v52 }
  0xe8   : > { %v559_v48 = vmul.f32 0.00390625, %v532_v43  ;;  %645 = vadd.xlane.f32.xlu1 %v644_v28  ;;  %648 = vadd.xlane.f32.xlu0 %v647_v34  ;;  %v535_v49 = vpop.xlane.xlu1 %534  ;;  %v613_v56 = vmul.f32 %v2289_v30, %v2289_v30  ;;  %v614_v57 = vmul.f32 %v2292_v31, %v2292_v31 }
  0xe9   : > { %v560_v38 = vmul.f32 0.00390625, %v535_v49  ;;  %v615_v58 = vmul.f32 %v2295_v39, %v2295_v39  ;;  %v616_v59 = vmul.f32 %v2298_v42, %v2298_v42 }
  0xea   : > { %v2309_v54 = vsub.f32 %v2161_v62, %v559_v48  ;;  %v2312_v40 = vsub.f32 %v2164_v63, %v559_v48  ;;  %v653_v60 = vadd.f32 %v614_v57, %v613_v56 }
  0xeb   : > { %v2315_v3 = vsub.f32 %v2167_v0, %v560_v38  ;;  %v2318_v8 = vsub.f32 %v2170_v1, %v560_v38  ;;  %v538_v9 = vpop.xlane.xlu0 %537  ;;  %v656_v45 = vadd.f32 %v616_v59, %v615_v58  ;;  %v758_v58 = vlaneseq }
  0xec   : > { %v561_v14 = vmul.f32 0.00390625, %v538_v9  ;;  %651 = vadd.xlane.f32.xlu1 %v650_v37  ;;  %654 = vadd.xlane.f32.xlu0 %v653_v60  ;;  %v541_v44 = vpop.xlane.xlu1 %540  ;;  %v617_v62 = vmul.f32 %v2309_v54, %v2309_v54  ;;  %v618_v63 = vmul.f32 %v2312_v40, %v2312_v40 }
  0xed   : > { %v562_v15 = vmul.f32 0.00390625, %v541_v44  ;;  %v619_v0 = vmul.f32 %v2315_v3, %v2315_v3  ;;  %v620_v1 = vmul.f32 %v2318_v8, %v2318_v8 }
  0xee   : > { %v2329_v46 = vsub.f32 %v2177_v4, %v561_v14  ;;  %v2332_v47 = vsub.f32 %v2180_v5, %v561_v14  ;;  %v659_v18 = vadd.f32 %v618_v63, %v617_v62 }
  0xef   : > { %v2335_v25 = vsub.f32 %v2183_v6, %v562_v15  ;;  %v2338_v26 = vsub.f32 %v2186_v7, %v562_v15  ;;  %v544_v27 = vpop.xlane.xlu0 %543  ;;  %v662_v51 = vadd.f32 %v620_v1, %v619_v0 }
  0xf0   : > { %v563_v28 = vmul.f32 0.00390625, %v544_v27  ;;  %657 = vadd.xlane.f32.xlu1 %v656_v45  ;;  %660 = vadd.xlane.f32.xlu0 %v659_v18  ;;  %v547_v50 = vpop.xlane.xlu1 %546  ;;  %v621_v4 = vmul.f32 %v2329_v46, %v2329_v46  ;;  %v622_v5 = vmul.f32 %v2332_v47, %v2332_v47  ;;  %v759_v45 = vshrl.u32 %v758_v58, 7 }
  0xf1   : > { %v564_v29 = vmul.f32 0.00390625, %v547_v50  ;;  %v623_v6 = vmul.f32 %v2335_v25, %v2335_v25  ;;  %v624_v7 = vmul.f32 %v2338_v26, %v2338_v26  ;;  %v498_v50 = vld [vmem:[%s2618_s1] sm:$0x3] }
  0xf2   : > { %v2349_v52 = vsub.f32 %v2193_v10, %v563_v28  ;;  %v2352_v53 = vsub.f32 %v2196_v11, %v563_v28  ;;  %v665_v34 = vadd.f32 %v622_v5, %v621_v4  ;;  %v760_v27 = vsub.s32 0, %v759_v45 }
  0xf3   : > { %v2355_v43 = vsub.f32 %v2199_v12, %v564_v29  ;;  %v2358_v48 = vsub.f32 %v2202_v13, %v564_v29  ;;  %v668_v49 = vadd.f32 %v624_v7, %v623_v6  ;;  %v764_v28 = vsub.s32 1, %v759_v45  ;;  %v499_v6 = vld [vmem:[%s2619_s2] sm:$0x3] }
  0xf4   : > { %663 = vadd.xlane.f32.xlu1 %v662_v51  ;;  %666 = vadd.xlane.f32.xlu0 %v665_v34  ;;  %v625_v37 = vmul.f32 %v2349_v52, %v2349_v52  ;;  %v626_v10 = vmul.f32 %v2352_v53, %v2352_v53 }
  0xf5   : > { %v627_v11 = vmul.f32 %v2355_v43, %v2355_v43  ;;  %v628_v56 = vmul.f32 %v2358_v48, %v2358_v48 }
  0xf6   : > { %v671_v12 = vadd.f32 %v626_v10, %v625_v37  ;;  %v2376_v37 = vrot.slane %v498_v50, %v764_v28 }
  0xf7   : > { %v674_v13 = vadd.f32 %v628_v56, %v627_v11 }
  0xf8   : > { %669 = vadd.xlane.f32.xlu1 %v668_v49  ;;  %672 = vadd.xlane.f32.xlu0 %v671_v12  ;;  %v2374_v49 = vrot.slane %v498_v50, %v760_v27  ;;  %v2378_v12 = vrot.slane %v499_v6, %v760_v27 }
  0xfc   : > { %675 = vadd.xlane.f32.xlu1 %v674_v13 }
 0x169   : > { %v631_v57 = vpop.xlane.xlu0 %630 }
 0x16a   : > { %v677_v38 = vmul.f32 0.00390625, %v631_v57 }
 0x16c   : > { %v693_v59 = vadd.f32 1e-05, %v677_v38 }
 0x16d   : > { %v634_v60 = vpop.xlane.xlu1 %633  ;;  %v637_v9 = vpop.xlane.xlu0 %636 }
 0x16e   : > { %1723 = vrsqrt.f32 %v693_v59  ;;  %v678_v14 = vmul.f32 0.00390625, %v634_v60  ;;  %v679_v44 = vmul.f32 0.00390625, %v637_v9  ;;  %v2382_v9 = vrot.slane %v499_v6, %v764_v28 }
 0x170   : > { %v694_v62 = vadd.f32 1e-05, %v678_v14  ;;  %v695_v63 = vadd.f32 1e-05, %v679_v44 }
 0x171   : > { %v640_v15 = vpop.xlane.xlu1 %639  ;;  %v643_v0 = vpop.xlane.xlu0 %642 }
 0x172   : > { %1725 = vrsqrt.f32 %v694_v62  ;;  %v680_v1 = vmul.f32 0.00390625, %v640_v15  ;;  %v681_v18 = vmul.f32 0.00390625, %v643_v0 }
 0x173   : > { %1727 = vrsqrt.f32 %v695_v63 }
 0x174   : > { %v696_v51 = vadd.f32 1e-05, %v680_v1  ;;  %v697_v4 = vadd.f32 1e-05, %v681_v18 }
 0x175   : > { %v646_v5 = vpop.xlane.xlu1 %645  ;;  %v649_v29 = vpop.xlane.xlu0 %648 }
 0x176   : > { %1729 = vrsqrt.f32 %v696_v51  ;;  %v682_v7 = vmul.f32 0.00390625, %v646_v5  ;;  %v683_v34 = vmul.f32 0.00390625, %v649_v29 }
 0x177   : > { %1731 = vrsqrt.f32 %v697_v4 }
 0x178   : > { %v1724_v10 = vpop.eup %1723  ;;  %v698_v11 = vadd.f32 1e-05, %v682_v7  ;;  %v699_v56 = vadd.f32 1e-05, %v683_v34 }
 0x179   : > { %v725_v13 = vmul.f32 %v1724_v10, %v2209_v20  ;;  %v726_v57 = vmul.f32 %v1724_v10, %v2212_v21  ;;  %v652_v38 = vpop.xlane.xlu1 %651  ;;  %v655_v58 = vpop.xlane.xlu0 %654 }
 0x17a   : > { %1733 = vrsqrt.f32 %v698_v11  ;;  %v684_v59 = vmul.f32 0.00390625, %v652_v38  ;;  %v685_v60 = vmul.f32 0.00390625, %v655_v58 }
 0x17b   : > { %v768_v14 = vmul.f32 %v2374_v49, %v725_v13  ;;  %v769_v44 = vmul.f32 %v2376_v37, %v726_v57  ;;  %1735 = vrsqrt.f32 %v699_v56 }
 0x17c   : > { %v1726_v45 = vpop.eup %1725  ;;  %v700_v62 = vadd.f32 1e-05, %v684_v59  ;;  %v701_v63 = vadd.f32 1e-05, %v685_v60 }
 0x17d   : > { %v1728_v15 = vpop.eup %1727  ;;  %v811_v20 = vadd.f32 %v2378_v12, %v768_v14  ;;  %v727_v21 = vmul.f32 %v1726_v45, %v2229_v32  ;;  %v728_v0 = vmul.f32 %v1726_v45, %v2232_v33  ;;  %v658_v1 = vpop.xlane.xlu1 %657  ;;  %v812_v51 = vadd.f32 %v2382_v9, %v769_v44 }
 0x17e   : > { %v661_v18 = vpop.xlane.xlu0 %660  ;;  %v729_v27 = vmul.f32 %v1728_v15, %v2215_v22  ;;  %v730_v28 = vmul.f32 %v1728_v15, %v2218_v23  ;;  %1737 = vrsqrt.f32 %v700_v62  ;;  %v686_v50 = vmul.f32 0.00390625, %v658_v1 }
 0x17f   : > { %v770_v4 = vmul.f32 %v2374_v49, %v727_v21  ;;  %v771_v5 = vmul.f32 %v2376_v37, %v728_v0  ;;  %1739 = vrsqrt.f32 %v701_v63  ;;  %v687_v7 = vmul.f32 0.00390625, %v661_v18 }
 0x180   : > { %v1730_v29 = vpop.eup %1729  ;;  %v772_v32 = vmul.f32 %v2374_v49, %v729_v27  ;;  %v773_v33 = vmul.f32 %v2376_v37, %v730_v28  ;;  %v702_v6 = vadd.f32 1e-05, %v686_v50 }
 0x181   : > { %v1732_v34 = vpop.eup %1731  ;;  %v813_v22 = vadd.f32 %v2378_v12, %v770_v4  ;;  %v814_v23 = vadd.f32 %v2382_v9, %v771_v5  ;;  %v731_v10 = vmul.f32 %v1730_v29, %v2235_v35  ;;  %v732_v11 = vmul.f32 %v1730_v29, %v2238_v36  ;;  %v664_v56 = vpop.xlane.xlu1 %663 }
 0x182   : > { %v815_v13 = vadd.f32 %v2378_v12, %v772_v32  ;;  %v816_v57 = vadd.f32 %v2382_v9, %v773_v33  ;;  %v733_v38 = vmul.f32 %v1732_v34, %v2249_v41  ;;  %v734_v58 = vmul.f32 %v1732_v34, %v2252_v55  ;;  %v667_v63 = vpop.xlane.xlu0 %666 }
 0x183   : > { %v843_v59 = vpack.c.bf16 %v813_v22, %v811_v20  ;;  %v844_v60 = vpack.c.bf16 %v814_v23, %v812_v51  ;;  %v774_v14 = vmul.f32 %v2374_v49, %v731_v10  ;;  %v775_v44 = vmul.f32 %v2376_v37, %v732_v11 }
 0x184   : > { %v1734_v45 = vpop.eup %1733  ;;  %v776_v35 = vmul.f32 %v2374_v49, %v733_v38  ;;  %v777_v36 = vmul.f32 %v2376_v37, %v734_v58  ;;  %1741 = vrsqrt.f32 %v702_v6  ;;  %v703_v62 = vadd.f32 1e-05, %v687_v7 }
 0x185   : > { %v1736_v15 = vpop.eup %1735  ;;  %859 = vst [vmem:[#allocation2] sm:$0xff] %v843_v59  ;;  %860 = vst [vmem:[#allocation2 + $0x8] sm:$0xff] %v844_v60  ;;  %v817_v41 = vadd.f32 %v2378_v12, %v774_v14  ;;  %v818_v55 = vadd.f32 %v2382_v9, %v775_v44  ;;  %v735_v20 = vmul.f32 %v1734_v45, %v2255_v61  ;;  %v670_v5 = vpop.xlane.xlu1 %669  ;;  %v688_v32 = vmul.f32 0.00390625, %v664_v56 }
 0x186   : > { %v736_v21 = vmul.f32 %v1734_v45, %v2258_v2  ;;  %v819_v0 = vadd.f32 %v2378_v12, %v776_v35  ;;  %v820_v1 = vadd.f32 %v2382_v9, %v777_v36  ;;  %v737_v18 = vmul.f32 %v1736_v15, %v2269_v16  ;;  %v673_v23 = vpop.xlane.xlu0 %672 }
 0x187   : > { %v738_v27 = vmul.f32 %v1736_v15, %v2272_v17  ;;  %v845_v28 = vpack.c.bf16 %v817_v41, %v815_v13  ;;  %v846_v50 = vpack.c.bf16 %v818_v55, %v816_v57  ;;  %v778_v51 = vmul.f32 %v2374_v49, %v735_v20 }
 0x188   : > { %v779_v4 = vmul.f32 %v2376_v37, %v736_v21  ;;  %v1738_v29 = vpop.eup %1737  ;;  %v780_v61 = vmul.f32 %v2374_v49, %v737_v18  ;;  %1743 = vrsqrt.f32 %v703_v62  ;;  %v704_v58 = vadd.f32 1e-05, %v688_v32 }
 0x189   : > { %v781_v2 = vmul.f32 %v2376_v37, %v738_v27  ;;  %v1740_v33 = vpop.eup %1739  ;;  %861 = vst [vmem:[#allocation2 + $0x10] sm:$0xff] %v845_v28  ;;  %862 = vst [vmem:[#allocation2 + $0x18] sm:$0xff] %v846_v50  ;;  %v821_v16 = vadd.f32 %v2378_v12, %v778_v51  ;;  %v739_v6 = vmul.f32 %v1738_v29, %v2275_v19  ;;  %v689_v59 = vmul.f32 0.00390625, %v667_v63  ;;  %v676_v60 = vpop.xlane.xlu1 %675 }
 0x18a   : > { %v822_v17 = vadd.f32 %v2382_v9, %v779_v4  ;;  %v740_v7 = vmul.f32 %v1738_v29, %v2278_v24  ;;  %v741_v34 = vmul.f32 %v1740_v33, %v2289_v30  ;;  %v742_v22 = vmul.f32 %v1740_v33, %v2292_v31 }
 0x18b   : > { %v847_v10 = vpack.c.bf16 %v821_v16, %v819_v0  ;;  %v782_v56 = vmul.f32 %v2374_v49, %v739_v6  ;;  %v823_v57 = vadd.f32 %v2378_v12, %v780_v61  ;;  %v824_v38 = vadd.f32 %v2382_v9, %v781_v2 }
 0x18c   : > { %v848_v11 = vpack.c.bf16 %v822_v17, %v820_v1  ;;  %v783_v13 = vmul.f32 %v2376_v37, %v740_v7  ;;  %v690_v30 = vmul.f32 0.00390625, %v670_v5  ;;  %v691_v31 = vmul.f32 0.00390625, %v673_v23 }
 0x18d   : > { %863 = vst [vmem:[#allocation2 + $0x20] sm:$0xff] %v847_v10  ;;  %v825_v19 = vadd.f32 %v2378_v12, %v782_v56  ;;  %v784_v44 = vmul.f32 %v2374_v49, %v741_v34  ;;  %v785_v45 = vmul.f32 %v2376_v37, %v742_v22  ;;  %1745 = vrsqrt.f32 %v704_v58 }
 0x18e   : > { %864 = vst [vmem:[#allocation2 + $0x28] sm:$0xff] %v848_v11  ;;  %v826_v24 = vadd.f32 %v2382_v9, %v783_v13  ;;  %v1742_v14 = vpop.eup %1741  ;;  %v705_v35 = vadd.f32 1e-05, %v689_v59  ;;  %v706_v41 = vadd.f32 1e-05, %v690_v30  ;;  %v692_v20 = vmul.f32 0.00390625, %v676_v60 }
 0x18f   : > { %v849_v36 = vpack.c.bf16 %v825_v19, %v823_v57  ;;  %v743_v63 = vmul.f32 %v1742_v14, %v2295_v39  ;;  %v744_v15 = vmul.f32 %v1742_v14, %v2298_v42  ;;  %v707_v55 = vadd.f32 1e-05, %v691_v31 }
 0x190   : > { %v850_v62 = vpack.c.bf16 %v826_v24, %v824_v38  ;;  %1747 = vrsqrt.f32 %v705_v35  ;;  %v708_v18 = vadd.f32 1e-05, %v692_v20  ;;  %v827_v27 = vadd.f32 %v2378_v12, %v784_v44 }
 0x191   : > { %865 = vst [vmem:[#allocation2 + $0x30] sm:$0xff] %v849_v36  ;;  %v786_v21 = vmul.f32 %v2374_v49, %v743_v63  ;;  %v787_v0 = vmul.f32 %v2376_v37, %v744_v15  ;;  %1749 = vrsqrt.f32 %v706_v41  ;;  %v828_v28 = vadd.f32 %v2382_v9, %v785_v45 }
 0x192   : > { %866 = vst [vmem:[#allocation2 + $0x38] sm:$0xff] %v850_v62  ;;  %v1744_v1 = vpop.eup %1743  ;;  %1751 = vrsqrt.f32 %v707_v55 }
 0x193   : > { %v829_v39 = vadd.f32 %v2378_v12, %v786_v21  ;;  %v830_v42 = vadd.f32 %v2382_v9, %v787_v0  ;;  %v745_v50 = vmul.f32 %v1744_v1, %v2309_v54  ;;  %v746_v51 = vmul.f32 %v1744_v1, %v2312_v40 }
 0x194   : > { %1753 = vrsqrt.f32 %v708_v18 }
 0x195   : > { %v851_v4 = vpack.c.bf16 %v829_v39, %v827_v27  ;;  %v852_v5 = vpack.c.bf16 %v830_v42, %v828_v28  ;;  %v788_v61 = vmul.f32 %v2374_v49, %v745_v50  ;;  %v789_v2 = vmul.f32 %v2376_v37, %v746_v51 }
 0x197   : > { %867 = vst [vmem:[#allocation2 + $0x40] sm:$0xff] %v851_v4  ;;  %868 = vst [vmem:[#allocation2 + $0x48] sm:$0xff] %v852_v5  ;;  %v1746_v29 = vpop.eup %1745  ;;  %v831_v34 = vadd.f32 %v2378_v12, %v788_v61  ;;  %v832_v22 = vadd.f32 %v2382_v9, %v789_v2 }
 0x198   : > { %v747_v32 = vmul.f32 %v1746_v29, %v2315_v3  ;;  %v748_v33 = vmul.f32 %v1746_v29, %v2318_v8 }
 0x19a   : > { %v1748_v16 = vpop.eup %1747  ;;  %v790_v54 = vmul.f32 %v2374_v49, %v747_v32  ;;  %v791_v40 = vmul.f32 %v2376_v37, %v748_v33 }
 0x19b   : > { %v749_v17 = vmul.f32 %v1748_v16, %v2329_v46  ;;  %v750_v6 = vmul.f32 %v1748_v16, %v2332_v47  ;;  %v1750_v7 = vpop.eup %1749 }
 0x19c   : > { %v833_v23 = vadd.f32 %v2378_v12, %v790_v54  ;;  %v834_v3 = vadd.f32 %v2382_v9, %v791_v40  ;;  %v1752_v11 = vpop.eup %1751  ;;  %v751_v56 = vmul.f32 %v1750_v7, %v2335_v25  ;;  %v752_v46 = vmul.f32 %v1750_v7, %v2338_v26 }
 0x19d   : > { %v792_v8 = vmul.f32 %v2374_v49, %v749_v17  ;;  %v793_v10 = vmul.f32 %v2376_v37, %v750_v6  ;;  %v753_v59 = vmul.f32 %v1752_v11, %v2349_v52  ;;  %v754_v19 = vmul.f32 %v1752_v11, %v2352_v53 }
 0x19e   : > { %v853_v13 = vpack.c.bf16 %v833_v23, %v831_v34  ;;  %v854_v47 = vpack.c.bf16 %v834_v3, %v832_v22  ;;  %v1754_v57 = vpop.eup %1753  ;;  %v794_v38 = vmul.f32 %v2374_v49, %v751_v56  ;;  %v795_v58 = vmul.f32 %v2376_v37, %v752_v46 }
 0x19f   : > { %v835_v24 = vadd.f32 %v2378_v12, %v792_v8  ;;  %v836_v30 = vadd.f32 %v2382_v9, %v793_v10  ;;  %v755_v25 = vmul.f32 %v1754_v57, %v2355_v43  ;;  %v756_v26 = vmul.f32 %v1754_v57, %v2358_v48 }
 0x1a0   : > { %869 = vst [vmem:[#allocation2 + $0x50] sm:$0xff] %v853_v13  ;;  %870 = vst [vmem:[#allocation2 + $0x58] sm:$0xff] %v854_v47  ;;  %v837_v31 = vadd.f32 %v2378_v12, %v794_v38  ;;  %v838_v60 = vadd.f32 %v2382_v9, %v795_v58  ;;  %v796_v14 = vmul.f32 %v2374_v49, %v753_v59 }
 0x1a1   : > { %v797_v52 = vmul.f32 %v2376_v37, %v754_v19  ;;  %v798_v53 = vmul.f32 %v2374_v49, %v755_v25  ;;  %v799_v44 = vmul.f32 %v2376_v37, %v756_v26 }
 0x1a2   : > { %v855_v45 = vpack.c.bf16 %v837_v31, %v835_v24  ;;  %v856_v35 = vpack.c.bf16 %v838_v60, %v836_v30  ;;  %v839_v36 = vadd.f32 %v2378_v12, %v796_v14 }
 0x1a3   : > { %v840_v43 = vadd.f32 %v2382_v9, %v797_v52  ;;  %v841_v48 = vadd.f32 %v2378_v12, %v798_v53  ;;  %v842_v62 = vadd.f32 %v2382_v9, %v799_v44 }
 0x1a4   : > { %871 = vst [vmem:[#allocation2 + $0x60] sm:$0xff] %v855_v45  ;;  %872 = vst [vmem:[#allocation2 + $0x68] sm:$0xff] %v856_v35 }
 0x1a5   : > { %v857_v63 = vpack.c.bf16 %v841_v48, %v839_v36  ;;  %v858_v15 = vpack.c.bf16 %v842_v62, %v840_v43 }
 0x1a7   : > { %873 = vst [vmem:[#allocation2 + $0x70] sm:$0xff] %v857_v63  ;;  %874 = vst [vmem:[#allocation2 + $0x78] sm:$0xff] %v858_v15 }
 0x1a8 PF: > { %v1755_v49 = vld [vmem:[%s2075_s7 + $0x4] ss:$8 sps:$4 sm:$0xff]   ;;  %v1757_v37 = vld [vmem:[%s2075_s7] ss:$8 sps:$4 sm:$0xff]   ;;  %v1758_v12 = vld [vmem:[%s2075_s7 + $0x14] ss:$8 sps:$4 sm:$0xff]   ;;  %v925_v25 = vlaneseq }
 0x1a9   : > { %1095 = vmatprep.subr.bf16.mxu0 %v1755_v49  ;;  %1618 = vmatprep.subr.bf16.mxu1 %v1755_v49  ;;  %v1760_v9 = vld [vmem:[%s2075_s7 + $0x10] ss:$8 sps:$4 sm:$0xff]   ;;  %v1761_v41 = vld [vmem:[%s2075_s7 + $0x24] ss:$8 sps:$4 sm:$0xff]   ;;  %v1763_v55 = vld [vmem:[%s2075_s7 + $0x20] ss:$8 sps:$4 sm:$0xff]  }
 0x1aa   : > { %1096 = vmatpush1.bf16.msra.mxu0 %v1757_v37  ;;  %1634 = vmatpush1.bf16.msra.mxu1 %v1757_v37  ;;  %v1764_v20 = vld [vmem:[%s2075_s7 + $0x34] ss:$8 sps:$4 sm:$0xff]   ;;  %v1766_v21 = vld [vmem:[%s2075_s7 + $0x30] ss:$8 sps:$4 sm:$0xff]   ;;  %v1767_v0 = vld [vmem:[%s2075_s7 + $0x44] ss:$8 sps:$4 sm:$0xff]  }
 0x1ab   : > { %1097 = vmatprep.subr.bf16.mxu0 %v1758_v12  ;;  %1619 = vmatprep.subr.bf16.mxu1 %v1758_v12  ;;  %v1769_v1 = vld [vmem:[%s2075_s7 + $0x40] ss:$8 sps:$4 sm:$0xff]   ;;  %v1770_v18 = vld [vmem:[%s2075_s7 + $0x54] ss:$8 sps:$4 sm:$0xff]   ;;  %v1772_v27 = vld [vmem:[%s2075_s7 + $0x50] ss:$8 sps:$4 sm:$0xff]  }
 0x1ac   : > { %v1773_v28 = vld [vmem:[%s2075_s7 + $0x64] ss:$8 sps:$4 sm:$0xff]   ;;  %v1775_v50 = vld [vmem:[%s2075_s7 + $0x60] ss:$8 sps:$4 sm:$0xff]   ;;  %v1776_v51 = vld [vmem:[%s2075_s7 + $0x74] ss:$8 sps:$4 sm:$0xff]  }
 0x1ad   : > { %v876_v39 = vld [vmem:[#allocation2 + $0x8] sm:$0xff]  ;;  %v1778_v4 = vld [vmem:[%s2075_s7 + $0x70] ss:$8 sps:$4 sm:$0xff]   ;;  %v1782_v61 = vld [vmem:[%s2075_s7 + $0x94] ss:$8 sps:$4 sm:$0xff]   ;;  %v926_v26 = vshrl.u32 %v925_v25, 7 }
 0x1ae   : > { %1098 = vmatpush1.bf16.msra.mxu0 %v1760_v9  ;;  %1635 = vmatpush1.bf16.msra.mxu1 %v1760_v9  ;;  %v884_v42 = vld [vmem:[#allocation2 + $0x48] sm:$0xff]  ;;  %v1784_v2 = vld [vmem:[%s2075_s7 + $0x90] ss:$8 sps:$4 sm:$0xff]   ;;  %v1788_v16 = vld [vmem:[%s2075_s7 + $0xb4] ss:$8 sps:$4 sm:$0xff]   ;;  %s1650_s15 = smul.u32 (%p1972_p9), 96, %s1861_s23 }
 0x1af   : > { %1099 = vmatprep.subr.bf16.mxu0 %v1761_v41  ;;  %1620 = vmatprep.subr.bf16.mxu1 %v1761_v41  ;;  %v1779_v5 = vld [vmem:[%s2075_s7 + $0x84] ss:$8 sps:$4 sm:$0xff]   ;;  %v1781_v29 = vld [vmem:[%s2075_s7 + $0x80] ss:$8 sps:$4 sm:$0xff]   ;;  %v1790_v54 = vld [vmem:[%s2075_s7 + $0xb0] ss:$8 sps:$4 sm:$0xff]  }
 0x1b0   : > { %1127 = vmatprep.mubr.bf16.mxu0 %v876_v39  ;;  %1167 = vmatprep.mubr.bf16.mxu1 %v884_v42  ;;  %v1785_v32 = vld [vmem:[%s2075_s7 + $0xa4] ss:$8 sps:$4 sm:$0xff]   ;;  %v1787_v33 = vld [vmem:[%s2075_s7 + $0xa0] ss:$8 sps:$4 sm:$0xff]   ;;  %v1794_v6 = vld [vmem:[%s2075_s7 + $0xd4] ss:$8 sps:$4 sm:$0xff]   ;;  %s1332_s11 = sadd.s32 (%p1972_p9), %s1650_s15, %s2059_s13 }
 0x1b1   : > { %v1791_v40 = vld [vmem:[%s2075_s7 + $0xc4] ss:$8 sps:$4 sm:$0xff]   ;;  %v1793_v17 = vld [vmem:[%s2075_s7 + $0xc0] ss:$8 sps:$4 sm:$0xff]   ;;  %v1796_v7 = vld [vmem:[%s2075_s7 + $0xd0] ss:$8 sps:$4 sm:$0xff]  }
 0x1b2   : > { %1100 = vmatpush1.bf16.msra.mxu0 %v1763_v55  ;;  %1636 = vmatpush1.bf16.msra.mxu1 %v1763_v55  ;;  %v1797_v34 = vld [vmem:[%s2075_s7 + $0xe4] ss:$8 sps:$4 sm:$0xff]   ;;  %v1799_v22 = vld [vmem:[%s2075_s7 + $0xe0] ss:$8 sps:$4 sm:$0xff]   ;;  %v1800_v23 = vld [vmem:[%s2075_s7 + $0xf4] ss:$8 sps:$4 sm:$0xff]  }
 0x1b3   : > { %1101 = vmatprep.subr.bf16.mxu0 %v1764_v20  ;;  %1621 = vmatprep.subr.bf16.mxu1 %v1764_v20  ;;  %v1802_v3 = vld [vmem:[%s2075_s7 + $0xf0] ss:$8 sps:$4 sm:$0xff]   ;;  %v875_v8 = vld [vmem:[#allocation2] sm:$0xff]  ;;  %v880_v47 = vld [vmem:[#allocation2 + $0x28] sm:$0xff]  ;;  %v927_v31 = vsub.s32 0, %v926_v26  ;;  %v931_v14 = vsub.s32 1, %v926_v26 }
 0x1b4   : > { %v883_v10 = vld [vmem:[#allocation2 + $0x40] sm:$0xff]  ;;  %v878_v11 = vld [vmem:[#allocation2 + $0x18] sm:$0xff]  ;;  %v877_v46 = vld [vmem:[#allocation2 + $0x10] sm:$0xff]  ;;  %s1597_s27 = sshll.u32 (%p1972_p9), %s1332_s11, 2 }
 0x1b5   : > { %v886_v56 = vld [vmem:[#allocation2 + $0x58] sm:$0xff]  ;;  %v885_v13 = vld [vmem:[#allocation2 + $0x50] sm:$0xff]  ;;  %v888_v57 = vld [vmem:[#allocation2 + $0x68] sm:$0xff]  ;;  %s1334_s23 = scalar_lea.vmem (%p1972_p9), %s2622_s5, %s1597_s27 }
 0x1b6   : > { %1102 = vmatpush1.bf16.msra.mxu0 %v1766_v21  ;;  %1637 = vmatpush1.bf16.msra.mxu1 %v1766_v21  ;;  %v879_v38 = vld [vmem:[#allocation2 + $0x20] sm:$0xff]  ;;  %v882_v59 = vld [vmem:[#allocation2 + $0x38] sm:$0xff]  ;;  %v881_v24 = vld [vmem:[#allocation2 + $0x30] sm:$0xff] }
 0x1b7   : > { %1103 = vmatprep.subr.bf16.mxu0 %v1767_v0  ;;  %1622 = vmatprep.subr.bf16.mxu1 %v1767_v0  ;;  %v887_v58 = vld [vmem:[#allocation2 + $0x60] sm:$0xff]  ;;  %v890_v19 = vld [vmem:[#allocation2 + $0x78] sm:$0xff]  ;;  %v889_v30 = vld [vmem:[#allocation2 + $0x70] sm:$0xff] }
 0x1b8   : > { %v923_v60 = vld [vmem:[%s458_s6] sm:$0x3] }
 0x1b9   : > { %v2515_v52 = vrot.slane %v923_v60, %v927_v31  ;;  %v2517_v53 = vrot.slane %v923_v60, %v931_v14 }
 0x1ba   : > { %1104 = vmatpush1.bf16.msra.mxu0 %v1769_v1  ;;  %1638 = vmatpush1.bf16.msra.mxu1 %v1769_v1 }
 0x1bb   : > { %1105 = vmatprep.subr.bf16.mxu0 %v1770_v18  ;;  %1623 = vmatprep.subr.bf16.mxu1 %v1770_v18 }
 0x1be   : > { %1106 = vmatpush1.bf16.msra.mxu0 %v1772_v27  ;;  %1639 = vmatpush1.bf16.msra.mxu1 %v1772_v27 }
 0x1bf   : > { %1107 = vmatprep.subr.bf16.mxu0 %v1773_v28  ;;  %1624 = vmatprep.subr.bf16.mxu1 %v1773_v28 }
 0x1c2   : > { %1108 = vmatpush1.bf16.msra.mxu0 %v1775_v50  ;;  %1640 = vmatpush1.bf16.msra.mxu1 %v1775_v50 }
 0x1c3   : > { %1109 = vmatprep.subr.bf16.mxu0 %v1776_v51  ;;  %1625 = vmatprep.subr.bf16.mxu1 %v1776_v51 }
 0x1c6   : > { %1110 = vmatpush1.bf16.msra.mxu0 %v1778_v4  ;;  %1641 = vmatpush1.bf16.msra.mxu1 %v1778_v4 }
 0x1c7   : > { %1111 = vmatprep.subr.bf16.mxu0 %v1779_v5  ;;  %1626 = vmatprep.subr.bf16.mxu1 %v1779_v5 }
 0x1ca   : > { %1112 = vmatpush1.bf16.msra.mxu0 %v1781_v29  ;;  %1642 = vmatpush1.bf16.msra.mxu1 %v1781_v29 }
 0x1cb   : > { %1113 = vmatprep.subr.bf16.mxu0 %v1782_v61  ;;  %1627 = vmatprep.subr.bf16.mxu1 %v1782_v61 }
 0x1ce   : > { %1114 = vmatpush1.bf16.msra.mxu0 %v1784_v2  ;;  %1643 = vmatpush1.bf16.msra.mxu1 %v1784_v2 }
 0x1cf   : > { %1115 = vmatprep.subr.bf16.mxu0 %v1785_v32  ;;  %1628 = vmatprep.subr.bf16.mxu1 %v1785_v32 }
 0x1d2   : > { %1116 = vmatpush1.bf16.msra.mxu0 %v1787_v33  ;;  %1644 = vmatpush1.bf16.msra.mxu1 %v1787_v33 }
 0x1d3   : > { %1117 = vmatprep.subr.bf16.mxu0 %v1788_v16  ;;  %1629 = vmatprep.subr.bf16.mxu1 %v1788_v16 }
 0x1d6   : > { %1118 = vmatpush1.bf16.msra.mxu0 %v1790_v54  ;;  %1645 = vmatpush1.bf16.msra.mxu1 %v1790_v54 }
 0x1d7   : > { %1119 = vmatprep.subr.bf16.mxu0 %v1791_v40  ;;  %1630 = vmatprep.subr.bf16.mxu1 %v1791_v40 }
 0x1da   : > { %1120 = vmatpush1.bf16.msra.mxu0 %v1793_v17  ;;  %1646 = vmatpush1.bf16.msra.mxu1 %v1793_v17 }
 0x1db   : > { %1121 = vmatprep.subr.bf16.mxu0 %v1794_v6  ;;  %1631 = vmatprep.subr.bf16.mxu1 %v1794_v6 }
 0x1de   : > { %1122 = vmatpush1.bf16.msra.mxu0 %v1796_v7  ;;  %1647 = vmatpush1.bf16.msra.mxu1 %v1796_v7 }
 0x1df   : > { %1123 = vmatprep.subr.bf16.mxu0 %v1797_v34  ;;  %1632 = vmatprep.subr.bf16.mxu1 %v1797_v34 }
 0x1e2   : > { %1124 = vmatpush1.bf16.msra.mxu0 %v1799_v22  ;;  %1648 = vmatpush1.bf16.msra.mxu1 %v1799_v22 }
 0x1e3   : > { %1125 = vmatprep.subr.bf16.mxu0 %v1800_v23  ;;  %1633 = vmatprep.subr.bf16.mxu1 %v1800_v23 }
 0x1e6   : > { %1126 = vmatpush1.bf16.msra.mxu0 %v1802_v3  ;;  %1649 = vmatpush1.bf16.msra.mxu1 %v1802_v3 }
 0x1e9   : > { %1128 = vmatmul.mubr.bf16.vlgmr.msra.gmra.mrb[0].mxu0 %v875_v8  ;;  %1168 = vmatmul.mubr.bf16.vlgmr.msra.gmra.mrb[0].mxu1 %v883_v10 }
 0x1ea   : > { %1137 = vmatprep.mubr.bf16.mxu0 %v878_v11  ;;  %1177 = vmatprep.mubr.bf16.mxu1 %v886_v56 }
 0x1f1   : > { %1138 = vmatmul.mubr.bf16.gmra.mrb[4].mxu0 %v877_v46  ;;  %1178 = vmatmul.mubr.bf16.gmra.mrb[4].mxu1 %v885_v13 }
 0x1f2   : > { %1147 = vmatprep.mubr.bf16.mxu0 %v880_v47  ;;  %1187 = vmatprep.mubr.bf16.mxu1 %v888_v57 }
 0x1f9   : > { %1148 = vmatmul.mubr.bf16.gmra.mrb[8].mxu0 %v879_v38  ;;  %1188 = vmatmul.mubr.bf16.gmra.mrb[8].mxu1 %v887_v58 }
 0x1fa   : > { %1157 = vmatprep.mubr.bf16.mxu0 %v882_v59  ;;  %1197 = vmatprep.mubr.bf16.mxu1 %v890_v19 }
 0x201   : > { %1158 = vmatmul.mubr.bf16.gmra.mrb[12].mxu0 %v881_v24  ;;  %1198 = vmatmul.mubr.bf16.gmra.mrb[12].mxu1 %v889_v30 }
 0x2bc   : > { %v1129_v44 = vpop.f32.mrb[0].mxu0  ;;  %v1169_v45 = vpop.f32.mrb[0].mxu1 }
 0x2bd   : > { %v1130_v35 = vadd.f32 %v1129_v44, %v2515_v52  ;;  %v1170_v36 = vadd.f32 %v1169_v45, %v2515_v52  ;;  %v1131_v43 = vpop.f32.mrb[1].mxu0  ;;  %v1171_v48 = vpop.f32.mrb[1].mxu1 }
 0x2be   : > { %v1132_v62 = vadd.f32 %v1131_v43, %v2517_v53  ;;  %v1172_v63 = vadd.f32 %v1171_v48, %v2517_v53  ;;  %v1133_v15 = vpop.f32.mrb[2].mxu0  ;;  %v1173_v49 = vpop.f32.mrb[2].mxu1 }
 0x2bf   : > { %v1134_v37 = vadd.f32 %v1133_v15, %v2515_v52  ;;  %v1174_v12 = vadd.f32 %v1173_v49, %v2515_v52  ;;  %v1135_v9 = vpop.f32.mrb[3].mxu0  ;;  %v1175_v41 = vpop.f32.mrb[3].mxu1 }
 0x2c0   : > { %v1602_v55 = vpack.c.bf16 %v1132_v62, %v1130_v35  ;;  %v1610_v20 = vpack.c.bf16 %v1172_v63, %v1170_v36  ;;  %v1136_v21 = vadd.f32 %v1135_v9, %v2517_v53  ;;  %v1176_v0 = vadd.f32 %v1175_v41, %v2517_v53 }
 0x2c2   : > { %1304 = vst [vmem:[%s2077_s3] sm:$0xff] %v1602_v55  ;;  %1312 = vst [vmem:[%s2077_s3 + $0x40] sm:$0xff] %v1610_v20  ;;  %v1603_v1 = vpack.c.bf16 %v1136_v21, %v1134_v37  ;;  %v1611_v18 = vpack.c.bf16 %v1176_v0, %v1174_v12 }
 0x2c4   : > { %1305 = vst [vmem:[%s2077_s3 + $0x8] sm:$0xff] %v1603_v1  ;;  %1313 = vst [vmem:[%s2077_s3 + $0x48] sm:$0xff] %v1611_v18  ;;  %v1139_v27 = vpop.f32.mrb[4].mxu0  ;;  %v1179_v28 = vpop.f32.mrb[4].mxu1 }
 0x2c5   : > { %v1140_v39 = vadd.f32 %v1139_v27, %v2515_v52  ;;  %v1180_v42 = vadd.f32 %v1179_v28, %v2515_v52  ;;  %v1141_v50 = vpop.f32.mrb[5].mxu0  ;;  %v1181_v51 = vpop.f32.mrb[5].mxu1 }
 0x2c6   : > { %v1142_v4 = vadd.f32 %v1141_v50, %v2517_v53  ;;  %v1182_v5 = vadd.f32 %v1181_v51, %v2517_v53  ;;  %v1143_v29 = vpop.f32.mrb[6].mxu0  ;;  %v1183_v61 = vpop.f32.mrb[6].mxu1 }
 0x2c7   : > { %v1144_v2 = vadd.f32 %v1143_v29, %v2515_v52  ;;  %v1184_v32 = vadd.f32 %v1183_v61, %v2515_v52  ;;  %v1145_v33 = vpop.f32.mrb[7].mxu0  ;;  %v1185_v16 = vpop.f32.mrb[7].mxu1 }
 0x2c8   : > { %v1604_v54 = vpack.c.bf16 %v1142_v4, %v1140_v39  ;;  %v1612_v40 = vpack.c.bf16 %v1182_v5, %v1180_v42  ;;  %v1146_v17 = vadd.f32 %v1145_v33, %v2517_v53  ;;  %v1186_v6 = vadd.f32 %v1185_v16, %v2517_v53 }
 0x2c9   : > { %v1408_v50 = vld [vmem:[%s2077_s3 + $0x40] sm:$0xff] (%p1972_p9) }
 0x2ca   : > { %1306 = vst [vmem:[%s2077_s3 + $0x10] sm:$0xff] %v1604_v54  ;;  %1314 = vst [vmem:[%s2077_s3 + $0x50] sm:$0xff] %v1612_v40  ;;  %v1605_v7 = vpack.c.bf16 %v1146_v17, %v1144_v2  ;;  %v1613_v34 = vpack.c.bf16 %v1186_v6, %v1184_v32 }
 0x2cb   : > { %v1410_v51 = vld [vmem:[%s2077_s3 + $0x48] sm:$0xff] (%p1972_p9)  ;;  %1409 = vst [vmem:[%s1334_s23 + $0xc0] sm:$0xff] (%p1972_p9), %v1408_v50 }
 0x2cc   : > { %1307 = vst [vmem:[%s2077_s3 + $0x18] sm:$0xff] %v1605_v7  ;;  %1315 = vst [vmem:[%s2077_s3 + $0x58] sm:$0xff] %v1613_v34  ;;  %v1149_v22 = vpop.f32.mrb[8].mxu0  ;;  %v1189_v23 = vpop.f32.mrb[8].mxu1 }
 0x2cd   : > { %v1150_v3 = vadd.f32 %v1149_v22, %v2515_v52  ;;  %v1190_v8 = vadd.f32 %v1189_v23, %v2515_v52  ;;  %v1151_v10 = vpop.f32.mrb[9].mxu0  ;;  %v1191_v11 = vpop.f32.mrb[9].mxu1  ;;  %1411 = vst [vmem:[%s1334_s23 + $0xd8] sm:$0xff] (%p1972_p9), %v1410_v51 }
 0x2ce   : > { %v1152_v56 = vadd.f32 %v1151_v10, %v2517_v53  ;;  %v1192_v46 = vadd.f32 %v1191_v11, %v2517_v53  ;;  %v1153_v13 = vpop.f32.mrb[10].mxu0  ;;  %v1193_v47 = vpop.f32.mrb[10].mxu1 }
 0x2cf   : > { %v1154_v57 = vadd.f32 %v1153_v13, %v2515_v52  ;;  %v1194_v38 = vadd.f32 %v1193_v47, %v2515_v52  ;;  %v1155_v58 = vpop.f32.mrb[11].mxu0  ;;  %v1195_v59 = vpop.f32.mrb[11].mxu1 }
 0x2d0   : > { %v1606_v19 = vpack.c.bf16 %v1152_v56, %v1150_v3  ;;  %v1614_v24 = vpack.c.bf16 %v1192_v46, %v1190_v8  ;;  %v1156_v30 = vadd.f32 %v1155_v58, %v2517_v53  ;;  %v1196_v25 = vadd.f32 %v1195_v59, %v2517_v53 }
 0x2d1   : > { %v1396_v1 = vld [vmem:[%s2077_s3 + $0x10] sm:$0xff] (%p1972_p9) }
 0x2d2   : > { %1308 = vst [vmem:[%s2077_s3 + $0x20] sm:$0xff] %v1606_v19  ;;  %1316 = vst [vmem:[%s2077_s3 + $0x60] sm:$0xff] %v1614_v24  ;;  %v1607_v26 = vpack.c.bf16 %v1156_v30, %v1154_v57  ;;  %v1615_v31 = vpack.c.bf16 %v1196_v25, %v1194_v38  ;;  %v1412_v4 = vld [vmem:[%s2077_s3 + $0x50] sm:$0xff] (%p1972_p9) }
 0x2d3   : > { %v1398_v18 = vld [vmem:[%s2077_s3 + $0x18] sm:$0xff] (%p1972_p9)  ;;  %1397 = vst [vmem:[%s1334_s23 + $0x30] sm:$0xff] (%p1972_p9), %v1396_v1  ;;  %1413 = vst [vmem:[%s1334_s23 + $0xf0] sm:$0xff] (%p1972_p9), %v1412_v4 }
 0x2d4   : > { %1309 = vst [vmem:[%s2077_s3 + $0x28] sm:$0xff] %v1607_v26  ;;  %1317 = vst [vmem:[%s2077_s3 + $0x68] sm:$0xff] %v1615_v31  ;;  %v1159_v60 = vpop.f32.mrb[12].mxu0  ;;  %v1199_v14 = vpop.f32.mrb[12].mxu1  ;;  %v1414_v5 = vld [vmem:[%s2077_s3 + $0x58] sm:$0xff] (%p1972_p9) }
 0x2d5   : > { %v1160_v44 = vadd.f32 %v1159_v60, %v2515_v52  ;;  %v1200_v45 = vadd.f32 %v1199_v14, %v2515_v52  ;;  %v1161_v35 = vpop.f32.mrb[13].mxu0  ;;  %v1201_v36 = vpop.f32.mrb[13].mxu1  ;;  %1399 = vst [vmem:[%s1334_s23 + $0x48] sm:$0xff] (%p1972_p9), %v1398_v18  ;;  %1415 = vst [vmem:[%s1334_s23 + $0x108] sm:$0xff] (%p1972_p9), %v1414_v5 }
 0x2d6   : > { %v1162_v43 = vadd.f32 %v1161_v35, %v2517_v53  ;;  %v1202_v48 = vadd.f32 %v1201_v36, %v2517_v53  ;;  %v1163_v62 = vpop.f32.mrb[14].mxu0  ;;  %v1203_v63 = vpop.f32.mrb[14].mxu1  ;;  %1326 = sbr.rel (!%p1972_p9) target bundleno = 742 (0x2e6), region = 86 }
 0x2d7   : > { %v1164_v15 = vadd.f32 %v1163_v62, %v2515_v52  ;;  %v1204_v49 = vadd.f32 %v1203_v63, %v2515_v52  ;;  %v1165_v37 = vpop.f32.mrb[15].mxu0  ;;  %v1205_v12 = vpop.f32.mrb[15].mxu1  ;;  %v1392_v52 = vld [vmem:[%s2077_s3] sm:$0xff] (%p1972_p9) }
 0x2d8   : > { %v1608_v9 = vpack.c.bf16 %v1162_v43, %v1160_v44  ;;  %v1616_v41 = vpack.c.bf16 %v1202_v48, %v1200_v45  ;;  %v1166_v55 = vadd.f32 %v1165_v37, %v2517_v53  ;;  %v1206_v20 = vadd.f32 %v1205_v12, %v2517_v53  ;;  %v1394_v53 = vld [vmem:[%s2077_s3 + $0x8] sm:$0xff] (%p1972_p9)  ;;  %1393 = vst [vmem:[%s1334_s23] sm:$0xff] (%p1972_p9), %v1392_v52 }
 0x2d9   : > { %v1400_v27 = vld [vmem:[%s2077_s3 + $0x20] sm:$0xff] (%p1972_p9)  ;;  %1395 = vst [vmem:[%s1334_s23 + $0x18] sm:$0xff] (%p1972_p9), %v1394_v53 }
 0x2da   : > { %1310 = vst [vmem:[%s2077_s3 + $0x30] sm:$0xff] %v1608_v9  ;;  %1318 = vst [vmem:[%s2077_s3 + $0x70] sm:$0xff] %v1616_v41  ;;  %v1609_v21 = vpack.c.bf16 %v1166_v55, %v1164_v15  ;;  %v1617_v0 = vpack.c.bf16 %v1206_v20, %v1204_v49  ;;  %v1416_v29 = vld [vmem:[%s2077_s3 + $0x60] sm:$0xff] (%p1972_p9) }
 0x2db   : > { %v1402_v28 = vld [vmem:[%s2077_s3 + $0x28] sm:$0xff] (%p1972_p9)  ;;  %1401 = vst [vmem:[%s1334_s23 + $0x60] sm:$0xff] (%p1972_p9), %v1400_v27  ;;  %1417 = vst [vmem:[%s1334_s23 + $0x120] sm:$0xff] (%p1972_p9), %v1416_v29 }
 0x2dc   : > { %1311 = vst [vmem:[%s2077_s3 + $0x38] sm:$0xff] %v1609_v21  ;;  %1319 = vst [vmem:[%s2077_s3 + $0x78] sm:$0xff] %v1617_v0  ;;  %v1418_v61 = vld [vmem:[%s2077_s3 + $0x68] sm:$0xff] (%p1972_p9) }
 0x2dd   : > { %1403 = vst [vmem:[%s1334_s23 + $0x78] sm:$0xff] %v1402_v28  ;;  %1419 = vst [vmem:[%s1334_s23 + $0x138] sm:$0xff] %v1418_v61 }
 0x2e1   : > { %v1404_v39 = vld [vmem:[%s2077_s3 + $0x30] sm:$0xff] }
 0x2e2   : > { %v1420_v2 = vld [vmem:[%s2077_s3 + $0x70] sm:$0xff]  ;;  %1405 = vst [vmem:[%s1334_s23 + $0x90] sm:$0xff] %v1404_v39 }
 0x2e3   : > { %v1406_v42 = vld [vmem:[%s2077_s3 + $0x38] sm:$0xff]  ;;  %1421 = vst [vmem:[%s1334_s23 + $0x150] sm:$0xff] %v1420_v2 }
 0x2e4   : > { %1407 = vst [vmem:[%s1334_s23 + $0xa8] sm:$0xff] %v1406_v42  ;;  %v1422_v32 = vld [vmem:[%s2077_s3 + $0x78] sm:$0xff] }
 0x2e5   : > { %1423 = vst [vmem:[%s1334_s23 + $0x168] sm:$0xff] %v1422_v32 }
 0x2e6 PF: > { %s15_s26 = sadd.s32 1, %s1873_s26   ;;  %s2626_s18 = smov %s1845_s19 }
 0x2e7   : > { %p12_p3 = scmp.ge.s32.totalorder %s15_s26, 8   ;;  %s2627_s19 = smov %s1977_s12 }
 0x2e8   : > { %s2628_s20 = smov %s1853_s21  ;;  %s2629_s21 = smov %s1966_s8 }
 0x2e9   : > { %s2630_s22 = smov %s1865_s24  ;;  %s2631_s23 = smov %s1869_s25 }
 0x2ea   : > { %s2632_s24 = smov %s2635_s28  ;;  %s2633_s25 = smov %s2639_s29 }
 0x2eb   :  { %14 = sbr.rel (!%p12_p3) target bundleno = 7 (0x7), region = 161 }

// kernel: monai_decoder_only_forward.14
= control target key start
LH: loop header
LB: loop body
LE: loop exit
PB: predicated region body
PF: predicated region fallthrough
CT: control target
= control target key end

     0   :  { %s2938_s0 = inlined_call_operand.vmem [shape: f32[2,128,256], index: 0, kind: input, shape index: {}]   ;;  %s2939_s1 = inlined_call_operand.vmem [shape: f32[1,256], index: 1, kind: input, shape index: {}]   ;;  %s2940_s2 = inlined_call_operand.vmem [shape: f32[1,256], index: 2, kind: input, shape index: {}]   ;;  %s2941_s3 = inlined_call_operand.vmem [shape: bf16[256,1024], index: 3, kind: input, shape index: {}]   ;;  %s2942_s4 = inlined_call_operand.vmem [shape: f32[1,1024], index: 4, kind: input, shape index: {}]   ;;  %s2943_s5 = inlined_call_operand.vmem [shape: bf16[2,128,1024], index: 5, kind: output, shape index: {}]  }
   0x1   :  { %2944 = sst [smem:[#allocation5_spill]] %s2941_s3 }
   0x2   :  { %s2129_s18 = smov 0   ;;  %s2131_s19 = smov 0  }
   0x3   :  { %s2133_s20 = smov 0   ;;  %s2135_s21 = smov 0  }
   0x4   :  { %s2137_s22 = smov 0   ;;  %s2139_s23 = smov 0  }
   0x5   :  { %s2141_s24 = smov 0   ;;  %s2143_s25 = smov 0  }
   0x6   :  { %s2145_s26 = smov 0  }
   0x7 LB: > { %s1693_s27 = sadd.s32 4294967295, %s2097_s26   ;;  %s27_s28 = sadd.s32 1, %s2089_s24  ;;  %s2097_s26 = sphi %s2145_s26, %s15_s26   ;;  %s2093_s25 = sphi %s2143_s25, %s2954_s25   ;;  %s2089_s24 = sphi %s2141_s24, %s2953_s24   ;;  %s2085_s23 = sphi %s2139_s23, %s2952_s23   ;;  %s2081_s22 = sphi %s2137_s22, %s2951_s22   ;;  %s2077_s21 = sphi %s2135_s21, %s2950_s21   ;;  %s2073_s20 = sphi %s2133_s20, %s2949_s20   ;;  %s2069_s19 = sphi %s2131_s19, %s2948_s19   ;;  %s2065_s18 = sphi %s2129_s18, %s2947_s18  }
   0x8   : > { %p28_p0 = scmp.ge.s32.totalorder %s27_s28, 4  ;;  %s34_s29 = sadd.s32 1, %s2093_s25 }
   0x9   : > { %s111_s30 = sadd.s32 1, %s2077_s21  ;;  %p118_p1 = scmp.ne.s32.totalorder %s2077_s21, %s2073_s20 }
   0xa   : > { %s2956_s28 = smov (%p28_p0, %s27_s28), 0  ;;  %s2958_s29 = smov (!%p28_p0, %s34_s29), %s2093_s25 }
   0xb   : > { %s108_s6 = ssub.s32 %s2089_s24, %s2956_s28  ;;  %p119_p2 = scmp.eq.s32.totalorder %s2097_s26, 0 }
   0xc   : > { %p36_p3 = scmp.ge.s32.totalorder %s2958_s29, 2  ;;  %p109_p4 = scmp.eq.s32.totalorder %s108_s6, 0 }
   0xd   : > { %p120_p5 = por %p119_p2, %p118_p1  ;;  %s167_s7 = sadd.s32 1, %s2069_s19 }
   0xe   : > { %s2960_s29 = smov (%p36_p3, %s2958_s29), 0  ;;  %p177_p6 = scmp.ne.s32.totalorder %s2069_s19, %s2065_s18 }
   0xf   : > { %s2190_s8 = scalar_select %p109_p4, %s2077_s21, %s111_s30  }
  0x10   : > { %s160_s9 = ssub.s32 %s2093_s25, %s2960_s29  ;;  %p178_p7 = scmp.eq.s32.totalorder %s1693_s27, 7 }
  0x11   : > { %s164_s10 = sor.u32 %s160_s9, %s108_s6  ;;  %p1696_p10 = scmp.ge.s32.totalorder %s2097_s26, 8 }
  0x12   : > { %p165_p8 = scmp.eq.s32.totalorder %s164_s10, 0  ;;  %p2196_p9 = por %p178_p7, %p177_p6 }
  0x13   : > { %206 = sbr.rel (%p1696_p10) target bundleno = 68 (0x44), region = 24 }
  0x14   : > { %s2201_s12 = scalar_select %p165_p8, %s2069_s19, %s167_s7  }
  0x1a   : > { %223 = sbr.rel (!%p120_p5) target bundleno = 68 (0x44), region = 32  ;;  %s225_s13 = sand.u32 (%p120_p5), 1, %s2077_s21  }
  0x1b   : > { %s1761_s14 = sshll.u32 (%p120_p5), %s2089_s24, 3  ;;  %s1697_s15 = sshll.u32 (%p120_p5), %s225_s13, 8 }
  0x1c   : > { %s2946_s3 = sld [smem:[#allocation5_spill]] (%p120_p5)  ;;  %s2214_s30 = scalar_lea.vmem (%p120_p5), [#allocation3], %s1697_s15 }
  0x22   : > { %s2209_s27 = scalar_lea.vmem %s2946_s3, %s1761_s14 }
  0x23   : > { %v320_v0 = vld [vmem:[%s2209_s27] sm:$0xff] }
  0x24   : > { %v322_v1 = vld [vmem:[%s2209_s27 + $0x20] sm:$0xff]  ;;  %321 = vst [vmem:[%s2214_s30] sm:$0xff] %v320_v0 }
  0x25   : > { %v324_v2 = vld [vmem:[%s2209_s27 + $0x40] sm:$0xff]  ;;  %323 = vst [vmem:[%s2214_s30 + $0x8] sm:$0xff] %v322_v1 }
  0x26   : > { %325 = vst [vmem:[%s2214_s30 + $0x10] sm:$0xff] %v324_v2  ;;  %v326_v3 = vld [vmem:[%s2209_s27 + $0x60] sm:$0xff] }
  0x27   : > { %v328_v4 = vld [vmem:[%s2209_s27 + $0x80] sm:$0xff]  ;;  %327 = vst [vmem:[%s2214_s30 + $0x18] sm:$0xff] %v326_v3 }
  0x28   : > { %v330_v5 = vld [vmem:[%s2209_s27 + $0xa0] sm:$0xff]  ;;  %329 = vst [vmem:[%s2214_s30 + $0x20] sm:$0xff] %v328_v4 }
  0x29   : > { %331 = vst [vmem:[%s2214_s30 + $0x28] sm:$0xff] %v330_v5  ;;  %v332_v6 = vld [vmem:[%s2209_s27 + $0xc0] sm:$0xff] }
  0x2a   : > { %v334_v7 = vld [vmem:[%s2209_s27 + $0xe0] sm:$0xff]  ;;  %333 = vst [vmem:[%s2214_s30 + $0x30] sm:$0xff] %v332_v6 }
  0x2b   : > { %v336_v8 = vld [vmem:[%s2209_s27 + $0x100] sm:$0xff]  ;;  %335 = vst [vmem:[%s2214_s30 + $0x38] sm:$0xff] %v334_v7 }
  0x2c   : > { %337 = vst [vmem:[%s2214_s30 + $0x40] sm:$0xff] %v336_v8  ;;  %v338_v9 = vld [vmem:[%s2209_s27 + $0x120] sm:$0xff] }
  0x2d   : > { %v340_v10 = vld [vmem:[%s2209_s27 + $0x140] sm:$0xff]  ;;  %339 = vst [vmem:[%s2214_s30 + $0x48] sm:$0xff] %v338_v9 }
  0x2e   : > { %v342_v11 = vld [vmem:[%s2209_s27 + $0x160] sm:$0xff]  ;;  %341 = vst [vmem:[%s2214_s30 + $0x50] sm:$0xff] %v340_v10 }
  0x2f   : > { %343 = vst [vmem:[%s2214_s30 + $0x58] sm:$0xff] %v342_v11  ;;  %v344_v12 = vld [vmem:[%s2209_s27 + $0x180] sm:$0xff] }
  0x30   : > { %v346_v13 = vld [vmem:[%s2209_s27 + $0x1a0] sm:$0xff]  ;;  %345 = vst [vmem:[%s2214_s30 + $0x60] sm:$0xff] %v344_v12 }
  0x31   : > { %v348_v14 = vld [vmem:[%s2209_s27 + $0x1c0] sm:$0xff]  ;;  %347 = vst [vmem:[%s2214_s30 + $0x68] sm:$0xff] %v346_v13 }
  0x32   : > { %349 = vst [vmem:[%s2214_s30 + $0x70] sm:$0xff] %v348_v14  ;;  %v350_v15 = vld [vmem:[%s2209_s27 + $0x1e0] sm:$0xff] }
  0x33   : > { %v352_v16 = vld [vmem:[%s2209_s27 + $0x200] sm:$0xff]  ;;  %351 = vst [vmem:[%s2214_s30 + $0x78] sm:$0xff] %v350_v15 }
  0x34   : > { %v354_v17 = vld [vmem:[%s2209_s27 + $0x220] sm:$0xff]  ;;  %353 = vst [vmem:[%s2214_s30 + $0x80] sm:$0xff] %v352_v16 }
  0x35   : > { %355 = vst [vmem:[%s2214_s30 + $0x88] sm:$0xff] %v354_v17  ;;  %v356_v18 = vld [vmem:[%s2209_s27 + $0x240] sm:$0xff] }
  0x36   : > { %v358_v19 = vld [vmem:[%s2209_s27 + $0x260] sm:$0xff]  ;;  %357 = vst [vmem:[%s2214_s30 + $0x90] sm:$0xff] %v356_v18 }
  0x37   : > { %v360_v20 = vld [vmem:[%s2209_s27 + $0x280] sm:$0xff]  ;;  %359 = vst [vmem:[%s2214_s30 + $0x98] sm:$0xff] %v358_v19 }
  0x38   : > { %361 = vst [vmem:[%s2214_s30 + $0xa0] sm:$0xff] %v360_v20  ;;  %v362_v21 = vld [vmem:[%s2209_s27 + $0x2a0] sm:$0xff] }
  0x39   : > { %v364_v22 = vld [vmem:[%s2209_s27 + $0x2c0] sm:$0xff]  ;;  %363 = vst [vmem:[%s2214_s30 + $0xa8] sm:$0xff] %v362_v21 }
  0x3a   : > { %v366_v23 = vld [vmem:[%s2209_s27 + $0x2e0] sm:$0xff]  ;;  %365 = vst [vmem:[%s2214_s30 + $0xb0] sm:$0xff] %v364_v22 }
  0x3b   : > { %367 = vst [vmem:[%s2214_s30 + $0xb8] sm:$0xff] %v366_v23  ;;  %v368_v24 = vld [vmem:[%s2209_s27 + $0x300] sm:$0xff] }
  0x3c   : > { %v370_v25 = vld [vmem:[%s2209_s27 + $0x320] sm:$0xff]  ;;  %369 = vst [vmem:[%s2214_s30 + $0xc0] sm:$0xff] %v368_v24 }
  0x3d   : > { %v372_v26 = vld [vmem:[%s2209_s27 + $0x340] sm:$0xff]  ;;  %371 = vst [vmem:[%s2214_s30 + $0xc8] sm:$0xff] %v370_v25 }
  0x3e   : > { %373 = vst [vmem:[%s2214_s30 + $0xd0] sm:$0xff] %v372_v26  ;;  %v374_v27 = vld [vmem:[%s2209_s27 + $0x360] sm:$0xff] }
  0x3f   : > { %v376_v28 = vld [vmem:[%s2209_s27 + $0x380] sm:$0xff]  ;;  %375 = vst [vmem:[%s2214_s30 + $0xd8] sm:$0xff] %v374_v27 }
  0x40   : > { %v378_v29 = vld [vmem:[%s2209_s27 + $0x3a0] sm:$0xff]  ;;  %377 = vst [vmem:[%s2214_s30 + $0xe0] sm:$0xff] %v376_v28 }
  0x41   : > { %379 = vst [vmem:[%s2214_s30 + $0xe8] sm:$0xff] %v378_v29  ;;  %v380_v30 = vld [vmem:[%s2209_s27 + $0x3c0] sm:$0xff] }
  0x42   : > { %v382_v31 = vld [vmem:[%s2209_s27 + $0x3e0] sm:$0xff]  ;;  %381 = vst [vmem:[%s2214_s30 + $0xf0] sm:$0xff] %v380_v30 }
  0x43   : > { %383 = vst [vmem:[%s2214_s30 + $0xf8] sm:$0xff] %v382_v31 }
  0x44 PF: > { %p1700_p11 = scmp.ge.s32.totalorder %s2097_s26, 1  ;;  %p396_p12 = scmp.lt.s32.totalorder %s2097_s26, 9 }
  0x46   : > { %p397_p13 = pnand %p1700_p11, %p396_p12 }
  0x47   : > { %s403_s6 = sand.u32 (!%p397_p13), 1, %s2073_s20   ;;  %s440_s7 = sand.u32 (!%p397_p13), 1, %s2065_s18  }
  0x48   : > { %400 = sbr.rel (%p397_p13) target bundleno = 788 (0x314), region = 74  ;;  %s1701_s9 = sshll.u32 (!%p397_p13), %s403_s6, 8 }
  0x49   : > { %s1702_s10 = sshll.u32 (!%p397_p13), %s440_s7, 7  ;;  %p444_p0 = scmp.lt.s32.totalorder (!%p397_p13), %s2085_s23, 1 }
  0x4a   : > { %s2283_s13 = sshll.u32 (!%p397_p13), %s2081_s22, 1  ;;  %s2299_s7 = scalar_lea.vmem (!%p397_p13), [#allocation3], %s1701_s9 }
  0x4b   : > { %p456_p1 = scmp.lt.s32.totalorder (!%p397_p13), %s2283_s13, 7  ;;  %s2301_s3 = scalar_lea.vmem (!%p397_p13), [#allocation4], %s1702_s10 }
  0x4c   : > { %p1706_p2 = scmp.ne.s32.totalorder (!%p397_p13), %s2081_s22, 0 }
  0x4f   : > { %s445_s14 = scalar_select %p444_p0, %s2085_s23, 1 }
  0x50   : > { %s2288_s15 = scalar_select %p456_p1, %s2283_s13, 7 }
  0x51   : > { %s1762_s16 = sshll.u32 %s445_s14, 8  ;;  %465 = sbr.rel (%p1706_p2) target bundleno = 440 (0x1b8), region = 82 }
  0x52   : > { %s2293_s30 = scalar_lea.vmem %s2938_s0, %s1762_s16  ;;  %s458_s6 = scalar_lea.vmem %s2942_s4, %s2288_s15 }
  0x53   : > { %v2305_v32 = vld [vmem:[%s2293_s30] sm:$0xff] (!%p1706_p2)  ;;  %v2308_v33 = vld [vmem:[%s2293_s30 + $0x8] sm:$0xff] (!%p1706_p2)  ;;  %v2319_v37 = vld [vmem:[%s2293_s30 + $0x10] sm:$0xff] (!%p1706_p2) }
  0x54   : > { %v2311_v34 = vld [vmem:[%s2293_s30 + $0x20] sm:$0xff] (!%p1706_p2)  ;;  %v500_v35 = vadd.f32 (!%p1706_p2), %v2308_v33, %v2305_v32  ;;  %v2316_v36 = vld [vmem:[%s2293_s30 + $0x28] sm:$0xff] (!%p1706_p2)  ;;  %v2322_v38 = vld [vmem:[%s2293_s30 + $0x18] sm:$0xff] (!%p1706_p2) }
  0x55   : > { %v506_v39 = vadd.f32 (!%p1706_p2), %v2316_v36, %v2311_v34  ;;  %v2327_v40 = vld [vmem:[%s2293_s30 + $0x30] sm:$0xff] (!%p1706_p2)  ;;  %v2330_v41 = vld [vmem:[%s2293_s30 + $0x38] sm:$0xff] (!%p1706_p2)  ;;  %v503_v42 = vadd.f32 (!%p1706_p2), %v2322_v38, %v2319_v37  ;;  %v2337_v44 = vld [vmem:[%s2293_s30 + $0x40] sm:$0xff] (!%p1706_p2) }
  0x56   : > { %501 = vadd.xlane.f32.xlu0 (!%p1706_p2), %v500_v35  ;;  %v509_v43 = vadd.f32 (!%p1706_p2), %v2330_v41, %v2327_v40  ;;  %v2340_v45 = vld [vmem:[%s2293_s30 + $0x48] sm:$0xff] (!%p1706_p2)  ;;  %v2343_v46 = vld [vmem:[%s2293_s30 + $0x50] sm:$0xff] (!%p1706_p2)  ;;  %v2346_v47 = vld [vmem:[%s2293_s30 + $0x58] sm:$0xff] (!%p1706_p2) }
  0x57   : > { %507 = vadd.xlane.f32.xlu1 (!%p1706_p2), %v506_v39  ;;  %v512_v48 = vadd.f32 (!%p1706_p2), %v2340_v45, %v2337_v44  ;;  %v515_v49 = vadd.f32 (!%p1706_p2), %v2346_v47, %v2343_v46  ;;  %v2353_v50 = vld [vmem:[%s2293_s30 + $0x60] sm:$0xff] (!%p1706_p2)  ;;  %v2356_v51 = vld [vmem:[%s2293_s30 + $0x68] sm:$0xff] (!%p1706_p2)  ;;  %v2359_v52 = vld [vmem:[%s2293_s30 + $0x70] sm:$0xff] (!%p1706_p2) }
  0x58   : > { %v2362_v53 = vld [vmem:[%s2293_s30 + $0x78] sm:$0xff]  ;;  %v518_v54 = vadd.f32 %v2356_v51, %v2353_v50  ;;  %v2369_v56 = vld [vmem:[%s2293_s30 + $0x80] sm:$0xff]  ;;  %v2372_v57 = vld [vmem:[%s2293_s30 + $0x88] sm:$0xff] }
  0x59   : > { %v521_v55 = vadd.f32 %v2362_v53, %v2359_v52  ;;  %v2375_v58 = vld [vmem:[%s2293_s30 + $0x90] sm:$0xff]  ;;  %v2378_v59 = vld [vmem:[%s2293_s30 + $0x98] sm:$0xff]  ;;  %v524_v60 = vadd.f32 %v2372_v57, %v2369_v56  ;;  %v2385_v62 = vld [vmem:[%s2293_s30 + $0xa0] sm:$0xff] }
  0x5a   : > { %504 = vadd.xlane.f32.xlu0 %v503_v42  ;;  %v527_v61 = vadd.f32 %v2378_v59, %v2375_v58  ;;  %v2388_v63 = vld [vmem:[%s2293_s30 + $0xa8] sm:$0xff]  ;;  %v2391_v0 = vld [vmem:[%s2293_s30 + $0xb0] sm:$0xff]  ;;  %v2394_v1 = vld [vmem:[%s2293_s30 + $0xb8] sm:$0xff] }
  0x5b   : > { %510 = vadd.xlane.f32.xlu1 %v509_v43  ;;  %v530_v2 = vadd.f32 %v2388_v63, %v2385_v62  ;;  %v533_v3 = vadd.f32 %v2394_v1, %v2391_v0  ;;  %v2401_v4 = vld [vmem:[%s2293_s30 + $0xc0] sm:$0xff]  ;;  %v2404_v5 = vld [vmem:[%s2293_s30 + $0xc8] sm:$0xff]  ;;  %v2407_v6 = vld [vmem:[%s2293_s30 + $0xd0] sm:$0xff] }
  0x5c   : > { %v2410_v7 = vld [vmem:[%s2293_s30 + $0xd8] sm:$0xff]  ;;  %v536_v8 = vadd.f32 %v2404_v5, %v2401_v4  ;;  %v2417_v10 = vld [vmem:[%s2293_s30 + $0xe0] sm:$0xff]  ;;  %v2420_v11 = vld [vmem:[%s2293_s30 + $0xe8] sm:$0xff] }
  0x5d   : > { %v539_v9 = vadd.f32 %v2410_v7, %v2407_v6  ;;  %v2423_v12 = vld [vmem:[%s2293_s30 + $0xf0] sm:$0xff]  ;;  %v2426_v13 = vld [vmem:[%s2293_s30 + $0xf8] sm:$0xff]  ;;  %v542_v14 = vadd.f32 %v2420_v11, %v2417_v10 }
  0x5e   : > { %513 = vadd.xlane.f32.xlu0 %v512_v48  ;;  %v545_v15 = vadd.f32 %v2426_v13, %v2423_v12 }
  0x5f   : > { %516 = vadd.xlane.f32.xlu1 %v515_v49 }
  0x62   : > { %519 = vadd.xlane.f32.xlu0 %v518_v54 }
  0x63   : > { %522 = vadd.xlane.f32.xlu1 %v521_v55 }
  0x66   : > { %525 = vadd.xlane.f32.xlu0 %v524_v60 }
  0x67   : > { %528 = vadd.xlane.f32.xlu1 %v527_v61 }
  0x6a   : > { %531 = vadd.xlane.f32.xlu0 %v530_v2 }
  0x6b   : > { %534 = vadd.xlane.f32.xlu1 %v533_v3 }
  0x6e   : > { %537 = vadd.xlane.f32.xlu0 %v536_v8 }
  0x6f   : > { %540 = vadd.xlane.f32.xlu1 %v539_v9 }
  0x72   : > { %543 = vadd.xlane.f32.xlu0 %v542_v14 }
  0x73   : > { %546 = vadd.xlane.f32.xlu1 %v545_v15 }
  0xe3   : > { %v502_v16 = vpop.xlane.xlu0 %501 }
  0xe4   : > { %v549_v17 = vmul.f32 0.00390625, %v502_v16  ;;  %v508_v18 = vpop.xlane.xlu1 %507 }
  0xe5   : > { %v551_v19 = vmul.f32 0.00390625, %v508_v18 }
  0xe6   : > { %v2433_v20 = vsub.f32 %v2305_v32, %v549_v17  ;;  %v2436_v21 = vsub.f32 %v2308_v33, %v549_v17 }
  0xe7   : > { %v2439_v22 = vsub.f32 %v2311_v34, %v551_v19  ;;  %v2442_v23 = vsub.f32 %v2316_v36, %v551_v19  ;;  %v505_v24 = vpop.xlane.xlu0 %504 }
  0xe8   : > { %v550_v25 = vmul.f32 0.00390625, %v505_v24  ;;  %v511_v26 = vpop.xlane.xlu1 %510  ;;  %v597_v27 = vmul.f32 %v2433_v20, %v2433_v20  ;;  %v598_v28 = vmul.f32 %v2436_v21, %v2436_v21 }
  0xe9   : > { %v552_v29 = vmul.f32 0.00390625, %v511_v26  ;;  %v601_v30 = vmul.f32 %v2439_v22, %v2439_v22  ;;  %v602_v31 = vmul.f32 %v2442_v23, %v2442_v23 }
  0xea   : > { %v2453_v32 = vsub.f32 %v2319_v37, %v550_v25  ;;  %v2456_v33 = vsub.f32 %v2322_v38, %v550_v25  ;;  %v629_v34 = vadd.f32 %v598_v28, %v597_v27 }
  0xeb   : > { %v2459_v35 = vsub.f32 %v2327_v40, %v552_v29  ;;  %v2462_v36 = vsub.f32 %v2330_v41, %v552_v29  ;;  %v514_v39 = vpop.xlane.xlu0 %513  ;;  %v635_v48 = vadd.f32 %v602_v31, %v601_v30 }
  0xec   : > { %v553_v42 = vmul.f32 0.00390625, %v514_v39  ;;  %630 = vadd.xlane.f32.xlu0 %v629_v34  ;;  %v517_v43 = vpop.xlane.xlu1 %516  ;;  %v599_v49 = vmul.f32 %v2453_v32, %v2453_v32  ;;  %v600_v37 = vmul.f32 %v2456_v33, %v2456_v33 }
  0xed   : > { %v554_v38 = vmul.f32 0.00390625, %v517_v43  ;;  %v603_v54 = vmul.f32 %v2459_v35, %v2459_v35  ;;  %v604_v40 = vmul.f32 %v2462_v36, %v2462_v36 }
  0xee   : > { %v2473_v41 = vsub.f32 %v2337_v44, %v553_v42  ;;  %v2476_v55 = vsub.f32 %v2340_v45, %v553_v42  ;;  %v632_v60 = vadd.f32 %v600_v37, %v599_v49 }
  0xef   : > { %v2479_v61 = vsub.f32 %v2343_v46, %v554_v38  ;;  %v2482_v2 = vsub.f32 %v2346_v47, %v554_v38  ;;  %v520_v3 = vpop.xlane.xlu0 %519  ;;  %v638_v14 = vadd.f32 %v604_v40, %v603_v54 }
  0xf0   : > { %v555_v8 = vmul.f32 0.00390625, %v520_v3  ;;  %636 = vadd.xlane.f32.xlu0 %v635_v48  ;;  %633 = vadd.xlane.f32.xlu1 %v632_v60  ;;  %v523_v9 = vpop.xlane.xlu1 %522  ;;  %v605_v44 = vmul.f32 %v2473_v41, %v2473_v41  ;;  %v606_v45 = vmul.f32 %v2476_v55, %v2476_v55 }
  0xf1   : > { %v556_v15 = vmul.f32 0.00390625, %v523_v9  ;;  %v607_v46 = vmul.f32 %v2479_v61, %v2479_v61  ;;  %v608_v47 = vmul.f32 %v2482_v2, %v2482_v2 }
  0xf2   : > { %v2493_v16 = vsub.f32 %v2353_v50, %v555_v8  ;;  %v2496_v17 = vsub.f32 %v2356_v51, %v555_v8  ;;  %v641_v18 = vadd.f32 %v606_v45, %v605_v44 }
  0xf3   : > { %v2499_v19 = vsub.f32 %v2359_v52, %v556_v15  ;;  %v2502_v24 = vsub.f32 %v2362_v53, %v556_v15  ;;  %v526_v25 = vpop.xlane.xlu0 %525  ;;  %v644_v28 = vadd.f32 %v608_v47, %v607_v46 }
  0xf4   : > { %v557_v26 = vmul.f32 0.00390625, %v526_v25  ;;  %639 = vadd.xlane.f32.xlu1 %v638_v14  ;;  %642 = vadd.xlane.f32.xlu0 %v641_v18  ;;  %v529_v27 = vpop.xlane.xlu1 %528  ;;  %v609_v50 = vmul.f32 %v2493_v16, %v2493_v16  ;;  %v610_v51 = vmul.f32 %v2496_v17, %v2496_v17 }
  0xf5   : > { %v558_v29 = vmul.f32 0.00390625, %v529_v27  ;;  %v611_v52 = vmul.f32 %v2499_v19, %v2499_v19  ;;  %v612_v53 = vmul.f32 %v2502_v24, %v2502_v24 }
  0xf6   : > { %v2513_v30 = vsub.f32 %v2369_v56, %v557_v26  ;;  %v2516_v31 = vsub.f32 %v2372_v57, %v557_v26  ;;  %v647_v34 = vadd.f32 %v610_v51, %v609_v50 }
  0xf7   : > { %v2519_v39 = vsub.f32 %v2375_v58, %v558_v29  ;;  %v2522_v42 = vsub.f32 %v2378_v59, %v558_v29  ;;  %v532_v43 = vpop.xlane.xlu0 %531  ;;  %v650_v37 = vadd.f32 %v612_v53, %v611_v52 }
  0xf8   : > { %v559_v48 = vmul.f32 0.00390625, %v532_v43  ;;  %645 = vadd.xlane.f32.xlu1 %v644_v28  ;;  %648 = vadd.xlane.f32.xlu0 %v647_v34  ;;  %v535_v49 = vpop.xlane.xlu1 %534  ;;  %v613_v56 = vmul.f32 %v2513_v30, %v2513_v30  ;;  %v614_v57 = vmul.f32 %v2516_v31, %v2516_v31 }
  0xf9   : > { %v560_v38 = vmul.f32 0.00390625, %v535_v49  ;;  %v615_v58 = vmul.f32 %v2519_v39, %v2519_v39  ;;  %v616_v59 = vmul.f32 %v2522_v42, %v2522_v42 }
  0xfa   : > { %v2533_v54 = vsub.f32 %v2385_v62, %v559_v48  ;;  %v2536_v40 = vsub.f32 %v2388_v63, %v559_v48  ;;  %v653_v60 = vadd.f32 %v614_v57, %v613_v56 }
  0xfb   : > { %v2539_v3 = vsub.f32 %v2391_v0, %v560_v38  ;;  %v2542_v8 = vsub.f32 %v2394_v1, %v560_v38  ;;  %v538_v9 = vpop.xlane.xlu0 %537  ;;  %v656_v45 = vadd.f32 %v616_v59, %v615_v58  ;;  %v758_v58 = vlaneseq }
  0xfc   : > { %v561_v14 = vmul.f32 0.00390625, %v538_v9  ;;  %651 = vadd.xlane.f32.xlu1 %v650_v37  ;;  %654 = vadd.xlane.f32.xlu0 %v653_v60  ;;  %v541_v44 = vpop.xlane.xlu1 %540  ;;  %v617_v62 = vmul.f32 %v2533_v54, %v2533_v54  ;;  %v618_v63 = vmul.f32 %v2536_v40, %v2536_v40 }
  0xfd   : > { %v562_v15 = vmul.f32 0.00390625, %v541_v44  ;;  %v619_v0 = vmul.f32 %v2539_v3, %v2539_v3  ;;  %v620_v1 = vmul.f32 %v2542_v8, %v2542_v8 }
  0xfe   : > { %v2553_v46 = vsub.f32 %v2401_v4, %v561_v14  ;;  %v2556_v47 = vsub.f32 %v2404_v5, %v561_v14  ;;  %v659_v18 = vadd.f32 %v618_v63, %v617_v62 }
  0xff   : > { %v2559_v25 = vsub.f32 %v2407_v6, %v562_v15  ;;  %v2562_v26 = vsub.f32 %v2410_v7, %v562_v15  ;;  %v544_v27 = vpop.xlane.xlu0 %543  ;;  %v662_v51 = vadd.f32 %v620_v1, %v619_v0 }
 0x100   : > { %v563_v28 = vmul.f32 0.00390625, %v544_v27  ;;  %657 = vadd.xlane.f32.xlu1 %v656_v45  ;;  %660 = vadd.xlane.f32.xlu0 %v659_v18  ;;  %v547_v50 = vpop.xlane.xlu1 %546  ;;  %v621_v4 = vmul.f32 %v2553_v46, %v2553_v46  ;;  %v622_v5 = vmul.f32 %v2556_v47, %v2556_v47  ;;  %v759_v45 = vshrl.u32 %v758_v58, 7 }
 0x101   : > { %v564_v29 = vmul.f32 0.00390625, %v547_v50  ;;  %v623_v6 = vmul.f32 %v2559_v25, %v2559_v25  ;;  %v624_v7 = vmul.f32 %v2562_v26, %v2562_v26  ;;  %v498_v50 = vld [vmem:[%s2939_s1] sm:$0x3] }
 0x102   : > { %v2573_v52 = vsub.f32 %v2417_v10, %v563_v28  ;;  %v2576_v53 = vsub.f32 %v2420_v11, %v563_v28  ;;  %v665_v34 = vadd.f32 %v622_v5, %v621_v4  ;;  %v760_v27 = vsub.s32 0, %v759_v45 }
 0x103   : > { %v2579_v43 = vsub.f32 %v2423_v12, %v564_v29  ;;  %v2582_v48 = vsub.f32 %v2426_v13, %v564_v29  ;;  %v668_v49 = vadd.f32 %v624_v7, %v623_v6  ;;  %v764_v28 = vsub.s32 1, %v759_v45  ;;  %v499_v6 = vld [vmem:[%s2940_s2] sm:$0x3] }
 0x104   : > { %663 = vadd.xlane.f32.xlu1 %v662_v51  ;;  %666 = vadd.xlane.f32.xlu0 %v665_v34  ;;  %v625_v37 = vmul.f32 %v2573_v52, %v2573_v52  ;;  %v626_v10 = vmul.f32 %v2576_v53, %v2576_v53 }
 0x105   : > { %v627_v11 = vmul.f32 %v2579_v43, %v2579_v43  ;;  %v628_v56 = vmul.f32 %v2582_v48, %v2582_v48 }
 0x106   : > { %v671_v12 = vadd.f32 %v626_v10, %v625_v37  ;;  %v2600_v37 = vrot.slane %v498_v50, %v764_v28 }
 0x107   : > { %v674_v13 = vadd.f32 %v628_v56, %v627_v11 }
 0x108   : > { %669 = vadd.xlane.f32.xlu1 %v668_v49  ;;  %672 = vadd.xlane.f32.xlu0 %v671_v12  ;;  %v2598_v49 = vrot.slane %v498_v50, %v760_v27  ;;  %v2602_v12 = vrot.slane %v499_v6, %v760_v27 }
 0x10c   : > { %675 = vadd.xlane.f32.xlu1 %v674_v13 }
 0x179   : > { %v631_v57 = vpop.xlane.xlu0 %630 }
 0x17a   : > { %v677_v38 = vmul.f32 0.00390625, %v631_v57 }
 0x17c   : > { %v693_v59 = vadd.f32 1e-05, %v677_v38 }
 0x17d   : > { %v634_v60 = vpop.xlane.xlu1 %633  ;;  %v637_v9 = vpop.xlane.xlu0 %636 }
 0x17e   : > { %1883 = vrsqrt.f32 %v693_v59  ;;  %v678_v14 = vmul.f32 0.00390625, %v634_v60  ;;  %v679_v44 = vmul.f32 0.00390625, %v637_v9  ;;  %v2606_v9 = vrot.slane %v499_v6, %v764_v28 }
 0x180   : > { %v694_v62 = vadd.f32 1e-05, %v678_v14  ;;  %v695_v63 = vadd.f32 1e-05, %v679_v44 }
 0x181   : > { %v640_v15 = vpop.xlane.xlu1 %639  ;;  %v643_v0 = vpop.xlane.xlu0 %642 }
 0x182   : > { %1885 = vrsqrt.f32 %v694_v62  ;;  %v680_v1 = vmul.f32 0.00390625, %v640_v15  ;;  %v681_v18 = vmul.f32 0.00390625, %v643_v0 }
 0x183   : > { %1887 = vrsqrt.f32 %v695_v63 }
 0x184   : > { %v696_v51 = vadd.f32 1e-05, %v680_v1  ;;  %v697_v4 = vadd.f32 1e-05, %v681_v18 }
 0x185   : > { %v646_v5 = vpop.xlane.xlu1 %645  ;;  %v649_v29 = vpop.xlane.xlu0 %648 }
 0x186   : > { %1889 = vrsqrt.f32 %v696_v51  ;;  %v682_v7 = vmul.f32 0.00390625, %v646_v5  ;;  %v683_v34 = vmul.f32 0.00390625, %v649_v29 }
 0x187   : > { %1891 = vrsqrt.f32 %v697_v4 }
 0x188   : > { %v1884_v10 = vpop.eup %1883  ;;  %v698_v11 = vadd.f32 1e-05, %v682_v7  ;;  %v699_v56 = vadd.f32 1e-05, %v683_v34 }
 0x189   : > { %v725_v13 = vmul.f32 %v1884_v10, %v2433_v20  ;;  %v726_v57 = vmul.f32 %v1884_v10, %v2436_v21  ;;  %v652_v38 = vpop.xlane.xlu1 %651  ;;  %v655_v58 = vpop.xlane.xlu0 %654 }
 0x18a   : > { %1893 = vrsqrt.f32 %v698_v11  ;;  %v684_v59 = vmul.f32 0.00390625, %v652_v38  ;;  %v685_v60 = vmul.f32 0.00390625, %v655_v58 }
 0x18b   : > { %v768_v14 = vmul.f32 %v2598_v49, %v725_v13  ;;  %v769_v44 = vmul.f32 %v2600_v37, %v726_v57  ;;  %1895 = vrsqrt.f32 %v699_v56 }
 0x18c   : > { %v1886_v45 = vpop.eup %1885  ;;  %v700_v62 = vadd.f32 1e-05, %v684_v59  ;;  %v701_v63 = vadd.f32 1e-05, %v685_v60 }
 0x18d   : > { %v1888_v15 = vpop.eup %1887  ;;  %v811_v20 = vadd.f32 %v2602_v12, %v768_v14  ;;  %v727_v21 = vmul.f32 %v1886_v45, %v2453_v32  ;;  %v728_v0 = vmul.f32 %v1886_v45, %v2456_v33  ;;  %v658_v1 = vpop.xlane.xlu1 %657  ;;  %v812_v51 = vadd.f32 %v2606_v9, %v769_v44 }
 0x18e   : > { %v661_v18 = vpop.xlane.xlu0 %660  ;;  %v729_v27 = vmul.f32 %v1888_v15, %v2439_v22  ;;  %v730_v28 = vmul.f32 %v1888_v15, %v2442_v23  ;;  %1897 = vrsqrt.f32 %v700_v62  ;;  %v686_v50 = vmul.f32 0.00390625, %v658_v1 }
 0x18f   : > { %v770_v4 = vmul.f32 %v2598_v49, %v727_v21  ;;  %v771_v5 = vmul.f32 %v2600_v37, %v728_v0  ;;  %1899 = vrsqrt.f32 %v701_v63  ;;  %v687_v7 = vmul.f32 0.00390625, %v661_v18 }
 0x190   : > { %v1890_v29 = vpop.eup %1889  ;;  %v772_v32 = vmul.f32 %v2598_v49, %v729_v27  ;;  %v773_v33 = vmul.f32 %v2600_v37, %v730_v28  ;;  %v702_v6 = vadd.f32 1e-05, %v686_v50 }
 0x191   : > { %v1892_v34 = vpop.eup %1891  ;;  %v813_v22 = vadd.f32 %v2602_v12, %v770_v4  ;;  %v814_v23 = vadd.f32 %v2606_v9, %v771_v5  ;;  %v731_v10 = vmul.f32 %v1890_v29, %v2459_v35  ;;  %v732_v11 = vmul.f32 %v1890_v29, %v2462_v36  ;;  %v664_v56 = vpop.xlane.xlu1 %663 }
 0x192   : > { %v815_v13 = vadd.f32 %v2602_v12, %v772_v32  ;;  %v816_v57 = vadd.f32 %v2606_v9, %v773_v33  ;;  %v733_v38 = vmul.f32 %v1892_v34, %v2473_v41  ;;  %v734_v58 = vmul.f32 %v1892_v34, %v2476_v55  ;;  %v667_v63 = vpop.xlane.xlu0 %666 }
 0x193   : > { %v843_v59 = vpack.c.bf16 %v813_v22, %v811_v20  ;;  %v844_v60 = vpack.c.bf16 %v814_v23, %v812_v51  ;;  %v774_v14 = vmul.f32 %v2598_v49, %v731_v10  ;;  %v775_v44 = vmul.f32 %v2600_v37, %v732_v11 }
 0x194   : > { %v1894_v45 = vpop.eup %1893  ;;  %v776_v35 = vmul.f32 %v2598_v49, %v733_v38  ;;  %v777_v36 = vmul.f32 %v2600_v37, %v734_v58  ;;  %1901 = vrsqrt.f32 %v702_v6  ;;  %v703_v62 = vadd.f32 1e-05, %v687_v7 }
 0x195   : > { %v1896_v15 = vpop.eup %1895  ;;  %859 = vst [vmem:[#allocation2] sm:$0xff] %v843_v59  ;;  %860 = vst [vmem:[#allocation2 + $0x8] sm:$0xff] %v844_v60  ;;  %v817_v41 = vadd.f32 %v2602_v12, %v774_v14  ;;  %v818_v55 = vadd.f32 %v2606_v9, %v775_v44  ;;  %v735_v20 = vmul.f32 %v1894_v45, %v2479_v61  ;;  %v670_v5 = vpop.xlane.xlu1 %669  ;;  %v688_v32 = vmul.f32 0.00390625, %v664_v56 }
 0x196   : > { %v736_v21 = vmul.f32 %v1894_v45, %v2482_v2  ;;  %v819_v0 = vadd.f32 %v2602_v12, %v776_v35  ;;  %v820_v1 = vadd.f32 %v2606_v9, %v777_v36  ;;  %v737_v18 = vmul.f32 %v1896_v15, %v2493_v16  ;;  %v673_v23 = vpop.xlane.xlu0 %672 }
 0x197   : > { %v738_v27 = vmul.f32 %v1896_v15, %v2496_v17  ;;  %v845_v28 = vpack.c.bf16 %v817_v41, %v815_v13  ;;  %v846_v50 = vpack.c.bf16 %v818_v55, %v816_v57  ;;  %v778_v51 = vmul.f32 %v2598_v49, %v735_v20 }
 0x198   : > { %v779_v4 = vmul.f32 %v2600_v37, %v736_v21  ;;  %v1898_v29 = vpop.eup %1897  ;;  %v780_v61 = vmul.f32 %v2598_v49, %v737_v18  ;;  %1903 = vrsqrt.f32 %v703_v62  ;;  %v704_v58 = vadd.f32 1e-05, %v688_v32 }
 0x199   : > { %v781_v2 = vmul.f32 %v2600_v37, %v738_v27  ;;  %v1900_v33 = vpop.eup %1899  ;;  %861 = vst [vmem:[#allocation2 + $0x10] sm:$0xff] %v845_v28  ;;  %862 = vst [vmem:[#allocation2 + $0x18] sm:$0xff] %v846_v50  ;;  %v821_v16 = vadd.f32 %v2602_v12, %v778_v51  ;;  %v739_v6 = vmul.f32 %v1898_v29, %v2499_v19  ;;  %v689_v59 = vmul.f32 0.00390625, %v667_v63  ;;  %v676_v60 = vpop.xlane.xlu1 %675 }
 0x19a   : > { %v822_v17 = vadd.f32 %v2606_v9, %v779_v4  ;;  %v740_v7 = vmul.f32 %v1898_v29, %v2502_v24  ;;  %v741_v34 = vmul.f32 %v1900_v33, %v2513_v30  ;;  %v742_v22 = vmul.f32 %v1900_v33, %v2516_v31 }
 0x19b   : > { %v847_v10 = vpack.c.bf16 %v821_v16, %v819_v0  ;;  %v782_v56 = vmul.f32 %v2598_v49, %v739_v6  ;;  %v823_v57 = vadd.f32 %v2602_v12, %v780_v61  ;;  %v824_v38 = vadd.f32 %v2606_v9, %v781_v2 }
 0x19c   : > { %v848_v11 = vpack.c.bf16 %v822_v17, %v820_v1  ;;  %v783_v13 = vmul.f32 %v2600_v37, %v740_v7  ;;  %v690_v30 = vmul.f32 0.00390625, %v670_v5  ;;  %v691_v31 = vmul.f32 0.00390625, %v673_v23 }
 0x19d   : > { %863 = vst [vmem:[#allocation2 + $0x20] sm:$0xff] %v847_v10  ;;  %v825_v19 = vadd.f32 %v2602_v12, %v782_v56  ;;  %v784_v44 = vmul.f32 %v2598_v49, %v741_v34  ;;  %v785_v45 = vmul.f32 %v2600_v37, %v742_v22  ;;  %1905 = vrsqrt.f32 %v704_v58 }
 0x19e   : > { %864 = vst [vmem:[#allocation2 + $0x28] sm:$0xff] %v848_v11  ;;  %v826_v24 = vadd.f32 %v2606_v9, %v783_v13  ;;  %v1902_v14 = vpop.eup %1901  ;;  %v705_v35 = vadd.f32 1e-05, %v689_v59  ;;  %v706_v41 = vadd.f32 1e-05, %v690_v30  ;;  %v692_v20 = vmul.f32 0.00390625, %v676_v60 }
 0x19f   : > { %v849_v36 = vpack.c.bf16 %v825_v19, %v823_v57  ;;  %v743_v63 = vmul.f32 %v1902_v14, %v2519_v39  ;;  %v744_v15 = vmul.f32 %v1902_v14, %v2522_v42  ;;  %v707_v55 = vadd.f32 1e-05, %v691_v31 }
 0x1a0   : > { %v850_v62 = vpack.c.bf16 %v826_v24, %v824_v38  ;;  %1907 = vrsqrt.f32 %v705_v35  ;;  %v708_v18 = vadd.f32 1e-05, %v692_v20  ;;  %v827_v27 = vadd.f32 %v2602_v12, %v784_v44 }
 0x1a1   : > { %865 = vst [vmem:[#allocation2 + $0x30] sm:$0xff] %v849_v36  ;;  %v786_v21 = vmul.f32 %v2598_v49, %v743_v63  ;;  %v787_v0 = vmul.f32 %v2600_v37, %v744_v15  ;;  %1909 = vrsqrt.f32 %v706_v41  ;;  %v828_v28 = vadd.f32 %v2606_v9, %v785_v45 }
 0x1a2   : > { %866 = vst [vmem:[#allocation2 + $0x38] sm:$0xff] %v850_v62  ;;  %v1904_v1 = vpop.eup %1903  ;;  %1911 = vrsqrt.f32 %v707_v55 }
 0x1a3   : > { %v829_v39 = vadd.f32 %v2602_v12, %v786_v21  ;;  %v830_v42 = vadd.f32 %v2606_v9, %v787_v0  ;;  %v745_v50 = vmul.f32 %v1904_v1, %v2533_v54  ;;  %v746_v51 = vmul.f32 %v1904_v1, %v2536_v40 }
 0x1a4   : > { %1913 = vrsqrt.f32 %v708_v18 }
 0x1a5   : > { %v851_v4 = vpack.c.bf16 %v829_v39, %v827_v27  ;;  %v852_v5 = vpack.c.bf16 %v830_v42, %v828_v28  ;;  %v788_v61 = vmul.f32 %v2598_v49, %v745_v50  ;;  %v789_v2 = vmul.f32 %v2600_v37, %v746_v51 }
 0x1a7   : > { %867 = vst [vmem:[#allocation2 + $0x40] sm:$0xff] %v851_v4  ;;  %868 = vst [vmem:[#allocation2 + $0x48] sm:$0xff] %v852_v5  ;;  %v1906_v29 = vpop.eup %1905  ;;  %v831_v34 = vadd.f32 %v2602_v12, %v788_v61  ;;  %v832_v22 = vadd.f32 %v2606_v9, %v789_v2 }
 0x1a8   : > { %v747_v32 = vmul.f32 %v1906_v29, %v2539_v3  ;;  %v748_v33 = vmul.f32 %v1906_v29, %v2542_v8 }
 0x1aa   : > { %v1908_v16 = vpop.eup %1907  ;;  %v790_v54 = vmul.f32 %v2598_v49, %v747_v32  ;;  %v791_v40 = vmul.f32 %v2600_v37, %v748_v33 }
 0x1ab   : > { %v749_v17 = vmul.f32 %v1908_v16, %v2553_v46  ;;  %v750_v6 = vmul.f32 %v1908_v16, %v2556_v47  ;;  %v1910_v7 = vpop.eup %1909 }
 0x1ac   : > { %v833_v23 = vadd.f32 %v2602_v12, %v790_v54  ;;  %v834_v3 = vadd.f32 %v2606_v9, %v791_v40  ;;  %v1912_v11 = vpop.eup %1911  ;;  %v751_v56 = vmul.f32 %v1910_v7, %v2559_v25  ;;  %v752_v46 = vmul.f32 %v1910_v7, %v2562_v26 }
 0x1ad   : > { %v792_v8 = vmul.f32 %v2598_v49, %v749_v17  ;;  %v793_v10 = vmul.f32 %v2600_v37, %v750_v6  ;;  %v753_v59 = vmul.f32 %v1912_v11, %v2573_v52  ;;  %v754_v19 = vmul.f32 %v1912_v11, %v2576_v53 }
 0x1ae   : > { %v853_v13 = vpack.c.bf16 %v833_v23, %v831_v34  ;;  %v854_v47 = vpack.c.bf16 %v834_v3, %v832_v22  ;;  %v1914_v57 = vpop.eup %1913  ;;  %v794_v38 = vmul.f32 %v2598_v49, %v751_v56  ;;  %v795_v58 = vmul.f32 %v2600_v37, %v752_v46 }
 0x1af   : > { %v835_v24 = vadd.f32 %v2602_v12, %v792_v8  ;;  %v836_v30 = vadd.f32 %v2606_v9, %v793_v10  ;;  %v755_v25 = vmul.f32 %v1914_v57, %v2579_v43  ;;  %v756_v26 = vmul.f32 %v1914_v57, %v2582_v48 }
 0x1b0   : > { %869 = vst [vmem:[#allocation2 + $0x50] sm:$0xff] %v853_v13  ;;  %870 = vst [vmem:[#allocation2 + $0x58] sm:$0xff] %v854_v47  ;;  %v837_v31 = vadd.f32 %v2602_v12, %v794_v38  ;;  %v838_v60 = vadd.f32 %v2606_v9, %v795_v58  ;;  %v796_v14 = vmul.f32 %v2598_v49, %v753_v59 }
 0x1b1   : > { %v797_v52 = vmul.f32 %v2600_v37, %v754_v19  ;;  %v798_v53 = vmul.f32 %v2598_v49, %v755_v25  ;;  %v799_v44 = vmul.f32 %v2600_v37, %v756_v26 }
 0x1b2   : > { %v855_v45 = vpack.c.bf16 %v837_v31, %v835_v24  ;;  %v856_v35 = vpack.c.bf16 %v838_v60, %v836_v30  ;;  %v839_v36 = vadd.f32 %v2602_v12, %v796_v14 }
 0x1b3   : > { %v840_v43 = vadd.f32 %v2606_v9, %v797_v52  ;;  %v841_v48 = vadd.f32 %v2602_v12, %v798_v53  ;;  %v842_v62 = vadd.f32 %v2606_v9, %v799_v44 }
 0x1b4   : > { %871 = vst [vmem:[#allocation2 + $0x60] sm:$0xff] %v855_v45  ;;  %872 = vst [vmem:[#allocation2 + $0x68] sm:$0xff] %v856_v35 }
 0x1b5   : > { %v857_v63 = vpack.c.bf16 %v841_v48, %v839_v36  ;;  %v858_v15 = vpack.c.bf16 %v842_v62, %v840_v43 }
 0x1b7   : > { %873 = vst [vmem:[#allocation2 + $0x70] sm:$0xff] %v857_v63  ;;  %874 = vst [vmem:[#allocation2 + $0x78] sm:$0xff] %v858_v15 }
 0x1b8 PF: > { %v1915_v49 = vld [vmem:[%s2299_s7 + $0x4] ss:$8 sps:$4 sm:$0xff]   ;;  %v1917_v37 = vld [vmem:[%s2299_s7] ss:$8 sps:$4 sm:$0xff]   ;;  %v1918_v12 = vld [vmem:[%s2299_s7 + $0x14] ss:$8 sps:$4 sm:$0xff]   ;;  %v925_v25 = vlaneseq }
 0x1b9   : > { %1095 = vmatprep.subr.bf16.mxu0 %v1915_v49  ;;  %1779 = vmatprep.subr.bf16.mxu1 %v1915_v49  ;;  %v1920_v9 = vld [vmem:[%s2299_s7 + $0x10] ss:$8 sps:$4 sm:$0xff]   ;;  %v1921_v41 = vld [vmem:[%s2299_s7 + $0x24] ss:$8 sps:$4 sm:$0xff]   ;;  %v1923_v55 = vld [vmem:[%s2299_s7 + $0x20] ss:$8 sps:$4 sm:$0xff]  }
 0x1ba   : > { %1096 = vmatpush1.bf16.msra.mxu0 %v1917_v37  ;;  %1795 = vmatpush1.bf16.msra.mxu1 %v1917_v37  ;;  %v1924_v20 = vld [vmem:[%s2299_s7 + $0x34] ss:$8 sps:$4 sm:$0xff]   ;;  %v1926_v21 = vld [vmem:[%s2299_s7 + $0x30] ss:$8 sps:$4 sm:$0xff]   ;;  %v1927_v0 = vld [vmem:[%s2299_s7 + $0x44] ss:$8 sps:$4 sm:$0xff]  }
 0x1bb   : > { %1097 = vmatprep.subr.bf16.mxu0 %v1918_v12  ;;  %1780 = vmatprep.subr.bf16.mxu1 %v1918_v12  ;;  %v1929_v1 = vld [vmem:[%s2299_s7 + $0x40] ss:$8 sps:$4 sm:$0xff]   ;;  %v1930_v18 = vld [vmem:[%s2299_s7 + $0x54] ss:$8 sps:$4 sm:$0xff]   ;;  %v1932_v27 = vld [vmem:[%s2299_s7 + $0x50] ss:$8 sps:$4 sm:$0xff]  }
 0x1bc   : > { %v1933_v28 = vld [vmem:[%s2299_s7 + $0x64] ss:$8 sps:$4 sm:$0xff]   ;;  %v1935_v50 = vld [vmem:[%s2299_s7 + $0x60] ss:$8 sps:$4 sm:$0xff]   ;;  %v1936_v51 = vld [vmem:[%s2299_s7 + $0x74] ss:$8 sps:$4 sm:$0xff]  }
 0x1bd   : > { %v876_v39 = vld [vmem:[#allocation2 + $0x8] sm:$0xff]  ;;  %v1938_v4 = vld [vmem:[%s2299_s7 + $0x70] ss:$8 sps:$4 sm:$0xff]   ;;  %v1942_v61 = vld [vmem:[%s2299_s7 + $0x94] ss:$8 sps:$4 sm:$0xff]   ;;  %v926_v26 = vshrl.u32 %v925_v25, 7 }
 0x1be   : > { %1098 = vmatpush1.bf16.msra.mxu0 %v1920_v9  ;;  %1796 = vmatpush1.bf16.msra.mxu1 %v1920_v9  ;;  %v884_v42 = vld [vmem:[#allocation2 + $0x48] sm:$0xff]  ;;  %v1944_v2 = vld [vmem:[%s2299_s7 + $0x90] ss:$8 sps:$4 sm:$0xff]   ;;  %v1948_v16 = vld [vmem:[%s2299_s7 + $0xb4] ss:$8 sps:$4 sm:$0xff]   ;;  %s1757_s15 = sshll.u32 (%p2196_p9), %s2085_s23, 7 }
 0x1bf   : > { %1099 = vmatprep.subr.bf16.mxu0 %v1921_v41  ;;  %1781 = vmatprep.subr.bf16.mxu1 %v1921_v41  ;;  %v1939_v5 = vld [vmem:[%s2299_s7 + $0x84] ss:$8 sps:$4 sm:$0xff]   ;;  %v1941_v29 = vld [vmem:[%s2299_s7 + $0x80] ss:$8 sps:$4 sm:$0xff]   ;;  %v1950_v54 = vld [vmem:[%s2299_s7 + $0xb0] ss:$8 sps:$4 sm:$0xff]   ;;  %s1492_s11 = sadd.s32 (%p2196_p9), %s1757_s15, %s2283_s13 }
 0x1c0   : > { %1127 = vmatprep.mubr.bf16.mxu0 %v876_v39  ;;  %1167 = vmatprep.mubr.bf16.mxu1 %v884_v42  ;;  %v1945_v32 = vld [vmem:[%s2299_s7 + $0xa4] ss:$8 sps:$4 sm:$0xff]   ;;  %v1947_v33 = vld [vmem:[%s2299_s7 + $0xa0] ss:$8 sps:$4 sm:$0xff]   ;;  %v1954_v6 = vld [vmem:[%s2299_s7 + $0xd4] ss:$8 sps:$4 sm:$0xff]  }
 0x1c1   : > { %v1951_v40 = vld [vmem:[%s2299_s7 + $0xc4] ss:$8 sps:$4 sm:$0xff]   ;;  %v1953_v17 = vld [vmem:[%s2299_s7 + $0xc0] ss:$8 sps:$4 sm:$0xff]   ;;  %v1956_v7 = vld [vmem:[%s2299_s7 + $0xd0] ss:$8 sps:$4 sm:$0xff]  }
 0x1c2   : > { %1100 = vmatpush1.bf16.msra.mxu0 %v1923_v55  ;;  %1797 = vmatpush1.bf16.msra.mxu1 %v1923_v55  ;;  %v1957_v34 = vld [vmem:[%s2299_s7 + $0xe4] ss:$8 sps:$4 sm:$0xff]   ;;  %v1959_v22 = vld [vmem:[%s2299_s7 + $0xe0] ss:$8 sps:$4 sm:$0xff]   ;;  %v1960_v23 = vld [vmem:[%s2299_s7 + $0xf4] ss:$8 sps:$4 sm:$0xff]  }
 0x1c3   : > { %1101 = vmatprep.subr.bf16.mxu0 %v1924_v20  ;;  %1782 = vmatprep.subr.bf16.mxu1 %v1924_v20  ;;  %v1962_v3 = vld [vmem:[%s2299_s7 + $0xf0] ss:$8 sps:$4 sm:$0xff]   ;;  %v875_v8 = vld [vmem:[#allocation2] sm:$0xff]  ;;  %v880_v47 = vld [vmem:[#allocation2 + $0x28] sm:$0xff]  ;;  %v927_v31 = vsub.s32 0, %v926_v26  ;;  %v931_v14 = vsub.s32 1, %v926_v26 }
 0x1c4   : > { %v883_v10 = vld [vmem:[#allocation2 + $0x40] sm:$0xff]  ;;  %v878_v11 = vld [vmem:[#allocation2 + $0x18] sm:$0xff]  ;;  %v877_v46 = vld [vmem:[#allocation2 + $0x10] sm:$0xff]  ;;  %s1758_s27 = sshll.u32 (%p2196_p9), %s1492_s11, 2 }
 0x1c5   : > { %v886_v56 = vld [vmem:[#allocation2 + $0x58] sm:$0xff]  ;;  %v885_v13 = vld [vmem:[#allocation2 + $0x50] sm:$0xff]  ;;  %v888_v57 = vld [vmem:[#allocation2 + $0x68] sm:$0xff]  ;;  %s1494_s18 = scalar_lea.vmem (%p2196_p9), %s2943_s5, %s1758_s27 }
 0x1c6   : > { %1102 = vmatpush1.bf16.msra.mxu0 %v1926_v21  ;;  %1798 = vmatpush1.bf16.msra.mxu1 %v1926_v21  ;;  %v879_v38 = vld [vmem:[#allocation2 + $0x20] sm:$0xff]  ;;  %v882_v59 = vld [vmem:[#allocation2 + $0x38] sm:$0xff]  ;;  %v881_v24 = vld [vmem:[#allocation2 + $0x30] sm:$0xff] }
 0x1c7   : > { %1103 = vmatprep.subr.bf16.mxu0 %v1927_v0  ;;  %1783 = vmatprep.subr.bf16.mxu1 %v1927_v0  ;;  %v887_v58 = vld [vmem:[#allocation2 + $0x60] sm:$0xff]  ;;  %v890_v19 = vld [vmem:[#allocation2 + $0x78] sm:$0xff]  ;;  %v889_v30 = vld [vmem:[#allocation2 + $0x70] sm:$0xff] }
 0x1c8   : > { %v923_v60 = vld [vmem:[%s458_s6] sm:$0x3] }
 0x1c9   : > { %v2739_v52 = vrot.slane %v923_v60, %v927_v31  ;;  %v2741_v53 = vrot.slane %v923_v60, %v931_v14 }
 0x1ca   : > { %1104 = vmatpush1.bf16.msra.mxu0 %v1929_v1  ;;  %1799 = vmatpush1.bf16.msra.mxu1 %v1929_v1 }
 0x1cb   : > { %1105 = vmatprep.subr.bf16.mxu0 %v1930_v18  ;;  %1784 = vmatprep.subr.bf16.mxu1 %v1930_v18 }
 0x1ce   : > { %1106 = vmatpush1.bf16.msra.mxu0 %v1932_v27  ;;  %1800 = vmatpush1.bf16.msra.mxu1 %v1932_v27 }
 0x1cf   : > { %1107 = vmatprep.subr.bf16.mxu0 %v1933_v28  ;;  %1785 = vmatprep.subr.bf16.mxu1 %v1933_v28 }
 0x1d2   : > { %1108 = vmatpush1.bf16.msra.mxu0 %v1935_v50  ;;  %1801 = vmatpush1.bf16.msra.mxu1 %v1935_v50 }
 0x1d3   : > { %1109 = vmatprep.subr.bf16.mxu0 %v1936_v51  ;;  %1786 = vmatprep.subr.bf16.mxu1 %v1936_v51 }
 0x1d6   : > { %1110 = vmatpush1.bf16.msra.mxu0 %v1938_v4  ;;  %1802 = vmatpush1.bf16.msra.mxu1 %v1938_v4 }
 0x1d7   : > { %1111 = vmatprep.subr.bf16.mxu0 %v1939_v5  ;;  %1787 = vmatprep.subr.bf16.mxu1 %v1939_v5 }
 0x1da   : > { %1112 = vmatpush1.bf16.msra.mxu0 %v1941_v29  ;;  %1803 = vmatpush1.bf16.msra.mxu1 %v1941_v29 }
 0x1db   : > { %1113 = vmatprep.subr.bf16.mxu0 %v1942_v61  ;;  %1788 = vmatprep.subr.bf16.mxu1 %v1942_v61 }
 0x1de   : > { %1114 = vmatpush1.bf16.msra.mxu0 %v1944_v2  ;;  %1804 = vmatpush1.bf16.msra.mxu1 %v1944_v2 }
 0x1df   : > { %1115 = vmatprep.subr.bf16.mxu0 %v1945_v32  ;;  %1789 = vmatprep.subr.bf16.mxu1 %v1945_v32 }
 0x1e2   : > { %1116 = vmatpush1.bf16.msra.mxu0 %v1947_v33  ;;  %1805 = vmatpush1.bf16.msra.mxu1 %v1947_v33 }
 0x1e3   : > { %1117 = vmatprep.subr.bf16.mxu0 %v1948_v16  ;;  %1790 = vmatprep.subr.bf16.mxu1 %v1948_v16 }
 0x1e6   : > { %1118 = vmatpush1.bf16.msra.mxu0 %v1950_v54  ;;  %1806 = vmatpush1.bf16.msra.mxu1 %v1950_v54 }
 0x1e7   : > { %1119 = vmatprep.subr.bf16.mxu0 %v1951_v40  ;;  %1791 = vmatprep.subr.bf16.mxu1 %v1951_v40 }
 0x1ea   : > { %1120 = vmatpush1.bf16.msra.mxu0 %v1953_v17  ;;  %1807 = vmatpush1.bf16.msra.mxu1 %v1953_v17 }
 0x1eb   : > { %1121 = vmatprep.subr.bf16.mxu0 %v1954_v6  ;;  %1792 = vmatprep.subr.bf16.mxu1 %v1954_v6 }
 0x1ee   : > { %1122 = vmatpush1.bf16.msra.mxu0 %v1956_v7  ;;  %1808 = vmatpush1.bf16.msra.mxu1 %v1956_v7 }
 0x1ef   : > { %1123 = vmatprep.subr.bf16.mxu0 %v1957_v34  ;;  %1793 = vmatprep.subr.bf16.mxu1 %v1957_v34 }
 0x1f2   : > { %1124 = vmatpush1.bf16.msra.mxu0 %v1959_v22  ;;  %1809 = vmatpush1.bf16.msra.mxu1 %v1959_v22 }
 0x1f3   : > { %1125 = vmatprep.subr.bf16.mxu0 %v1960_v23  ;;  %1794 = vmatprep.subr.bf16.mxu1 %v1960_v23 }
 0x1f6   : > { %1126 = vmatpush1.bf16.msra.mxu0 %v1962_v3  ;;  %1810 = vmatpush1.bf16.msra.mxu1 %v1962_v3 }
 0x1f9   : > { %1128 = vmatmul.mubr.bf16.vlgmr.msra.gmra.mrb[0].mxu0 %v875_v8  ;;  %1168 = vmatmul.mubr.bf16.vlgmr.msra.gmra.mrb[0].mxu1 %v883_v10 }
 0x1fa   : > { %1137 = vmatprep.mubr.bf16.mxu0 %v878_v11  ;;  %1177 = vmatprep.mubr.bf16.mxu1 %v886_v56 }
 0x201   : > { %1138 = vmatmul.mubr.bf16.gmra.mrb[4].mxu0 %v877_v46  ;;  %1178 = vmatmul.mubr.bf16.gmra.mrb[4].mxu1 %v885_v13 }
 0x202   : > { %1147 = vmatprep.mubr.bf16.mxu0 %v880_v47  ;;  %1187 = vmatprep.mubr.bf16.mxu1 %v888_v57 }
 0x209   : > { %1148 = vmatmul.mubr.bf16.gmra.mrb[8].mxu0 %v879_v38  ;;  %1188 = vmatmul.mubr.bf16.gmra.mrb[8].mxu1 %v887_v58 }
 0x20a   : > { %1157 = vmatprep.mubr.bf16.mxu0 %v882_v59  ;;  %1197 = vmatprep.mubr.bf16.mxu1 %v890_v19 }
 0x211   : > { %1158 = vmatmul.mubr.bf16.gmra.mrb[12].mxu0 %v881_v24  ;;  %1198 = vmatmul.mubr.bf16.gmra.mrb[12].mxu1 %v889_v30 }
 0x2cc   : > { %v1129_v44 = vpop.f32.mrb[0].mxu0  ;;  %v1169_v45 = vpop.f32.mrb[0].mxu1 }
 0x2cd   : > { %v1130_v35 = vadd.f32 %v1129_v44, %v2739_v52  ;;  %v1170_v36 = vadd.f32 %v1169_v45, %v2739_v52  ;;  %v1131_v43 = vpop.f32.mrb[1].mxu0  ;;  %v1171_v48 = vpop.f32.mrb[1].mxu1 }
 0x2ce   : > { %v1132_v62 = vadd.f32 %v1131_v43, %v2741_v53  ;;  %v1172_v63 = vadd.f32 %v1171_v48, %v2741_v53  ;;  %v1133_v15 = vpop.f32.mrb[2].mxu0  ;;  %v1173_v49 = vpop.f32.mrb[2].mxu1 }
 0x2cf   : > { %v1240_v37 = vmul.f32 0.70710677, %v1130_v35  ;;  %v1256_v12 = vmul.f32 0.70710677, %v1170_v36  ;;  %v1134_v55 = vadd.f32 %v1133_v15, %v2739_v52  ;;  %v1174_v20 = vadd.f32 %v1173_v49, %v2739_v52  ;;  %v1135_v21 = vpop.f32.mrb[3].mxu0  ;;  %v1175_v0 = vpop.f32.mrb[3].mxu1 }
 0x2d0   : > { %v1241_v9 = vmul.f32 0.70710677, %v1132_v62  ;;  %v1257_v41 = vmul.f32 0.70710677, %v1172_v63  ;;  %v1136_v1 = vadd.f32 %v1135_v21, %v2741_v53  ;;  %v1176_v18 = vadd.f32 %v1175_v0, %v2741_v53 }
 0x2d1   : > { %1963 = verf.f32 %v1240_v37  ;;  %v1242_v27 = vmul.f32 0.70710677, %v1134_v55  ;;  %v1258_v28 = vmul.f32 0.70710677, %v1174_v20  ;;  %v1208_v29 = vmul.f32 0.5, %v1130_v35 }
 0x2d2   : > { %1965 = verf.f32 %v1256_v12  ;;  %v1243_v39 = vmul.f32 0.70710677, %v1136_v1  ;;  %v1259_v50 = vmul.f32 0.70710677, %v1176_v18  ;;  %v1224_v16 = vmul.f32 0.5, %v1170_v36 }
 0x2d3   : > { %1967 = verf.f32 %v1241_v9  ;;  %v1209_v7 = vmul.f32 0.5, %v1132_v62  ;;  %v1225_v34 = vmul.f32 0.5, %v1172_v63  ;;  %v1210_v3 = vmul.f32 0.5, %v1134_v55 }
 0x2d4   : > { %1969 = verf.f32 %v1257_v41  ;;  %v1139_v42 = vpop.f32.mrb[4].mxu0  ;;  %v1179_v4 = vpop.f32.mrb[4].mxu1  ;;  %v1226_v47 = vmul.f32 0.5, %v1174_v20  ;;  %v1211_v57 = vmul.f32 0.5, %v1136_v1  ;;  %v1227_v38 = vmul.f32 0.5, %v1176_v18 }
 0x2d5   : > { %1971 = verf.f32 %v1242_v27  ;;  %v1140_v51 = vadd.f32 %v1139_v42, %v2739_v52  ;;  %v1141_v5 = vpop.f32.mrb[5].mxu0  ;;  %v1180_v61 = vadd.f32 %v1179_v4, %v2739_v52  ;;  %v1181_v32 = vpop.f32.mrb[5].mxu1 }
 0x2d6   : > { %1973 = verf.f32 %v1258_v28  ;;  %v1142_v2 = vadd.f32 %v1141_v5, %v2741_v53  ;;  %v1143_v33 = vpop.f32.mrb[6].mxu0  ;;  %v2755_v40 = vadd.f32 %v1181_v32, %v2741_v53  ;;  %v1183_v17 = vpop.f32.mrb[6].mxu1 }
 0x2d7   : > { %1975 = verf.f32 %v1243_v39  ;;  %v1244_v54 = vmul.f32 0.70710677, %v1140_v51  ;;  %v1145_v6 = vpop.f32.mrb[7].mxu0  ;;  %v1260_v22 = vmul.f32 0.70710677, %v1180_v61  ;;  %v1185_v23 = vpop.f32.mrb[7].mxu1  ;;  %v1144_v11 = vadd.f32 %v1143_v33, %v2739_v52 }
 0x2d8   : > { %1977 = verf.f32 %v1259_v50  ;;  %v1245_v8 = vmul.f32 0.70710677, %v1142_v2  ;;  %v1261_v10 = vmul.f32 0.70710677, %v2755_v40  ;;  %v2760_v56 = vadd.f32 %v1183_v17, %v2739_v52 }
 0x2d9   : > { %1979 = verf.f32 %v1244_v54  ;;  %v2763_v46 = vadd.f32 %v1145_v6, %v2741_v53  ;;  %v1246_v19 = vmul.f32 0.70710677, %v1144_v11  ;;  %v2766_v24 = vadd.f32 %v1185_v23, %v2741_v53 }
 0x2da   : > { %1981 = verf.f32 %v1260_v22  ;;  %v1212_v60 = vmul.f32 0.5, %v1140_v51  ;;  %v1228_v14 = vmul.f32 0.5, %v1180_v61  ;;  %v1262_v44 = vmul.f32 0.70710677, %v2760_v56 }
 0x2db   : > { %v1964_v13 = vpop.eup %1963  ;;  %1983 = verf.f32 %v1245_v8  ;;  %v1247_v48 = vmul.f32 0.70710677, %v2763_v46  ;;  %v1213_v12 = vmul.f32 0.5, %v1142_v2  ;;  %v1263_v0 = vmul.f32 0.70710677, %v2766_v24 }
 0x2dc   : > { %v1966_v58 = vpop.eup %1965  ;;  %v1304_v59 = vadd.f32 1.0, %v1964_v13  ;;  %1985 = verf.f32 %v1261_v10  ;;  %v1149_v30 = vpop.f32.mrb[8].mxu0  ;;  %v1229_v33 = vmul.f32 0.5, %v2755_v40  ;;  %v1214_v6 = vmul.f32 0.5, %v1144_v11 }
 0x2dd   : > { %v1189_v25 = vpop.f32.mrb[8].mxu1  ;;  %v1968_v26 = vpop.eup %1967  ;;  %v1320_v31 = vadd.f32 1.0, %v1966_v58  ;;  %1987 = verf.f32 %v1246_v19  ;;  %v2782_v39 = vadd.f32 %v1149_v30, %v2739_v52 }
 0x2de   : > { %v1151_v45 = vpop.f32.mrb[9].mxu0  ;;  %v1970_v35 = vpop.eup %1969  ;;  %v1336_v36 = vmul.f32 %v1304_v59, %v1208_v29  ;;  %v1305_v43 = vadd.f32 1.0, %v1968_v26  ;;  %1989 = verf.f32 %v1262_v44  ;;  %v2785_v42 = vadd.f32 %v1189_v25, %v2739_v52 }
 0x2df   : > { %v2770_v62 = vpop.f32.mrb[9].mxu1  ;;  %v2772_v63 = vpop.f32.mrb[10].mxu0  ;;  %v1352_v49 = vmul.f32 %v1320_v31, %v1224_v16  ;;  %v1321_v37 = vadd.f32 1.0, %v1970_v35  ;;  %1991 = verf.f32 %v1247_v48  ;;  %v2793_v13 = vadd.f32 %v1151_v45, %v2741_v53 }
 0x2e0   : > { %v1972_v15 = vpop.eup %1971  ;;  %v2774_v9 = vpop.f32.mrb[10].mxu1  ;;  %v1337_v20 = vmul.f32 %v1305_v43, %v1209_v7  ;;  %1993 = verf.f32 %v1263_v0  ;;  %v1248_v7 = vmul.f32 0.70710677, %v2782_v39  ;;  %v1264_v10 = vmul.f32 0.70710677, %v2785_v42 }
 0x2e1   : > { %v2776_v41 = vpop.f32.mrb[11].mxu0  ;;  %v1974_v55 = vpop.eup %1973  ;;  %v1306_v21 = vadd.f32 1.0, %v1972_v15  ;;  %v1353_v27 = vmul.f32 %v1321_v37, %v1225_v34  ;;  %v1192_v43 = vadd.f32 %v2770_v62, %v2741_v53  ;;  %v2819_v37 = vadd.f32 %v2774_v9, %v2739_v52 }
 0x2e2   : > { %v2779_v1 = vpop.f32.mrb[11].mxu1  ;;  %v1976_v18 = vpop.eup %1975  ;;  %v1322_v28 = vadd.f32 1.0, %v1974_v55  ;;  %v1763_v51 = vpack.c.bf16 %v1337_v20, %v1336_v36  ;;  %1995 = verf.f32 %v1248_v7  ;;  %v1249_v36 = vmul.f32 0.70710677, %v2793_v13 }
 0x2e3   : > { %v1978_v50 = vpop.eup %1977  ;;  %v1338_v4 = vmul.f32 %v1306_v21, %v1210_v3  ;;  %v1307_v5 = vadd.f32 1.0, %v1976_v18  ;;  %v1771_v61 = vpack.c.bf16 %v1353_v27, %v1352_v49  ;;  %1997 = verf.f32 %v1264_v10 }
 0x2e4   : > { %v1980_v29 = vpop.eup %1979  ;;  %v1354_v2 = vmul.f32 %v1322_v28, %v1226_v47  ;;  %v1323_v32 = vadd.f32 1.0, %v1978_v50  ;;  %1464 = vst [vmem:[%s2301_s3] sm:$0xff] %v1763_v51  ;;  %v1159_v34 = vpop.f32.mrb[12].mxu0  ;;  %v2815_v49 = vadd.f32 %v2772_v63, %v2739_v52  ;;  %v1215_v20 = vmul.f32 0.5, %v2763_v46 }
 0x2e5   : > { %v1982_v16 = vpop.eup %1981  ;;  %v1339_v54 = vmul.f32 %v1307_v5, %v1211_v57  ;;  %v1308_v17 = vadd.f32 1.0, %v1980_v29  ;;  %v1199_v22 = vpop.f32.mrb[12].mxu1  ;;  %1472 = vst [vmem:[%s2301_s3 + $0x40] sm:$0xff] %v1771_v61  ;;  %1999 = verf.f32 %v1249_v36  ;;  %v1265_v18 = vmul.f32 0.70710677, %v1192_v43 }
 0x2e6   : > { %v1984_v23 = vpop.eup %1983  ;;  %v1355_v3 = vmul.f32 %v1323_v32, %v1227_v38  ;;  %v1324_v8 = vadd.f32 1.0, %v1982_v16  ;;  %v2795_v47 = vpop.f32.mrb[13].mxu0  ;;  %v1231_v63 = vmul.f32 0.5, %v2766_v24  ;;  %v1250_v50 = vmul.f32 0.70710677, %v2815_v49 }
 0x2e7   : > { %v2797_v40 = vpop.f32.mrb[13].mxu1  ;;  %v1986_v57 = vpop.eup %1985  ;;  %v1764_v11 = vpack.c.bf16 %v1339_v54, %v1338_v4  ;;  %v1340_v58 = vmul.f32 %v1308_v17, %v1212_v60  ;;  %v1309_v59 = vadd.f32 1.0, %v1984_v23  ;;  %v1230_v60 = vmul.f32 0.5, %v2760_v56 }
 0x2e8   : > { %v2799_v19 = vpop.f32.mrb[14].mxu0  ;;  %v2801_v38 = vpop.f32.mrb[14].mxu1  ;;  %v1772_v30 = vpack.c.bf16 %v1355_v3, %v1354_v2  ;;  %v1356_v25 = vmul.f32 %v1324_v8, %v1228_v14  ;;  %v1325_v26 = vadd.f32 1.0, %v1986_v57  ;;  %2001 = verf.f32 %v1265_v18 }
 0x2e9   : > { %v2803_v31 = vpop.f32.mrb[15].mxu0  ;;  %v2805_v44 = vpop.f32.mrb[15].mxu1  ;;  %1465 = vst [vmem:[%s2301_s3 + $0x8] sm:$0xff] %v1764_v11  ;;  %v1341_v35 = vmul.f32 %v1309_v59, %v1213_v12  ;;  %v1266_v4 = vmul.f32 0.70710677, %v2819_v37  ;;  %2003 = verf.f32 %v1250_v50  ;;  %v1156_v46 = vadd.f32 %v2776_v41, %v2741_v53 }
 0x2ea   : > { %v1988_v45 = vpop.eup %1987  ;;  %1473 = vst [vmem:[%s2301_s3 + $0x48] sm:$0xff] %v1772_v30  ;;  %v1357_v14 = vmul.f32 %v1325_v26, %v1229_v33  ;;  %v2831_v5 = vadd.f32 %v2779_v1, %v2741_v53  ;;  %v2834_v29 = vadd.f32 %v1159_v34, %v2739_v52  ;;  %v2837_v2 = vadd.f32 %v1199_v22, %v2739_v52 }
 0x2eb   : > { %v1990_v48 = vpop.eup %1989  ;;  %v1310_v15 = vadd.f32 1.0, %v1988_v45  ;;  %v1765_v12 = vpack.c.bf16 %v1341_v35, %v1340_v58  ;;  %2005 = verf.f32 %v1266_v4  ;;  %v1251_v33 = vmul.f32 0.70710677, %v1156_v46 }
 0x2ec   : > { %v1992_v56 = vpop.eup %1991  ;;  %v1326_v55 = vadd.f32 1.0, %v1990_v48  ;;  %v1773_v62 = vpack.c.bf16 %v1357_v14, %v1356_v25  ;;  %v1267_v16 = vmul.f32 0.70710677, %v2831_v5  ;;  %v1252_v1 = vmul.f32 0.70710677, %v2834_v29 }
 0x2ed   : > { %v1342_v21 = vmul.f32 %v1310_v15, %v1214_v6  ;;  %v1311_v0 = vadd.f32 1.0, %v1992_v56  ;;  %v1994_v27 = vpop.eup %1993  ;;  %1466 = vst [vmem:[%s2301_s3 + $0x10] sm:$0xff] %v1765_v12  ;;  %v1216_v6 = vmul.f32 0.5, %v2782_v39  ;;  %v1232_v7 = vmul.f32 0.5, %v2785_v42 }
 0x2ee   : > { %v1358_v28 = vmul.f32 %v1326_v55, %v1230_v60  ;;  %1474 = vst [vmem:[%s2301_s3 + $0x50] sm:$0xff] %v1773_v62  ;;  %v1327_v51 = vadd.f32 1.0, %v1994_v27  ;;  %v1996_v32 = vpop.eup %1995  ;;  %2007 = verf.f32 %v1251_v33  ;;  %v1268_v34 = vmul.f32 0.70710677, %v2837_v2 }
 0x2ef   : > { %v1343_v9 = vmul.f32 %v1311_v0, %v1215_v20  ;;  %v1998_v54 = vpop.eup %1997  ;;  %v1312_v17 = vadd.f32 1.0, %v1996_v32  ;;  %2009 = verf.f32 %v1267_v16  ;;  %v1162_v23 = vadd.f32 %v2795_v47, %v2741_v53 }
 0x2f0   : > { %v1359_v61 = vmul.f32 %v1327_v51, %v1231_v63  ;;  %v1328_v22 = vadd.f32 1.0, %v1998_v54  ;;  %v2850_v3 = vadd.f32 %v2797_v40, %v2741_v53  ;;  %v2000_v8 = vpop.eup %1999  ;;  %v1217_v10 = vmul.f32 0.5, %v2793_v13 }
 0x2f1   : > { %v1766_v24 = vpack.c.bf16 %v1343_v9, %v1342_v21  ;;  %2011 = verf.f32 %v1252_v1  ;;  %v2855_v39 = vadd.f32 %v2799_v19, %v2739_v52  ;;  %v2859_v42 = vadd.f32 %v2801_v38, %v2739_v52 }
 0x2f2   : > { %v1774_v41 = vpack.c.bf16 %v1359_v61, %v1358_v28  ;;  %v1344_v57 = vmul.f32 %v1312_v17, %v1216_v6  ;;  %v1313_v11 = vadd.f32 1.0, %v2000_v8  ;;  %2013 = verf.f32 %v1268_v34  ;;  %v2002_v30 = vpop.eup %2001 }
 0x2f3   : > { %1467 = vst [vmem:[%s2301_s3 + $0x18] sm:$0xff] %v1766_v24  ;;  %v1253_v47 = vmul.f32 0.70710677, %v1162_v23  ;;  %v1233_v58 = vmul.f32 0.5, %v1192_v43  ;;  %v1269_v40 = vmul.f32 0.70710677, %v2850_v3  ;;  %v1360_v13 = vmul.f32 %v1328_v22, %v1232_v7  ;;  %v2004_v26 = vpop.eup %2003 }
 0x2f4   : > { %1475 = vst [vmem:[%s2301_s3 + $0x58] sm:$0xff] %v1774_v41  ;;  %v1254_v59 = vmul.f32 0.70710677, %v2855_v39  ;;  %v1345_v25 = vmul.f32 %v1313_v11, %v1217_v10  ;;  %v1270_v19 = vmul.f32 0.70710677, %v2859_v42  ;;  %v1329_v45 = vadd.f32 1.0, %v2002_v30 }
 0x2f5   : > { %2015 = verf.f32 %v1253_v47  ;;  %v1166_v52 = vadd.f32 %v2803_v31, %v2741_v53  ;;  %v2868_v38 = vadd.f32 %v2805_v44, %v2741_v53  ;;  %v2006_v35 = vpop.eup %2005  ;;  %v1314_v36 = vadd.f32 1.0, %v2004_v26  ;;  %v1556_v26 = vld [vmem:[%s2301_s3 + $0x10] sm:$0xff] (%p2196_p9) }
 0x2f6   : > { %2017 = verf.f32 %v1269_v40  ;;  %v1767_v60 = vpack.c.bf16 %v1345_v25, %v1344_v57  ;;  %v1361_v43 = vmul.f32 %v1329_v45, %v1233_v58  ;;  %v1330_v48 = vadd.f32 1.0, %v2006_v35  ;;  %1557 = vst [vmem:[%s1494_s18 + $0x40] sm:$0xff] (%p2196_p9), %v1556_v26 }
 0x2f7   : > { %2019 = verf.f32 %v1254_v59  ;;  %v1218_v14 = vmul.f32 0.5, %v2815_v49  ;;  %v1255_v15 = vmul.f32 0.70710677, %v1166_v52  ;;  %v1271_v56 = vmul.f32 0.70710677, %v2868_v38 }
 0x2f8   : > { %2021 = verf.f32 %v1270_v19  ;;  %1468 = vst [vmem:[%s2301_s3 + $0x20] sm:$0xff] %v1767_v60  ;;  %v2008_v12 = vpop.eup %2007  ;;  %v1775_v31 = vpack.c.bf16 %v1361_v43, %v1360_v13  ;;  %v1234_v55 = vmul.f32 0.5, %v2819_v37  ;;  %v1219_v20 = vmul.f32 0.5, %v1156_v46  ;;  %v1554_v19 = vld [vmem:[%s2301_s3 + $0x8] sm:$0xff] (%p2196_p9) }
 0x2f9   : > { %v2010_v53 = vpop.eup %2009  ;;  %v1346_v44 = vmul.f32 %v1314_v36, %v1218_v14  ;;  %v1315_v62 = vadd.f32 1.0, %v2008_v12  ;;  %2023 = verf.f32 %v1255_v15  ;;  %v1235_v18 = vmul.f32 0.5, %v2831_v5  ;;  %v1568_v36 = vld [vmem:[%s2301_s3 + $0x40] sm:$0xff] (%p2196_p9)  ;;  %v1570_v43 = vld [vmem:[%s2301_s3 + $0x48] sm:$0xff] (%p2196_p9)  ;;  %1555 = vst [vmem:[%s1494_s18 + $0x20] sm:$0xff] (%p2196_p9), %v1554_v19 }
 0x2fa   : > { %1476 = vst [vmem:[%s2301_s3 + $0x60] sm:$0xff] %v1775_v31  ;;  %v1362_v0 = vmul.f32 %v1330_v48, %v1234_v55  ;;  %v1331_v27 = vadd.f32 1.0, %v2010_v53  ;;  %2025 = verf.f32 %v1271_v56  ;;  %v1220_v9 = vmul.f32 0.5, %v2834_v29  ;;  %v1558_v45 = vld [vmem:[%s2301_s3 + $0x18] sm:$0xff] (%p2196_p9)  ;;  %v1572_v48 = vld [vmem:[%s2301_s3 + $0x50] sm:$0xff] (%p2196_p9)  ;;  %1569 = vst [vmem:[%s1494_s18 + $0x100] sm:$0xff] (%p2196_p9), %v1568_v36 }
 0x2fb   : > { %v2012_v21 = vpop.eup %2011  ;;  %v1347_v28 = vmul.f32 %v1315_v62, %v1219_v20  ;;  %v1236_v46 = vmul.f32 0.5, %v2837_v2  ;;  %v1221_v33 = vmul.f32 0.5, %v1162_v23  ;;  %v1237_v41 = vmul.f32 0.5, %v2850_v3  ;;  %v1574_v14 = vld [vmem:[%s2301_s3 + $0x58] sm:$0xff] (%p2196_p9)  ;;  %1559 = vst [vmem:[%s1494_s18 + $0x60] sm:$0xff] (%p2196_p9), %v1558_v45  ;;  %1571 = vst [vmem:[%s1494_s18 + $0x120] sm:$0xff] (%p2196_p9), %v1570_v43 }
 0x2fc   : > { %v2014_v49 = vpop.eup %2013  ;;  %v1316_v63 = vadd.f32 1.0, %v2012_v21  ;;  %v1363_v50 = vmul.f32 %v1331_v27, %v1235_v18  ;;  %v1222_v22 = vmul.f32 0.5, %v2855_v39  ;;  %v1238_v10 = vmul.f32 0.5, %v2859_v42  ;;  %v1552_v42 = vld [vmem:[%s2301_s3] sm:$0xff] (%p2196_p9)  ;;  %1573 = vst [vmem:[%s1494_s18 + $0x140] sm:$0xff] (%p2196_p9), %v1572_v48  ;;  %1575 = vst [vmem:[%s1494_s18 + $0x160] sm:$0xff] (%p2196_p9), %v1574_v14 }
 0x2fd   : > { %v1332_v37 = vadd.f32 1.0, %v2014_v49  ;;  %v1768_v4 = vpack.c.bf16 %v1347_v28, %v1346_v44  ;;  %v1223_v11 = vmul.f32 0.5, %v1166_v52  ;;  %v1239_v40 = vmul.f32 0.5, %v2868_v38  ;;  %1553 = vst [vmem:[%s1494_s18] sm:$0xff] (%p2196_p9), %v1552_v42 }
 0x2fe   : > { %v1776_v61 = vpack.c.bf16 %v1363_v50, %v1362_v0  ;;  %v1348_v32 = vmul.f32 %v1316_v63, %v1220_v9 }
 0x2ff   : > { %v2016_v51 = vpop.eup %2015  ;;  %1469 = vst [vmem:[%s2301_s3 + $0x28] sm:$0xff] %v1768_v4  ;;  %v1364_v54 = vmul.f32 %v1332_v37, %v1236_v46  ;;  %v1560_v52 = vld [vmem:[%s2301_s3 + $0x20] sm:$0xff] (%p2196_p9) }
 0x300   : > { %v2018_v24 = vpop.eup %2017  ;;  %v1317_v5 = vadd.f32 1.0, %v2016_v51  ;;  %1477 = vst [vmem:[%s2301_s3 + $0x68] sm:$0xff] %v1776_v61  ;;  %1561 = vst [vmem:[%s1494_s18 + $0x80] sm:$0xff] (%p2196_p9), %v1560_v52 }
 0x301   : > { %v2020_v16 = vpop.eup %2019  ;;  %v1333_v17 = vadd.f32 1.0, %v2018_v24  ;;  %v1576_v15 = vld [vmem:[%s2301_s3 + $0x60] sm:$0xff] (%p2196_p9) }
 0x302   : > { %v2022_v1 = vpop.eup %2021  ;;  %v1349_v29 = vmul.f32 %v1317_v5, %v1221_v33  ;;  %v1318_v6 = vadd.f32 1.0, %v2020_v16  ;;  %1577 = vst [vmem:[%s1494_s18 + $0x180] sm:$0xff] (%p2196_p9), %v1576_v15 }
 0x303   : > { %v1365_v7 = vmul.f32 %v1333_v17, %v1237_v41  ;;  %v1334_v34 = vadd.f32 1.0, %v2022_v1  ;;  %v2024_v8 = vpop.eup %2023 }
 0x304   : > { %v1769_v2 = vpack.c.bf16 %v1349_v29, %v1348_v32  ;;  %v2026_v57 = vpop.eup %2025  ;;  %v1350_v3 = vmul.f32 %v1318_v6, %v1222_v22  ;;  %v1319_v47 = vadd.f32 1.0, %v2024_v8 }
 0x305   : > { %v1777_v23 = vpack.c.bf16 %v1365_v7, %v1364_v54  ;;  %v1366_v58 = vmul.f32 %v1334_v34, %v1238_v10  ;;  %v1335_v59 = vadd.f32 1.0, %v2026_v57  ;;  %1486 = sbr.rel (!%p2196_p9) target bundleno = 788 (0x314), region = 86 }
 0x306   : > { %1470 = vst [vmem:[%s2301_s3 + $0x30] sm:$0xff] %v1769_v2  ;;  %v1351_v30 = vmul.f32 %v1319_v47, %v1223_v11  ;;  %v1562_v38 = vld [vmem:[%s2301_s3 + $0x28] sm:$0xff] (%p2196_p9) }
 0x307   : > { %1478 = vst [vmem:[%s2301_s3 + $0x70] sm:$0xff] %v1777_v23  ;;  %v1367_v13 = vmul.f32 %v1335_v59, %v1239_v40  ;;  %1563 = vst [vmem:[%s1494_s18 + $0xa0] sm:$0xff] (%p2196_p9), %v1562_v38  ;;  %v1578_v56 = vld [vmem:[%s2301_s3 + $0x68] sm:$0xff] (%p2196_p9) }
 0x308   : > { %v1770_v25 = vpack.c.bf16 %v1351_v30, %v1350_v3  ;;  %1579 = vst [vmem:[%s1494_s18 + $0x1a0] sm:$0xff] (%p2196_p9), %v1578_v56 }
 0x309   : > { %v1778_v39 = vpack.c.bf16 %v1367_v13, %v1366_v58 }
 0x30a   : > { %1471 = vst [vmem:[%s2301_s3 + $0x38] sm:$0xff] %v1770_v25 }
 0x30b   : > { %1479 = vst [vmem:[%s2301_s3 + $0x78] sm:$0xff] %v1778_v39 }
 0x30d   : > { %v1564_v35 = vld [vmem:[%s2301_s3 + $0x30] sm:$0xff] }
 0x30e   : > { %1565 = vst [vmem:[%s1494_s18 + $0xc0] sm:$0xff] %v1564_v35  ;;  %v1580_v12 = vld [vmem:[%s2301_s3 + $0x70] sm:$0xff] }
 0x30f   : > { %1581 = vst [vmem:[%s1494_s18 + $0x1c0] sm:$0xff] %v1580_v12 }
 0x311   : > { %v1566_v60 = vld [vmem:[%s2301_s3 + $0x38] sm:$0xff] }
 0x312   : > { %1567 = vst [vmem:[%s1494_s18 + $0xe0] sm:$0xff] %v1566_v60  ;;  %v1582_v31 = vld [vmem:[%s2301_s3 + $0x78] sm:$0xff] }
 0x313   : > { %1583 = vst [vmem:[%s1494_s18 + $0x1e0] sm:$0xff] %v1582_v31 }
 0x314 PF: > { %s15_s26 = sadd.s32 1, %s2097_s26   ;;  %s2947_s18 = smov %s2069_s19 }
 0x315   : > { %p12_p3 = scmp.ge.s32.totalorder %s15_s26, 10   ;;  %s2948_s19 = smov %s2201_s12 }
 0x316   : > { %s2949_s20 = smov %s2077_s21  ;;  %s2950_s21 = smov %s2190_s8 }
 0x317   : > { %s2951_s22 = smov %s2089_s24  ;;  %s2952_s23 = smov %s2093_s25 }
 0x318   : > { %s2953_s24 = smov %s2956_s28  ;;  %s2954_s25 = smov %s2960_s29 }
 0x319   :  { %14 = sbr.rel (!%p12_p3) target bundleno = 7 (0x7), region = 161 }

// kernel: monai_decoder_only_forward.12
= control target key start
LH: loop header
LB: loop body
LE: loop exit
PB: predicated region body
PF: predicated region fallthrough
CT: control target
= control target key end

     0   :  { %s5420_s12 = smov 0   ;;  %s5422_s13 = smov 0   ;;  %s6728_s0 = inlined_call_operand.vmem [shape: bf16[2,128,768], index: 0, kind: input, shape index: {}, may-alias: {0,1,2}]   ;;  %s6729_s1 = inlined_call_operand.vmem [shape: bf16[2,128,768], index: 1, kind: input, shape index: {}, may-alias: {0,1,2}]   ;;  %s6730_s2 = inlined_call_operand.vmem [shape: bf16[2,128,768], index: 2, kind: input, shape index: {}, may-alias: {0,1,2}]   ;;  %s6731_s3 = inlined_call_operand.vmem [shape: bf16[2,128,256], index: 3, kind: output, shape index: {}]  }
   0x1   :  { %s5424_s14 = smov 0   ;;  %s5426_s15 = smov 0  }
   0x2   :  { %s5428_s16 = smov 0  }
   0x3 LB: > { %s32_s17 = sadd.s32 1, %s5390_s15  ;;  %p48_p1 = scmp.ne.s32.totalorder %s5382_s13, %s5378_s12  ;;  %s5394_s16 = sphi %s5428_s16, %s13_s16   ;;  %s5390_s15 = sphi %s5426_s15, %s6825_s15   ;;  %s5386_s14 = sphi %s5424_s14, %s6824_s14   ;;  %s5382_s13 = sphi %s5422_s13, %s6823_s13   ;;  %s5378_s12 = sphi %s5420_s12, %s6822_s12  }
   0x4   : > { %p34_p0 = scmp.ge.s32.totalorder %s32_s17, 2  ;;  %p49_p2 = scmp.eq.s32.totalorder %s5394_s16, 0 }
   0x5   : > { %s41_s20 = sadd.s32 1, %s5382_s13  ;;  %p4675_p5 = scmp.ge.s32.totalorder %s5394_s16, 2 }
   0x6   : > { %s6827_s17 = smov (%p34_p0, %s32_s17), 0  ;;  %p5451_p3 = por %p49_p2, %p48_p1 }
   0x7   : > { %s36_s19 = ssub.s32 %s5390_s15, %s6827_s17  ;;  %166 = sbr.rel (%p4675_p5) target bundleno = 53 (0x35), region = 16 }
   0x8   : > { %p39_p4 = scmp.eq.s32.totalorder %s36_s19, 0 }
   0xa   : > { %s5459_s21 = scalar_select %p39_p4, %s5382_s13, %s41_s20  }
   0xe   : > { %169 = sbr.rel (!%p5451_p3) target bundleno = 27 (0x1b), region = 20  ;;  %s171_s22 = sand.u32 (%p5451_p3), 1, %s5382_s13  }
   0xf   : > { %s5075_s23 = smul.u32 (%p5451_p3), 384, %s5390_s15  ;;  %s4676_s24 = sshll.u32 (%p5451_p3), %s171_s22, 7 }
  0x10   : > { %s173_s28 = scalar_lea.vmem (%p5451_p3), [#allocation5], %s4676_s24 }
  0x11   : > { %s5469_s27 = scalar_lea.vmem (%p5451_p3), %s6728_s0, %s5075_s23 }
  0x12   : > { %v237_v0 = vld [vmem:[%s5469_s27] sm:$0xff] (%p5451_p3)  ;;  %v239_v1 = vld [vmem:[%s5469_s27 + $0x18] sm:$0xff] (%p5451_p3)  ;;  %v241_v2 = vld [vmem:[%s5469_s27 + $0x30] sm:$0xff] (%p5451_p3) }
  0x13   : > { %238 = vst [vmem:[%s173_s28] sm:$0xff] (%p5451_p3), %v237_v0  ;;  %240 = vst [vmem:[%s173_s28 + $0x8] sm:$0xff] (%p5451_p3), %v239_v1  ;;  %v243_v3 = vld [vmem:[%s5469_s27 + $0x48] sm:$0xff] (%p5451_p3)  ;;  %v245_v4 = vld [vmem:[%s5469_s27 + $0x60] sm:$0xff] (%p5451_p3) }
  0x14   : > { %242 = vst [vmem:[%s173_s28 + $0x10] sm:$0xff] (%p5451_p3), %v241_v2  ;;  %v247_v5 = vld [vmem:[%s5469_s27 + $0x78] sm:$0xff] (%p5451_p3)  ;;  %244 = vst [vmem:[%s173_s28 + $0x18] sm:$0xff] (%p5451_p3), %v243_v3  ;;  %v249_v6 = vld [vmem:[%s5469_s27 + $0x90] sm:$0xff] (%p5451_p3) }
  0x15   : > { %246 = vst [vmem:[%s173_s28 + $0x20] sm:$0xff] %v245_v4  ;;  %248 = vst [vmem:[%s173_s28 + $0x28] sm:$0xff] %v247_v5  ;;  %v251_v7 = vld [vmem:[%s5469_s27 + $0xa8] sm:$0xff]  ;;  %v253_v8 = vld [vmem:[%s5469_s27 + $0xc0] sm:$0xff] }
  0x16   : > { %250 = vst [vmem:[%s173_s28 + $0x30] sm:$0xff] %v249_v6  ;;  %252 = vst [vmem:[%s173_s28 + $0x38] sm:$0xff] %v251_v7  ;;  %v255_v9 = vld [vmem:[%s5469_s27 + $0xd8] sm:$0xff]  ;;  %v257_v10 = vld [vmem:[%s5469_s27 + $0xf0] sm:$0xff] }
  0x17   : > { %254 = vst [vmem:[%s173_s28 + $0x40] sm:$0xff] %v253_v8  ;;  %v259_v11 = vld [vmem:[%s5469_s27 + $0x108] sm:$0xff]  ;;  %256 = vst [vmem:[%s173_s28 + $0x48] sm:$0xff] %v255_v9  ;;  %v261_v12 = vld [vmem:[%s5469_s27 + $0x120] sm:$0xff] }
  0x18   : > { %258 = vst [vmem:[%s173_s28 + $0x50] sm:$0xff] %v257_v10  ;;  %260 = vst [vmem:[%s173_s28 + $0x58] sm:$0xff] %v259_v11  ;;  %v263_v13 = vld [vmem:[%s5469_s27 + $0x138] sm:$0xff]  ;;  %v265_v14 = vld [vmem:[%s5469_s27 + $0x150] sm:$0xff] }
  0x19   : > { %262 = vst [vmem:[%s173_s28 + $0x60] sm:$0xff] %v261_v12  ;;  %264 = vst [vmem:[%s173_s28 + $0x68] sm:$0xff] %v263_v13  ;;  %v267_v15 = vld [vmem:[%s5469_s27 + $0x168] sm:$0xff] }
  0x1a   : > { %266 = vst [vmem:[%s173_s28 + $0x70] sm:$0xff] %v265_v14  ;;  %268 = vst [vmem:[%s173_s28 + $0x78] sm:$0xff] %v267_v15 }
  0x1b PF: > { %274 = sbr.rel (!%p5451_p3) target bundleno = 40 (0x28), region = 58  ;;  %s276_s29 = sand.u32 (%p5451_p3), 1, %s5382_s13  }
  0x1c   : > { %s4679_s30 = smul.u32 (%p5451_p3), 384, %s5390_s15  ;;  %s4678_s4 = sshll.u32 (%p5451_p3), %s276_s29, 7 }
  0x1d   : > { %s278_s8 = scalar_lea.vmem (%p5451_p3), [#allocation6], %s4678_s4 }
  0x1e   : > { %s5494_s7 = scalar_lea.vmem (%p5451_p3), %s6729_s1, %s4679_s30 }
  0x1f   : > { %v4680_v16 = vld [vmem:[%s5494_s7 + $0x8] sm:$0xff] (%p5451_p3)  ;;  %v4681_v17 = vld [vmem:[%s5494_s7 + $0x20] sm:$0xff] (%p5451_p3)  ;;  %v4682_v18 = vld [vmem:[%s5494_s7 + $0x38] sm:$0xff] (%p5451_p3) }
  0x20   : > { %346 = vst [vmem:[%s278_s8] sm:$0xff] (%p5451_p3), %v4680_v16  ;;  %348 = vst [vmem:[%s278_s8 + $0x8] sm:$0xff] (%p5451_p3), %v4681_v17  ;;  %v4683_v19 = vld [vmem:[%s5494_s7 + $0x50] sm:$0xff] (%p5451_p3)  ;;  %v4684_v20 = vld [vmem:[%s5494_s7 + $0x68] sm:$0xff] (%p5451_p3) }
  0x21   : > { %350 = vst [vmem:[%s278_s8 + $0x10] sm:$0xff] (%p5451_p3), %v4682_v18  ;;  %v4685_v21 = vld [vmem:[%s5494_s7 + $0x80] sm:$0xff] (%p5451_p3)  ;;  %352 = vst [vmem:[%s278_s8 + $0x18] sm:$0xff] (%p5451_p3), %v4683_v19  ;;  %v4686_v22 = vld [vmem:[%s5494_s7 + $0x98] sm:$0xff] (%p5451_p3) }
  0x22   : > { %354 = vst [vmem:[%s278_s8 + $0x20] sm:$0xff] %v4684_v20  ;;  %356 = vst [vmem:[%s278_s8 + $0x28] sm:$0xff] %v4685_v21  ;;  %v4687_v23 = vld [vmem:[%s5494_s7 + $0xb0] sm:$0xff]  ;;  %v4688_v24 = vld [vmem:[%s5494_s7 + $0xc8] sm:$0xff] }
  0x23   : > { %358 = vst [vmem:[%s278_s8 + $0x30] sm:$0xff] %v4686_v22  ;;  %360 = vst [vmem:[%s278_s8 + $0x38] sm:$0xff] %v4687_v23  ;;  %v4689_v25 = vld [vmem:[%s5494_s7 + $0xe0] sm:$0xff]  ;;  %v4690_v26 = vld [vmem:[%s5494_s7 + $0xf8] sm:$0xff] }
  0x24   : > { %362 = vst [vmem:[%s278_s8 + $0x40] sm:$0xff] %v4688_v24  ;;  %v4691_v27 = vld [vmem:[%s5494_s7 + $0x110] sm:$0xff]  ;;  %364 = vst [vmem:[%s278_s8 + $0x48] sm:$0xff] %v4689_v25  ;;  %v4692_v28 = vld [vmem:[%s5494_s7 + $0x128] sm:$0xff] }
  0x25   : > { %366 = vst [vmem:[%s278_s8 + $0x50] sm:$0xff] %v4690_v26  ;;  %368 = vst [vmem:[%s278_s8 + $0x58] sm:$0xff] %v4691_v27  ;;  %v4693_v29 = vld [vmem:[%s5494_s7 + $0x140] sm:$0xff]  ;;  %v4694_v30 = vld [vmem:[%s5494_s7 + $0x158] sm:$0xff] }
  0x26   : > { %370 = vst [vmem:[%s278_s8 + $0x60] sm:$0xff] %v4692_v28  ;;  %372 = vst [vmem:[%s278_s8 + $0x68] sm:$0xff] %v4693_v29  ;;  %v4695_v31 = vld [vmem:[%s5494_s7 + $0x170] sm:$0xff] }
  0x27   : > { %374 = vst [vmem:[%s278_s8 + $0x70] sm:$0xff] %v4694_v30  ;;  %376 = vst [vmem:[%s278_s8 + $0x78] sm:$0xff] %v4695_v31 }
  0x28 PF: > { %382 = sbr.rel (!%p5451_p3) target bundleno = 53 (0x35), region = 96  ;;  %s384_s9 = sand.u32 (%p5451_p3), 1, %s5382_s13  }
  0x29   : > { %s4697_s10 = smul.u32 (%p5451_p3), 384, %s5390_s15  ;;  %s4696_s11 = sshll.u32 (%p5451_p3), %s384_s9, 7 }
  0x2a   : > { %s386_s18 = scalar_lea.vmem (%p5451_p3), [#allocation7], %s4696_s11 }
  0x2b   : > { %s5519_s22 = scalar_lea.vmem (%p5451_p3), %s6730_s2, %s4697_s10 }
  0x2c   : > { %v4698_v32 = vld [vmem:[%s5519_s22 + $0x10] sm:$0xff] (%p5451_p3)  ;;  %v4699_v33 = vld [vmem:[%s5519_s22 + $0x28] sm:$0xff] (%p5451_p3)  ;;  %v4700_v34 = vld [vmem:[%s5519_s22 + $0x40] sm:$0xff] (%p5451_p3) }
  0x2d   : > { %454 = vst [vmem:[%s386_s18] sm:$0xff] (%p5451_p3), %v4698_v32  ;;  %456 = vst [vmem:[%s386_s18 + $0x8] sm:$0xff] (%p5451_p3), %v4699_v33  ;;  %v4701_v35 = vld [vmem:[%s5519_s22 + $0x58] sm:$0xff] (%p5451_p3)  ;;  %v4702_v36 = vld [vmem:[%s5519_s22 + $0x70] sm:$0xff] (%p5451_p3) }
  0x2e   : > { %458 = vst [vmem:[%s386_s18 + $0x10] sm:$0xff] (%p5451_p3), %v4700_v34  ;;  %v4703_v37 = vld [vmem:[%s5519_s22 + $0x88] sm:$0xff] (%p5451_p3)  ;;  %460 = vst [vmem:[%s386_s18 + $0x18] sm:$0xff] (%p5451_p3), %v4701_v35  ;;  %v4704_v38 = vld [vmem:[%s5519_s22 + $0xa0] sm:$0xff] (%p5451_p3) }
  0x2f   : > { %462 = vst [vmem:[%s386_s18 + $0x20] sm:$0xff] %v4702_v36  ;;  %464 = vst [vmem:[%s386_s18 + $0x28] sm:$0xff] %v4703_v37  ;;  %v4705_v39 = vld [vmem:[%s5519_s22 + $0xb8] sm:$0xff]  ;;  %v4706_v40 = vld [vmem:[%s5519_s22 + $0xd0] sm:$0xff] }
  0x30   : > { %466 = vst [vmem:[%s386_s18 + $0x30] sm:$0xff] %v4704_v38  ;;  %468 = vst [vmem:[%s386_s18 + $0x38] sm:$0xff] %v4705_v39  ;;  %v4707_v41 = vld [vmem:[%s5519_s22 + $0xe8] sm:$0xff]  ;;  %v4708_v42 = vld [vmem:[%s5519_s22 + $0x100] sm:$0xff] }
  0x31   : > { %470 = vst [vmem:[%s386_s18 + $0x40] sm:$0xff] %v4706_v40  ;;  %v4709_v43 = vld [vmem:[%s5519_s22 + $0x118] sm:$0xff]  ;;  %472 = vst [vmem:[%s386_s18 + $0x48] sm:$0xff] %v4707_v41  ;;  %v4710_v44 = vld [vmem:[%s5519_s22 + $0x130] sm:$0xff] }
  0x32   : > { %474 = vst [vmem:[%s386_s18 + $0x50] sm:$0xff] %v4708_v42  ;;  %476 = vst [vmem:[%s386_s18 + $0x58] sm:$0xff] %v4709_v43  ;;  %v4711_v45 = vld [vmem:[%s5519_s22 + $0x148] sm:$0xff]  ;;  %v4712_v46 = vld [vmem:[%s5519_s22 + $0x160] sm:$0xff] }
  0x33   : > { %478 = vst [vmem:[%s386_s18 + $0x60] sm:$0xff] %v4710_v44  ;;  %480 = vst [vmem:[%s386_s18 + $0x68] sm:$0xff] %v4711_v45  ;;  %v4713_v47 = vld [vmem:[%s5519_s22 + $0x178] sm:$0xff] }
  0x34   : > { %482 = vst [vmem:[%s386_s18 + $0x70] sm:$0xff] %v4712_v46  ;;  %484 = vst [vmem:[%s386_s18 + $0x78] sm:$0xff] %v4713_v47 }
  0x35 PF: > { %p4714_p6 = scmp.ge.s32.totalorder %s5394_s16, 1  ;;  %p489_p7 = scmp.lt.s32.totalorder %s5394_s16, 3 }
  0x37   : > { %p490_p8 = pnand %p4714_p6, %p489_p7 }
  0x39   : > { %493 = sbr.rel (%p490_p8) target bundleno = 1583 (0x62f), region = 134 }
  0x40   : > { %s496_s23 = sand.u32 1, %s5378_s12   ;;  %vm569_vm0 = vcmask 15360   ;;  %v5396_v0 = vmov -1e+30   ;;  %v2376_v1 = vlaneseq  ;;  %v6733_v34 = vmov 0   ;;  %p554_p9 = scmp.lt.s32.totalorder %s5386_s14, 1 }
  0x41   : > { %s5540_s24 = sshll.u32 %s496_s23, 7  ;;  %572 = vst.msk [vmem:[#allocation2 + $0x10] sm:$0xff] %vm569_vm0, %v5396_v0  ;;  %570 = vst.msk [vmem:[#allocation2] sm:$0xff] %vm569_vm0, %v5396_v0  ;;  %5121 = vset.pattern.permute.xlu1 %v6733_v34  ;;  %5120 = vset.pattern.permute.xlu0 %v6733_v34 }
  0x42   : > { %s5543_s25 = scalar_lea.vmem [#allocation6], %s5540_s24  ;;  %s5549_s12 = scalar_lea.vmem [#allocation5], %s5540_s24  ;;  %571 = vst.msk [vmem:[#allocation2 + $0x8] sm:$0xff] %vm569_vm0, %v5396_v0  ;;  %573 = vst.msk [vmem:[#allocation2 + $0x18] sm:$0xff] %vm569_vm0, %v5396_v0  ;;  %v5580_v2 = vshrl.u32 %v2376_v1, 7  ;;  %v5585_v4 = vand.u32 127, %v2376_v1 }
  0x43   : > { %v5144_v48 = vld [vmem:[%s5543_s25] ss:$8 sps:$4 sm:$0xff]   ;;  %v5147_v49 = vld [vmem:[%s5543_s25 + $0x10] ss:$8 sps:$4 sm:$0xff]   ;;  %574 = vst.msk [vmem:[#allocation2 + $0x20] sm:$0xff] %vm569_vm0, %v5396_v0  ;;  %575 = vst.msk [vmem:[#allocation2 + $0x28] sm:$0xff] %vm569_vm0, %v5396_v0 }
  0x44   : > { %4947 = vmatprep.subr.bf16.mxu0 %v5144_v48  ;;  %v5149_v50 = vld [vmem:[%s5543_s25 + $0x20] ss:$8 sps:$4 sm:$0xff]   ;;  %v5151_v52 = vld [vmem:[%s5543_s25 + $0x30] ss:$8 sps:$4 sm:$0xff]   ;;  %576 = vst.msk [vmem:[#allocation2 + $0x30] sm:$0xff] %vm569_vm0, %v5396_v0  ;;  %577 = vst.msk [vmem:[#allocation2 + $0x38] sm:$0xff] %vm569_vm0, %v5396_v0  ;;  %vm2395_vm2 = vcmp.ge.s32.totalorder %v5580_v2, %v5585_v4 }
  0x45   : > { %4948 = vmatpush3.bf16.xpose.msra.mxu0 %v5144_v48  ;;  %v5161_v51 = vld [vmem:[%s5549_s12] ss:$8 sps:$4 sm:$0xff]   ;;  %v5155_v54 = vld [vmem:[%s5543_s25 + $0x50] ss:$8 sps:$4 sm:$0xff]   ;;  %578 = vst.msk [vmem:[#allocation2 + $0x40] sm:$0xff] %vm569_vm0, %v5396_v0  ;;  %579 = vst.msk [vmem:[#allocation2 + $0x48] sm:$0xff] %vm569_vm0, %v5396_v0 }
  0x46   : > { %4949 = vmatprep.subr.bf16.mxu0 %v5147_v49  ;;  %4963 = vmatprep.mubr.bf16.mxu0 %v5161_v51  ;;  %v5153_v53 = vld [vmem:[%s5543_s25 + $0x40] ss:$8 sps:$4 sm:$0xff]   ;;  %v5159_v56 = vld [vmem:[%s5543_s25 + $0x70] ss:$8 sps:$4 sm:$0xff]   ;;  %580 = vst.msk [vmem:[#allocation2 + $0x50] sm:$0xff] %vm569_vm0, %v5396_v0  ;;  %581 = vst.msk [vmem:[#allocation2 + $0x58] sm:$0xff] %vm569_vm0, %v5396_v0 }
  0x47   : > { %v5157_v55 = vld [vmem:[%s5543_s25 + $0x60] ss:$8 sps:$4 sm:$0xff]   ;;  %v5164_v57 = vld [vmem:[%s5549_s12 + $0x10] ss:$8 sps:$4 sm:$0xff]   ;;  %582 = vst.msk [vmem:[#allocation2 + $0x60] sm:$0xff] %vm569_vm0, %v5396_v0  ;;  %583 = vst.msk [vmem:[#allocation2 + $0x68] sm:$0xff] %vm569_vm0, %v5396_v0 }
  0x48   : > { %v5167_v58 = vld [vmem:[%s5549_s12 + $0x20] ss:$8 sps:$4 sm:$0xff]   ;;  %v5169_v59 = vld [vmem:[%s5549_s12 + $0x30] ss:$8 sps:$4 sm:$0xff]   ;;  %584 = vst.msk [vmem:[#allocation2 + $0x70] sm:$0xff] %vm569_vm0, %v5396_v0  ;;  %585 = vst.msk [vmem:[#allocation2 + $0x78] sm:$0xff] %vm569_vm0, %v5396_v0 }
  0x49   : > { %v5171_v60 = vld [vmem:[%s5549_s12 + $0x40] ss:$8 sps:$4 sm:$0xff]   ;;  %v5173_v61 = vld [vmem:[%s5549_s12 + $0x50] ss:$8 sps:$4 sm:$0xff]   ;;  %v5583_v3 = vadd.s32 16, %v5580_v2  ;;  %v5590_v5 = vadd.s32 24, %v5580_v2 }
  0x4a   : > { %v5175_v62 = vld [vmem:[%s5549_s12 + $0x60] ss:$8 sps:$4 sm:$0xff]   ;;  %v5177_v63 = vld [vmem:[%s5549_s12 + $0x70] ss:$8 sps:$4 sm:$0xff]   ;;  %v5595_v6 = vadd.s32 8, %v5580_v2  ;;  %v5611_v12 = vadd.s32 48, %v5580_v2 }
  0x4b   : > { %vm2397_vm1 = vcmp.ge.s32.totalorder %v5583_v3, %v5585_v4  ;;  %vm2398_vm3 = vcmp.ge.s32.totalorder %v5590_v5, %v5585_v4  ;;  %v5617_v14 = vadd.s32 56, %v5580_v2  ;;  %v5625_v16 = vadd.s32 32, %v5580_v2  ;;  %s5776_s26 = scalar_lea.vmem [#allocation7], %s5540_s24  ;;  %v5793_v0 = vld [vmem:[#allocation2 + $0x18] sm:$0xff]  ;;  %v5798_v1 = vld [vmem:[#allocation2 + $0x8] sm:$0xff]  ;;  %s6829_s14 = smov (!%p554_p9, %s5386_s14), 1 }
  0x4c   : > { %6748 = vst [vmem:[#allocation8_spill] sm:$0xff] %v5611_v12  ;;  %vm2396_vm4 = vcmp.ge.s32.totalorder %v5595_v6, %v5585_v4  ;;  %vm2401_vm5 = vcmp.ge.s32.totalorder %v5611_v12, %v5585_v4  ;;  %v5636_v18 = vadd.s32 40, %v5580_v2  ;;  %v5651_v23 = vadd.s32 80, %v5580_v2  ;;  %v2367_v3 = vld [vmem:[%s5776_s26 + $0x38] sm:$0xff]  ;;  %s4850_s27 = sshll.u32 %s6829_s14, 7 }
  0x4d   : > { %4950 = vmatpush3.bf16.xpose.msra.mxu0 %v5147_v49  ;;  %vm2402_vm6 = vcmp.ge.s32.totalorder %v5617_v14, %v5585_v4  ;;  %vm2399_vm7 = vcmp.ge.s32.totalorder %v5625_v16, %v5585_v4  ;;  %v5666_v27 = vadd.s32 88, %v5580_v2  ;;  %v5674_v29 = vadd.s32 64, %v5580_v2  ;;  %s6641_s30 = scalar_lea.vmem %s6731_s3, %s4850_s27 }
  0x4e   : > { %4951 = vmatprep.subr.bf16.mxu0 %v5149_v50  ;;  %6749 = vst [vmem:[#allocation9_spill] sm:$0xff] %v5636_v18  ;;  %vm2400_vm8 = vcmp.ge.s32.totalorder %v5636_v18, %v5585_v4  ;;  %6750 = vst [vmem:[#allocation10_spill] sm:$0xff] %v5651_v23  ;;  %v5677_v30 = vadd.s32 72, %v5580_v2  ;;  %vm6732_vm9 = vcmp.ge.s32.totalorder %v5651_v23, %v5585_v4  ;;  %v5697_v36 = vadd.s32 112, %v5580_v2 }
  0x4f   : > { %6751 = vst [vmem:[#allocation11_spill] sm:$0xff] %v5666_v27  ;;  %6752 = vst [vmem:[#allocation12_spill] sm:$0xff] %v5674_v29  ;;  %vm2406_vm10 = vcmp.ge.s32.totalorder %v5666_v27, %v5585_v4  ;;  %vm2403_vm11 = vcmp.ge.s32.totalorder %v5674_v29, %v5585_v4  ;;  %v5707_v39 = vadd.s32 120, %v5580_v2  ;;  %v5720_v42 = vadd.s32 96, %v5580_v2  ;;  %v5887_v34 = vld [vmem:[#allocation2 + $0x78] sm:$0xff] }
  0x50   : > { %6753 = vst [vmem:[#allocation13_spill] sm:$0xff] %v5677_v30  ;;  %vm2404_vm12 = vcmp.ge.s32.totalorder %v5677_v30, %v5585_v4  ;;  %6754 = vst [vmem:[#allocation14_spill] sm:$0xff] %v5697_v36  ;;  %v5723_v43 = vadd.s32 104, %v5580_v2  ;;  %vm2409_vm13 = vcmp.ge.s32.totalorder %v5697_v36, %v5585_v4  ;;  %v5398_v48 = vmov 0.0  }
  0x51   : > { %6755 = vst [vmem:[#allocation15_spill] sm:$0xff] %v5707_v39  ;;  %6756 = vst [vmem:[#allocation16_spill] sm:$0xff] %v5720_v42  ;;  %vm2410_vm14 = vcmp.ge.s32.totalorder %v5707_v39, %v5585_v4  ;;  %vm2407_vm15 = vcmp.ge.s32.totalorder %v5720_v42, %v5585_v4  ;;  %v5904_v39 = vld [vmem:[#allocation2 + $0x68] sm:$0xff] }
  0x52   : > { %6757 = vst [vmem:[#allocation17_spill] sm:$0xff] %v5723_v43  ;;  %588 = vst.msk [vmem:[#allocation3 + $0x10] sm:$0xff] %vm569_vm0, %v5398_v48 }
  0x53   : > { %586 = vst.msk [vmem:[#allocation3] sm:$0xff] %vm569_vm0, %v5398_v48  ;;  %587 = vst.msk [vmem:[#allocation3 + $0x8] sm:$0xff] %vm569_vm0, %v5398_v48 }
  0x54   : > { %589 = vst.msk [vmem:[#allocation3 + $0x18] sm:$0xff] %vm569_vm0, %v5398_v48  ;;  %590 = vst.msk [vmem:[#allocation3 + $0x20] sm:$0xff] %vm569_vm0, %v5398_v48 }
  0x55   : > { %4952 = vmatpush3.bf16.xpose.msra.mxu0 %v5149_v50  ;;  %591 = vst.msk [vmem:[#allocation3 + $0x28] sm:$0xff] %vm569_vm0, %v5398_v48  ;;  %592 = vst.msk [vmem:[#allocation3 + $0x30] sm:$0xff] %vm569_vm0, %v5398_v48 }
  0x56   : > { %4953 = vmatprep.subr.bf16.mxu0 %v5151_v52  ;;  %593 = vst.msk [vmem:[#allocation3 + $0x38] sm:$0xff] %vm569_vm0, %v5398_v48  ;;  %594 = vst.msk [vmem:[#allocation3 + $0x40] sm:$0xff] %vm569_vm0, %v5398_v48 }
  0x57   : > { %595 = vst.msk [vmem:[#allocation3 + $0x48] sm:$0xff] %vm569_vm0, %v5398_v48  ;;  %596 = vst.msk [vmem:[#allocation3 + $0x50] sm:$0xff] %vm569_vm0, %v5398_v48 }
  0x58   : > { %597 = vst.msk [vmem:[#allocation3 + $0x58] sm:$0xff] %vm569_vm0, %v5398_v48  ;;  %598 = vst.msk [vmem:[#allocation3 + $0x60] sm:$0xff] %vm569_vm0, %v5398_v48 }
  0x59   : > { %599 = vst.msk [vmem:[#allocation3 + $0x68] sm:$0xff] %vm569_vm0, %v5398_v48  ;;  %600 = vst.msk [vmem:[#allocation3 + $0x70] sm:$0xff] %vm569_vm0, %v5398_v48 }
  0x5a   : > { %601 = vst.msk [vmem:[#allocation3 + $0x78] sm:$0xff] %vm569_vm0, %v5398_v48  ;;  %vm2940_vm0 = vcmask 7168   ;;  %v5835_v48 = vld [vmem:[#allocation2 + $0x28] sm:$0xff] }
  0x5d   : > { %4954 = vmatpush3.bf16.xpose.msra.mxu0 %v5151_v52 }
  0x5e   : > { %4955 = vmatprep.subr.bf16.mxu0 %v5153_v53 }
  0x65   : > { %4956 = vmatpush3.bf16.xpose.msra.mxu0 %v5153_v53  ;;  %v5179_v53 = vld [vmem:[%s5776_s26] ss:$8 sps:$4 sm:$0xff]  }
  0x66   : > { %4957 = vmatprep.subr.bf16.mxu0 %v5155_v54  ;;  %4979 = vmatprep.subr.bf16.mxu1 %v5179_v53 }
  0x67   : > { %4980 = vmatpush3.bf16.msra.mxu1 %v5179_v53 }
  0x6d   : > { %4958 = vmatpush3.bf16.xpose.msra.mxu0 %v5155_v54  ;;  %v5181_v54 = vld [vmem:[%s5776_s26 + $0x4] ss:$8 sps:$4 sm:$0xff]  }
  0x6e   : > { %4959 = vmatprep.subr.bf16.mxu0 %v5157_v55 }
  0x75   : > { %4960 = vmatpush3.bf16.xpose.msra.mxu0 %v5157_v55  ;;  %v5182_v55 = vld [vmem:[%s5776_s26 + $0x10] ss:$8 sps:$4 sm:$0xff]  }
  0x76   : > { %4961 = vmatprep.subr.bf16.mxu0 %v5159_v56  ;;  %4981 = vmatprep.subr.bf16.mxu1 %v5182_v55 }
  0x77   : > { %4982 = vmatpush3.bf16.msra.mxu1 %v5182_v55 }
  0x7d   : > { %4962 = vmatpush3.bf16.xpose.msra.mxu0 %v5159_v56  ;;  %v5184_v56 = vld [vmem:[%s5776_s26 + $0x20] ss:$8 sps:$4 sm:$0xff]  }
  0x7e   : > { %5043 = vmatprep.subr.bf16.mxu0 %v5181_v54  ;;  %4983 = vmatprep.subr.bf16.mxu1 %v5184_v56 }
  0x7f   : > { %4984 = vmatpush3.bf16.msra.mxu1 %v5184_v56 }
  0x84   : > { %4964 = vmatmul.mubr.bf16.vlgmr.msra.gmra.mrb[0].mxu0 %v5164_v57  ;;  %v5782_v57 = vld [vmem:[#allocation2 + $0x10] sm:$0xff] }
  0x85   : > { %4967 = vmatprep.mubr.bf16.mxu0 %v5167_v58  ;;  %5044 = vmatpush3.bf16.msra.mxu0 %v5181_v54  ;;  %v5784_v58 = vld [vmem:[#allocation2] sm:$0xff] }
  0x86   : > { %v5192_v54 = vld [vmem:[%s5776_s26 + $0x60] ss:$8 sps:$4 sm:$0xff]  }
  0x8c   : > { %4968 = vmatmul.mubr.bf16.gmra.mrb[4].mxu0 %v5169_v59 }
  0x8d   : > { %4971 = vmatprep.mubr.bf16.mxu0 %v5171_v60 }
  0x94   : > { %4972 = vmatmul.mubr.bf16.gmra.mrb[8].mxu0 %v5173_v61 }
  0x95   : > { %4975 = vmatprep.mubr.bf16.mxu0 %v5175_v62  ;;  %v5186_v62 = vld [vmem:[%s5776_s26 + $0x30] ss:$8 sps:$4 sm:$0xff]  }
  0x96   : > { %4985 = vmatprep.subr.bf16.mxu1 %v5186_v62 }
  0x97   : > { %4986 = vmatpush3.bf16.msra.mxu1 %v5186_v62  ;;  %v5853_v62 = vld [vmem:[#allocation2 + $0x58] sm:$0xff] }
  0x9c   : > { %4976 = vmatmul.mubr.bf16.gmra.mrb[12].mxu0 %v5177_v63 }
 0x157   : > { %v4965_v7 = vpop.f32.mrb[0].mxu0 }
 0x158   : > { %v2541_v8 = vpop.f32.mrb[1].mxu0  ;;  %v5600_v9 = vsel %vm2397_vm1, %v4965_v7, -1e+30  ;;  %v5884_v7 = vld [vmem:[#allocation2 + $0x70] sm:$0xff] }
 0x159   : > { %2640 = vmax.xlane.f32.xlu1 %v5600_v9  ;;  %v4966_v10 = vpop.f32.mrb[2].mxu0  ;;  %v5606_v11 = vsel %vm2395_vm2, %v2541_v8, -1e+30 }
 0x15a   : > { %2636 = vmax.xlane.f32.xlu0 %v5606_v11  ;;  %v2544_v13 = vpop.f32.mrb[3].mxu0  ;;  %v5622_v15 = vsel %vm2398_vm3, %v4966_v10, -1e+30 }
 0x15b   : > { %v5631_v17 = vsel %vm2396_vm4, %v2544_v13, -1e+30 }
 0x15d   : > { %2642 = vmax.xlane.f32.xlu1 %v5622_v15 }
 0x15e   : > { %2638 = vmax.xlane.f32.xlu0 %v5631_v17 }
 0x15f   : > { %v4969_v19 = vpop.f32.mrb[4].mxu0 }
 0x160   : > { %v2557_v20 = vpop.f32.mrb[5].mxu0  ;;  %v5644_v21 = vsel %vm2401_vm5, %v4969_v19, -1e+30  ;;  %v5188_v19 = vld [vmem:[%s5776_s26 + $0x40] ss:$8 sps:$4 sm:$0xff]  }
 0x161   : > { %v4970_v22 = vpop.f32.mrb[6].mxu0  ;;  %v5663_v26 = vsel %vm2399_vm7, %v2557_v20, -1e+30  ;;  %4987 = vmatprep.subr.bf16.mxu1 %v5188_v19 }
 0x162   : > { %v5656_v24 = vsel %vm2402_vm6, %v4970_v22, -1e+30  ;;  %v2560_v25 = vpop.f32.mrb[7].mxu0  ;;  %2648 = vmax.xlane.f32.xlu0 %v5644_v21  ;;  %4988 = vmatpush3.bf16.msra.mxu1 %v5188_v19 }
 0x163   : > { %2650 = vmax.xlane.f32.xlu1 %v5656_v24  ;;  %v5671_v28 = vsel %vm2400_vm8, %v2560_v25, -1e+30  ;;  %v5816_v25 = vld [vmem:[#allocation2 + $0x30] sm:$0xff] }
 0x166   : > { %2644 = vmax.xlane.f32.xlu0 %v5663_v26 }
 0x167   : > { %2646 = vmax.xlane.f32.xlu1 %v5671_v28  ;;  %v4973_v31 = vpop.f32.mrb[8].mxu0 }
 0x168   : > { %v2573_v32 = vpop.f32.mrb[9].mxu0  ;;  %v5688_v33 = vsel %vm6732_vm9, %v4973_v31, -1e+30  ;;  %vm2408_vm9 = vcmp.ge.s32.totalorder %v5723_v43, %v5585_v4  ;;  %v5821_v31 = vld [vmem:[#allocation2 + $0x38] sm:$0xff]  ;;  %v5901_v43 = vld [vmem:[#allocation2 + $0x60] sm:$0xff] }
 0x169   : > { %v4974_v35 = vpop.f32.mrb[10].mxu0  ;;  %v5712_v40 = vsel %vm2403_vm11, %v2573_v32, -1e+30 }
 0x16a   : > { %v5702_v37 = vsel %vm2406_vm10, %v4974_v35, -1e+30  ;;  %v2576_v38 = vpop.f32.mrb[11].mxu0  ;;  %2656 = vmax.xlane.f32.xlu0 %v5688_v33  ;;  %v5190_v35 = vld [vmem:[%s5776_s26 + $0x50] ss:$8 sps:$4 sm:$0xff]  }
 0x16b   : > { %2658 = vmax.xlane.f32.xlu1 %v5702_v37  ;;  %v5717_v41 = vsel %vm2404_vm12, %v2576_v38, -1e+30  ;;  %4989 = vmatprep.subr.bf16.mxu1 %v5190_v35 }
 0x16c   : > { %4990 = vmatpush3.bf16.msra.mxu1 %v5190_v35 }
 0x16d   : > { %4991 = vmatprep.subr.bf16.mxu1 %v5192_v54 }
 0x16e   : > { %2652 = vmax.xlane.f32.xlu0 %v5712_v40 }
 0x16f   : > { %2654 = vmax.xlane.f32.xlu1 %v5717_v41  ;;  %v4977_v44 = vpop.f32.mrb[12].mxu0 }
 0x170   : > { %v2589_v45 = vpop.f32.mrb[13].mxu0  ;;  %v5734_v46 = vsel %vm2409_vm13, %v4977_v44, -1e+30  ;;  %4992 = vmatpush3.bf16.msra.mxu1 %v5192_v54  ;;  %v5870_v54 = vld [vmem:[#allocation2 + $0x48] sm:$0xff] }
 0x171   : > { %v4978_v47 = vpop.f32.mrb[14].mxu0  ;;  %v5766_v51 = vsel %vm2407_vm15, %v2589_v45, -1e+30 }
 0x172   : > { %v5759_v49 = vsel %vm2410_vm14, %v4978_v47, -1e+30  ;;  %v2592_v50 = vpop.f32.mrb[15].mxu0  ;;  %2664 = vmax.xlane.f32.xlu0 %v5734_v46  ;;  %v5830_v47 = vld [vmem:[#allocation2 + $0x20] sm:$0xff] }
 0x173   : > { %2666 = vmax.xlane.f32.xlu1 %v5759_v49  ;;  %v5771_v52 = vsel %vm2408_vm9, %v2592_v50, -1e+30 }
 0x176   : > { %2660 = vmax.xlane.f32.xlu0 %v5766_v51 }
 0x177   : > { %2662 = vmax.xlane.f32.xlu1 %v5771_v52 }
 0x1e6   : > { %v2641_v59 = vpop.xlane.xlu1 %2640 }
 0x1e7   : > { %v5787_v60 = vmax.f32 %v5782_v57, %v2641_v59  ;;  %v2637_v61 = vpop.xlane.xlu0 %2636 }
 0x1e8   : > { %v5791_v63 = vmax.f32 %v5784_v58, %v2637_v61  ;;  %v5848_v61 = vld [vmem:[#allocation2 + $0x50] sm:$0xff] }
 0x1e9   : > { %3256 = vst.msk [vmem:[#allocation2 + $0x10] sm:$0xff] %vm2940_vm0, %v5787_v60  ;;  %2744 = vperm.xlu1 %5121, %v5787_v60  }
 0x1ea   : > { %3254 = vst.msk [vmem:[#allocation2] sm:$0xff] %vm2940_vm0, %v5791_v63  ;;  %v2643_v8 = vpop.xlane.xlu1 %2642  ;;  %2734 = vperm.xlu0 %5120, %v5791_v63  }
 0x1eb   : > { %v5806_v10 = vmax.f32 %v5793_v0, %v2643_v8  ;;  %v2639_v13 = vpop.xlane.xlu0 %2638  ;;  %v5856_v8 = vld [vmem:[%s5543_s25 + $0x4] ss:$8 sps:$4 sm:$0xff]  }
 0x1ec   : > { %v5810_v20 = vmax.f32 %v5798_v1, %v2639_v13 }
 0x1ed   : > { %3257 = vst.msk [vmem:[#allocation2 + $0x18] sm:$0xff] %vm2940_vm0, %v5806_v10 }
 0x1ee   : > { %3255 = vst.msk [vmem:[#allocation2 + $0x8] sm:$0xff] %vm2940_vm0, %v5810_v20  ;;  %2739 = vperm.xlu1 %5121, %v5810_v20   ;;  %v2685_v42 = vsub.f32 %v5798_v1, %v5810_v20  ;;  %v2686_v20 = vsub.f32 %v5782_v57, %v5787_v60 }
 0x1ef   : > { %v2649_v32 = vpop.xlane.xlu0 %2648 }
 0x1f0   : > { %v2651_v38 = vpop.xlane.xlu1 %2650  ;;  %v5825_v44 = vmax.f32 %v5816_v25, %v2649_v32  ;;  %v5194_v32 = vld [vmem:[%s5776_s26 + $0x70] ss:$8 sps:$4 sm:$0xff]  }
 0x1f1   : > { %v5828_v45 = vmax.f32 %v5821_v31, %v2651_v38  ;;  %4993 = vmatprep.subr.bf16.mxu1 %v5194_v32 }
 0x1f2   : > { %2749 = vperm.xlu1 %5121, %v5806_v10   ;;  %3260 = vst.msk [vmem:[#allocation2 + $0x30] sm:$0xff] %vm2940_vm0, %v5825_v44  ;;  %4994 = vmatpush3.bf16.msra.mxu1 %v5194_v32 }
 0x1f3   : > { %3261 = vst.msk [vmem:[#allocation2 + $0x38] sm:$0xff] %vm2940_vm0, %v5828_v45  ;;  %v2645_v53 = vpop.xlane.xlu0 %2644  ;;  %5011 = vmatprep.subr.bf16.mxu1 %v5856_v8 }
 0x1f4   : > { %v2647_v55 = vpop.xlane.xlu1 %2646  ;;  %v5843_v56 = vmax.f32 %v5830_v47, %v2645_v53 }
 0x1f5   : > { %v5846_v59 = vmax.f32 %v5835_v48, %v2647_v55  ;;  %v2628_v55 = vld [vmem:[#allocation2 + $0x40] sm:$0xff] }
 0x1f6   : > { %2764 = vperm.xlu1 %5121, %v5825_v44   ;;  %3258 = vst.msk [vmem:[#allocation2 + $0x20] sm:$0xff] %vm2940_vm0, %v5843_v56 }
 0x1f7   : > { %3259 = vst.msk [vmem:[#allocation2 + $0x28] sm:$0xff] %vm2940_vm0, %v5846_v59  ;;  %v2657_v19 = vpop.xlane.xlu0 %2656 }
 0x1f8   : > { %v2659_v35 = vpop.xlane.xlu1 %2658  ;;  %v5864_v38 = vmax.f32 %v5848_v61, %v2657_v19 }
 0x1f9   : > { %v5867_v53 = vmax.f32 %v5853_v62, %v2659_v35 }
 0x1fa   : > { %2754 = vperm.xlu1 %5121, %v5843_v56   ;;  %3264 = vst.msk [vmem:[#allocation2 + $0x50] sm:$0xff] %vm2940_vm0, %v5864_v38 }
 0x1fb   : > { %3265 = vst.msk [vmem:[#allocation2 + $0x58] sm:$0xff] %vm2940_vm0, %v5867_v53  ;;  %v2653_v35 = vpop.xlane.xlu0 %2652 }
 0x1fc   : > { %v2655_v13 = vpop.xlane.xlu1 %2654  ;;  %v2676_v50 = vmax.f32 %v2628_v55, %v2653_v35 }
 0x1fd   : > { %v5882_v22 = vmax.f32 %v5870_v54, %v2655_v13 }
 0x1fe   : > { %2759 = vperm.xlu1 %5121, %v5846_v59   ;;  %3262 = vst.msk [vmem:[#allocation2 + $0x40] sm:$0xff] %vm2940_vm0, %v2676_v50  ;;  %v2692_v60 = vsub.f32 %v2628_v55, %v2676_v50 }
 0x1ff   : > { %3263 = vst.msk [vmem:[#allocation2 + $0x48] sm:$0xff] %vm2940_vm0, %v5882_v22  ;;  %2779 = vperm.xlu0 %5120, %v5882_v22   ;;  %v2665_v35 = vpop.xlane.xlu0 %2664 }
 0x200   : > { %v2667_v19 = vpop.xlane.xlu1 %2666  ;;  %v5896_v13 = vmax.f32 %v5884_v7, %v2665_v35  ;;  %v2702_v35 = vmul.f32 1.442695, %v2685_v42  ;;  %v2690_v42 = vsub.f32 %v5816_v25, %v5825_v44 }
 0x201   : > { %v5899_v36 = vmax.f32 %v5887_v34, %v2667_v19 }
 0x202   : > { %2769 = vperm.xlu1 %5121, %v5828_v45   ;;  %3268 = vst.msk [vmem:[#allocation2 + $0x70] sm:$0xff] %vm2940_vm0, %v5896_v13  ;;  %5196 = vpow2.f32 %v2702_v35  ;;  %v2712_v27 = vmul.f32 1.442695, %v2690_v42  ;;  %v2716_v35 = vmul.f32 1.442695, %v2692_v60 }
 0x203   : > { %3269 = vst.msk [vmem:[#allocation2 + $0x78] sm:$0xff] %vm2940_vm0, %v5899_v36  ;;  %2789 = vperm.xlu0 %5120, %v5867_v53   ;;  %v2661_v19 = vpop.xlane.xlu0 %2660 }
 0x204   : > { %v2663_v23 = vpop.xlane.xlu1 %2662  ;;  %v5918_v30 = vmax.f32 %v5901_v43, %v2661_v19  ;;  %v2688_v19 = vsub.f32 %v5830_v47, %v5843_v56 }
 0x205   : > { %v5921_v32 = vmax.f32 %v5904_v39, %v2663_v23  ;;  %v2704_v23 = vmul.f32 1.442695, %v2686_v20 }
 0x206   : > { %2774 = vperm.xlu1 %5121, %v2676_v50   ;;  %3266 = vst.msk [vmem:[#allocation2 + $0x60] sm:$0xff] %vm2940_vm0, %v5918_v30  ;;  %v2708_v57 = vmul.f32 1.442695, %v2688_v19 }
 0x207   : > { %3267 = vst.msk [vmem:[#allocation2 + $0x68] sm:$0xff] %vm2940_vm0, %v5921_v32  ;;  %2799 = vperm.xlu0 %5120, %v5921_v32   ;;  %5198 = vpow2.f32 %v2704_v23 }
 0x208   : > { %5200 = vpow2.f32 %v2708_v57 }
 0x209   : > { %5202 = vpow2.f32 %v2712_v27 }
 0x20a   : > { %2784 = vperm.xlu1 %5121, %v5864_v38   ;;  %5204 = vpow2.f32 %v2716_v35 }
 0x20b   : > { %2809 = vperm.xlu0 %5120, %v5899_v36  }
 0x20c   : > { %v5942_v1 = vpop.eup %5196 }
 0x20e   : > { %2794 = vperm.xlu1 %5121, %v5918_v30  }
 0x211   : > { %v5945_v47 = vpop.eup %5198 }
 0x212   : > { %2804 = vperm.xlu1 %5121, %v5896_v13   ;;  %v5948_v56 = vpop.eup %5200 }
 0x213   : > { %v5951_v25 = vpop.eup %5202 }
 0x214   : > { %v5954_v44 = vpop.eup %5204 }
 0x216   : > { %2980 = vperm.xlu1 %5121, %v5942_v1  }
 0x21a   : > { %2985 = vperm.xlu1 %5121, %v5945_v47  }
 0x21e   : > { %2995 = vperm.xlu1 %5121, %v5948_v56  }
 0x222   : > { %3005 = vperm.xlu1 %5121, %v5951_v25  }
 0x226   : > { %3015 = vperm.xlu1 %5121, %v5954_v44  }
 0x268   : > { %v2745_v50 = vpop.permute.xlu1 %2744 }
 0x269   : > { %v2814_v27 = vsub.f32 %v5600_v9, %v2745_v50  ;;  %v2735_v55 = vpop.permute.xlu0 %2734 }
 0x26a   : > { %v2812_v20 = vsub.f32 %v5606_v11, %v2735_v55 }
 0x26b   : > { %v2832_v23 = vmul.f32 1.442695, %v2814_v27 }
 0x26c   : > { %v2828_v19 = vmul.f32 1.442695, %v2812_v20 }
 0x26d   : > { %5206 = vpow2.f32 %v2832_v23  ;;  %v2740_v42 = vpop.permute.xlu1 %2739 }
 0x26e   : > { %5208 = vpow2.f32 %v2828_v19  ;;  %v2813_v57 = vsub.f32 %v5631_v17, %v2740_v42  ;;  %v2346_v19 = vld [vmem:[%s5543_s25 + $0x10] sm:$0xff]  ;;  %v2347_v42 = vld [vmem:[%s5543_s25 + $0x18] sm:$0xff] }
 0x270   : > { %v2830_v60 = vmul.f32 1.442695, %v2813_v57 }
 0x271   : > { %v2750_v35 = vpop.permute.xlu1 %2749 }
 0x272   : > { %5210 = vpow2.f32 %v2830_v60  ;;  %v2815_v29 = vsub.f32 %v5622_v15, %v2750_v35 }
 0x274   : > { %v2834_v12 = vmul.f32 1.442695, %v2815_v29 }
 0x275   : > { %v2765_v18 = vpop.permute.xlu1 %2764 }
 0x276   : > { %5212 = vpow2.f32 %v2834_v12  ;;  %v2818_v9 = vsub.f32 %v5644_v21, %v2765_v18 }
 0x277   : > { %v5207_v11 = vpop.eup %5206 }
 0x278   : > { %v5209_v50 = vpop.eup %5208  ;;  %v2840_v27 = vmul.f32 1.442695, %v2818_v9  ;;  %2896 = vadd.xlane.f32.xlu0 %v5207_v11  ;;  %v4801_v9 = vcombine.high %v2346_v19, %v2347_v42 }
 0x279   : > { %2892 = vadd.xlane.f32.xlu1 %v5209_v50  ;;  %v2755_v55 = vpop.permute.xlu1 %2754 }
 0x27a   : > { %5214 = vpow2.f32 %v2840_v27  ;;  %v2816_v17 = vsub.f32 %v5663_v26, %v2755_v55 }
 0x27c   : > { %v5211_v20 = vpop.eup %5210  ;;  %v2836_v23 = vmul.f32 1.442695, %v2816_v17 }
 0x27d   : > { %2894 = vadd.xlane.f32.xlu0 %v5211_v20  ;;  %v2760_v15 = vpop.permute.xlu1 %2759  ;;  %v3069_v29 = vpack.c.bf16 %v5211_v20, %v5209_v50 }
 0x27e   : > { %5216 = vpow2.f32 %v2836_v23  ;;  %v2817_v12 = vsub.f32 %v5671_v28, %v2760_v15  ;;  %v2780_v18 = vpop.permute.xlu0 %2779  ;;  %v2348_v23 = vld [vmem:[%s5543_s25 + $0x20] sm:$0xff]  ;;  %v2349_v15 = vld [vmem:[%s5543_s25 + $0x28] sm:$0xff] }
 0x27f   : > { %4995 = vmatprep.mubr.bf16.mxu1 %v3069_v29  ;;  %v2821_v60 = vsub.f32 %v5717_v41, %v2780_v18 }
 0x280   : > { %v5213_v21 = vpop.eup %5212  ;;  %v2838_v57 = vmul.f32 1.442695, %v2817_v12 }
 0x281   : > { %2898 = vadd.xlane.f32.xlu1 %v5213_v21  ;;  %v2770_v35 = vpop.permute.xlu1 %2769  ;;  %v3070_v26 = vpack.c.bf16 %v5213_v21, %v5207_v11  ;;  %v2846_v28 = vmul.f32 1.442695, %v2821_v60 }
 0x282   : > { %5218 = vpow2.f32 %v2838_v57  ;;  %v2819_v50 = vsub.f32 %v5656_v24, %v2770_v35  ;;  %v2790_v27 = vpop.permute.xlu0 %2789 }
 0x283   : > { %4996 = vmatmul.mubr.bf16.vlgmr.msra.gmra.mrb[0].mxu1 %v3070_v26  ;;  %v2823_v20 = vsub.f32 %v5702_v37, %v2790_v27  ;;  %v4802_v37 = vcombine.high %v2348_v23, %v2349_v15  ;;  %v2351_v27 = vld [vmem:[%s5543_s25 + $0x38] sm:$0xff] }
 0x284   : > { %v5215_v55 = vpop.eup %5214  ;;  %v2842_v17 = vmul.f32 1.442695, %v2819_v50  ;;  %5012 = vmatpush3.bf16.xpose.msra.mxu1 %v5856_v8 }
 0x285   : > { %2904 = vadd.xlane.f32.xlu0 %v5215_v55  ;;  %v2775_v41 = vpop.permute.xlu1 %2774  ;;  %5013 = vmatprep.subr.bf16.mxu1 %v4801_v9  ;;  %v2850_v42 = vmul.f32 1.442695, %v2823_v20 }
 0x286   : > { %5220 = vpow2.f32 %v2842_v17  ;;  %v2820_v11 = vsub.f32 %v5712_v40, %v2775_v41  ;;  %v2800_v29 = vpop.permute.xlu0 %2799 }
 0x287   : > { %5222 = vpow2.f32 %v2846_v28  ;;  %v2825_v12 = vsub.f32 %v5771_v52, %v2800_v29  ;;  %v2350_v52 = vld [vmem:[%s5543_s25 + $0x30] sm:$0xff] }
 0x288   : > { %v5217_v19 = vpop.eup %5216  ;;  %v2844_v24 = vmul.f32 1.442695, %v2820_v11  ;;  %v4803_v23 = vcombine.high %v2350_v52, %v2351_v27  ;;  %v2356_v52 = vld [vmem:[%s5543_s25 + $0x60] sm:$0xff]  ;;  %v2357_v27 = vld [vmem:[%s5543_s25 + $0x68] sm:$0xff] }
 0x289   : > { %2900 = vadd.xlane.f32.xlu0 %v5217_v19  ;;  %v2785_v8 = vpop.permute.xlu1 %2784  ;;  %v2854_v40 = vmul.f32 1.442695, %v2825_v12 }
 0x28a   : > { %5224 = vpow2.f32 %v2844_v24  ;;  %v2822_v18 = vsub.f32 %v5688_v33, %v2785_v8  ;;  %v2810_v21 = vpop.permute.xlu0 %2809  ;;  %v2352_v24 = vld [vmem:[%s5543_s25 + $0x40] sm:$0xff] }
 0x28b   : > { %5226 = vpow2.f32 %v2850_v42  ;;  %v2827_v35 = vsub.f32 %v5759_v49, %v2810_v21  ;;  %v2353_v42 = vld [vmem:[%s5543_s25 + $0x48] sm:$0xff] }
 0x28c   : > { %v5219_v57 = vpop.eup %5218  ;;  %v2848_v60 = vmul.f32 1.442695, %v2822_v18  ;;  %5014 = vmatpush3.bf16.xpose.msra.mxu1 %v4801_v9  ;;  %v4804_v12 = vcombine.high %v2352_v24, %v2353_v42  ;;  %v2338_v42 = vld [vmem:[%s5549_s12 + $0x50] sm:$0xff] }
 0x28d   : > { %v2795_v26 = vpop.permute.xlu1 %2794  ;;  %v3071_v50 = vpack.c.bf16 %v5219_v57, %v5217_v19  ;;  %5015 = vmatprep.subr.bf16.mxu1 %v4802_v37  ;;  %v2858_v33 = vmul.f32 1.442695, %v2827_v35  ;;  %v5163_v35 = vld [vmem:[%s5549_s12 + $0x4] ss:$8 sps:$4 sm:$0xff]  }
 0x28e   : > { %5228 = vpow2.f32 %v2848_v60  ;;  %v2824_v17 = vsub.f32 %v5766_v51, %v2795_v26  ;;  %v2355_v60 = vld [vmem:[%s5543_s25 + $0x58] sm:$0xff] }
 0x28f   : > { %4999 = vmatprep.mubr.bf16.mxu1 %v3071_v50  ;;  %5230 = vpow2.f32 %v2854_v40 }
 0x290   : > { %v5221_v28 = vpop.eup %5220  ;;  %v2852_v20 = vmul.f32 1.442695, %v2824_v17  ;;  %v4806_v17 = vcombine.high %v2356_v52, %v2357_v27  ;;  %v6762_v52 = vsub.f32 %v5793_v0, %v5806_v10 }
 0x291   : > { %2906 = vadd.xlane.f32.xlu1 %v5221_v28  ;;  %v2805_v41 = vpop.permute.xlu1 %2804  ;;  %v3072_v9 = vpack.c.bf16 %v5221_v28, %v5215_v55  ;;  %v5223_v15 = vpop.eup %5222  ;;  %v2358_v28 = vld [vmem:[%s5543_s25 + $0x70] sm:$0xff] }
 0x292   : > { %5232 = vpow2.f32 %v2852_v20  ;;  %v2826_v49 = vsub.f32 %v5734_v46, %v2805_v41  ;;  %v2359_v20 = vld [vmem:[%s5543_s25 + $0x78] sm:$0xff]  ;;  %v2332_v41 = vld [vmem:[%s5549_s12 + $0x20] sm:$0xff]  ;;  %v2706_v27 = vmul.f32 1.442695, %v6762_v52 }
 0x293   : > { %5000 = vmatmul.mubr.bf16.gmra.mrb[4].mxu1 %v3072_v9  ;;  %5234 = vpow2.f32 %v2858_v33  ;;  %v4807_v33 = vcombine.high %v2358_v28, %v2359_v20  ;;  %v2333_v9 = vld [vmem:[%s5549_s12 + $0x28] sm:$0xff]  ;;  %v2862_v28 = vld [vmem:[#allocation3 + $0x10] sm:$0xff] }
 0x294   : > { %v5225_v11 = vpop.eup %5224  ;;  %v2856_v29 = vmul.f32 1.442695, %v2826_v49  ;;  %5016 = vmatpush3.bf16.xpose.msra.mxu1 %v4802_v37  ;;  %v4794_v49 = vcombine.high %v2332_v41, %v2333_v9  ;;  %v2860_v41 = vld [vmem:[#allocation3] sm:$0xff]  ;;  %v2878_v9 = vmul.f32 %v5945_v47, %v2862_v28  ;;  %v6765_v47 = vsub.f32 %v5821_v31, %v5828_v45 }
 0x295   : > { %2902 = vadd.xlane.f32.xlu1 %v5219_v57  ;;  %v3073_v51 = vpack.c.bf16 %v5223_v15, %v5225_v11  ;;  %5017 = vmatprep.subr.bf16.mxu1 %v4803_v23  ;;  %v5227_v19 = vpop.eup %5226  ;;  %v2354_v57 = vld [vmem:[%s5543_s25 + $0x50] sm:$0xff]  ;;  %v6767_v31 = vsub.f32 %v5848_v61, %v5864_v38  ;;  %v2867_v38 = vld [vmem:[#allocation3 + $0x38] sm:$0xff] }
 0x296   : > { %5236 = vpow2.f32 %v2856_v29  ;;  %v4805_v50 = vcombine.high %v2354_v57, %v2355_v60  ;;  %v2336_v29 = vld [vmem:[%s5549_s12 + $0x40] sm:$0xff]  ;;  %v6002_v60 = vpop.permute.xlu1 %2980 }
 0x297   : > { %5003 = vmatprep.mubr.bf16.mxu1 %v3073_v51  ;;  %v2337_v51 = vld [vmem:[%s5549_s12 + $0x48] sm:$0xff]  ;;  %6758 = vst [vmem:[#allocation18_spill] sm:$0xff] %v6002_v60  ;;  %v2720_v45 = vmul.f32 1.442695, %v6767_v31 }
 0x298   : > { %v5229_v55 = vpop.eup %5228  ;;  %v4796_v24 = vcombine.high %v2336_v29, %v2337_v51  ;;  %v2863_v51 = vld [vmem:[#allocation3 + $0x18] sm:$0xff] }
 0x299   : > { %2914 = vadd.xlane.f32.xlu1 %v5227_v19  ;;  %2912 = vadd.xlane.f32.xlu0 %v5229_v55  ;;  %v3074_v46 = vpack.c.bf16 %v5227_v19, %v5229_v55  ;;  %v5231_v8 = vpop.eup %5230  ;;  %v2339_v55 = vld [vmem:[%s5549_s12 + $0x58] sm:$0xff] }
 0x29b   : > { %5004 = vmatmul.mubr.bf16.gmra.mrb[8].mxu1 %v3074_v46  ;;  %v2340_v46 = vld [vmem:[%s5549_s12 + $0x60] sm:$0xff] }
 0x29c   : > { %v5233_v37 = vpop.eup %5232  ;;  %5018 = vmatpush3.bf16.xpose.msra.mxu1 %v4803_v23  ;;  %v5166_v23 = vld [vmem:[%s5549_s12 + $0x14] ss:$8 sps:$4 sm:$0xff]  }
 0x29d   : > { %2910 = vadd.xlane.f32.xlu1 %v5223_v15  ;;  %2908 = vadd.xlane.f32.xlu0 %v5225_v11  ;;  %v3075_v18 = vpack.c.bf16 %v5231_v8, %v5233_v37  ;;  %v5235_v21 = vpop.eup %5234  ;;  %v2334_v15 = vld [vmem:[%s5549_s12 + $0x30] sm:$0xff]  ;;  %v2335_v11 = vld [vmem:[%s5549_s12 + $0x38] sm:$0xff] }
 0x29e   : > { %5019 = vmatprep.subr.bf16.mxu1 %v4804_v12  ;;  %v4795_v19 = vcombine.high %v2334_v15, %v2335_v11  ;;  %v2861_v15 = vld [vmem:[#allocation3 + $0x8] sm:$0xff] }
 0x29f   : > { %5007 = vmatprep.mubr.bf16.mxu1 %v3075_v18  ;;  %v2342_v18 = vld [vmem:[%s5549_s12 + $0x70] sm:$0xff]  ;;  %v2877_v0 = vmul.f32 %v5942_v1, %v2861_v15  ;;  %v6766_v1 = vsub.f32 %v5835_v48, %v5846_v59 }
 0x2a0   : > { %v5237_v40 = vpop.eup %5236 }
 0x2a1   : > { %2922 = vadd.xlane.f32.xlu1 %v5235_v21  ;;  %2920 = vadd.xlane.f32.xlu0 %v5237_v40  ;;  %v3076_v26 = vpack.c.bf16 %v5235_v21, %v5237_v40  ;;  %v2343_v21 = vld [vmem:[%s5549_s12 + $0x78] sm:$0xff]  ;;  %v6004_v40 = vpop.permute.xlu1 %2985 }
 0x2a2   : > { %v4799_v57 = vcombine.high %v2342_v18, %v2343_v21  ;;  %6759 = vst [vmem:[#allocation19_spill] sm:$0xff] %v6004_v40  ;;  %v2864_v21 = vld [vmem:[#allocation3 + $0x20] sm:$0xff]  ;;  %v2375_v40 = vld [vmem:[%s5776_s26 + $0x78] sm:$0xff] }
 0x2a3   : > { %5008 = vmatmul.mubr.bf16.gmra.mrb[12].mxu1 %v3076_v26  ;;  %v2880_v48 = vmul.f32 %v5948_v56, %v2864_v21  ;;  %v6771_v56 = vsub.f32 %v5887_v34, %v5899_v36  ;;  %v2875_v21 = vld [vmem:[#allocation3 + $0x78] sm:$0xff] }
 0x2a4   : > { %5020 = vmatpush3.bf16.xpose.msra.mxu1 %v4804_v12  ;;  %5027 = vmatprep.mubr.bf16.mxu1 %v5163_v35  ;;  %v2341_v12 = vld [vmem:[%s5549_s12 + $0x68] sm:$0xff]  ;;  %v6760_v35 = vsub.f32 %v5784_v58, %v5791_v63 }
 0x2a5   : > { %2918 = vadd.xlane.f32.xlu1 %v5231_v8  ;;  %2916 = vadd.xlane.f32.xlu0 %v5233_v37  ;;  %v4797_v8 = vcombine.high %v2338_v42, %v2339_v55  ;;  %v4798_v37 = vcombine.high %v2340_v46, %v2341_v12  ;;  %v2866_v46 = vld [vmem:[#allocation3 + $0x30] sm:$0xff]  ;;  %v2730_v28 = vmul.f32 1.442695, %v6771_v56 }
 0x2a6   : > { %5021 = vmatprep.subr.bf16.mxu1 %v4805_v50  ;;  %v2700_v26 = vmul.f32 1.442695, %v6760_v35  ;;  %v6768_v35 = vsub.f32 %v5853_v62, %v5867_v53  ;;  %v6770_v62 = vsub.f32 %v5884_v7, %v5896_v13  ;;  %v6773_v7 = vsub.f32 %v5904_v39, %v5921_v32 }
 0x2a8   : > { %5238 = vpow2.f32 %v2700_v26  ;;  %v2722_v26 = vmul.f32 1.442695, %v6768_v35  ;;  %v2728_v53 = vmul.f32 1.442695, %v6770_v62  ;;  %v2726_v13 = vmul.f32 1.442695, %v6773_v7 }
 0x2a9   : > { %5240 = vpow2.f32 %v2706_v27 }
 0x2ac   : > { %5022 = vmatpush3.bf16.xpose.msra.mxu1 %v4805_v50  ;;  %v6009_v50 = vpop.permute.xlu1 %2995 }
 0x2ad   : > { %5023 = vmatprep.subr.bf16.mxu1 %v4806_v17  ;;  %6761 = vst [vmem:[#allocation20_spill] sm:$0xff] %v6009_v50 }
 0x2b2   : > { %v6016_v20 = vpop.eup %5238 }
 0x2b3   : > { %v2876_v63 = vmul.f32 %v6016_v20, %v2860_v41  ;;  %v6025_v10 = vpop.eup %5240 }
 0x2b4   : > { %5024 = vmatpush3.bf16.xpose.msra.mxu1 %v4806_v17  ;;  %v6014_v17 = vpop.permute.xlu1 %3005  ;;  %v2879_v42 = vmul.f32 %v6025_v10, %v2863_v51 }
 0x2b5   : > { %5025 = vmatprep.subr.bf16.mxu1 %v4807_v33  ;;  %6763 = vst [vmem:[#allocation21_spill] sm:$0xff] %v6014_v17 }
 0x2bc   : > { %5026 = vmatpush3.bf16.xpose.msra.mxu1 %v4807_v33  ;;  %v6018_v33 = vpop.permute.xlu1 %3015 }
 0x2bd   : > { %6764 = vst [vmem:[#allocation22_spill] sm:$0xff] %v6018_v33  ;;  %v6293_v33 = vld [vmem:[#allocation2 + $0x30] sm:$0xff] }
 0x2c3   : > { %5028 = vmatmul.mubr.bf16.vlgmr.msra.gmra.mrb[16].mxu1 %v5166_v23 }
 0x2c4   : > { %5031 = vmatprep.mubr.bf16.mxu1 %v4794_v49 }
 0x2cb   : > { %5032 = vmatmul.mubr.bf16.gmra.mrb[20].mxu1 %v4795_v19 }
 0x2cc   : > { %5035 = vmatprep.mubr.bf16.mxu1 %v4796_v24  ;;  %v2714_v24 = vmul.f32 1.442695, %v6765_v47  ;;  %v2869_v47 = vld [vmem:[#allocation3 + $0x48] sm:$0xff] }
 0x2ce   : > { %5242 = vpow2.f32 %v2714_v24 }
 0x2d3   : > { %5036 = vmatmul.mubr.bf16.gmra.mrb[24].mxu1 %v4797_v8  ;;  %v2710_v8 = vmul.f32 1.442695, %v6766_v1 }
 0x2d4   : > { %5039 = vmatprep.mubr.bf16.mxu1 %v4798_v37  ;;  %v2882_v37 = vmul.f32 %v5951_v25, %v2866_v46  ;;  %v6769_v25 = vsub.f32 %v5870_v54, %v5882_v22  ;;  %v2865_v54 = vld [vmem:[#allocation3 + $0x28] sm:$0xff] }
 0x2d5   : > { %5244 = vpow2.f32 %v2710_v8 }
 0x2d6   : > { %5246 = vpow2.f32 %v2720_v45  ;;  %v2718_v27 = vmul.f32 1.442695, %v6769_v25  ;;  %v2873_v25 = vld [vmem:[#allocation3 + $0x68] sm:$0xff] }
 0x2d7   : > { %5248 = vpow2.f32 %v2722_v26 }
 0x2d8   : > { %v6049_v61 = vpop.eup %5242  ;;  %5250 = vpow2.f32 %v2718_v27 }
 0x2d9   : > { %v2883_v41 = vmul.f32 %v6049_v61, %v2867_v38  ;;  %5252 = vpow2.f32 %v2728_v53 }
 0x2da   : > { %5254 = vpow2.f32 %v2730_v28 }
 0x2db   : > { %5040 = vmatmul.mubr.bf16.gmra.mrb[28].mxu1 %v4799_v57 }
 0x305   : > { %v2897_v58 = vpop.xlane.xlu0 %2896 }
 0x306   : > { %v2926_v23 = vadd.f32 %v2897_v58, %v2878_v9  ;;  %v2893_v49 = vpop.xlane.xlu1 %2892  ;;  %v6058_v9 = vpop.eup %5244  ;;  %v6772_v58 = vsub.f32 %v5901_v43, %v5918_v30 }
 0x307   : > { %v2924_v11 = vadd.f32 %v2893_v49, %v2876_v63  ;;  %v6066_v49 = vpop.eup %5246  ;;  %v2881_v34 = vmul.f32 %v6058_v9, %v2865_v54 }
 0x308   : > { %2943 = vst.msk [vmem:[#allocation3 + $0x10] sm:$0xff] %vm2940_vm0, %v2926_v23  ;;  %v2724_v63 = vmul.f32 1.442695, %v6772_v58  ;;  %v6070_v36 = vpop.eup %5248 }
 0x309   : > { %2941 = vst.msk [vmem:[#allocation3] sm:$0xff] %vm2940_vm0, %v2924_v11  ;;  %v2870_v11 = vld [vmem:[#allocation3 + $0x50] sm:$0xff]  ;;  %v6075_v32 = vpop.eup %5250 }
 0x30a   : > { %v2895_v29 = vpop.xlane.xlu0 %2894  ;;  %5256 = vpow2.f32 %v2724_v63  ;;  %v2886_v43 = vmul.f32 %v6066_v49, %v2870_v11 }
 0x30b   : > { %v2925_v19 = vadd.f32 %v2895_v29, %v2877_v0  ;;  %v2871_v0 = vld [vmem:[#allocation3 + $0x58] sm:$0xff]  ;;  %5258 = vpow2.f32 %v2726_v13 }
 0x30c   : > { %v2887_v39 = vmul.f32 %v6070_v36, %v2871_v0 }
 0x30d   : > { %2942 = vst.msk [vmem:[#allocation3 + $0x8] sm:$0xff] %vm2940_vm0, %v2925_v19  ;;  %v2868_v19 = vld [vmem:[#allocation3 + $0x40] sm:$0xff] }
 0x30e   : > { %v2899_v55 = vpop.xlane.xlu1 %2898  ;;  %v2884_v46 = vmul.f32 %v5954_v44, %v2868_v19 }
 0x30f   : > { %v2927_v12 = vadd.f32 %v2899_v55, %v2879_v42  ;;  %v6077_v55 = vpop.eup %5252 }
 0x310   : > { %v6083_v1 = vpop.eup %5254 }
 0x311   : > { %2944 = vst.msk [vmem:[#allocation3 + $0x18] sm:$0xff] %vm2940_vm0, %v2927_v12  ;;  %v2885_v12 = vmul.f32 %v6075_v32, %v2869_v47  ;;  %v2891_v44 = vmul.f32 %v6083_v1, %v2875_v21 }
 0x312   : > { %v2905_v18 = vpop.xlane.xlu0 %2904 }
 0x313   : > { %v2930_v57 = vadd.f32 %v2905_v18, %v2882_v37  ;;  %v2874_v18 = vld [vmem:[#allocation3 + $0x70] sm:$0xff] }
 0x314   : > { %v2890_v35 = vmul.f32 %v6077_v55, %v2874_v18 }
 0x315   : > { %2947 = vst.msk [vmem:[#allocation3 + $0x30] sm:$0xff] %vm2940_vm0, %v2930_v57  ;;  %v6085_v57 = vpop.eup %5256 }
 0x316   : > { %v2901_v59 = vpop.xlane.xlu0 %2900  ;;  %v6091_v26 = vpop.eup %5258 }
 0x317   : > { %v2928_v52 = vadd.f32 %v2901_v59, %v2880_v48  ;;  %v2889_v53 = vmul.f32 %v6091_v26, %v2873_v25 }
 0x319   : > { %2945 = vst.msk [vmem:[#allocation3 + $0x20] sm:$0xff] %vm2940_vm0, %v2928_v52  ;;  %v2872_v52 = vld [vmem:[#allocation3 + $0x60] sm:$0xff] }
 0x31a   : > { %v2888_v62 = vmul.f32 %v6085_v57, %v2872_v52  ;;  %v2363_v52 = vld [vmem:[%s5776_s26 + $0x18] sm:$0xff] }
 0x31e   : > { %v2907_v22 = vpop.xlane.xlu1 %2906 }
 0x31f   : > { %v2931_v23 = vadd.f32 %v2907_v22, %v2883_v41 }
 0x321   : > { %2948 = vst.msk [vmem:[#allocation3 + $0x38] sm:$0xff] %vm2940_vm0, %v2931_v23 }
 0x322   : > { %v2903_v15 = vpop.xlane.xlu1 %2902 }
 0x323   : > { %v2929_v30 = vadd.f32 %v2903_v15, %v2881_v34 }
 0x325   : > { %2946 = vst.msk [vmem:[#allocation3 + $0x28] sm:$0xff] %vm2940_vm0, %v2929_v30 }
 0x326   : > { %v2913_v29 = vpop.xlane.xlu0 %2912  ;;  %v2915_v51 = vpop.xlane.xlu1 %2914 }
 0x327   : > { %v2934_v24 = vadd.f32 %v2913_v29, %v2886_v43  ;;  %v2935_v42 = vadd.f32 %v2915_v51, %v2887_v39 }
 0x329   : > { %2951 = vst.msk [vmem:[#allocation3 + $0x50] sm:$0xff] %vm2940_vm0, %v2934_v24  ;;  %2952 = vst.msk [vmem:[#allocation3 + $0x58] sm:$0xff] %vm2940_vm0, %v2935_v42 }
 0x32a   : > { %v2909_v8 = vpop.xlane.xlu0 %2908  ;;  %v2911_v37 = vpop.xlane.xlu1 %2910 }
 0x32b   : > { %v2932_v31 = vadd.f32 %v2909_v8, %v2884_v46  ;;  %v2933_v45 = vadd.f32 %v2911_v37, %v2885_v12 }
 0x32d   : > { %2949 = vst.msk [vmem:[#allocation3 + $0x40] sm:$0xff] %vm2940_vm0, %v2932_v31  ;;  %2950 = vst.msk [vmem:[#allocation3 + $0x48] sm:$0xff] %vm2940_vm0, %v2933_v45 }
 0x32e   : > { %v2921_v48 = vpop.xlane.xlu0 %2920  ;;  %v2923_v59 = vpop.xlane.xlu1 %2922 }
 0x32f   : > { %v2938_v27 = vadd.f32 %v2921_v48, %v2890_v35  ;;  %v2939_v38 = vadd.f32 %v2923_v59, %v2891_v44 }
 0x331   : > { %2955 = vst.msk [vmem:[#allocation3 + $0x70] sm:$0xff] %vm2940_vm0, %v2938_v27  ;;  %2956 = vst.msk [vmem:[#allocation3 + $0x78] sm:$0xff] %vm2940_vm0, %v2939_v38  ;;  %v6745_v27 = vmov 1  }
 0x332   : > { %v2917_v56 = vpop.xlane.xlu0 %2916  ;;  %v2919_v28 = vpop.xlane.xlu1 %2918  ;;  %5123 = vset.pattern.permute.xlu0 %v6745_v27 }
 0x333   : > { %v2936_v41 = vadd.f32 %v2917_v56, %v2888_v62  ;;  %v2937_v22 = vadd.f32 %v2919_v28, %v2889_v53  ;;  %v2364_v56 = vld [vmem:[%s5776_s26 + $0x20] sm:$0xff] }
 0x335   : > { %2953 = vst.msk [vmem:[#allocation3 + $0x60] sm:$0xff] %vm2940_vm0, %v2936_v41  ;;  %2954 = vst.msk [vmem:[#allocation3 + $0x68] sm:$0xff] %vm2940_vm0, %v2937_v22  ;;  %v6794_v41 = vld [vmem:[#allocation10_spill] sm:$0xff] }
 0x356   : > { %v6099_v54 = vpop.f32.mrb[0].mxu1 }
 0x357   : > { %6774 = vst [vmem:[#allocation23_spill] sm:$0xff] %v6099_v54  ;;  %v6101_v58 = vpop.f32.mrb[1].mxu1  ;;  %v2374_v54 = vld [vmem:[%s5776_s26 + $0x70] sm:$0xff] }
 0x358   : > { %6775 = vst [vmem:[#allocation24_spill] sm:$0xff] %v6101_v58  ;;  %v6103_v63 = vpop.f32.mrb[2].mxu1 }
 0x359   : > { %6776 = vst [vmem:[#allocation25_spill] sm:$0xff] %v6103_v63  ;;  %v6105_v23 = vpop.f32.mrb[3].mxu1 }
 0x35a   : > { %6777 = vst [vmem:[#allocation26_spill] sm:$0xff] %v6105_v23  ;;  %v6311_v23 = vld [vmem:[#allocation2 + $0x40] sm:$0xff] }
 0x366   : > { %v6107_v7 = vpop.f32.mrb[4].mxu1 }
 0x367   : > { %6778 = vst [vmem:[#allocation27_spill] sm:$0xff] %v6107_v7  ;;  %v6109_v13 = vpop.f32.mrb[5].mxu1  ;;  %v2372_v7 = vld [vmem:[%s5776_s26 + $0x60] sm:$0xff] }
 0x368   : > { %6779 = vst [vmem:[#allocation28_spill] sm:$0xff] %v6109_v13  ;;  %v6111_v34 = vpop.f32.mrb[6].mxu1 }
 0x369   : > { %6780 = vst [vmem:[#allocation29_spill] sm:$0xff] %v6111_v34  ;;  %v6113_v15 = vpop.f32.mrb[7].mxu1 }
 0x36a   : > { %6781 = vst [vmem:[#allocation30_spill] sm:$0xff] %v6113_v15 }
 0x36e   : > { %v6115_v11 = vpop.f32.mrb[8].mxu1 }
 0x36f   : > { %v6117_v0 = vpop.f32.mrb[9].mxu1 }
 0x370   : > { %6782 = vst [vmem:[#allocation31_spill] sm:$0xff] %v6117_v0  ;;  %v6119_v30 = vpop.f32.mrb[10].mxu1  ;;  %v2370_v0 = vld [vmem:[%s5776_s26 + $0x50] sm:$0xff] }
 0x371   : > { %6783 = vst [vmem:[#allocation32_spill] sm:$0xff] %v6119_v30  ;;  %v6121_v43 = vpop.f32.mrb[11].mxu1 }
 0x372   : > { %6784 = vst [vmem:[#allocation33_spill] sm:$0xff] %v6121_v43 }
 0x376   : > { %v6123_v39 = vpop.f32.mrb[12].mxu1 }
 0x377   : > { %6785 = vst [vmem:[#allocation34_spill] sm:$0xff] %v6123_v39  ;;  %v6125_v29 = vpop.f32.mrb[13].mxu1  ;;  %v6329_v39 = vld [vmem:[#allocation2 + $0x50] sm:$0xff] }
 0x378   : > { %6786 = vst [vmem:[#allocation35_spill] sm:$0xff] %v6125_v29  ;;  %v6127_v51 = vpop.f32.mrb[14].mxu1 }
 0x379   : > { %6787 = vst [vmem:[#allocation36_spill] sm:$0xff] %v6127_v51  ;;  %v6129_v19 = vpop.f32.mrb[15].mxu1 }
 0x37a   : > { %6788 = vst [vmem:[#allocation37_spill] sm:$0xff] %v6129_v19  ;;  %v6275_v19 = vld [vmem:[#allocation2 + $0x20] sm:$0xff] }
 0x396   : > { %v5029_v47 = vpop.f32.mrb[16].mxu1 }
 0x397   : > { %v3368_v24 = vpop.f32.mrb[17].mxu1  ;;  %v6152_v18 = vsel %vm2397_vm1, %v5029_v47, -1e+30  ;;  %vm6795_vm1 = vcmp.ge.s32.totalorder %v6794_v41, %v5585_v4  ;;  %v6233_v4 = vld [vmem:[#allocation2] sm:$0xff]  ;;  %v2365_v41 = vld [vmem:[%s5776_s26 + $0x28] sm:$0xff] }
 0x398   : > { %v5030_v42 = vpop.f32.mrb[18].mxu1  ;;  %v6134_v46 = vsel %vm2395_vm2, %v3368_v24, -1e+30  ;;  %vm3767_vm2 = vcmask 15368  }
 0x399   : > { %3463 = vmax.xlane.f32.xlu1 %v6134_v46  ;;  %v3371_v12 = vpop.f32.mrb[19].mxu1  ;;  %v6146_v37 = vsel %vm2398_vm3, %v5030_v42, -1e+30 }
 0x39a   : > { %v6140_v8 = vsel %vm2396_vm4, %v3371_v12, -1e+30 }
 0x39b   : > { %3465 = vmax.xlane.f32.xlu0 %v6140_v8 }
 0x39d   : > { %3469 = vmax.xlane.f32.xlu1 %v6146_v37 }
 0x39e   : > { %v5033_v2 = vpop.f32.mrb[20].mxu1 }
 0x39f   : > { %3467 = vmax.xlane.f32.xlu0 %v6152_v18  ;;  %v3384_v6 = vpop.f32.mrb[21].mxu1  ;;  %v6175_v16 = vsel %vm2401_vm5, %v5033_v2, -1e+30 }
 0x3a0   : > { %v5034_v21 = vpop.f32.mrb[22].mxu1  ;;  %v6158_v31 = vsel %vm2399_vm7, %v3384_v6, -1e+30  ;;  %v4810_v6 = vcombine.high %v2364_v56, %v2365_v41  ;;  %v6268_v56 = vld [vmem:[#allocation2 + $0x38] sm:$0xff] }
 0x3a1   : > { %v6163_v5 = vsel %vm2402_vm6, %v5034_v21, -1e+30  ;;  %v3387_v45 = vpop.f32.mrb[23].mxu1 }
 0x3a2   : > { %3477 = vmax.xlane.f32.xlu1 %v6163_v5  ;;  %v6170_v35 = vsel %vm2400_vm8, %v3387_v45, -1e+30 }
 0x3a3   : > { %3471 = vmax.xlane.f32.xlu0 %v6158_v31 }
 0x3a6   : > { %3473 = vmax.xlane.f32.xlu1 %v6170_v35  ;;  %v5037_v14 = vpop.f32.mrb[24].mxu1 }
 0x3a7   : > { %3475 = vmax.xlane.f32.xlu0 %v6175_v16  ;;  %v3400_v48 = vpop.f32.mrb[25].mxu1  ;;  %v6200_v22 = vsel %vm6795_vm1, %v5037_v14, -1e+30 }
 0x3a8   : > { %v5038_v59 = vpop.f32.mrb[26].mxu1  ;;  %v6182_v25 = vsel %vm2403_vm11, %v3400_v48, -1e+30 }
 0x3a9   : > { %v6188_v62 = vsel %vm2406_vm10, %v5038_v59, -1e+30  ;;  %v3403_v53 = vpop.f32.mrb[27].mxu1  ;;  %v2362_v59 = vld [vmem:[%s5776_s26 + $0x10] sm:$0xff] }
 0x3aa   : > { %3485 = vmax.xlane.f32.xlu1 %v6188_v62  ;;  %v6195_v28 = vsel %vm2404_vm12, %v3403_v53, -1e+30  ;;  %v4809_v38 = vcombine.high %v2362_v59, %v2363_v52  ;;  %v6258_v59 = vld [vmem:[#allocation2 + $0x10] sm:$0xff] }
 0x3ab   : > { %3479 = vmax.xlane.f32.xlu0 %v6182_v25 }
 0x3ac   : > { %5045 = vmatprep.subr.bf16.mxu0 %v4809_v38 }
 0x3ad   : > { %5046 = vmatpush3.bf16.msra.mxu0 %v4809_v38 }
 0x3ae   : > { %3481 = vmax.xlane.f32.xlu1 %v6195_v28  ;;  %v5041_v47 = vpop.f32.mrb[28].mxu1  ;;  %5047 = vmatprep.subr.bf16.mxu0 %v4810_v6 }
 0x3af   : > { %3483 = vmax.xlane.f32.xlu0 %v6200_v22  ;;  %v3416_v24 = vpop.f32.mrb[29].mxu1  ;;  %v6224_v48 = vsel %vm2409_vm13, %v5041_v47, -1e+30 }
 0x3b0   : > { %v5042_v42 = vpop.f32.mrb[30].mxu1  ;;  %v6207_v2 = vsel %vm2407_vm15, %v3416_v24, -1e+30 }
 0x3b1   : > { %v6212_v21 = vsel %vm2410_vm14, %v5042_v42, -1e+30  ;;  %v3419_v45 = vpop.f32.mrb[31].mxu1  ;;  %v6248_v42 = vld [vmem:[#allocation2 + $0x18] sm:$0xff]  ;;  %5048 = vmatpush3.bf16.msra.mxu0 %v4810_v6 }
 0x3b2   : > { %3493 = vmax.xlane.f32.xlu1 %v6212_v21  ;;  %v6219_v44 = vsel %vm2408_vm9, %v3419_v45, -1e+30  ;;  %v2366_v45 = vld [vmem:[%s5776_s26 + $0x30] sm:$0xff] }
 0x3b3   : > { %3487 = vmax.xlane.f32.xlu0 %v6207_v2 }
 0x3b6   : > { %3489 = vmax.xlane.f32.xlu1 %v6219_v44 }
 0x3b7   : > { %3491 = vmax.xlane.f32.xlu0 %v6224_v48 }
 0x3c7   : > { %3025 = vperm.xlu1 %5121, %v6066_v49   ;;  %v6240_v49 = vld [vmem:[#allocation2 + $0x8] sm:$0xff] }
 0x3cb   : > { %3040 = vperm.xlu1 %5121, %v6091_v26  }
 0x3cf   : > { %5122 = vset.pattern.permute.xlu1 %v6745_v27 }
 0x426   : > { %v3464_v53 = vpop.xlane.xlu1 %3463 }
 0x427   : > { %v6238_v47 = vmax.f32 %v6233_v4, %v3464_v53  ;;  %v4811_v53 = vcombine.high %v2366_v45, %v2367_v3  ;;  %v6286_v45 = vld [vmem:[#allocation2 + $0x28] sm:$0xff] }
 0x428   : > { %v3466_v26 = vpop.xlane.xlu0 %3465 }
 0x429   : > { %4065 = vst.msk [vmem:[#allocation2] sm:$0xff] %vm3767_vm2, %v6238_v47  ;;  %v6245_v24 = vmax.f32 %v6240_v49, %v3466_v26  ;;  %3561 = vperm.xlu1 %5122, %v6238_v47   ;;  %v2368_v26 = vld [vmem:[%s5776_s26 + $0x40] sm:$0xff]  ;;  %5049 = vmatprep.subr.bf16.mxu0 %v4811_v53 }
 0x42a   : > { %v3470_v12 = vpop.xlane.xlu1 %3469  ;;  %5050 = vmatpush3.bf16.msra.mxu0 %v4811_v53 }
 0x42b   : > { %4066 = vst.msk [vmem:[#allocation2 + $0x8] sm:$0xff] %vm3767_vm2, %v6245_v24  ;;  %v6255_v14 = vmax.f32 %v6248_v42, %v3470_v12  ;;  %3566 = vperm.xlu0 %5123, %v6245_v24   ;;  %v2369_v12 = vld [vmem:[%s5776_s26 + $0x48] sm:$0xff] }
 0x42c   : > { %v3468_v52 = vpop.xlane.xlu0 %3467 }
 0x42d   : > { %4068 = vst.msk [vmem:[#allocation2 + $0x18] sm:$0xff] %vm3767_vm2, %v6255_v14  ;;  %v6263_v38 = vmax.f32 %v6258_v59, %v3468_v52 }
 0x42f   : > { %4067 = vst.msk [vmem:[#allocation2 + $0x10] sm:$0xff] %vm3767_vm2, %v6263_v38  ;;  %3571 = vperm.xlu1 %5122, %v6263_v38   ;;  %v3478_v41 = vpop.xlane.xlu1 %3477  ;;  %v3513_v15 = vsub.f32 %v6258_v59, %v6263_v38  ;;  %v6800_v59 = vmov 0  }
 0x430   : > { %v6273_v27 = vmax.f32 %v6268_v56, %v3478_v41  ;;  %v3472_v52 = vpop.xlane.xlu0 %3471  ;;  %v4812_v41 = vcombine.high %v2368_v26, %v2369_v12  ;;  %v6304_v26 = vld [vmem:[#allocation2 + $0x58] sm:$0xff] }
 0x431   : > { %v6278_v6 = vmax.f32 %v6275_v19, %v3472_v52  ;;  %v2371_v52 = vld [vmem:[%s5776_s26 + $0x58] sm:$0xff] }
 0x432   : > { %4072 = vst.msk [vmem:[#allocation2 + $0x38] sm:$0xff] %vm3767_vm2, %v6273_v27  ;;  %5051 = vmatprep.subr.bf16.mxu0 %v4812_v41 }
 0x433   : > { %4069 = vst.msk [vmem:[#allocation2 + $0x20] sm:$0xff] %vm3767_vm2, %v6278_v6  ;;  %3581 = vperm.xlu0 %5123, %v6278_v6   ;;  %3576 = vperm.xlu1 %5122, %v6255_v14   ;;  %v3474_v3 = vpop.xlane.xlu1 %3473  ;;  %v3515_v58 = vsub.f32 %v6275_v19, %v6278_v6 }
 0x434   : > { %v6291_v53 = vmax.f32 %v6286_v45, %v3474_v3  ;;  %v3476_v13 = vpop.xlane.xlu0 %3475  ;;  %5052 = vmatpush3.bf16.msra.mxu0 %v4812_v41  ;;  %v4813_v3 = vcombine.high %v2370_v0, %v2371_v52  ;;  %v6322_v0 = vld [vmem:[#allocation2 + $0x48] sm:$0xff] }
 0x435   : > { %v6296_v50 = vmax.f32 %v6293_v33, %v3476_v13  ;;  %v2373_v13 = vld [vmem:[%s5776_s26 + $0x68] sm:$0xff] }
 0x436   : > { %4070 = vst.msk [vmem:[#allocation2 + $0x28] sm:$0xff] %vm3767_vm2, %v6291_v53  ;;  %5053 = vmatprep.subr.bf16.mxu0 %v4813_v3 }
 0x437   : > { %4071 = vst.msk [vmem:[#allocation2 + $0x30] sm:$0xff] %vm3767_vm2, %v6296_v50  ;;  %3591 = vperm.xlu0 %5123, %v6296_v50   ;;  %3586 = vperm.xlu1 %5122, %v6291_v53   ;;  %v3486_v12 = vpop.xlane.xlu1 %3485 }
 0x438   : > { %v6309_v17 = vmax.f32 %v6304_v26, %v3486_v12  ;;  %v3480_v41 = vpop.xlane.xlu0 %3479  ;;  %5054 = vmatpush3.bf16.msra.mxu0 %v4813_v3  ;;  %v4814_v12 = vcombine.high %v2372_v7, %v2373_v13  ;;  %v6340_v7 = vld [vmem:[#allocation2 + $0x78] sm:$0xff] }
 0x439   : > { %v6314_v60 = vmax.f32 %v6311_v23, %v3480_v41 }
 0x43a   : > { %4076 = vst.msk [vmem:[#allocation2 + $0x58] sm:$0xff] %vm3767_vm2, %v6309_v17  ;;  %5055 = vmatprep.subr.bf16.mxu0 %v4814_v12 }
 0x43b   : > { %4073 = vst.msk [vmem:[#allocation2 + $0x40] sm:$0xff] %vm3767_vm2, %v6314_v60  ;;  %3601 = vperm.xlu0 %5123, %v6314_v60   ;;  %3596 = vperm.xlu1 %5122, %v6273_v27   ;;  %v3482_v52 = vpop.xlane.xlu1 %3481 }
 0x43c   : > { %v6327_v41 = vmax.f32 %v6322_v0, %v3482_v52  ;;  %v3484_v29 = vpop.xlane.xlu0 %3483  ;;  %5056 = vmatpush3.bf16.msra.mxu0 %v4814_v12  ;;  %v4815_v52 = vcombine.high %v2374_v54, %v2375_v40  ;;  %v3512_v12 = vsub.f32 %v6240_v49, %v6245_v24  ;;  %v6358_v40 = vld [vmem:[#allocation2 + $0x68] sm:$0xff] }
 0x43d   : > { %v6332_v3 = vmax.f32 %v6329_v39, %v3484_v29  ;;  %v6345_v29 = vld [vmem:[#allocation2 + $0x60] sm:$0xff] }
 0x43e   : > { %4074 = vst.msk [vmem:[#allocation2 + $0x48] sm:$0xff] %vm3767_vm2, %v6327_v41  ;;  %5057 = vmatprep.subr.bf16.mxu0 %v4815_v52 }
 0x43f   : > { %4075 = vst.msk [vmem:[#allocation2 + $0x50] sm:$0xff] %vm3767_vm2, %v6332_v3  ;;  %3611 = vperm.xlu0 %5123, %v6332_v3   ;;  %3606 = vperm.xlu1 %5122, %v6327_v41   ;;  %v3494_v13 = vpop.xlane.xlu1 %3493 }
 0x440   : > { %v6343_v30 = vmax.f32 %v6340_v7, %v3494_v13  ;;  %v3488_v43 = vpop.xlane.xlu0 %3487  ;;  %5058 = vmatpush3.bf16.msra.mxu0 %v4815_v52  ;;  %v6363_v13 = vld [vmem:[#allocation2 + $0x70] sm:$0xff]  ;;  %v3529_v52 = vmul.f32 1.442695, %v3512_v12  ;;  %v3531_v12 = vmul.f32 1.442695, %v3513_v15 }
 0x441   : > { %v6348_v34 = vmax.f32 %v6345_v29, %v3488_v43  ;;  %v3535_v15 = vmul.f32 1.442695, %v3515_v58 }
 0x442   : > { %4080 = vst.msk [vmem:[#allocation2 + $0x78] sm:$0xff] %vm3767_vm2, %v6343_v30  ;;  %5260 = vpow2.f32 %v3529_v52 }
 0x443   : > { %4077 = vst.msk [vmem:[#allocation2 + $0x60] sm:$0xff] %vm3767_vm2, %v6348_v34  ;;  %3621 = vperm.xlu0 %5123, %v6348_v34   ;;  %3616 = vperm.xlu1 %5122, %v6309_v17   ;;  %v3490_v54 = vpop.xlane.xlu1 %3489  ;;  %5262 = vpow2.f32 %v3531_v12 }
 0x444   : > { %v6361_v43 = vmax.f32 %v6358_v40, %v3490_v54  ;;  %v3492_v49 = vpop.xlane.xlu0 %3491 }
 0x445   : > { %v6366_v24 = vmax.f32 %v6363_v13, %v3492_v49  ;;  %v3514_v49 = vsub.f32 %v6248_v42, %v6255_v14 }
 0x446   : > { %4078 = vst.msk [vmem:[#allocation2 + $0x68] sm:$0xff] %vm3767_vm2, %v6361_v43 }
 0x447   : > { %4079 = vst.msk [vmem:[#allocation2 + $0x70] sm:$0xff] %vm3767_vm2, %v6366_v24  ;;  %3631 = vperm.xlu0 %5123, %v6366_v24   ;;  %3626 = vperm.xlu1 %5122, %v6361_v43   ;;  %v3026_v54 = vpop.permute.xlu1 %3025  ;;  %v3533_v38 = vmul.f32 1.442695, %v3514_v49 }
 0x448   : > { %v3063_v51 = vmul.f32 0.0, %v3026_v54 }
 0x449   : > { %5264 = vpow2.f32 %v3533_v38 }
 0x44a   : > { %v6379_v63 = vadd.f32 %v6115_v11, %v3063_v51  ;;  %v3516_v11 = vsub.f32 %v6286_v45, %v6291_v53  ;;  %5266 = vpow2.f32 %v3535_v15 }
 0x44b   : > { %5124 = vset.pattern.permute.xlu0 %v6800_v59  ;;  %3636 = vperm.xlu1 %5122, %v6343_v30   ;;  %v6470_v54 = vpop.permute.xlu1 %3040 }
 0x44c   : > { %2975 = vperm.xlu0 %5124, %v6016_v20   ;;  %v6391_v51 = vpop.eup %5260  ;;  %v6801_v20 = vmov 1   ;;  %v3537_v19 = vmul.f32 1.442695, %v3516_v11 }
 0x44d   : > { %v6398_v42 = vpop.eup %5262 }
 0x44e   : > { %5268 = vpow2.f32 %v3537_v19 }
 0x44f   : > { %5125 = vset.pattern.permute.xlu1 %v6800_v59 }
 0x450   : > { %2990 = vperm.xlu0 %5124, %v6025_v10   ;;  %3050 = vperm.xlu1 %5125, %v6083_v1   ;;  %v3517_v10 = vsub.f32 %v6293_v33, %v6296_v50  ;;  %v3511_v1 = vsub.f32 %v6233_v4, %v6238_v47  ;;  %v3522_v50 = vsub.f32 %v6304_v26, %v6309_v17 }
 0x451   : > { %v3520_v17 = vsub.f32 %v6322_v0, %v6327_v41 }
 0x452   : > { %v3539_v58 = vmul.f32 1.442695, %v3517_v10  ;;  %v3527_v6 = vmul.f32 1.442695, %v3511_v1 }
 0x453   : > { %v6406_v14 = vpop.eup %5264  ;;  %v3545_v45 = vmul.f32 1.442695, %v3520_v17 }
 0x454   : > { %3000 = vperm.xlu0 %5124, %v6058_v9   ;;  %5127 = vset.pattern.permute.xlu1 %v6801_v20  ;;  %v3518_v9 = vsub.f32 %v6268_v56, %v6273_v27  ;;  %5270 = vpow2.f32 %v3539_v58  ;;  %v6414_v4 = vpop.eup %5266  ;;  %v3549_v27 = vmul.f32 1.442695, %v3522_v50 }
 0x455   : > { %3807 = vperm.xlu1 %5127, %v6391_v51   ;;  %5272 = vpow2.f32 %v3527_v6 }
 0x456   : > { %v3541_v33 = vmul.f32 1.442695, %v3518_v9 }
 0x458   : > { %3010 = vperm.xlu0 %5124, %v6049_v61   ;;  %v3521_v61 = vsub.f32 %v6329_v39, %v6332_v3  ;;  %5274 = vpow2.f32 %v3541_v33  ;;  %v6422_v56 = vpop.eup %5268 }
 0x459   : > { %3812 = vperm.xlu1 %5127, %v6398_v42   ;;  %5276 = vpow2.f32 %v3549_v27 }
 0x45a   : > { %v3547_v47 = vmul.f32 1.442695, %v3521_v61 }
 0x45c   : > { %3020 = vperm.xlu0 %5124, %v6075_v32   ;;  %v3519_v32 = vsub.f32 %v6311_v23, %v6314_v60  ;;  %5278 = vpow2.f32 %v3547_v47  ;;  %v3525_v60 = vsub.f32 %v6363_v13, %v6366_v24 }
 0x45d   : > { %3817 = vperm.xlu1 %5127, %v6406_v14  }
 0x45e   : > { %v3543_v39 = vmul.f32 1.442695, %v3519_v32  ;;  %v6430_v23 = vpop.eup %5270  ;;  %v3555_v26 = vmul.f32 1.442695, %v3525_v60 }
 0x45f   : > { %v6438_v0 = vpop.eup %5272 }
 0x460   : > { %3030 = vperm.xlu0 %5124, %v6070_v36   ;;  %v3526_v36 = vsub.f32 %v6340_v7, %v6343_v30  ;;  %5280 = vpow2.f32 %v3543_v39  ;;  %v3524_v30 = vsub.f32 %v6358_v40, %v6361_v43 }
 0x461   : > { %3822 = vperm.xlu1 %5127, %v6414_v4   ;;  %5282 = vpow2.f32 %v3545_v45 }
 0x462   : > { %v3557_v53 = vmul.f32 1.442695, %v3526_v36  ;;  %v6440_v41 = vpop.eup %5274 }
 0x463   : > { %v6445_v3 = vpop.eup %5276 }
 0x464   : > { %3035 = vperm.xlu0 %5124, %v6085_v57   ;;  %v3523_v57 = vsub.f32 %v6345_v29, %v6348_v34  ;;  %5284 = vpow2.f32 %v3557_v53  ;;  %v3553_v34 = vmul.f32 1.442695, %v3524_v30 }
 0x465   : > { %3827 = vperm.xlu1 %5127, %v6422_v56   ;;  %5286 = vpow2.f32 %v3555_v26 }
 0x466   : > { %v6447_v7 = vpop.eup %5278 }
 0x468   : > { %3045 = vperm.xlu0 %5124, %v6077_v55   ;;  %v3551_v55 = vmul.f32 1.442695, %v3523_v57 }
 0x469   : > { %3832 = vperm.xlu1 %5127, %v6430_v23  }
 0x46a   : > { %5288 = vpow2.f32 %v3551_v55  ;;  %v6451_v29 = vpop.eup %5280 }
 0x46b   : > { %5290 = vpow2.f32 %v3553_v34  ;;  %v6453_v40 = vpop.eup %5282 }
 0x46c   : > { %5126 = vset.pattern.permute.xlu0 %v6801_v20 }
 0x46d   : > { %3802 = vperm.xlu0 %5126, %v6438_v0   ;;  %3837 = vperm.xlu1 %5127, %v6440_v41  }
 0x46e   : > { %v6457_v43 = vpop.eup %5284 }
 0x46f   : > { %v6459_v13 = vpop.eup %5286 }
 0x471   : > { %3857 = vperm.xlu0 %5126, %v6445_v3   ;;  %3852 = vperm.xlu1 %5127, %v6447_v7  }
 0x474   : > { %v6463_v24 = vpop.eup %5288 }
 0x475   : > { %3847 = vperm.xlu0 %5126, %v6453_v40   ;;  %3842 = vperm.xlu1 %5127, %v6451_v29   ;;  %v6465_v52 = vpop.eup %5290 }
 0x479   : > { %3877 = vperm.xlu0 %5126, %v6457_v43   ;;  %3872 = vperm.xlu1 %5127, %v6459_v13  }
 0x47d   : > { %3862 = vperm.xlu1 %5127, %v6463_v24   ;;  %3867 = vperm.xlu0 %5126, %v6465_v52  }
 0x481   : > { %5128 = vset.pattern.permute.xlu1 %v6800_v59 }
 0x4a8   : > { %v3562_v49 = vpop.permute.xlu1 %3561 }
 0x4a9   : > { %v3639_v12 = vsub.f32 %v6134_v46, %v3562_v49 }
 0x4aa   : > { %v3567_v38 = vpop.permute.xlu0 %3566 }
 0x4ab   : > { %v3655_v15 = vmul.f32 1.442695, %v3639_v12  ;;  %v3640_v11 = vsub.f32 %v6140_v8, %v3567_v38 }
 0x4ad   : > { %5292 = vpow2.f32 %v3655_v15  ;;  %v3657_v19 = vmul.f32 1.442695, %v3640_v11 }
 0x4ae   : > { %v3572_v10 = vpop.permute.xlu1 %3571 }
 0x4af   : > { %5294 = vpow2.f32 %v3657_v19  ;;  %v3641_v1 = vsub.f32 %v6152_v18, %v3572_v10 }
 0x4b1   : > { %v3659_v9 = vmul.f32 1.442695, %v3641_v1 }
 0x4b2   : > { %v3582_v58 = vpop.permute.xlu0 %3581  ;;  %v3577_v6 = vpop.permute.xlu1 %3576 }
 0x4b3   : > { %5296 = vpow2.f32 %v3659_v9  ;;  %v3643_v50 = vsub.f32 %v6158_v31, %v3582_v58  ;;  %v3642_v33 = vsub.f32 %v6146_v37, %v3577_v6 }
 0x4b5   : > { %v3661_v61 = vmul.f32 1.442695, %v3642_v33  ;;  %v3663_v46 = vmul.f32 1.442695, %v3643_v50 }
 0x4b6   : > { %v3592_v27 = vpop.permute.xlu0 %3591  ;;  %v3587_v32 = vpop.permute.xlu1 %3586 }
 0x4b7   : > { %v5293_v17 = vpop.eup %5292  ;;  %v3645_v8 = vsub.f32 %v6175_v16, %v3592_v27  ;;  %v3644_v47 = vsub.f32 %v6170_v35, %v3587_v32  ;;  %5298 = vpow2.f32 %v3661_v61 }
 0x4b8   : > { %3719 = vadd.xlane.f32.xlu1 %v5293_v17  ;;  %5300 = vpow2.f32 %v3663_v46 }
 0x4b9   : > { %v5295_v18 = vpop.eup %5294  ;;  %v3667_v39 = vmul.f32 1.442695, %v3645_v8  ;;  %v3665_v36 = vmul.f32 1.442695, %v3644_v47 }
 0x4ba   : > { %v3602_v45 = vpop.permute.xlu0 %3601  ;;  %v3597_v60 = vpop.permute.xlu1 %3596  ;;  %v3896_v31 = vpack.c.bf16 %v5295_v18, %v5293_v17 }
 0x4bb   : > { %5302 = vpow2.f32 %v3667_v39  ;;  %v3647_v37 = vsub.f32 %v6182_v25, %v3602_v45  ;;  %v3646_v53 = vsub.f32 %v6163_v5, %v3597_v60 }
 0x4bc   : > { %5304 = vpow2.f32 %v3665_v36  ;;  %5059 = vmatprep.mubr.bf16.mxu0 %v3896_v31  ;;  %v6802_v36 = vld [vmem:[#allocation24_spill] sm:$0xff] }
 0x4bd   : > { %v5297_v57 = vpop.eup %5296  ;;  %v3669_v16 = vmul.f32 1.442695, %v3646_v53  ;;  %v3671_v30 = vmul.f32 1.442695, %v3647_v37 }
 0x4be   : > { %v3612_v35 = vpop.permute.xlu0 %3611  ;;  %3723 = vadd.xlane.f32.xlu0 %v5297_v57  ;;  %v3607_v26 = vpop.permute.xlu1 %3606 }
 0x4bf   : > { %v3649_v55 = vsub.f32 %v6200_v22, %v3612_v35  ;;  %v3648_v34 = vsub.f32 %v6195_v28, %v3607_v26  ;;  %5306 = vpow2.f32 %v3669_v16  ;;  %v6803_v16 = vld [vmem:[#allocation25_spill] sm:$0xff]  ;;  %v6804_v35 = vld [vmem:[#allocation36_spill] sm:$0xff] }
 0x4c0   : > { %5308 = vpow2.f32 %v3671_v30 }
 0x4c1   : > { %v3675_v49 = vmul.f32 1.442695, %v3649_v55  ;;  %v3673_v12 = vmul.f32 1.442695, %v3648_v34  ;;  %v5299_v38 = vpop.eup %5298 }
 0x4c2   : > { %v3622_v25 = vpop.permute.xlu0 %3621  ;;  %3721 = vadd.xlane.f32.xlu0 %v5295_v18  ;;  %v3617_v5 = vpop.permute.xlu1 %3616  ;;  %3725 = vadd.xlane.f32.xlu1 %v5299_v38  ;;  %v3897_v19 = vpack.c.bf16 %v5299_v38, %v5297_v57 }
 0x4c3   : > { %5310 = vpow2.f32 %v3675_v49  ;;  %v3651_v15 = vsub.f32 %v6207_v2, %v3622_v25  ;;  %v3650_v11 = vsub.f32 %v6188_v62, %v3617_v5  ;;  %v5301_v10 = vpop.eup %5300  ;;  %v6805_v5 = vld [vmem:[#allocation30_spill] sm:$0xff] }
 0x4c4   : > { %5312 = vpow2.f32 %v3673_v12  ;;  %5060 = vmatmul.mubr.bf16.vlgmr.msra.gmra.mrb[16].mxu0 %v3897_v19 }
 0x4c5   : > { %v5303_v22 = vpop.eup %5302  ;;  %v3677_v1 = vmul.f32 1.442695, %v3650_v11  ;;  %v3679_v9 = vmul.f32 1.442695, %v3651_v15 }
 0x4c6   : > { %v5305_v28 = vpop.eup %5304  ;;  %v3632_v58 = vpop.permute.xlu0 %3631  ;;  %3731 = vadd.xlane.f32.xlu0 %v5303_v22 }
 0x4c7   : > { %v3627_v6 = vpop.permute.xlu1 %3626  ;;  %v3653_v50 = vsub.f32 %v6224_v48, %v3632_v58  ;;  %v3898_v61 = vpack.c.bf16 %v5305_v28, %v5301_v10  ;;  %5314 = vpow2.f32 %v3677_v1 }
 0x4c8   : > { %v3652_v33 = vsub.f32 %v6219_v44, %v3627_v6  ;;  %5316 = vpow2.f32 %v3679_v9 }
 0x4c9   : > { %v3683_v2 = vmul.f32 1.442695, %v3653_v50  ;;  %5063 = vmatprep.mubr.bf16.mxu0 %v3898_v61  ;;  %v5307_v62 = vpop.eup %5306  ;;  %v6807_v50 = vld [vmem:[#allocation33_spill] sm:$0xff] }
 0x4ca   : > { %v3681_v46 = vmul.f32 1.442695, %v3652_v33  ;;  %3727 = vadd.xlane.f32.xlu0 %v5301_v10  ;;  %3733 = vadd.xlane.f32.xlu1 %v5307_v62  ;;  %v3899_v8 = vpack.c.bf16 %v5307_v62, %v5303_v22  ;;  %v5309_v47 = vpop.eup %5308 }
 0x4cb   : > { %v3637_v27 = vpop.permute.xlu1 %3636  ;;  %5318 = vpow2.f32 %v3683_v2  ;;  %v2976_v17 = vpop.permute.xlu0 %2975 }
 0x4cc   : > { %v3654_v32 = vsub.f32 %v6212_v21, %v3637_v27  ;;  %5320 = vpow2.f32 %v3681_v46  ;;  %v3053_v48 = vmul.f32 0.0, %v2976_v17  ;;  %5064 = vmatmul.mubr.bf16.gmra.mrb[20].mxu0 %v3899_v8  ;;  %v6808_v46 = vld [vmem:[#allocation32_spill] sm:$0xff]  ;;  %v6809_v17 = vld [vmem:[#allocation35_spill] sm:$0xff] }
 0x4cd   : > { %v5311_v18 = vpop.eup %5310 }
 0x4ce   : > { %v3685_v44 = vmul.f32 1.442695, %v3654_v32  ;;  %v5313_v39 = vpop.eup %5312  ;;  %3739 = vadd.xlane.f32.xlu0 %v5311_v18  ;;  %v6489_v45 = vadd.f32 %v6802_v36, %v3053_v48  ;;  %3729 = vadd.xlane.f32.xlu1 %v5305_v28  ;;  %v6806_v28 = vld [vmem:[#allocation29_spill] sm:$0xff] }
 0x4cf   : > { %v2991_v60 = vpop.permute.xlu0 %2990  ;;  %v3051_v31 = vpop.permute.xlu1 %3050  ;;  %v3900_v37 = vpack.c.bf16 %v5313_v39, %v5309_v47 }
 0x4d0   : > { %5322 = vpow2.f32 %v3685_v44  ;;  %v3056_v53 = vmul.f32 0.0, %v2991_v60  ;;  %v3068_v21 = vmul.f32 0.0, %v3051_v31 }
 0x4d1   : > { %5067 = vmatprep.mubr.bf16.mxu0 %v3900_v37  ;;  %v5315_v57 = vpop.eup %5314 }
 0x4d2   : > { %3735 = vadd.xlane.f32.xlu0 %v5309_v47  ;;  %v6492_v30 = vadd.f32 %v6803_v16, %v3056_v53  ;;  %v6495_v26 = vadd.f32 %v6804_v35, %v3068_v21  ;;  %3741 = vadd.xlane.f32.xlu1 %v5315_v57  ;;  %v3901_v34 = vpack.c.bf16 %v5315_v57, %v5311_v18  ;;  %v5317_v49 = vpop.eup %5316  ;;  %v6810_v18 = vld [vmem:[#allocation34_spill] sm:$0xff] }
 0x4d3   : > { %v3001_v55 = vpop.permute.xlu0 %3000 }
 0x4d4   : > { %v3058_v12 = vmul.f32 0.0, %v3001_v55  ;;  %5068 = vmatmul.mubr.bf16.gmra.mrb[24].mxu0 %v3901_v34 }
 0x4d5   : > { %v5319_v38 = vpop.eup %5318 }
 0x4d6   : > { %v5321_v25 = vpop.eup %5320  ;;  %3747 = vadd.xlane.f32.xlu0 %v5319_v38  ;;  %v6498_v15 = vadd.f32 %v6805_v5, %v3058_v12  ;;  %3737 = vadd.xlane.f32.xlu1 %v5313_v39  ;;  %v6515_v39 = vpop.permute.xlu1 %3807 }
 0x4d7   : > { %v3011_v11 = vpop.permute.xlu0 %3010  ;;  %v3902_v19 = vpack.c.bf16 %v5321_v25, %v5317_v49 }
 0x4d8   : > { %v3060_v10 = vmul.f32 0.0, %v3011_v11 }
 0x4d9   : > { %5071 = vmatprep.mubr.bf16.mxu0 %v3902_v19 }
 0x4da   : > { %v5323_v22 = vpop.eup %5322  ;;  %3743 = vadd.xlane.f32.xlu0 %v5317_v49  ;;  %v6501_v9 = vadd.f32 %v6806_v28, %v3060_v10  ;;  %v6517_v36 = vpop.permute.xlu1 %3812 }
 0x4db   : > { %v3903_v1 = vpack.c.bf16 %v5323_v22, %v5319_v38  ;;  %3749 = vadd.xlane.f32.xlu1 %v5323_v22  ;;  %v3021_v58 = vpop.permute.xlu0 %3020  ;;  %v3689_v22 = vld [vmem:[#allocation3 + $0x10] sm:$0xff] }
 0x4dc   : > { %v3062_v6 = vmul.f32 0.0, %v3021_v58 }
 0x4dd   : > { %5072 = vmatmul.mubr.bf16.gmra.mrb[28].mxu0 %v3903_v1  ;;  %v3705_v1 = vmul.f32 %v6398_v42, %v3689_v22 }
 0x4de   : > { %v6504_v33 = vadd.f32 %v6807_v50, %v3062_v6  ;;  %v6519_v60 = vpop.permute.xlu1 %3817  ;;  %v3688_v6 = vld [vmem:[#allocation3 + $0x8] sm:$0xff] }
 0x4df   : > { %3745 = vadd.xlane.f32.xlu1 %v5321_v25  ;;  %v3031_v61 = vpop.permute.xlu0 %3030  ;;  %v3687_v25 = vld [vmem:[#allocation3] sm:$0xff]  ;;  %v3704_v50 = vmul.f32 %v6391_v51, %v3688_v6 }
 0x4e0   : > { %v3064_v2 = vmul.f32 0.0, %v3031_v61  ;;  %v3703_v5 = vmul.f32 %v6438_v0, %v3687_v25  ;;  %v3690_v61 = vld [vmem:[#allocation3 + $0x18] sm:$0xff]  ;;  %v3691_v51 = vld [vmem:[#allocation3 + $0x20] sm:$0xff] }
 0x4e1   : > { %v3706_v0 = vmul.f32 %v6406_v14, %v3690_v61  ;;  %v3707_v14 = vmul.f32 %v6414_v4, %v3691_v51  ;;  %v3692_v61 = vld [vmem:[#allocation3 + $0x28] sm:$0xff] }
 0x4e2   : > { %v6507_v62 = vadd.f32 %v6808_v46, %v3064_v2  ;;  %v6521_v31 = vpop.permute.xlu1 %3822  ;;  %v3708_v4 = vmul.f32 %v6422_v56, %v3692_v61 }
 0x4e3   : > { %v3036_v27 = vpop.permute.xlu0 %3035 }
 0x4e4   : > { %v3065_v32 = vmul.f32 0.0, %v3036_v27 }
 0x4e6   : > { %v6510_v8 = vadd.f32 %v6809_v17, %v3065_v32  ;;  %v6523_v37 = vpop.permute.xlu1 %3827 }
 0x4e7   : > { %v3046_v47 = vpop.permute.xlu0 %3045 }
 0x4e8   : > { %v3067_v48 = vmul.f32 0.0, %v3046_v47  ;;  %v3693_v47 = vld [vmem:[#allocation3 + $0x30] sm:$0xff] }
 0x4e9   : > { %v3709_v42 = vmul.f32 %v6430_v23, %v3693_v47  ;;  %v3698_v47 = vld [vmem:[#allocation3 + $0x58] sm:$0xff] }
 0x4ea   : > { %v6513_v44 = vadd.f32 %v6810_v18, %v3067_v48  ;;  %v6525_v53 = vpop.permute.xlu1 %3832 }
 0x4ec   : > { %v6529_v57 = vpop.permute.xlu0 %3802 }
 0x4ee   : > { %v6527_v21 = vpop.permute.xlu1 %3837 }
 0x4f0   : > { %v6533_v35 = vpop.permute.xlu0 %3857 }
 0x4f2   : > { %v6531_v16 = vpop.permute.xlu1 %3852 }
 0x4f4   : > { %v6537_v34 = vpop.permute.xlu0 %3847 }
 0x4f6   : > { %v6535_v55 = vpop.permute.xlu1 %3842 }
 0x4f8   : > { %v6541_v12 = vpop.permute.xlu0 %3877 }
 0x4fa   : > { %v6539_v49 = vpop.permute.xlu1 %3872 }
 0x4fc   : > { %v6546_v10 = vpop.permute.xlu0 %3867 }
 0x4fe   : > { %v6543_v38 = vpop.permute.xlu1 %3862 }
 0x545   : > { %v3720_v11 = vpop.xlane.xlu1 %3719 }
 0x546   : > { %v3751_v19 = vadd.f32 %v3720_v11, %v3703_v5  ;;  %v3694_v5 = vld [vmem:[#allocation3 + $0x38] sm:$0xff] }
 0x548   : > { %3768 = vst.msk [vmem:[#allocation3] sm:$0xff] %vm3767_vm2, %v3751_v19  ;;  %v3710_v19 = vmul.f32 %v6440_v41, %v3694_v5 }
 0x54b   : > { %v3724_v28 = vpop.xlane.xlu0 %3723 }
 0x54c   : > { %v3753_v58 = vadd.f32 %v3724_v28, %v3705_v1 }
 0x54e   : > { %3770 = vst.msk [vmem:[#allocation3 + $0x10] sm:$0xff] %vm3767_vm2, %v3753_v58  ;;  %v3697_v58 = vld [vmem:[#allocation3 + $0x50] sm:$0xff] }
 0x54f   : > { %v4081_v2 = vld [vmem:[#allocation3] sm:$0xff]  ;;  %v3722_v46 = vpop.xlane.xlu0 %3721  ;;  %v3726_v32 = vpop.xlane.xlu1 %3725 }
 0x550   : > { %5324 = vrcp.f32 %v4081_v2  ;;  %v3752_v27 = vadd.f32 %v3722_v46, %v3704_v50  ;;  %v3754_v17 = vadd.f32 %v3726_v32, %v3706_v0  ;;  %v3713_v50 = vmul.f32 %v6447_v7, %v3697_v58  ;;  %v3695_v32 = vld [vmem:[#allocation3 + $0x40] sm:$0xff] }
 0x552   : > { %3769 = vst.msk [vmem:[#allocation3 + $0x8] sm:$0xff] %vm3767_vm2, %v3752_v27  ;;  %3771 = vst.msk [vmem:[#allocation3 + $0x18] sm:$0xff] %vm3767_vm2, %v3754_v17  ;;  %v3711_v17 = vmul.f32 %v6451_v29, %v3695_v32 }
 0x553   : > { %v3732_v48 = vpop.xlane.xlu0 %3731 }
 0x554   : > { %v3757_v18 = vadd.f32 %v3732_v48, %v3709_v42  ;;  %v3714_v42 = vmul.f32 %v6445_v3, %v3698_v47 }
 0x555   : > { %v4083_v25 = vld [vmem:[#allocation3 + $0x10] sm:$0xff] }
 0x556   : > { %5326 = vrcp.f32 %v4083_v25  ;;  %3774 = vst.msk [vmem:[#allocation3 + $0x30] sm:$0xff] %vm3767_vm2, %v3757_v18 }
 0x557   : > { %v3728_v11 = vpop.xlane.xlu0 %3727  ;;  %v3734_v1 = vpop.xlane.xlu1 %3733 }
 0x558   : > { %v3755_v22 = vadd.f32 %v3728_v11, %v3707_v14  ;;  %v3758_v28 = vadd.f32 %v3734_v1, %v3710_v19  ;;  %v3701_v14 = vld [vmem:[#allocation3 + $0x70] sm:$0xff]  ;;  %v3696_v11 = vld [vmem:[#allocation3 + $0x48] sm:$0xff] }
 0x559   : > { %v4084_v6 = vld [vmem:[#allocation3 + $0x18] sm:$0xff]  ;;  %v4082_v0 = vld [vmem:[#allocation3 + $0x8] sm:$0xff]  ;;  %v3717_v5 = vmul.f32 %v6459_v13, %v3701_v14  ;;  %v3712_v19 = vmul.f32 %v6453_v40, %v3696_v11 }
 0x55a   : > { %v5325_v23 = vpop.eup %5324  ;;  %3772 = vst.msk [vmem:[#allocation3 + $0x20] sm:$0xff] %vm3767_vm2, %v3755_v22  ;;  %5328 = vrcp.f32 %v4084_v6  ;;  %3775 = vst.msk [vmem:[#allocation3 + $0x38] sm:$0xff] %vm3767_vm2, %v3758_v28  ;;  %v3699_v6 = vld [vmem:[#allocation3 + $0x60] sm:$0xff] }
 0x55b   : > { %v3740_v2 = vpop.xlane.xlu0 %3739  ;;  %4355 = vperm.xlu0 %5126, %v5325_v23   ;;  %v3730_v41 = vpop.xlane.xlu1 %3729  ;;  %5330 = vrcp.f32 %v4082_v0  ;;  %v3715_v13 = vmul.f32 %v6463_v24, %v3699_v6 }
 0x55c   : > { %v3761_v46 = vadd.f32 %v3740_v2, %v3713_v50  ;;  %v3756_v27 = vadd.f32 %v3730_v41, %v3708_v4  ;;  %v3702_v50 = vld [vmem:[#allocation3 + $0x78] sm:$0xff] }
 0x55d   : > { %v4087_v56 = vld [vmem:[#allocation3 + $0x30] sm:$0xff]  ;;  %v3718_v40 = vmul.f32 %v6457_v43, %v3702_v50 }
 0x55e   : > { %3778 = vst.msk [vmem:[#allocation3 + $0x50] sm:$0xff] %vm3767_vm2, %v3761_v46  ;;  %3773 = vst.msk [vmem:[#allocation3 + $0x28] sm:$0xff] %vm3767_vm2, %v3756_v27  ;;  %5332 = vrcp.f32 %v4087_v56  ;;  %v3700_v27 = vld [vmem:[#allocation3 + $0x68] sm:$0xff] }
 0x55f   : > { %v3736_v7 = vpop.xlane.xlu0 %3735  ;;  %v3742_v25 = vpop.xlane.xlu1 %3741  ;;  %v3716_v24 = vmul.f32 %v6465_v52, %v3700_v27  ;;  %v3884_v27 = vmul.f32 0.0, %v6521_v31  ;;  %v3890_v31 = vmul.f32 0.0, %v6531_v16 }
 0x560   : > { %v5327_v48 = vpop.eup %5326  ;;  %v3759_v18 = vadd.f32 %v3736_v7, %v3711_v17  ;;  %v3762_v51 = vadd.f32 %v3742_v25, %v3714_v42 }
 0x561   : > { %4141 = vperm.xlu1 %5128, %v5327_v48   ;;  %v4085_v28 = vld [vmem:[#allocation3 + $0x20] sm:$0xff]  ;;  %v4088_v0 = vld [vmem:[#allocation3 + $0x38] sm:$0xff] }
 0x562   : > { %3776 = vst.msk [vmem:[#allocation3 + $0x40] sm:$0xff] %vm3767_vm2, %v3759_v18  ;;  %3779 = vst.msk [vmem:[#allocation3 + $0x58] sm:$0xff] %vm3767_vm2, %v3762_v51  ;;  %5334 = vrcp.f32 %v4085_v28  ;;  %v3882_v28 = vmul.f32 0.0, %v6517_v36 }
 0x563   : > { %v3748_v29 = vpop.xlane.xlu0 %3747  ;;  %v3738_v22 = vpop.xlane.xlu1 %3737  ;;  %5336 = vrcp.f32 %v4088_v0 }
 0x564   : > { %v3765_v3 = vadd.f32 %v3748_v29, %v3717_v5  ;;  %v5329_v1 = vpop.eup %5328  ;;  %v3760_v58 = vadd.f32 %v3738_v22, %v3712_v19 }
 0x565   : > { %5129 = vset.pattern.permute.xlu1 %v6801_v20  ;;  %4370 = vperm.xlu0 %5126, %v5329_v1   ;;  %v5331_v41 = vpop.eup %5330  ;;  %v4086_v47 = vld [vmem:[#allocation3 + $0x28] sm:$0xff]  ;;  %v4091_v42 = vld [vmem:[#allocation3 + $0x50] sm:$0xff] }
 0x566   : > { %3782 = vst.msk [vmem:[#allocation3 + $0x70] sm:$0xff] %vm3767_vm2, %v3765_v3  ;;  %4365 = vperm.xlu1 %5129, %v5327_v48   ;;  %3777 = vst.msk [vmem:[#allocation3 + $0x48] sm:$0xff] %vm3767_vm2, %v3760_v58  ;;  %5338 = vrcp.f32 %v4086_v47  ;;  %v3880_v58 = vmul.f32 0.0, %v6529_v57 }
 0x567   : > { %v3744_v61 = vpop.xlane.xlu0 %3743  ;;  %5340 = vrcp.f32 %v4091_v42 }
 0x568   : > { %v3763_v2 = vadd.f32 %v3744_v61, %v3715_v13  ;;  %v3750_v4 = vpop.xlane.xlu1 %3749  ;;  %v5333_v17 = vpop.eup %5332  ;;  %v3883_v13 = vmul.f32 0.0, %v6519_v60  ;;  %v3886_v60 = vmul.f32 0.0, %v6525_v53 }
 0x569   : > { %v3766_v46 = vadd.f32 %v3750_v4, %v3718_v40  ;;  %5131 = vset.pattern.permute.xlu0 %v6800_v59  ;;  %v4089_v48 = vld [vmem:[#allocation3 + $0x40] sm:$0xff]  ;;  %v4092_v18 = vld [vmem:[#allocation3 + $0x58] sm:$0xff]  ;;  %v3881_v40 = vmul.f32 0.0, %v6515_v39  ;;  %v3887_v39 = vmul.f32 0.0, %v6527_v21 }
 0x56a   : > { %3780 = vst.msk [vmem:[#allocation3 + $0x60] sm:$0xff] %vm3767_vm2, %v3763_v2  ;;  %5130 = vset.pattern.permute.xlu1 %v6800_v59  ;;  %4136 = vperm.xlu0 %5131, %v5331_v41   ;;  %5342 = vrcp.f32 %v4089_v48  ;;  %v3891_v48 = vmul.f32 0.0, %v6533_v35  ;;  %v3894_v35 = vmul.f32 0.0, %v6539_v49  ;;  %v6811_v49 = vld [vmem:[#allocation19_spill] sm:$0xff] }
 0x56b   : > { %3783 = vst.msk [vmem:[#allocation3 + $0x78] sm:$0xff] %vm3767_vm2, %v3766_v46  ;;  %4131 = vperm.xlu1 %5130, %v5325_v23   ;;  %5344 = vrcp.f32 %v4092_v18 }
 0x56c   : > { %v3746_v43 = vpop.xlane.xlu1 %3745  ;;  %v5335_v7 = vpop.eup %5334 }
 0x56d   : > { %v3764_v32 = vadd.f32 %v3746_v43, %v3716_v24  ;;  %v5337_v23 = vpop.eup %5336  ;;  %v4090_v56 = vld [vmem:[#allocation3 + $0x48] sm:$0xff]  ;;  %v4095_v14 = vld [vmem:[#allocation3 + $0x70] sm:$0xff] }
 0x56e   : > { %4161 = vperm.xlu0 %5131, %v5333_v17   ;;  %5346 = vrcp.f32 %v4090_v56 }
 0x56f   : > { %3781 = vst.msk [vmem:[#allocation3 + $0x68] sm:$0xff] %vm3767_vm2, %v3764_v32  ;;  %4146 = vperm.xlu1 %5130, %v5329_v1   ;;  %5348 = vrcp.f32 %v4095_v14 }
 0x570   : > { %v5339_v52 = vpop.eup %5338 }
 0x571   : > { %v5341_v25 = vpop.eup %5340  ;;  %v4093_v11 = vld [vmem:[#allocation3 + $0x60] sm:$0xff] }
 0x572   : > { %4151 = vperm.xlu0 %5131, %v5335_v7   ;;  %5350 = vrcp.f32 %v4093_v11  ;;  %v4096_v22 = vld [vmem:[#allocation3 + $0x78] sm:$0xff] }
 0x573   : > { %5132 = vset.pattern.permute.xlu1 %v6801_v20 }
 0x574   : > { %4360 = vperm.xlu1 %5132, %v5331_v41   ;;  %v5343_v51 = vpop.eup %5342 }
 0x575   : > { %v5345_v5 = vpop.eup %5344 }
 0x576   : > { %5134 = vset.pattern.permute.xlu0 %v6801_v20  ;;  %v4094_v19 = vld [vmem:[#allocation3 + $0x68] sm:$0xff] }
 0x577   : > { %4390 = vperm.xlu0 %5134, %v5337_v23   ;;  %5352 = vrcp.f32 %v4094_v19 }
 0x578   : > { %4385 = vperm.xlu1 %5132, %v5333_v17   ;;  %v5347_v29 = vpop.eup %5346  ;;  %5354 = vrcp.f32 %v4096_v22  ;;  %v3885_v17 = vmul.f32 0.0, %v6523_v37  ;;  %v3889_v37 = vmul.f32 0.0, %v6537_v34 }
 0x579   : > { %v5349_v3 = vpop.eup %5348 }
 0x57b   : > { %4380 = vperm.xlu0 %5134, %v5339_v52  }
 0x57c   : > { %4375 = vperm.xlu1 %5132, %v5335_v7   ;;  %v5351_v1 = vpop.eup %5350 }
 0x57f   : > { %5135 = vset.pattern.permute.xlu0 %v6800_v59 }
 0x580   : > { %5133 = vset.pattern.permute.xlu1 %v6800_v59  ;;  %4181 = vperm.xlu0 %5135, %v5341_v25  }
 0x581   : > { %4166 = vperm.xlu1 %5133, %v5337_v23   ;;  %v5353_v46 = vpop.eup %5352 }
 0x582   : > { %v5355_v57 = vpop.eup %5354 }
 0x584   : > { %4171 = vperm.xlu0 %5135, %v5343_v51  }
 0x585   : > { %4156 = vperm.xlu1 %5133, %v5339_v52  }
 0x588   : > { %5138 = vset.pattern.permute.xlu0 %v6801_v20 }
 0x589   : > { %5136 = vset.pattern.permute.xlu1 %v6801_v20  ;;  %4410 = vperm.xlu0 %5138, %v5345_v5  }
 0x58a   : > { %4405 = vperm.xlu1 %5136, %v5341_v25  }
 0x58d   : > { %4400 = vperm.xlu0 %5138, %v5347_v29  }
 0x58e   : > { %4395 = vperm.xlu1 %5136, %v5343_v51  }
 0x591   : > { %5139 = vset.pattern.permute.xlu0 %v6800_v59 }
 0x592   : > { %5137 = vset.pattern.permute.xlu1 %v6800_v59  ;;  %4201 = vperm.xlu0 %5139, %v5349_v3  }
 0x593   : > { %4186 = vperm.xlu1 %5137, %v5345_v5   ;;  %v3895_v5 = vmul.f32 0.0, %v6541_v12  ;;  %v3055_v12 = vmul.f32 0.0, %v6811_v49 }
 0x596   : > { %4191 = vperm.xlu0 %5139, %v5351_v1  }
 0x597   : > { %4176 = vperm.xlu1 %5137, %v5347_v29   ;;  %v5061_v6 = vpop.f32.mrb[16].mxu0 }
 0x598   : > { %v6593_v50 = vadd.f32 %v5061_v6, %v3882_v28  ;;  %v3970_v61 = vpop.f32.mrb[17].mxu0  ;;  %v6812_v28 = vld [vmem:[#allocation23_spill] sm:$0xff] }
 0x599   : > { %v4033_v2 = vadd.f32 %v3970_v61, %v3880_v58  ;;  %v5062_v4 = vpop.f32.mrb[18].mxu0  ;;  %v3224_v58 = vadd.f32 %v6812_v28, %v3055_v12 }
 0x59a   : > { %v4036_v41 = vadd.f32 %v5062_v4, %v3883_v13  ;;  %v3973_v0 = vpop.f32.mrb[19].mxu0  ;;  %5142 = vset.pattern.permute.xlu0 %v6801_v20 }
 0x59b   : > { %5140 = vset.pattern.permute.xlu1 %v6801_v20  ;;  %v6598_v36 = vadd.f32 %v3973_v0, %v3881_v40  ;;  %4420 = vperm.xlu0 %5142, %v5353_v46   ;;  %v6813_v0 = vld [vmem:[#allocation18_spill] sm:$0xff] }
 0x59c   : > { %4415 = vperm.xlu1 %5140, %v5351_v1  }
 0x59f   : > { %v5065_v24 = vpop.f32.mrb[20].mxu0  ;;  %4430 = vperm.xlu0 %5142, %v5355_v57  }
 0x5a0   : > { %5141 = vset.pattern.permute.xlu1 %v6800_v59  ;;  %v6604_v43 = vadd.f32 %v5065_v24, %v3886_v60  ;;  %v3986_v32 = vpop.f32.mrb[21].mxu0  ;;  %v3888_v59 = vmul.f32 0.0, %v6535_v55  ;;  %v6814_v24 = vld [vmem:[#allocation26_spill] sm:$0xff] }
 0x5a1   : > { %4206 = vperm.xlu1 %5141, %v5355_v57   ;;  %v6607_v47 = vadd.f32 %v3986_v32, %v3884_v27  ;;  %v5066_v7 = vpop.f32.mrb[22].mxu0  ;;  %v3054_v57 = vmul.f32 0.0, %v6813_v0 }
 0x5a2   : > { %v6609_v42 = vadd.f32 %v5066_v7, %v3887_v39  ;;  %v3989_v53 = vpop.f32.mrb[23].mxu0  ;;  %v6815_v7 = vld [vmem:[#allocation21_spill] sm:$0xff] }
 0x5a3   : > { %v6611_v23 = vadd.f32 %v3989_v53, %v3885_v17  ;;  %v3223_v39 = vadd.f32 %v6814_v24, %v3054_v57  ;;  %v3059_v53 = vmul.f32 0.0, %v6815_v7 }
 0x5a5   : > { %4196 = vperm.xlu1 %5141, %v5353_v46  }
 0x5a7   : > { %v5069_v21 = vpop.f32.mrb[24].mxu0 }
 0x5a8   : > { %v6616_v52 = vadd.f32 %v5069_v21, %v3890_v31  ;;  %v4002_v18 = vpop.f32.mrb[25].mxu0 }
 0x5a9   : > { %5143 = vset.pattern.permute.xlu1 %v6801_v20  ;;  %v6620_v25 = vadd.f32 %v4002_v18, %v3888_v59  ;;  %v5070_v56 = vpop.f32.mrb[26].mxu0  ;;  %v6816_v59 = vld [vmem:[#allocation27_spill] sm:$0xff] }
 0x5aa   : > { %4425 = vperm.xlu1 %5143, %v5349_v3   ;;  %v6622_v51 = vadd.f32 %v5070_v56, %v3891_v48  ;;  %v4005_v16 = vpop.f32.mrb[27].mxu0  ;;  %v6817_v56 = vld [vmem:[#allocation20_spill] sm:$0xff] }
 0x5ab   : > { %v6624_v55 = vadd.f32 %v4005_v16, %v3889_v37  ;;  %v3057_v16 = vmul.f32 0.0, %v6817_v56 }
 0x5b0   : > { %v5073_v14 = vpop.f32.mrb[28].mxu0 }
 0x5b1   : > { %v6628_v11 = vadd.f32 %v5073_v14, %v3894_v35  ;;  %v6630_v20 = vpop.f32.mrb[29].mxu0 }
 0x5b2   : > { %v5074_v34 = vpop.f32.mrb[30].mxu0 }
 0x5b3   : > { %v6632_v29 = vadd.f32 %v5074_v34, %v3895_v5  ;;  %v6634_v19 = vpop.f32.mrb[31].mxu0  ;;  %v6818_v5 = vld [vmem:[#allocation28_spill] sm:$0xff] }
 0x5b4   : > { %v3226_v34 = vadd.f32 %v6818_v5, %v3057_v16 }
 0x5da   : > { %v4356_v3 = vpop.permute.xlu0 %4355 }
 0x5db   : > { %v4433_v22 = vmul.f32 %v4356_v3, %v4033_v2 }
 0x5dd   : > { %v4867_v1 = vpack.c.bf16 %v4433_v22, %v4433_v22 }
 0x5df   : > { %4513 = vst [vmem:[%s6641_s30 + $0x4] sm:$0xf] %v4867_v1 }
 0x5e0   : > { %v4142_v6 = vpop.permute.xlu1 %4141 }
 0x5e1   : > { %v4211_v13 = vmul.f32 %v4142_v6, %v3224_v58 }
 0x5e3   : > { %v4853_v61 = vpack.c.bf16 %v4211_v13, %v4211_v13 }
 0x5e4   : > { %v4371_v40 = vpop.permute.xlu0 %4370 }
 0x5e5   : > { %4291 = vst [vmem:[%s6641_s30 + $0x10] sm:$0xf] %v4853_v61  ;;  %v4366_v2 = vpop.permute.xlu1 %4365  ;;  %v4436_v4 = vmul.f32 %v4371_v40, %v4036_v41 }
 0x5e6   : > { %v4435_v46 = vmul.f32 %v4366_v2, %v6593_v50  ;;  %v3228_v50 = vadd.f32 %v6816_v59, %v3059_v53 }
 0x5e7   : > { %v4870_v60 = vpack.c.bf16 %v4436_v4, %v4436_v4 }
 0x5e8   : > { %v4869_v27 = vpack.c.bf16 %v4435_v46, %v4435_v46 }
 0x5e9   : > { %4516 = vst [vmem:[%s6641_s30 + $0x1c] sm:$0xf] %v4870_v60  ;;  %v4137_v32 = vpop.permute.xlu0 %4136 }
 0x5ea   : > { %4515 = vst [vmem:[%s6641_s30 + $0x14] sm:$0xf] %v4869_v27  ;;  %v4132_v17 = vpop.permute.xlu1 %4131  ;;  %v4210_v31 = vmul.f32 %v4137_v32, %v3223_v39 }
 0x5eb   : > { %v4209_v41 = vmul.f32 %v4132_v17, %v6489_v45  ;;  %v6820_v17 = vld [vmem:[#allocation31_spill] sm:$0xff] }
 0x5ec   : > { %v4852_v21 = vpack.c.bf16 %v4210_v31, %v4210_v31 }
 0x5ed   : > { %v4851_v48 = vpack.c.bf16 %v4209_v41, %v4209_v41  ;;  %v4162_v18 = vpop.permute.xlu0 %4161 }
 0x5ee   : > { %v4147_v37 = vpop.permute.xlu1 %4146  ;;  %4290 = vst [vmem:[%s6641_s30 + $0x8] sm:$0xf] %v4852_v21  ;;  %v4215_v35 = vmul.f32 %v4162_v18, %v3228_v50 }
 0x5ef   : > { %4289 = vst [vmem:[%s6641_s30] sm:$0xf] %v4851_v48  ;;  %v4212_v14 = vmul.f32 %v4147_v37, %v6492_v30 }
 0x5f0   : > { %v4857_v3 = vpack.c.bf16 %v4215_v35, %v4215_v35 }
 0x5f1   : > { %v4854_v45 = vpack.c.bf16 %v4212_v14, %v4212_v14  ;;  %v4152_v22 = vpop.permute.xlu0 %4151 }
 0x5f2   : > { %4295 = vst [vmem:[%s6641_s30 + $0x30] sm:$0xf] %v4857_v3  ;;  %v4213_v49 = vmul.f32 %v4152_v22, %v3226_v34 }
 0x5f3   : > { %4292 = vst [vmem:[%s6641_s30 + $0x18] sm:$0xf] %v4854_v45  ;;  %v4361_v12 = vpop.permute.xlu1 %4360 }
 0x5f4   : > { %v4434_v1 = vmul.f32 %v4361_v12, %v6598_v36  ;;  %v4855_v28 = vpack.c.bf16 %v4213_v49, %v4213_v49 }
 0x5f6   : > { %v4868_v58 = vpack.c.bf16 %v4434_v1, %v4434_v1  ;;  %4293 = vst [vmem:[%s6641_s30 + $0x20] sm:$0xf] %v4855_v28  ;;  %v4391_v6 = vpop.permute.xlu0 %4390  ;;  %v3893_v28 = vmul.f32 0.0, %v6546_v10 }
 0x5f7   : > { %v4386_v30 = vpop.permute.xlu1 %4385  ;;  %v4440_v13 = vmul.f32 %v4391_v6, %v6609_v42 }
 0x5f8   : > { %4514 = vst [vmem:[%s6641_s30 + $0xc] sm:$0xf] %v4868_v58  ;;  %v4439_v61 = vmul.f32 %v4386_v30, %v6604_v43  ;;  %v6819_v43 = vld [vmem:[#allocation22_spill] sm:$0xff]  ;;  %v3892_v58 = vmul.f32 0.0, %v6543_v38  ;;  %v4046_v30 = vadd.f32 %v6634_v19, %v3893_v28  ;;  %v3066_v38 = vmul.f32 0.0, %v6470_v54 }
 0x5f9   : > { %v4874_v40 = vpack.c.bf16 %v4440_v13, %v4440_v13  ;;  %v3061_v24 = vmul.f32 0.0, %v6819_v43 }
 0x5fa   : > { %v4873_v2 = vpack.c.bf16 %v4439_v61, %v4439_v61  ;;  %v4381_v4 = vpop.permute.xlu0 %4380 }
 0x5fb   : > { %v4376_v46 = vpop.permute.xlu1 %4375  ;;  %4520 = vst [vmem:[%s6641_s30 + $0x3c] sm:$0xf] %v4874_v40  ;;  %v4438_v36 = vmul.f32 %v4381_v4, %v6611_v23  ;;  %v3230_v23 = vadd.f32 %v6820_v17, %v3061_v24 }
 0x5fc   : > { %4519 = vst [vmem:[%s6641_s30 + $0x34] sm:$0xf] %v4873_v2  ;;  %v4437_v0 = vmul.f32 %v4376_v46, %v6607_v47 }
 0x5fd   : > { %v4872_v57 = vpack.c.bf16 %v4438_v36, %v4438_v36 }
 0x5fe   : > { %v4871_v60 = vpack.c.bf16 %v4437_v0, %v4437_v0  ;;  %v6821_v0 = vld [vmem:[#allocation37_spill] sm:$0xff] }
 0x5ff   : > { %4518 = vst [vmem:[%s6641_s30 + $0x2c] sm:$0xf] %v4872_v57  ;;  %v4182_v27 = vpop.permute.xlu0 %4181  ;;  %v3235_v57 = vadd.f32 %v6821_v0, %v3066_v38 }
 0x600   : > { %4517 = vst [vmem:[%s6641_s30 + $0x24] sm:$0xf] %v4871_v60  ;;  %v4167_v42 = vpop.permute.xlu1 %4166  ;;  %v4219_v39 = vmul.f32 %v4182_v27, %v6379_v63 }
 0x601   : > { %v4216_v32 = vmul.f32 %v4167_v42, %v6501_v9 }
 0x602   : > { %v4861_v7 = vpack.c.bf16 %v4219_v39, %v4219_v39 }
 0x603   : > { %v4858_v53 = vpack.c.bf16 %v4216_v32, %v4216_v32  ;;  %v4172_v47 = vpop.permute.xlu0 %4171 }
 0x604   : > { %v4157_v31 = vpop.permute.xlu1 %4156  ;;  %4299 = vst [vmem:[%s6641_s30 + $0x50] sm:$0xf] %v4861_v7  ;;  %v4217_v41 = vmul.f32 %v4172_v47, %v3230_v23 }
 0x605   : > { %4296 = vst [vmem:[%s6641_s30 + $0x38] sm:$0xf] %v4858_v53  ;;  %v4214_v59 = vmul.f32 %v4157_v31, %v6498_v15 }
 0x606   : > { %v4859_v50 = vpack.c.bf16 %v4217_v41, %v4217_v41 }
 0x607   : > { %v4856_v21 = vpack.c.bf16 %v4214_v59, %v4214_v59 }
 0x608   : > { %4297 = vst [vmem:[%s6641_s30 + $0x40] sm:$0xf] %v4859_v50  ;;  %v4411_v63 = vpop.permute.xlu0 %4410 }
 0x609   : > { %4294 = vst [vmem:[%s6641_s30 + $0x28] sm:$0xf] %v4856_v21  ;;  %v4406_v9 = vpop.permute.xlu1 %4405  ;;  %v4444_v48 = vmul.f32 %v4411_v63, %v6622_v51 }
 0x60a   : > { %v4443_v18 = vmul.f32 %v4406_v9, %v6616_v52 }
 0x60b   : > { %v4878_v37 = vpack.c.bf16 %v4444_v48, %v4444_v48 }
 0x60c   : > { %v4877_v56 = vpack.c.bf16 %v4443_v18, %v4443_v18  ;;  %v4401_v16 = vpop.permute.xlu0 %4400 }
 0x60d   : > { %v4396_v35 = vpop.permute.xlu1 %4395  ;;  %4524 = vst [vmem:[%s6641_s30 + $0x5c] sm:$0xf] %v4878_v37  ;;  %v4442_v15 = vmul.f32 %v4401_v16, %v6624_v55 }
 0x60e   : > { %4523 = vst [vmem:[%s6641_s30 + $0x54] sm:$0xf] %v4877_v56  ;;  %v4441_v14 = vmul.f32 %v4396_v35, %v6620_v25 }
 0x60f   : > { %v4876_v5 = vpack.c.bf16 %v4442_v15, %v4442_v15 }
 0x610   : > { %v4875_v34 = vpack.c.bf16 %v4441_v14, %v4441_v14 }
 0x611   : > { %4522 = vst [vmem:[%s6641_s30 + $0x4c] sm:$0xf] %v4876_v5  ;;  %v4202_v3 = vpop.permute.xlu0 %4201 }
 0x612   : > { %4521 = vst [vmem:[%s6641_s30 + $0x44] sm:$0xf] %v4875_v34  ;;  %v4187_v51 = vpop.permute.xlu1 %4186  ;;  %v4223_v52 = vmul.f32 %v4202_v3, %v6513_v44 }
 0x613   : > { %v4220_v45 = vmul.f32 %v4187_v51, %v6507_v62  ;;  %v4045_v62 = vadd.f32 %v6630_v20, %v3892_v58 }
 0x614   : > { %v4865_v22 = vpack.c.bf16 %v4223_v52, %v4223_v52 }
 0x615   : > { %v4862_v49 = vpack.c.bf16 %v4220_v45, %v4220_v45  ;;  %v4192_v12 = vpop.permute.xlu0 %4191 }
 0x616   : > { %v4177_v1 = vpop.permute.xlu1 %4176  ;;  %4303 = vst [vmem:[%s6641_s30 + $0x70] sm:$0xf] %v4865_v22  ;;  %v4221_v25 = vmul.f32 %v4192_v12, %v6510_v8 }
 0x617   : > { %4300 = vst [vmem:[%s6641_s30 + $0x58] sm:$0xf] %v4862_v49  ;;  %v4218_v55 = vmul.f32 %v4177_v1, %v6504_v33 }
 0x618   : > { %v4863_v44 = vpack.c.bf16 %v4221_v25, %v4221_v25 }
 0x619   : > { %v4860_v6 = vpack.c.bf16 %v4218_v55, %v4218_v55 }
 0x61a   : > { %4301 = vst [vmem:[%s6641_s30 + $0x60] sm:$0xf] %v4863_v44  ;;  %v4421_v13 = vpop.permute.xlu0 %4420 }
 0x61b   : > { %4298 = vst [vmem:[%s6641_s30 + $0x48] sm:$0xf] %v4860_v6  ;;  %v4416_v61 = vpop.permute.xlu1 %4415  ;;  %v4446_v8 = vmul.f32 %v4421_v13, %v4046_v30 }
 0x61c   : > { %v4445_v33 = vmul.f32 %v4416_v61, %v4045_v62 }
 0x61d   : > { %v4880_v40 = vpack.c.bf16 %v4446_v8, %v4446_v8 }
 0x61e   : > { %v4879_v10 = vpack.c.bf16 %v4445_v33, %v4445_v33  ;;  %v4431_v2 = vpop.permute.xlu0 %4430 }
 0x61f   : > { %4526 = vst [vmem:[%s6641_s30 + $0x6c] sm:$0xf] %v4880_v40  ;;  %v4448_v20 = vmul.f32 %v4431_v2, %v6632_v29 }
 0x620   : > { %4525 = vst [vmem:[%s6641_s30 + $0x64] sm:$0xf] %v4879_v10  ;;  %v4207_v19 = vpop.permute.xlu1 %4206 }
 0x621   : > { %v4224_v4 = vmul.f32 %v4207_v19, %v6495_v26  ;;  %v4882_v46 = vpack.c.bf16 %v4448_v20, %v4448_v20 }
 0x623   : > { %v4866_v36 = vpack.c.bf16 %v4224_v4, %v4224_v4  ;;  %4528 = vst [vmem:[%s6641_s30 + $0x7c] sm:$0xf] %v4882_v46 }
 0x624   : > { %v4197_v60 = vpop.permute.xlu1 %4196 }
 0x625   : > { %4304 = vst [vmem:[%s6641_s30 + $0x78] sm:$0xf] %v4866_v36  ;;  %v4222_v27 = vmul.f32 %v4197_v60, %v3235_v57 }
 0x627   : > { %v4864_v42 = vpack.c.bf16 %v4222_v27, %v4222_v27 }
 0x629   : > { %4302 = vst [vmem:[%s6641_s30 + $0x68] sm:$0xf] %v4864_v42  ;;  %v4426_v54 = vpop.permute.xlu1 %4425 }
 0x62a   : > { %v4447_v43 = vmul.f32 %v4426_v54, %v6628_v11 }
 0x62c   : > { %v4881_v24 = vpack.c.bf16 %v4447_v43, %v4447_v43 }
 0x62e   : > { %4527 = vst [vmem:[%s6641_s30 + $0x74] sm:$0xf] %v4881_v24 }
 0x62f PF: > { %s13_s16 = sadd.s32 1, %s5394_s16   ;;  %s6822_s12 = smov %s5382_s13 }
 0x630   : > { %p10_p10 = scmp.ge.s32.totalorder %s13_s16, 4   ;;  %s6823_s13 = smov %s5459_s21 }
 0x631   : > { %s6824_s14 = smov %s5390_s15  ;;  %s6825_s15 = smov %s6827_s17 }
 0x632   :  { %12 = sbr.rel (!%p10_p10) target bundleno = 3 (0x3), region = 209 }

// kernel: monai_decoder_only_forward.21
= control target key start
LH: loop header
LB: loop body
LE: loop exit
PB: predicated region body
PF: predicated region fallthrough
CT: control target
= control target key end

     0   :  { %10 = vsyncpa [#allocation3], 0  ;;  %s1901_s0 = inlined_call_operand.vmem [shape: f32[2,128,256], index: 0, kind: input, shape index: {}]   ;;  %s1902_s1 = inlined_call_operand.vmem [shape: bf16[256,256], index: 1, kind: input, shape index: {}]   ;;  %s1903_s2 = inlined_call_operand.vmem [shape: f32[1,256], index: 2, kind: input, shape index: {}]   ;;  %s1904_s3 = inlined_call_operand.vmem [shape: bf16[256,256], index: 3, kind: input, shape index: {}]   ;;  %s1905_s4 = inlined_call_operand.vmem [shape: f32[1,256], index: 4, kind: input, shape index: {}]   ;;  %s1906_s5 = inlined_call_operand.hbm [shape: f32[2,128,256], index: 5, kind: output, shape index: {}]  }
   0x1   :  { %12 = vsyncpa [#allocation3 + $0x1], 0  ;;  %s1431_s18 = smov 0   ;;  %s1433_s19 = smov 0  }
   0x2   :  { %s1435_s20 = smov 0   ;;  %s1437_s21 = smov 0  }
   0x3   :  { %s1439_s22 = smov 0   ;;  %s1441_s23 = smov 0  }
   0x4 LB: > { %s1086_s24 = sadd.s32 4294967295, %s1396_s23   ;;  %s1087_s25 = sadd.s32 4294967294, %s1396_s23   ;;  %s1396_s23 = sphi %s1441_s23, %s18_s23   ;;  %s1392_s22 = sphi %s1439_s22, %s1913_s22   ;;  %s1388_s21 = sphi %s1437_s21, %s1912_s21   ;;  %s1384_s20 = sphi %s1435_s20, %s1911_s20   ;;  %s1380_s19 = sphi %s1433_s19, %s1910_s19   ;;  %s1376_s18 = sphi %s1431_s18, %s1909_s18  }
   0x5   : > { %s30_s26 = sadd.s32 1, %s1392_s22  ;;  %s151_s27 = sadd.s32 1, %s1384_s20 }
   0x6   : > { %p32_p0 = scmp.ge.s32.totalorder %s30_s26, 2  ;;  %p161_p1 = scmp.ne.s32.totalorder %s1384_s20, %s1380_s19 }
   0x7   : > { %p162_p2 = scmp.eq.s32.totalorder %s1086_s24, 1  ;;  %p167_p3 = scmp.ne.s32.totalorder %s1380_s19, %s1376_s18 }
   0x8   : > { %s1915_s26 = smov (%p32_p0, %s30_s26), 0  ;;  %p168_p5 = scmp.eq.s32.totalorder %s1087_s25, 1 }
   0x9   : > { %p1471_p4 = por %p162_p2, %p161_p1  ;;  %s146_s29 = ssub.s32 %s1392_s22, %s1915_s26 }
   0xa   : > { %p1090_p6 = scmp.ge.s32.totalorder %s1396_s23, 1  ;;  %p149_p7 = scmp.eq.s32.totalorder %s146_s29, 0 }
   0xb   : > { %p1478_p8 = por %p168_p5, %p167_p3  ;;  %p212_p9 = scmp.lt.s32.totalorder %s1396_s23, 3 }
   0xc   : > { %s1484_s6 = scalar_select %p149_p7, %s1384_s20, %s151_s27  }
   0xd   : > { %p213_p10 = pnand %p1090_p6, %p212_p9 }
   0xe   : > { %v1222_v0 = vld [vmem:[%s1902_s1 + $0x4] ss:$8 sps:$4 sm:$0xff] (!%p213_p10)   ;;  %v1224_v1 = vld [vmem:[%s1902_s1] ss:$8 sps:$4 sm:$0xff] (!%p213_p10)   ;;  %v1225_v2 = vld [vmem:[%s1902_s1 + $0x14] ss:$8 sps:$4 sm:$0xff] (!%p213_p10)  }
   0xf   : > { %216 = sbr.rel (%p213_p10) target bundleno = 587 (0x24b), region = 40  ;;  %509 = vmatprep.subr.bf16.mxu0 (!%p213_p10), %v1222_v0  ;;  %v1227_v3 = vld [vmem:[%s1902_s1 + $0x10] ss:$8 sps:$4 sm:$0xff] (!%p213_p10)   ;;  %v1228_v4 = vld [vmem:[%s1902_s1 + $0x24] ss:$8 sps:$4 sm:$0xff] (!%p213_p10)   ;;  %p246_p11 = scmp.lt.s32.totalorder (!%p213_p10), %s1388_s21, 1 }
  0x10   : > { %510 = vmatpush1.bf16.msra.mxu0 (!%p213_p10), %v1224_v1  ;;  %v1230_v5 = vld [vmem:[%s1902_s1 + $0x20] ss:$8 sps:$4 sm:$0xff] (!%p213_p10)   ;;  %v1231_v6 = vld [vmem:[%s1902_s1 + $0x34] ss:$8 sps:$4 sm:$0xff] (!%p213_p10)   ;;  %v1233_v7 = vld [vmem:[%s1902_s1 + $0x30] ss:$8 sps:$4 sm:$0xff] (!%p213_p10)  }
  0x11   : > { %511 = vmatprep.subr.bf16.mxu0 (!%p213_p10), %v1225_v2  ;;  %v1234_v8 = vld [vmem:[%s1902_s1 + $0x44] ss:$8 sps:$4 sm:$0xff] (!%p213_p10)   ;;  %v1236_v9 = vld [vmem:[%s1902_s1 + $0x40] ss:$8 sps:$4 sm:$0xff] (!%p213_p10)   ;;  %v1237_v10 = vld [vmem:[%s1902_s1 + $0x54] ss:$8 sps:$4 sm:$0xff] (!%p213_p10)  }
  0x12   : > { %v1239_v11 = vld [vmem:[%s1902_s1 + $0x50] ss:$8 sps:$4 sm:$0xff] (!%p213_p10)   ;;  %v1240_v12 = vld [vmem:[%s1902_s1 + $0x64] ss:$8 sps:$4 sm:$0xff] (!%p213_p10)   ;;  %v1242_v16 = vld [vmem:[%s1902_s1 + $0x60] ss:$8 sps:$4 sm:$0xff] (!%p213_p10)  }
  0x13   : > { %v1243_v17 = vld [vmem:[%s1902_s1 + $0x74] ss:$8 sps:$4 sm:$0xff] (!%p213_p10)   ;;  %v1245_v18 = vld [vmem:[%s1902_s1 + $0x70] ss:$8 sps:$4 sm:$0xff] (!%p213_p10)   ;;  %v1246_v19 = vld [vmem:[%s1902_s1 + $0x84] ss:$8 sps:$4 sm:$0xff] (!%p213_p10)  }
  0x14   : > { %512 = vmatpush1.bf16.msra.mxu0 (!%p213_p10), %v1227_v3  ;;  %v1248_v20 = vld [vmem:[%s1902_s1 + $0x80] ss:$8 sps:$4 sm:$0xff] (!%p213_p10)   ;;  %v1249_v21 = vld [vmem:[%s1902_s1 + $0x94] ss:$8 sps:$4 sm:$0xff] (!%p213_p10)   ;;  %v1270_v22 = vld [vmem:[%s1904_s3 + $0x4] ss:$8 sps:$4 sm:$0xff] (!%p213_p10)  }
  0x15   : > { %513 = vmatprep.subr.bf16.mxu0 (!%p213_p10), %v1228_v4  ;;  %v1272_v23 = vld [vmem:[%s1904_s3] ss:$8 sps:$4 sm:$0xff] (!%p213_p10)   ;;  %v1251_v24 = vld [vmem:[%s1902_s1 + $0x90] ss:$8 sps:$4 sm:$0xff] (!%p213_p10)   ;;  %842 = vmatprep.subr.bf16.mxu1 (!%p213_p10), %v1270_v22  ;;  %v1273_v25 = vld [vmem:[%s1904_s3 + $0x14] ss:$8 sps:$4 sm:$0xff] (!%p213_p10)  }
  0x16   : > { %s247_s8 = scalar_select %p246_p11, %s1388_s21, 1  ;;  %v1252_v26 = vld [vmem:[%s1902_s1 + $0xa4] ss:$8 sps:$4 sm:$0xff]   ;;  %843 = vmatpush1.bf16.msra.mxu1 %v1272_v23  ;;  %v1275_v27 = vld [vmem:[%s1904_s3 + $0x10] ss:$8 sps:$4 sm:$0xff]  }
  0x17   : > { %844 = vmatprep.subr.bf16.mxu1 %v1273_v25  ;;  %v1276_v28 = vld [vmem:[%s1904_s3 + $0x24] ss:$8 sps:$4 sm:$0xff]   ;;  %v1254_v29 = vld [vmem:[%s1902_s1 + $0xa0] ss:$8 sps:$4 sm:$0xff]   ;;  %v1255_v30 = vld [vmem:[%s1902_s1 + $0xb4] ss:$8 sps:$4 sm:$0xff]  }
  0x18   : > { %514 = vmatpush1.bf16.msra.mxu0 %v1230_v5  ;;  %s1163_s13 = sshll.u32 %s247_s8, 8  ;;  %v1278_v31 = vld [vmem:[%s1904_s3 + $0x20] ss:$8 sps:$4 sm:$0xff]   ;;  %v1279_v32 = vld [vmem:[%s1904_s3 + $0x34] ss:$8 sps:$4 sm:$0xff]   ;;  %s1164_s25 = sshll.u32 %s1388_s21, 12 }
  0x19   : > { %515 = vmatprep.subr.bf16.mxu0 %v1231_v6  ;;  %s1524_s24 = scalar_lea.vmem %s1901_s0, %s1163_s13  ;;  %v1257_v33 = vld [vmem:[%s1902_s1 + $0xb0] ss:$8 sps:$4 sm:$0xff]   ;;  %v1258_v34 = vld [vmem:[%s1902_s1 + $0xc4] ss:$8 sps:$4 sm:$0xff]   ;;  %v1260_v37 = vld [vmem:[%s1902_s1 + $0xc0] ss:$8 sps:$4 sm:$0xff]   ;;  %s1845_s8 = scalar_lea.hbm %s1906_s5, %s1164_s25 }
  0x1a   : > { %v258_v13 = vld [vmem:[%s1524_s24 + $0x8] sm:$0xff]  ;;  %v260_v14 = vld [vmem:[%s1524_s24 + $0x18] sm:$0xff]  ;;  %845 = vmatpush1.bf16.msra.mxu1 %v1275_v27  ;;  %v257_v50 = vld [vmem:[%s1524_s24] sm:$0xff]  ;;  %s242_s13 = sand.u32 1, %s1380_s19   ;;  %s1398_s10 = smov [#allocation2]  }
  0x1b   : > { %v290_v15 = vpack.c.bf16 %v260_v14, %v258_v13  ;;  %846 = vmatprep.subr.bf16.mxu1 %v1276_v28  ;;  %v1281_v35 = vld [vmem:[%s1904_s3 + $0x30] ss:$8 sps:$4 sm:$0xff]   ;;  %v1282_v36 = vld [vmem:[%s1904_s3 + $0x44] ss:$8 sps:$4 sm:$0xff]   ;;  %v1261_v38 = vld [vmem:[%s1902_s1 + $0xd4] ss:$8 sps:$4 sm:$0xff]  }
  0x1c   : > { %516 = vmatpush1.bf16.msra.mxu0 %v1233_v7  ;;  %v1284_v39 = vld [vmem:[%s1904_s3 + $0x40] ss:$8 sps:$4 sm:$0xff]   ;;  %v1285_v40 = vld [vmem:[%s1904_s3 + $0x54] ss:$8 sps:$4 sm:$0xff]   ;;  %v1263_v41 = vld [vmem:[%s1902_s1 + $0xd0] ss:$8 sps:$4 sm:$0xff]  }
  0x1d   : > { %517 = vmatprep.subr.bf16.mxu0 %v1234_v8  ;;  %541 = vmatprep.mubr.bf16.mxu0 %v290_v15  ;;  %v1287_v42 = vld [vmem:[%s1904_s3 + $0x50] ss:$8 sps:$4 sm:$0xff]   ;;  %v1264_v43 = vld [vmem:[%s1902_s1 + $0xe4] ss:$8 sps:$4 sm:$0xff]   ;;  %v1266_v45 = vld [vmem:[%s1902_s1 + $0xe0] ss:$8 sps:$4 sm:$0xff]  }
  0x1e   : > { %847 = vmatpush1.bf16.msra.mxu1 %v1278_v31  ;;  %v1288_v44 = vld [vmem:[%s1904_s3 + $0x64] ss:$8 sps:$4 sm:$0xff]   ;;  %v1290_v46 = vld [vmem:[%s1904_s3 + $0x60] ss:$8 sps:$4 sm:$0xff]   ;;  %v1267_v47 = vld [vmem:[%s1902_s1 + $0xf4] ss:$8 sps:$4 sm:$0xff]  }
  0x1f   : > { %848 = vmatprep.subr.bf16.mxu1 %v1279_v32  ;;  %v1291_v48 = vld [vmem:[%s1904_s3 + $0x74] ss:$8 sps:$4 sm:$0xff]   ;;  %v1269_v49 = vld [vmem:[%s1902_s1 + $0xf0] ss:$8 sps:$4 sm:$0xff]   ;;  %v262_v53 = vld [vmem:[%s1524_s24 + $0x28] sm:$0xff]  ;;  %s1091_s16 = sshll.u32 %s242_s13, 8 }
  0x20   : > { %518 = vmatpush1.bf16.msra.mxu0 %v1236_v9  ;;  %v259_v51 = vld [vmem:[%s1524_s24 + $0x10] sm:$0xff]  ;;  %v264_v54 = vld [vmem:[%s1524_s24 + $0x38] sm:$0xff]  ;;  %v1294_v55 = vld [vmem:[%s1904_s3 + $0x84] ss:$8 sps:$4 sm:$0xff]   ;;  %s1780_s17 = scalar_lea.vmem [#allocation2], %s1091_s16  ;;  %s1855_s21 = scalar_lea.sflag [#allocation3], %s242_s13 }
  0x21   : > { %519 = vmatprep.subr.bf16.mxu0 %v1237_v10  ;;  %v1293_v52 = vld [vmem:[%s1904_s3 + $0x70] ss:$8 sps:$4 sm:$0xff]   ;;  %v289_v56 = vpack.c.bf16 %v259_v51, %v257_v50  ;;  %v292_v57 = vpack.c.bf16 %v264_v54, %v262_v53  ;;  %v1296_v58 = vld [vmem:[%s1904_s3 + $0x80] ss:$8 sps:$4 sm:$0xff]   ;;  %v1297_v59 = vld [vmem:[%s1904_s3 + $0x94] ss:$8 sps:$4 sm:$0xff]  }
  0x22   : > { %849 = vmatpush1.bf16.msra.mxu1 %v1281_v35  ;;  %v261_v60 = vld [vmem:[%s1524_s24 + $0x20] sm:$0xff]  ;;  %v263_v61 = vld [vmem:[%s1524_s24 + $0x30] sm:$0xff]  ;;  %v266_v63 = vld [vmem:[%s1524_s24 + $0x48] sm:$0xff]  ;;  %s1004_s27 = sshll.u32 %s1780_s17, 4  ;;  %s1322_s11 = sshll.u32 %s1398_s10, 4  ;;  %s1847_s27 = int_to_ptr.vmem [resolvable:$true] %s1004_s27  ;;  %s1323_s11 = int_to_ptr.vmem [resolvable:$false] %s1322_s11 }
  0x23   : > { %850 = vmatprep.subr.bf16.mxu1 %v1282_v36  ;;  %v1299_v62 = vld [vmem:[%s1904_s3 + $0x90] ss:$8 sps:$4 sm:$0xff]   ;;  %v1300_v1 = vld [vmem:[%s1904_s3 + $0xa4] ss:$8 sps:$4 sm:$0xff]   ;;  %v291_v2 = vpack.c.bf16 %v263_v61, %v261_v60  ;;  %v1302_v4 = vld [vmem:[%s1904_s3 + $0xa0] ss:$8 sps:$4 sm:$0xff]   ;;  %p1325_p1 = scmp.lt.s32.totalorder %s1847_s27, %s1323_s11 }
  0x24   : > { %520 = vmatpush1.bf16.msra.mxu0 %v1239_v11  ;;  %v268_v0 = vld [vmem:[%s1524_s24 + $0x58] sm:$0xff]  ;;  %v265_v6 = vld [vmem:[%s1524_s24 + $0x40] sm:$0xff]  ;;  %v267_v7 = vld [vmem:[%s1524_s24 + $0x50] sm:$0xff]  ;;  %s1318_s9 = scalar_lea.vmem %s1847_s27, 4096 }
  0x25   : > { %521 = vmatprep.subr.bf16.mxu0 %v1240_v12  ;;  %v294_v3 = vpack.c.bf16 %v268_v0, %v266_v63  ;;  %v1303_v5 = vld [vmem:[%s1904_s3 + $0xb4] ss:$8 sps:$4 sm:$0xff]   ;;  %v1305_v8 = vld [vmem:[%s1904_s3 + $0xb0] ss:$8 sps:$4 sm:$0xff]   ;;  %v270_v9 = vld [vmem:[%s1524_s24 + $0x68] sm:$0xff]  ;;  %v293_v12 = vpack.c.bf16 %v267_v7, %v265_v6  ;;  %p1319_p12 = scmp.ne.s32.totalorder %s1847_s27, %s1318_s9 }
  0x26   : > { %851 = vmatpush1.bf16.msra.mxu1 %v1284_v39  ;;  %v272_v10 = vld [vmem:[%s1524_s24 + $0x78] sm:$0xff]  ;;  %v1306_v11 = vld [vmem:[%s1904_s3 + $0xc4] ss:$8 sps:$4 sm:$0xff]   ;;  %v1308_v14 = vld [vmem:[%s1904_s3 + $0xc0] ss:$8 sps:$4 sm:$0xff]  }
  0x27   : > { %852 = vmatprep.subr.bf16.mxu1 %v1285_v40  ;;  %v296_v13 = vpack.c.bf16 %v272_v10, %v270_v9  ;;  %v1309_v15 = vld [vmem:[%s1904_s3 + $0xd4] ss:$8 sps:$4 sm:$0xff]   ;;  %v273_v23 = vld [vmem:[%s1524_s24 + $0x80] sm:$0xff]  ;;  %v278_v25 = vld [vmem:[%s1524_s24 + $0xa8] sm:$0xff]  ;;  %p1320_p13 = pnand %p1319_p12, %p1471_p4 }
  0x28   : > { %522 = vmatpush1.bf16.msra.mxu0 %v1242_v16  ;;  %v269_v16 = vld [vmem:[%s1524_s24 + $0x60] sm:$0xff]  ;;  %v282_v31 = vld [vmem:[%s1524_s24 + $0xc8] sm:$0xff]  ;;  %v284_v32 = vld [vmem:[%s1524_s24 + $0xd8] sm:$0xff] }
  0x29   : > { %523 = vmatprep.subr.bf16.mxu0 %v1243_v17  ;;  %v271_v17 = vld [vmem:[%s1524_s24 + $0x70] sm:$0xff]  ;;  %v281_v35 = vld [vmem:[%s1524_s24 + $0xc0] sm:$0xff]  ;;  %p1321_p0 = pneg %p1320_p13 }
  0x2a   : > { %853 = vmatpush1.bf16.msra.mxu1 %v1287_v42  ;;  %v283_v36 = vld [vmem:[%s1524_s24 + $0xd0] sm:$0xff]  ;;  %v337_v51 = vld [vmem:[%s1903_s2] sm:$0x3] }
  0x2b   : > { %854 = vmatprep.subr.bf16.mxu1 %v1288_v44  ;;  %v301_v39 = vpack.c.bf16 %v283_v36, %v281_v35  ;;  %v287_v42 = vld [vmem:[%s1524_s24 + $0xf0] sm:$0xff]  ;;  %v1312_v44 = vld [vmem:[%s1904_s3 + $0xe4] ss:$8 sps:$4 sm:$0xff]  }
  0x2c   : > { %524 = vmatpush1.bf16.msra.mxu0 %v1245_v18  ;;  %v1311_v18 = vld [vmem:[%s1904_s3 + $0xd0] ss:$8 sps:$4 sm:$0xff]  }
  0x2d   : > { %525 = vmatprep.subr.bf16.mxu0 %v1246_v19  ;;  %v274_v19 = vld [vmem:[%s1524_s24 + $0x88] sm:$0xff] }
  0x2e   : > { %855 = vmatpush1.bf16.msra.mxu1 %v1290_v46  ;;  %v1315_v46 = vld [vmem:[%s1904_s3 + $0xf4] ss:$8 sps:$4 sm:$0xff]  }
  0x2f   : > { %856 = vmatprep.subr.bf16.mxu1 %v1291_v48  ;;  %v339_v48 = vlaneseq }
  0x30   : > { %526 = vmatpush1.bf16.msra.mxu0 %v1248_v20  ;;  %v276_v20 = vld [vmem:[%s1524_s24 + $0x98] sm:$0xff] }
  0x31   : > { %527 = vmatprep.subr.bf16.mxu0 %v1249_v21  ;;  %v295_v21 = vpack.c.bf16 %v271_v17, %v269_v16  ;;  %v298_v22 = vpack.c.bf16 %v276_v20, %v274_v19 }
  0x32   : > { %857 = vmatpush1.bf16.msra.mxu1 %v1293_v52 }
  0x33   : > { %858 = vmatprep.subr.bf16.mxu1 %v1294_v55 }
  0x34   : > { %528 = vmatpush1.bf16.msra.mxu0 %v1251_v24  ;;  %v275_v24 = vld [vmem:[%s1524_s24 + $0x90] sm:$0xff] }
  0x35   : > { %529 = vmatprep.subr.bf16.mxu0 %v1252_v26  ;;  %v280_v26 = vld [vmem:[%s1524_s24 + $0xb8] sm:$0xff]  ;;  %v297_v27 = vpack.c.bf16 %v275_v24, %v273_v23 }
  0x36   : > { %859 = vmatpush1.bf16.msra.mxu1 %v1296_v58  ;;  %v300_v28 = vpack.c.bf16 %v280_v26, %v278_v25 }
  0x37   : > { %860 = vmatprep.subr.bf16.mxu1 %v1297_v59 }
  0x38   : > { %530 = vmatpush1.bf16.msra.mxu0 %v1254_v29  ;;  %v277_v29 = vld [vmem:[%s1524_s24 + $0xa0] sm:$0xff] }
  0x39   : > { %531 = vmatprep.subr.bf16.mxu0 %v1255_v30  ;;  %v279_v30 = vld [vmem:[%s1524_s24 + $0xb0] sm:$0xff] }
  0x3a   : > { %861 = vmatpush1.bf16.msra.mxu1 %v1299_v62 }
  0x3b   : > { %862 = vmatprep.subr.bf16.mxu1 %v1300_v1 }
  0x3c   : > { %532 = vmatpush1.bf16.msra.mxu0 %v1257_v33  ;;  %v299_v33 = vpack.c.bf16 %v279_v30, %v277_v29 }
  0x3d   : > { %533 = vmatprep.subr.bf16.mxu0 %v1258_v34  ;;  %v302_v34 = vpack.c.bf16 %v284_v32, %v282_v31 }
  0x3e   : > { %863 = vmatpush1.bf16.msra.mxu1 %v1302_v4 }
  0x3f   : > { %864 = vmatprep.subr.bf16.mxu1 %v1303_v5 }
  0x40   : > { %534 = vmatpush1.bf16.msra.mxu0 %v1260_v37  ;;  %v286_v37 = vld [vmem:[%s1524_s24 + $0xe8] sm:$0xff] }
  0x41   : > { %535 = vmatprep.subr.bf16.mxu0 %v1261_v38  ;;  %v288_v38 = vld [vmem:[%s1524_s24 + $0xf8] sm:$0xff] }
  0x42   : > { %865 = vmatpush1.bf16.msra.mxu1 %v1305_v8  ;;  %v304_v40 = vpack.c.bf16 %v288_v38, %v286_v37 }
  0x43   : > { %866 = vmatprep.subr.bf16.mxu1 %v1306_v11 }
  0x44   : > { %536 = vmatpush1.bf16.msra.mxu0 %v1263_v41  ;;  %v285_v41 = vld [vmem:[%s1524_s24 + $0xe0] sm:$0xff]  ;;  %s1324_s24 = scalar_lea.vmem %s1323_s11, 8192 }
  0x45   : > { %537 = vmatprep.subr.bf16.mxu0 %v1264_v43  ;;  %v303_v43 = vpack.c.bf16 %v287_v42, %v285_v41  ;;  %p1326_p2 = scmp.lt.s32.totalorder %s1324_s24, %s1318_s9 }
  0x46   : > { %867 = vmatpush1.bf16.msra.mxu1 %v1308_v14 }
  0x47   : > { %868 = vmatprep.subr.bf16.mxu1 %v1309_v15  ;;  %p1327_p3 = por %p1326_p2, %p1325_p1 }
  0x48   : > { %538 = vmatpush1.bf16.msra.mxu0 %v1266_v45  ;;  %v1314_v45 = vld [vmem:[%s1904_s3 + $0xe0] ss:$8 sps:$4 sm:$0xff]  }
  0x49   : > { %539 = vmatprep.subr.bf16.mxu0 %v1267_v47  ;;  %v1317_v47 = vld [vmem:[%s1904_s3 + $0xf0] ss:$8 sps:$4 sm:$0xff]   ;;  %p1328_p5 = pnand %p1327_p3, %p1321_p0 }
  0x4a   : > { %869 = vmatpush1.bf16.msra.mxu1 %v1311_v18 }
  0x4b   : > { %870 = vmatprep.subr.bf16.mxu1 %v1312_v44 }
  0x4c   : > { %540 = vmatpush1.bf16.msra.mxu0 %v1269_v49  ;;  %v1717_v49 = vshrl.u32 %v339_v48, 7 }
  0x4e   : > { %871 = vmatpush1.bf16.msra.mxu1 %v1314_v45  ;;  %v341_v50 = vsub.s32 0, %v1717_v49  ;;  %v345_v52 = vsub.s32 1, %v1717_v49 }
  0x4f   : > { %542 = vmatmul.mubr.bf16.vlgmr.msra.gmra.mrb[0].mxu0 %v289_v56  ;;  %872 = vmatprep.subr.bf16.mxu1 %v1315_v46 }
  0x50   : > { %551 = vmatprep.mubr.bf16.mxu0 %v292_v57  ;;  %v1726_v53 = vrot.slane %v337_v51, %v341_v50  ;;  %v1730_v55 = vrot.slane %v337_v51, %v345_v52 }
  0x52   : > { %873 = vmatpush1.bf16.msra.mxu1 %v1317_v47 }
  0x57   : > { %552 = vmatmul.mubr.bf16.gmra.mrb[4].mxu0 %v291_v2 }
  0x58   : > { %561 = vmatprep.mubr.bf16.mxu0 %v294_v3 }
  0x5f   : > { %562 = vmatmul.mubr.bf16.gmra.mrb[8].mxu0 %v293_v12 }
  0x60   : > { %571 = vmatprep.mubr.bf16.mxu0 %v296_v13 }
  0x67   : > { %572 = vmatmul.mubr.bf16.gmra.mrb[12].mxu0 %v295_v21 }
  0x68   : > { %581 = vmatprep.mubr.bf16.mxu0 %v298_v22 }
  0x6f   : > { %582 = vmatmul.mubr.bf16.gmra.mrb[16].mxu0 %v297_v27 }
  0x70   : > { %591 = vmatprep.mubr.bf16.mxu0 %v300_v28 }
  0x77   : > { %592 = vmatmul.mubr.bf16.gmra.mrb[20].mxu0 %v299_v33 }
  0x78   : > { %601 = vmatprep.mubr.bf16.mxu0 %v302_v34 }
  0x7f   : > { %602 = vmatmul.mubr.bf16.gmra.mrb[24].mxu0 %v301_v39 }
  0x80   : > { %611 = vmatprep.mubr.bf16.mxu0 %v304_v40 }
  0x87   : > { %612 = vmatmul.mubr.bf16.gmra.mrb[28].mxu0 %v303_v43 }
 0x122   : > { %v543_v54 = vpop.f32.mrb[0].mxu0 }
 0x123   : > { %v545_v56 = vpop.f32.mrb[1].mxu0  ;;  %v544_v58 = vadd.f32 %v543_v54, %v1726_v53 }
 0x124   : > { %v547_v57 = vpop.f32.mrb[2].mxu0  ;;  %v546_v61 = vadd.f32 %v545_v56, %v1730_v55 }
 0x125   : > { %v548_v59 = vadd.f32 %v547_v57, %v1726_v53  ;;  %v549_v60 = vpop.f32.mrb[3].mxu0 }
 0x126   : > { %v550_v62 = vadd.f32 %v549_v60, %v1730_v55 }
 0x127   : > { %v622_v63 = vpack.c.bf16 %v548_v59, %v544_v58 }
 0x128   : > { %v623_v0 = vpack.c.bf16 %v550_v62, %v546_v61 }
 0x12a   : > { %v553_v1 = vpop.f32.mrb[4].mxu0  ;;  %874 = vmatprep.mubr.bf16.mxu1 %v623_v0 }
 0x12b   : > { %v555_v2 = vpop.f32.mrb[5].mxu0  ;;  %875 = vmatmul.mubr.bf16.vlgmr.msra.gmra.mrb[0].mxu1 %v622_v63  ;;  %v554_v4 = vadd.f32 %v553_v1, %v1726_v53 }
 0x12c   : > { %v557_v3 = vpop.f32.mrb[6].mxu0  ;;  %v556_v7 = vadd.f32 %v555_v2, %v1730_v55 }
 0x12d   : > { %v558_v5 = vadd.f32 %v557_v3, %v1726_v53  ;;  %v559_v6 = vpop.f32.mrb[7].mxu0 }
 0x12e   : > { %v560_v8 = vadd.f32 %v559_v6, %v1730_v55 }
 0x12f   : > { %v624_v9 = vpack.c.bf16 %v558_v5, %v554_v4 }
 0x130   : > { %v625_v10 = vpack.c.bf16 %v560_v8, %v556_v7 }
 0x132   : > { %v563_v11 = vpop.f32.mrb[8].mxu0  ;;  %884 = vmatprep.mubr.bf16.mxu1 %v625_v10 }
 0x133   : > { %v565_v12 = vpop.f32.mrb[9].mxu0  ;;  %885 = vmatmul.mubr.bf16.gmra.mrb[4].mxu1 %v624_v9  ;;  %v564_v14 = vadd.f32 %v563_v11, %v1726_v53 }
 0x134   : > { %v567_v13 = vpop.f32.mrb[10].mxu0  ;;  %v566_v17 = vadd.f32 %v565_v12, %v1730_v55  ;;  %v670_v12 = vld [vmem:[%s1905_s4] sm:$0x3] }
 0x135   : > { %v568_v15 = vadd.f32 %v567_v13, %v1726_v53  ;;  %v569_v16 = vpop.f32.mrb[11].mxu0  ;;  %v1772_v13 = vrot.slane %v670_v12, %v341_v50 }
 0x136   : > { %v570_v18 = vadd.f32 %v569_v16, %v1730_v55 }
 0x137   : > { %v626_v19 = vpack.c.bf16 %v568_v15, %v564_v14 }
 0x138   : > { %v627_v20 = vpack.c.bf16 %v570_v18, %v566_v17 }
 0x13a   : > { %v573_v21 = vpop.f32.mrb[12].mxu0  ;;  %894 = vmatprep.mubr.bf16.mxu1 %v627_v20 }
 0x13b   : > { %v575_v22 = vpop.f32.mrb[13].mxu0  ;;  %895 = vmatmul.mubr.bf16.gmra.mrb[8].mxu1 %v626_v19  ;;  %v574_v24 = vadd.f32 %v573_v21, %v1726_v53 }
 0x13c   : > { %v577_v23 = vpop.f32.mrb[14].mxu0  ;;  %v576_v27 = vadd.f32 %v575_v22, %v1730_v55 }
 0x13d   : > { %v578_v25 = vadd.f32 %v577_v23, %v1726_v53  ;;  %v579_v26 = vpop.f32.mrb[15].mxu0 }
 0x13e   : > { %v580_v28 = vadd.f32 %v579_v26, %v1730_v55 }
 0x13f   : > { %v628_v29 = vpack.c.bf16 %v578_v25, %v574_v24 }
 0x140   : > { %v629_v30 = vpack.c.bf16 %v580_v28, %v576_v27 }
 0x142   : > { %v583_v31 = vpop.f32.mrb[16].mxu0  ;;  %904 = vmatprep.mubr.bf16.mxu1 %v629_v30 }
 0x143   : > { %v585_v32 = vpop.f32.mrb[17].mxu0  ;;  %905 = vmatmul.mubr.bf16.gmra.mrb[12].mxu1 %v628_v29  ;;  %v584_v34 = vadd.f32 %v583_v31, %v1726_v53 }
 0x144   : > { %v587_v33 = vpop.f32.mrb[18].mxu0  ;;  %v586_v37 = vadd.f32 %v585_v32, %v1730_v55 }
 0x145   : > { %v588_v35 = vadd.f32 %v587_v33, %v1726_v53  ;;  %v589_v36 = vpop.f32.mrb[19].mxu0 }
 0x146   : > { %v590_v38 = vadd.f32 %v589_v36, %v1730_v55 }
 0x147   : > { %v630_v39 = vpack.c.bf16 %v588_v35, %v584_v34 }
 0x148   : > { %v631_v40 = vpack.c.bf16 %v590_v38, %v586_v37 }
 0x14a   : > { %v593_v41 = vpop.f32.mrb[20].mxu0  ;;  %914 = vmatprep.mubr.bf16.mxu1 %v631_v40 }
 0x14b   : > { %v595_v42 = vpop.f32.mrb[21].mxu0  ;;  %915 = vmatmul.mubr.bf16.gmra.mrb[16].mxu1 %v630_v39  ;;  %v594_v44 = vadd.f32 %v593_v41, %v1726_v53 }
 0x14c   : > { %v597_v43 = vpop.f32.mrb[22].mxu0  ;;  %v596_v47 = vadd.f32 %v595_v42, %v1730_v55 }
 0x14d   : > { %v598_v45 = vadd.f32 %v597_v43, %v1726_v53  ;;  %v599_v46 = vpop.f32.mrb[23].mxu0 }
 0x14e   : > { %v600_v48 = vadd.f32 %v599_v46, %v1730_v55 }
 0x14f   : > { %v632_v51 = vpack.c.bf16 %v598_v45, %v594_v44 }
 0x150   : > { %v633_v54 = vpack.c.bf16 %v600_v48, %v596_v47 }
 0x152   : > { %v603_v56 = vpop.f32.mrb[24].mxu0  ;;  %924 = vmatprep.mubr.bf16.mxu1 %v633_v54 }
 0x153   : > { %v605_v57 = vpop.f32.mrb[25].mxu0  ;;  %925 = vmatmul.mubr.bf16.gmra.mrb[20].mxu1 %v632_v51  ;;  %v604_v59 = vadd.f32 %v603_v56, %v1726_v53 }
 0x154   : > { %v607_v58 = vpop.f32.mrb[26].mxu0  ;;  %v606_v62 = vadd.f32 %v605_v57, %v1730_v55 }
 0x155   : > { %v608_v60 = vadd.f32 %v607_v58, %v1726_v53  ;;  %v609_v61 = vpop.f32.mrb[27].mxu0 }
 0x156   : > { %v610_v63 = vadd.f32 %v609_v61, %v1730_v55 }
 0x157   : > { %v634_v0 = vpack.c.bf16 %v608_v60, %v604_v59 }
 0x158   : > { %v635_v1 = vpack.c.bf16 %v610_v63, %v606_v62 }
 0x15a   : > { %v613_v2 = vpop.f32.mrb[28].mxu0  ;;  %934 = vmatprep.mubr.bf16.mxu1 %v635_v1 }
 0x15b   : > { %v615_v3 = vpop.f32.mrb[29].mxu0  ;;  %935 = vmatmul.mubr.bf16.gmra.mrb[24].mxu1 %v634_v0  ;;  %v614_v5 = vadd.f32 %v613_v2, %v1726_v53 }
 0x15c   : > { %v617_v4 = vpop.f32.mrb[30].mxu0  ;;  %v616_v8 = vadd.f32 %v615_v3, %v1730_v55 }
 0x15d   : > { %v618_v6 = vadd.f32 %v617_v4, %v1726_v53  ;;  %v619_v7 = vpop.f32.mrb[31].mxu0  ;;  %v1776_v53 = vrot.slane %v670_v12, %v345_v52 }
 0x15e   : > { %v620_v9 = vadd.f32 %v619_v7, %v1730_v55 }
 0x15f   : > { %v636_v10 = vpack.c.bf16 %v618_v6, %v614_v5 }
 0x160   : > { %v637_v11 = vpack.c.bf16 %v620_v9, %v616_v8 }
 0x162   : > { %944 = vmatprep.mubr.bf16.mxu1 %v637_v11 }
 0x163   : > { %945 = vmatmul.mubr.bf16.gmra.mrb[28].mxu1 %v636_v10 }
 0x1fe   : > { %v876_v55 = vpop.f32.mrb[0].mxu1 }
 0x1ff   : > { %v877_v14 = vadd.f32 %v876_v55, %v1772_v13  ;;  %v878_v15 = vpop.f32.mrb[1].mxu1 }
 0x200   : > { %v879_v16 = vadd.f32 %v878_v15, %v1776_v53  ;;  %v880_v17 = vpop.f32.mrb[2].mxu1 }
 0x201   : > { %955 = vst [vmem:[%s1780_s17] sm:$0xff] %v877_v14  ;;  %v881_v49 = vadd.f32 %v880_v17, %v1772_v13  ;;  %v882_v50 = vpop.f32.mrb[3].mxu1 }
 0x202   : > { %956 = vst [vmem:[%s1780_s17 + $0x8] sm:$0xff] %v879_v16  ;;  %v883_v52 = vadd.f32 %v882_v50, %v1776_v53 }
 0x203   : > { %957 = vst [vmem:[%s1780_s17 + $0x10] sm:$0xff] %v881_v49 }
 0x204   : > { %958 = vst [vmem:[%s1780_s17 + $0x18] sm:$0xff] %v883_v52 }
 0x206   : > { %v886_v18 = vpop.f32.mrb[4].mxu1 }
 0x207   : > { %v887_v19 = vadd.f32 %v886_v18, %v1772_v13  ;;  %v888_v20 = vpop.f32.mrb[5].mxu1 }
 0x208   : > { %v889_v21 = vadd.f32 %v888_v20, %v1776_v53  ;;  %v890_v22 = vpop.f32.mrb[6].mxu1 }
 0x209   : > { %959 = vst [vmem:[%s1780_s17 + $0x20] sm:$0xff] %v887_v19  ;;  %v891_v23 = vadd.f32 %v890_v22, %v1772_v13  ;;  %v892_v24 = vpop.f32.mrb[7].mxu1 }
 0x20a   : > { %960 = vst [vmem:[%s1780_s17 + $0x28] sm:$0xff] %v889_v21  ;;  %v893_v25 = vadd.f32 %v892_v24, %v1776_v53 }
 0x20b   : > { %961 = vst [vmem:[%s1780_s17 + $0x30] sm:$0xff] %v891_v23 }
 0x20c   : > { %962 = vst [vmem:[%s1780_s17 + $0x38] sm:$0xff] %v893_v25 }
 0x20e   : > { %v896_v26 = vpop.f32.mrb[8].mxu1 }
 0x20f   : > { %v897_v27 = vadd.f32 %v896_v26, %v1772_v13  ;;  %v898_v28 = vpop.f32.mrb[9].mxu1 }
 0x210   : > { %v899_v29 = vadd.f32 %v898_v28, %v1776_v53  ;;  %v900_v30 = vpop.f32.mrb[10].mxu1 }
 0x211   : > { %963 = vst [vmem:[%s1780_s17 + $0x40] sm:$0xff] %v897_v27  ;;  %v901_v31 = vadd.f32 %v900_v30, %v1772_v13  ;;  %v902_v32 = vpop.f32.mrb[11].mxu1 }
 0x212   : > { %964 = vst [vmem:[%s1780_s17 + $0x48] sm:$0xff] %v899_v29  ;;  %v903_v33 = vadd.f32 %v902_v32, %v1776_v53 }
 0x213   : > { %965 = vst [vmem:[%s1780_s17 + $0x50] sm:$0xff] %v901_v31 }
 0x214   : > { %966 = vst [vmem:[%s1780_s17 + $0x58] sm:$0xff] %v903_v33 }
 0x216   : > { %v906_v34 = vpop.f32.mrb[12].mxu1 }
 0x217   : > { %v907_v35 = vadd.f32 %v906_v34, %v1772_v13  ;;  %v908_v36 = vpop.f32.mrb[13].mxu1 }
 0x218   : > { %v909_v37 = vadd.f32 %v908_v36, %v1776_v53  ;;  %v910_v38 = vpop.f32.mrb[14].mxu1 }
 0x219   : > { %967 = vst [vmem:[%s1780_s17 + $0x60] sm:$0xff] %v907_v35  ;;  %v911_v39 = vadd.f32 %v910_v38, %v1772_v13  ;;  %v912_v40 = vpop.f32.mrb[15].mxu1 }
 0x21a   : > { %968 = vst [vmem:[%s1780_s17 + $0x68] sm:$0xff] %v909_v37  ;;  %v913_v41 = vadd.f32 %v912_v40, %v1776_v53 }
 0x21b   : > { %969 = vst [vmem:[%s1780_s17 + $0x70] sm:$0xff] %v911_v39 }
 0x21c   : > { %970 = vst [vmem:[%s1780_s17 + $0x78] sm:$0xff] %v913_v41 }
 0x21e   : > { %v916_v42 = vpop.f32.mrb[16].mxu1 }
 0x21f   : > { %v917_v43 = vadd.f32 %v916_v42, %v1772_v13  ;;  %v918_v44 = vpop.f32.mrb[17].mxu1 }
 0x220   : > { %v919_v45 = vadd.f32 %v918_v44, %v1776_v53  ;;  %v920_v46 = vpop.f32.mrb[18].mxu1 }
 0x221   : > { %971 = vst [vmem:[%s1780_s17 + $0x80] sm:$0xff] %v917_v43  ;;  %v921_v47 = vadd.f32 %v920_v46, %v1772_v13  ;;  %v922_v48 = vpop.f32.mrb[19].mxu1 }
 0x222   : > { %972 = vst [vmem:[%s1780_s17 + $0x88] sm:$0xff] %v919_v45  ;;  %v923_v51 = vadd.f32 %v922_v48, %v1776_v53 }
 0x223   : > { %973 = vst [vmem:[%s1780_s17 + $0x90] sm:$0xff] %v921_v47 }
 0x224   : > { %974 = vst [vmem:[%s1780_s17 + $0x98] sm:$0xff] %v923_v51 }
 0x226   : > { %v926_v54 = vpop.f32.mrb[20].mxu1 }
 0x227   : > { %v927_v56 = vadd.f32 %v926_v54, %v1772_v13  ;;  %v928_v57 = vpop.f32.mrb[21].mxu1 }
 0x228   : > { %v929_v58 = vadd.f32 %v928_v57, %v1776_v53  ;;  %v930_v59 = vpop.f32.mrb[22].mxu1 }
 0x229   : > { %975 = vst [vmem:[%s1780_s17 + $0xa0] sm:$0xff] %v927_v56  ;;  %v931_v60 = vadd.f32 %v930_v59, %v1772_v13  ;;  %v932_v61 = vpop.f32.mrb[23].mxu1 }
 0x22a   : > { %976 = vst [vmem:[%s1780_s17 + $0xa8] sm:$0xff] %v929_v58  ;;  %v933_v62 = vadd.f32 %v932_v61, %v1776_v53 }
 0x22b   : > { %977 = vst [vmem:[%s1780_s17 + $0xb0] sm:$0xff] %v931_v60 }
 0x22c   : > { %978 = vst [vmem:[%s1780_s17 + $0xb8] sm:$0xff] %v933_v62 }
 0x22e   : > { %v936_v63 = vpop.f32.mrb[24].mxu1 }
 0x22f   : > { %v937_v0 = vadd.f32 %v936_v63, %v1772_v13  ;;  %v938_v1 = vpop.f32.mrb[25].mxu1 }
 0x230   : > { %v939_v2 = vadd.f32 %v938_v1, %v1776_v53  ;;  %v940_v3 = vpop.f32.mrb[26].mxu1 }
 0x231   : > { %979 = vst [vmem:[%s1780_s17 + $0xc0] sm:$0xff] %v937_v0  ;;  %v941_v4 = vadd.f32 %v940_v3, %v1772_v13  ;;  %v942_v5 = vpop.f32.mrb[27].mxu1 }
 0x232   : > { %980 = vst [vmem:[%s1780_s17 + $0xc8] sm:$0xff] %v939_v2  ;;  %v943_v6 = vadd.f32 %v942_v5, %v1776_v53 }
 0x233   : > { %981 = vst [vmem:[%s1780_s17 + $0xd0] sm:$0xff] %v941_v4 }
 0x234   : > { %982 = vst [vmem:[%s1780_s17 + $0xd8] sm:$0xff] %v943_v6 }
 0x236   : > { %v946_v7 = vpop.f32.mrb[28].mxu1 }
 0x237   : > { %v947_v8 = vadd.f32 %v946_v7, %v1772_v13  ;;  %v948_v9 = vpop.f32.mrb[29].mxu1 }
 0x238   : > { %v949_v10 = vadd.f32 %v948_v9, %v1776_v53  ;;  %v950_v11 = vpop.f32.mrb[30].mxu1 }
 0x239   : > { %983 = vst [vmem:[%s1780_s17 + $0xe0] sm:$0xff] %v947_v8  ;;  %v951_v12 = vadd.f32 %v950_v11, %v1772_v13  ;;  %v952_v55 = vpop.f32.mrb[31].mxu1 }
 0x23a   : > { %984 = vst [vmem:[%s1780_s17 + $0xe8] sm:$0xff] %v949_v10  ;;  %v953_v14 = vadd.f32 %v952_v55, %v1776_v53 }
 0x23b   : > { %985 = vst [vmem:[%s1780_s17 + $0xf0] sm:$0xff] %v951_v12 }
 0x23c   : > { %986 = vst [vmem:[%s1780_s17 + $0xf8] sm:$0xff] %v953_v14 }
 0x23d   : > { %1331 = shalt.err (!%p1328_p5)
}
 0x23e   : > { %s1332_s12 = scalar_lea.hbm %s1845_s8, 4096  ;;  %s1336_s15 = scalar_lea.hbm %s1906_s5, 8192 }
 0x23f   : > { %p1333_p6 = scmp.ne.s32.totalorder %s1845_s8, %s1332_s12  ;;  %p1337_p10 = scmp.lt.u32.totalorder %s1845_s8, %s1906_s5 }
 0x240   : > { %p1338_p11 = scmp.lt.u32.totalorder %s1336_s15, %s1332_s12  ;;  %p1340_p13 = scmp.lt.u32.totalorder %s1332_s12, %s1845_s8 }
 0x241   : > { %p1334_p7 = pnand %p1333_p6, %p1471_p4 }
 0x242   : > { %p1339_p12 = por %p1338_p11, %p1337_p10 }
 0x243   : > { %p1335_p9 = pneg %p1334_p7 }
 0x244   : > { %p1341_p0 = por %p1340_p13, %p1339_p12 }
 0x246   : > { %p1342_p1 = pnand %p1341_p0, %p1335_p9 }
 0x248   : > { %1345 = shalt.err (!%p1342_p1)
}
 0x249   : > { %s1399_s25 = smov 256   ;;  %s1400_s29 = smov 16  }
 0x24a   : > { %1165 = dma.vmem_to_hbm [thread:$0]  (%p1471_p4), %s1847_s27, 4096, %s1845_s8, %s1855_s21, %s1399_s25, %s1399_s25, %s1400_s29  }
 0x24b PF: > { %p1171_p2 = scmp.ge.s32.totalorder %s1396_s23, 2  ;;  %s1019_s7 = sand.u32 1, %s1376_s18  }
 0x24c   : > { %s1020_s9 = scalar_lea.sflag [#allocation3], %s1019_s7 }
 0x24d   : > { %p1168_p3 = pnand %p1171_p2, %p1478_p8 }
 0x24f   : > { %1371 = dma.done.wait (!%p1168_p3), %s1020_s9, 4096  }
 0x250   : > { %1373 = vsyncadd (!%p1168_p3), %s1020_s9, 4294963200  ;;  %s18_s23 = sadd.s32 1, %s1396_s23   ;;  %s1909_s18 = smov %s1380_s19 }
 0x251   : > { %p15_p5 = scmp.ge.s32.totalorder %s18_s23, 4   ;;  %s1910_s19 = smov %s1384_s20 }
 0x252   : > { %s1911_s20 = smov %s1484_s6  ;;  %s1912_s21 = smov %s1392_s22 }
 0x253   : > { %s1913_s22 = smov %s1915_s26  ;;  %17 = sbr.rel (!%p15_p5) target bundleno = 4 (0x4), region = 75 }
 0x25a   :  { %1025 = vsyncpa [#allocation3], 1 }
 0x25b   :  { %1027 = vsyncpa [#allocation3 + $0x1], 1 }

// kernel: monai_decoder_only_forward.15
= control target key start
LH: loop header
LB: loop body
LE: loop exit
PB: predicated region body
PF: predicated region fallthrough
CT: control target
= control target key end

     0   :  { %s2834_s15 = smov 0   ;;  %s2836_s16 = smov 0   ;;  %s3435_s0 = inlined_call_operand.vmem [shape: bf16[2,128,1024], index: 0, kind: input, shape index: {}]   ;;  %s3436_s1 = inlined_call_operand.vmem [shape: f32[2,128,256], index: 1, kind: input, shape index: {}]   ;;  %s3437_s2 = inlined_call_operand.vmem [shape: bf16[1024,256], index: 2, kind: input, shape index: {}]   ;;  %s3438_s3 = inlined_call_operand.vmem [shape: f32[1,256], index: 3, kind: input, shape index: {}]   ;;  %s3439_s4 = inlined_call_operand.vmem [shape: f32[2,128,256], index: 4, kind: output, shape index: {}]  }
   0x1   :  { %s2838_s17 = smov 0  }
   0x2 LB: > { %s33_s18 = sadd.s32 1, %s2803_s16  ;;  %p2237_p0 = scmp.ge.s32.totalorder %s2807_s17, 1  ;;  %s2807_s17 = sphi %s2838_s17, %s14_s17   ;;  %s2803_s16 = sphi %s2836_s16, %s3441_s16   ;;  %s2799_s15 = sphi %s2834_s15, %s3440_s15  }
   0x3   : > { %p35_p1 = scmp.ge.s32.totalorder %s33_s18, 2  ;;  %p239_p2 = scmp.lt.s32.totalorder %s2807_s17, 3 }
   0x5   : > { %s3443_s18 = smov (%p35_p1, %s33_s18), 0  ;;  %p240_p3 = pnand %p2237_p0, %p239_p2 }
   0x6   : > { %v2593_v0 = vld [vmem:[%s3437_s2 + $0x4] ss:$8 sps:$4 sm:$0xff] (!%p240_p3)   ;;  %v2597_v2 = vld [vmem:[%s3437_s2] ss:$8 sps:$4 sm:$0xff] (!%p240_p3)   ;;  %v2599_v4 = vld [vmem:[%s3437_s2 + $0x14] ss:$8 sps:$4 sm:$0xff] (!%p240_p3)  }
   0x7   : > { %243 = sbr.rel (%p240_p3) target bundleno = 413 (0x19d), region = 36  ;;  %v2595_v1 = vld [vmem:[%s3437_s2 + $0x204] ss:$8 sps:$4 sm:$0xff] (!%p240_p3)   ;;  %1520 = vmatprep.subr.bf16.mxu1 (!%p240_p3), %v2593_v0  ;;  %v2598_v3 = vld [vmem:[%s3437_s2 + $0x200] ss:$8 sps:$4 sm:$0xff] (!%p240_p3)   ;;  %p303_p4 = scmp.lt.s32.totalorder (!%p240_p3), %s2799_s15, 1 }
   0x8   : > { %1746 = vmatprep.subr.bf16.mxu0 (!%p240_p3), %v2595_v1  ;;  %1521 = vmatpush1.bf16.msra.mxu1 (!%p240_p3), %v2597_v2  ;;  %v2601_v5 = vld [vmem:[%s3437_s2 + $0x214] ss:$8 sps:$4 sm:$0xff] (!%p240_p3)   ;;  %v2603_v6 = vld [vmem:[%s3437_s2 + $0x10] ss:$8 sps:$4 sm:$0xff] (!%p240_p3)   ;;  %v2605_v8 = vld [vmem:[%s3437_s2 + $0x24] ss:$8 sps:$4 sm:$0xff] (!%p240_p3)  }
   0x9   : > { %1747 = vmatpush1.bf16.msra.mxu0 (!%p240_p3), %v2598_v3  ;;  %1522 = vmatprep.subr.bf16.mxu1 (!%p240_p3), %v2599_v4  ;;  %v2604_v7 = vld [vmem:[%s3437_s2 + $0x210] ss:$8 sps:$4 sm:$0xff] (!%p240_p3)   ;;  %v2607_v9 = vld [vmem:[%s3437_s2 + $0x224] ss:$8 sps:$4 sm:$0xff] (!%p240_p3)   ;;  %v2609_v10 = vld [vmem:[%s3437_s2 + $0x20] ss:$8 sps:$4 sm:$0xff] (!%p240_p3)  }
   0xa   : > { %1748 = vmatprep.subr.bf16.mxu0 (!%p240_p3), %v2601_v5  ;;  %v2610_v11 = vld [vmem:[%s3437_s2 + $0x220] ss:$8 sps:$4 sm:$0xff] (!%p240_p3)   ;;  %v2611_v12 = vld [vmem:[%s3437_s2 + $0x34] ss:$8 sps:$4 sm:$0xff] (!%p240_p3)   ;;  %v2615_v14 = vld [vmem:[%s3437_s2 + $0x30] ss:$8 sps:$4 sm:$0xff] (!%p240_p3)  }
   0xb   : > { %v2613_v13 = vld [vmem:[%s3437_s2 + $0x234] ss:$8 sps:$4 sm:$0xff] (!%p240_p3)   ;;  %v2616_v15 = vld [vmem:[%s3437_s2 + $0x230] ss:$8 sps:$4 sm:$0xff] (!%p240_p3)   ;;  %v2617_v16 = vld [vmem:[%s3437_s2 + $0x44] ss:$8 sps:$4 sm:$0xff] (!%p240_p3)  }
   0xc   : > { %1523 = vmatpush1.bf16.msra.mxu1 (!%p240_p3), %v2603_v6  ;;  %v2619_v17 = vld [vmem:[%s3437_s2 + $0x244] ss:$8 sps:$4 sm:$0xff] (!%p240_p3)   ;;  %v2621_v18 = vld [vmem:[%s3437_s2 + $0x40] ss:$8 sps:$4 sm:$0xff] (!%p240_p3)   ;;  %v2623_v20 = vld [vmem:[%s3437_s2 + $0x54] ss:$8 sps:$4 sm:$0xff] (!%p240_p3)  }
   0xd   : > { %1749 = vmatpush1.bf16.msra.mxu0 (!%p240_p3), %v2604_v7  ;;  %1524 = vmatprep.subr.bf16.mxu1 (!%p240_p3), %v2605_v8  ;;  %v2622_v19 = vld [vmem:[%s3437_s2 + $0x240] ss:$8 sps:$4 sm:$0xff] (!%p240_p3)   ;;  %v2625_v21 = vld [vmem:[%s3437_s2 + $0x254] ss:$8 sps:$4 sm:$0xff] (!%p240_p3)   ;;  %v2627_v22 = vld [vmem:[%s3437_s2 + $0x50] ss:$8 sps:$4 sm:$0xff] (!%p240_p3)  }
   0xe   : > { %1750 = vmatprep.subr.bf16.mxu0 %v2607_v9  ;;  %v2628_v23 = vld [vmem:[%s3437_s2 + $0x250] ss:$8 sps:$4 sm:$0xff]   ;;  %v2629_v24 = vld [vmem:[%s3437_s2 + $0x64] ss:$8 sps:$4 sm:$0xff]   ;;  %v2633_v26 = vld [vmem:[%s3437_s2 + $0x60] ss:$8 sps:$4 sm:$0xff]  }
   0xf   : > { %v2631_v25 = vld [vmem:[%s3437_s2 + $0x264] ss:$8 sps:$4 sm:$0xff]   ;;  %v2634_v27 = vld [vmem:[%s3437_s2 + $0x260] ss:$8 sps:$4 sm:$0xff]   ;;  %v2635_v28 = vld [vmem:[%s3437_s2 + $0x74] ss:$8 sps:$4 sm:$0xff]  }
  0x10   : > { %1525 = vmatpush1.bf16.msra.mxu1 %v2609_v10  ;;  %v2637_v29 = vld [vmem:[%s3437_s2 + $0x274] ss:$8 sps:$4 sm:$0xff]   ;;  %v2639_v30 = vld [vmem:[%s3437_s2 + $0x70] ss:$8 sps:$4 sm:$0xff]   ;;  %v2641_v32 = vld [vmem:[%s3437_s2 + $0x84] ss:$8 sps:$4 sm:$0xff]  }
  0x11   : > { %1751 = vmatpush1.bf16.msra.mxu0 %v2610_v11  ;;  %1526 = vmatprep.subr.bf16.mxu1 %v2611_v12  ;;  %v2640_v31 = vld [vmem:[%s3437_s2 + $0x270] ss:$8 sps:$4 sm:$0xff]   ;;  %v2643_v33 = vld [vmem:[%s3437_s2 + $0x284] ss:$8 sps:$4 sm:$0xff]   ;;  %v2645_v34 = vld [vmem:[%s3437_s2 + $0x80] ss:$8 sps:$4 sm:$0xff]  }
  0x12   : > { %1752 = vmatprep.subr.bf16.mxu0 %v2613_v13  ;;  %v2646_v35 = vld [vmem:[%s3437_s2 + $0x280] ss:$8 sps:$4 sm:$0xff]   ;;  %v2647_v36 = vld [vmem:[%s3437_s2 + $0x94] ss:$8 sps:$4 sm:$0xff]   ;;  %s3445_s15 = smov (!%p303_p4, %s2799_s15), 1 }
  0x13   : > { %v2649_v37 = vld [vmem:[%s3437_s2 + $0x294] ss:$8 sps:$4 sm:$0xff]   ;;  %v2651_v38 = vld [vmem:[%s3437_s2 + $0x90] ss:$8 sps:$4 sm:$0xff]   ;;  %v2653_v40 = vld [vmem:[%s3437_s2 + $0xa4] ss:$8 sps:$4 sm:$0xff]  }
  0x14   : > { %1527 = vmatpush1.bf16.msra.mxu1 %v2615_v14  ;;  %v2652_v39 = vld [vmem:[%s3437_s2 + $0x290] ss:$8 sps:$4 sm:$0xff]   ;;  %s2438_s9 = sshll.u32 %s3445_s15, 9  ;;  %v2655_v41 = vld [vmem:[%s3437_s2 + $0x2a4] ss:$8 sps:$4 sm:$0xff]  }
  0x15   : > { %1753 = vmatpush1.bf16.msra.mxu0 %v2616_v15  ;;  %1528 = vmatprep.subr.bf16.mxu1 %v2617_v16  ;;  %v2657_v42 = vld [vmem:[%s3437_s2 + $0xa0] ss:$8 sps:$4 sm:$0xff]   ;;  %s2994_s22 = scalar_lea.vmem %s3435_s0, %s2438_s9  ;;  %v2659_v44 = vld [vmem:[%s3437_s2 + $0xb4] ss:$8 sps:$4 sm:$0xff]   ;;  %v2663_v46 = vld [vmem:[%s3437_s2 + $0xb0] ss:$8 sps:$4 sm:$0xff]  }
  0x16   : > { %1754 = vmatprep.subr.bf16.mxu0 %v2619_v17  ;;  %v2658_v43 = vld [vmem:[%s3437_s2 + $0x2a0] ss:$8 sps:$4 sm:$0xff]   ;;  %v2661_v45 = vld [vmem:[%s3437_s2 + $0x2b4] ss:$8 sps:$4 sm:$0xff]   ;;  %v2664_v47 = vld [vmem:[%s3437_s2 + $0x2b0] ss:$8 sps:$4 sm:$0xff]  }
  0x17   : > { %v356_v48 = vld [vmem:[%s2994_s22] sm:$0xff]  ;;  %v358_v50 = vld [vmem:[%s2994_s22 + $0x10] sm:$0xff] }
  0x18   : > { %1529 = vmatpush1.bf16.msra.mxu1 %v2621_v18  ;;  %v360_v49 = vld [vmem:[%s2994_s22 + $0x20] sm:$0xff]  ;;  %v362_v51 = vld [vmem:[%s2994_s22 + $0x30] sm:$0xff] }
  0x19   : > { %1755 = vmatpush1.bf16.msra.mxu0 %v2622_v19  ;;  %1530 = vmatprep.subr.bf16.mxu1 %v2623_v20  ;;  %v2665_v52 = vld [vmem:[%s3437_s2 + $0xc4] ss:$8 sps:$4 sm:$0xff]   ;;  %v2245_v53 = vcombine.high %v356_v48, %v360_v49  ;;  %v2249_v55 = vcombine.high %v358_v50, %v362_v51  ;;  %v2669_v56 = vld [vmem:[%s3437_s2 + $0xc0] ss:$8 sps:$4 sm:$0xff]   ;;  %v2671_v58 = vld [vmem:[%s3437_s2 + $0xd4] ss:$8 sps:$4 sm:$0xff]   ;;  %v2244_v11 = vcombine.low %v356_v48, %v360_v49 }
  0x1a   : > { %1756 = vmatprep.subr.bf16.mxu0 %v2625_v21  ;;  %v2667_v54 = vld [vmem:[%s3437_s2 + $0x2c4] ss:$8 sps:$4 sm:$0xff]   ;;  %v2670_v57 = vld [vmem:[%s3437_s2 + $0x2c0] ss:$8 sps:$4 sm:$0xff]   ;;  %v2673_v59 = vld [vmem:[%s3437_s2 + $0x2d4] ss:$8 sps:$4 sm:$0xff]   ;;  %v2248_v12 = vcombine.low %v358_v50, %v362_v51 }
  0x1b   : > { %1552 = vmatprep.mubr.bf16.mxu1 %v2245_v53  ;;  %1778 = vmatprep.mubr.bf16.mxu0 %v2249_v55  ;;  %v2675_v60 = vld [vmem:[%s3437_s2 + $0xd0] ss:$8 sps:$4 sm:$0xff]   ;;  %v2677_v62 = vld [vmem:[%s3437_s2 + $0xe4] ss:$8 sps:$4 sm:$0xff]   ;;  %v2681_v0 = vld [vmem:[%s3437_s2 + $0xe0] ss:$8 sps:$4 sm:$0xff]  }
  0x1c   : > { %1531 = vmatpush1.bf16.msra.mxu1 %v2627_v22  ;;  %v2676_v61 = vld [vmem:[%s3437_s2 + $0x2d0] ss:$8 sps:$4 sm:$0xff]   ;;  %v2679_v63 = vld [vmem:[%s3437_s2 + $0x2e4] ss:$8 sps:$4 sm:$0xff]   ;;  %v2682_v1 = vld [vmem:[%s3437_s2 + $0x2e0] ss:$8 sps:$4 sm:$0xff]  }
  0x1d   : > { %1757 = vmatpush1.bf16.msra.mxu0 %v2628_v23  ;;  %1532 = vmatprep.subr.bf16.mxu1 %v2629_v24  ;;  %v2683_v2 = vld [vmem:[%s3437_s2 + $0xf4] ss:$8 sps:$4 sm:$0xff]   ;;  %v2687_v4 = vld [vmem:[%s3437_s2 + $0xf0] ss:$8 sps:$4 sm:$0xff]   ;;  %v2691_v6 = vld [vmem:[%s3437_s2 + $0x104] ss:$8 sps:$4 sm:$0xff]  }
  0x1e   : > { %1758 = vmatprep.subr.bf16.mxu0 %v2631_v25  ;;  %v2685_v3 = vld [vmem:[%s3437_s2 + $0x2f4] ss:$8 sps:$4 sm:$0xff]   ;;  %v2688_v5 = vld [vmem:[%s3437_s2 + $0x2f0] ss:$8 sps:$4 sm:$0xff]   ;;  %v2694_v7 = vld [vmem:[%s3437_s2 + $0x304] ss:$8 sps:$4 sm:$0xff]  }
  0x1f   : > { %v2689_v8 = vld [vmem:[%s3437_s2 + $0x100] ss:$8 sps:$4 sm:$0xff]   ;;  %v366_v14 = vld [vmem:[%s2994_s22 + $0x50] sm:$0xff]  ;;  %v2703_v22 = vld [vmem:[%s3437_s2 + $0x124] ss:$8 sps:$4 sm:$0xff]  }
  0x20   : > { %1533 = vmatpush1.bf16.msra.mxu1 %v2633_v26  ;;  %v2692_v9 = vld [vmem:[%s3437_s2 + $0x300] ss:$8 sps:$4 sm:$0xff]   ;;  %v370_v15 = vld [vmem:[%s2994_s22 + $0x70] sm:$0xff]  ;;  %v2706_v23 = vld [vmem:[%s3437_s2 + $0x324] ss:$8 sps:$4 sm:$0xff]  }
  0x21   : > { %1759 = vmatpush1.bf16.msra.mxu0 %v2634_v27  ;;  %1534 = vmatprep.subr.bf16.mxu1 %v2635_v28  ;;  %v364_v10 = vld [vmem:[%s2994_s22 + $0x40] sm:$0xff]  ;;  %v2697_v16 = vld [vmem:[%s3437_s2 + $0x114] ss:$8 sps:$4 sm:$0xff]   ;;  %v2257_v19 = vcombine.high %v366_v14, %v370_v15  ;;  %v2695_v20 = vld [vmem:[%s3437_s2 + $0x110] ss:$8 sps:$4 sm:$0xff]  }
  0x22   : > { %1760 = vmatprep.subr.bf16.mxu0 %v2637_v29  ;;  %v368_v13 = vld [vmem:[%s2994_s22 + $0x60] sm:$0xff]  ;;  %v2700_v17 = vld [vmem:[%s3437_s2 + $0x314] ss:$8 sps:$4 sm:$0xff]   ;;  %v2698_v21 = vld [vmem:[%s3437_s2 + $0x310] ss:$8 sps:$4 sm:$0xff]   ;;  %v2256_v29 = vcombine.low %v366_v14, %v370_v15 }
  0x23   : > { %v2253_v18 = vcombine.high %v364_v10, %v368_v13  ;;  %v2701_v24 = vld [vmem:[%s3437_s2 + $0x120] ss:$8 sps:$4 sm:$0xff]   ;;  %v2252_v28 = vcombine.low %v364_v10, %v368_v13  ;;  %v2721_v48 = vld [vmem:[%s3437_s2 + $0x154] ss:$8 sps:$4 sm:$0xff]   ;;  %v2722_v53 = vld [vmem:[%s3437_s2 + $0x350] ss:$8 sps:$4 sm:$0xff]  }
  0x24   : > { %1535 = vmatpush1.bf16.msra.mxu1 %v2639_v30  ;;  %v2704_v25 = vld [vmem:[%s3437_s2 + $0x320] ss:$8 sps:$4 sm:$0xff]   ;;  %v374_v30 = vld [vmem:[%s2994_s22 + $0x90] sm:$0xff]  ;;  %v2730_v55 = vld [vmem:[%s3437_s2 + $0x364] ss:$8 sps:$4 sm:$0xff]  }
  0x25   : > { %1761 = vmatpush1.bf16.msra.mxu0 %v2640_v31  ;;  %1536 = vmatprep.subr.bf16.mxu1 %v2641_v32  ;;  %v372_v26 = vld [vmem:[%s2994_s22 + $0x80] sm:$0xff]  ;;  %v378_v31 = vld [vmem:[%s2994_s22 + $0xb0] sm:$0xff] }
  0x26   : > { %1762 = vmatprep.subr.bf16.mxu0 %v2643_v33  ;;  %v376_v27 = vld [vmem:[%s2994_s22 + $0xa0] sm:$0xff]  ;;  %v2709_v32 = vld [vmem:[%s3437_s2 + $0x134] ss:$8 sps:$4 sm:$0xff]  }
  0x27   : > { %v2712_v33 = vld [vmem:[%s3437_s2 + $0x334] ss:$8 sps:$4 sm:$0xff]   ;;  %v2737_v14 = vld [vmem:[%s3437_s2 + $0x180] ss:$8 sps:$4 sm:$0xff]  }
  0x28   : > { %1537 = vmatpush1.bf16.msra.mxu1 %v2645_v34  ;;  %v2261_v34 = vcombine.high %v372_v26, %v376_v27  ;;  %v2724_v49 = vld [vmem:[%s3437_s2 + $0x354] ss:$8 sps:$4 sm:$0xff]   ;;  %v2740_v15 = vld [vmem:[%s3437_s2 + $0x380] ss:$8 sps:$4 sm:$0xff]  }
  0x29   : > { %1763 = vmatpush1.bf16.msra.mxu0 %v2646_v35  ;;  %1538 = vmatprep.subr.bf16.mxu1 %v2647_v36  ;;  %v2265_v35 = vcombine.high %v374_v30, %v378_v31  ;;  %v2707_v36 = vld [vmem:[%s3437_s2 + $0x130] ss:$8 sps:$4 sm:$0xff]  }
  0x2a   : > { %1764 = vmatprep.subr.bf16.mxu0 %v2649_v37  ;;  %v2710_v37 = vld [vmem:[%s3437_s2 + $0x330] ss:$8 sps:$4 sm:$0xff]  }
  0x2b   : > { %v402_v13 = vld [vmem:[%s2994_s22 + $0x170] sm:$0xff] }
  0x2c   : > { %1539 = vmatpush1.bf16.msra.mxu1 %v2651_v38  ;;  %v2715_v38 = vld [vmem:[%s3437_s2 + $0x144] ss:$8 sps:$4 sm:$0xff]  }
  0x2d   : > { %1765 = vmatpush1.bf16.msra.mxu0 %v2652_v39  ;;  %1540 = vmatprep.subr.bf16.mxu1 %v2653_v40  ;;  %v2718_v39 = vld [vmem:[%s3437_s2 + $0x344] ss:$8 sps:$4 sm:$0xff]   ;;  %v2713_v40 = vld [vmem:[%s3437_s2 + $0x140] ss:$8 sps:$4 sm:$0xff]  }
  0x2e   : > { %1766 = vmatprep.subr.bf16.mxu0 %v2655_v41  ;;  %v2716_v41 = vld [vmem:[%s3437_s2 + $0x340] ss:$8 sps:$4 sm:$0xff]  }
  0x30   : > { %1541 = vmatpush1.bf16.msra.mxu1 %v2657_v42  ;;  %v380_v42 = vld [vmem:[%s2994_s22 + $0xc0] sm:$0xff] }
  0x31   : > { %1767 = vmatpush1.bf16.msra.mxu0 %v2658_v43  ;;  %1542 = vmatprep.subr.bf16.mxu1 %v2659_v44  ;;  %v384_v43 = vld [vmem:[%s2994_s22 + $0xe0] sm:$0xff]  ;;  %v2260_v44 = vcombine.low %v372_v26, %v376_v27 }
  0x32   : > { %1768 = vmatprep.subr.bf16.mxu0 %v2661_v45  ;;  %v2264_v45 = vcombine.low %v374_v30, %v378_v31  ;;  %v2269_v50 = vcombine.high %v380_v42, %v384_v43  ;;  %v408_v27 = vld [vmem:[%s2994_s22 + $0x1a0] sm:$0xff] }
  0x33   : > { %v2749_v30 = vld [vmem:[%s3437_s2 + $0x1a0] ss:$8 sps:$4 sm:$0xff]  }
  0x34   : > { %1543 = vmatpush1.bf16.msra.mxu1 %v2663_v46  ;;  %v382_v46 = vld [vmem:[%s2994_s22 + $0xd0] sm:$0xff]  ;;  %v2752_v31 = vld [vmem:[%s3437_s2 + $0x3a0] ss:$8 sps:$4 sm:$0xff]  }
  0x35   : > { %1769 = vmatpush1.bf16.msra.mxu0 %v2664_v47  ;;  %1544 = vmatprep.subr.bf16.mxu1 %v2665_v52  ;;  %v386_v47 = vld [vmem:[%s2994_s22 + $0xf0] sm:$0xff] }
  0x36   : > { %1770 = vmatprep.subr.bf16.mxu0 %v2667_v54  ;;  %v2273_v51 = vcombine.high %v382_v46, %v386_v47  ;;  %v2719_v52 = vld [vmem:[%s3437_s2 + $0x150] ss:$8 sps:$4 sm:$0xff]   ;;  %v2727_v54 = vld [vmem:[%s3437_s2 + $0x164] ss:$8 sps:$4 sm:$0xff]  }
  0x38   : > { %1545 = vmatpush1.bf16.msra.mxu1 %v2669_v56  ;;  %v2725_v56 = vld [vmem:[%s3437_s2 + $0x160] ss:$8 sps:$4 sm:$0xff]  }
  0x39   : > { %1771 = vmatpush1.bf16.msra.mxu0 %v2670_v57  ;;  %1546 = vmatprep.subr.bf16.mxu1 %v2671_v58  ;;  %v388_v57 = vld [vmem:[%s2994_s22 + $0x100] sm:$0xff] }
  0x3a   : > { %1772 = vmatprep.subr.bf16.mxu0 %v2673_v59  ;;  %v392_v58 = vld [vmem:[%s2994_s22 + $0x120] sm:$0xff]  ;;  %v2268_v59 = vcombine.low %v380_v42, %v384_v43 }
  0x3b   : > { %v2276_v10 = vcombine.low %v388_v57, %v392_v58  ;;  %v416_v43 = vld [vmem:[%s2994_s22 + $0x1e0] sm:$0xff] }
  0x3c   : > { %1547 = vmatpush1.bf16.msra.mxu1 %v2675_v60  ;;  %v2272_v60 = vcombine.low %v382_v46, %v386_v47  ;;  %v2761_v46 = vld [vmem:[%s3437_s2 + $0x1c0] ss:$8 sps:$4 sm:$0xff]  }
  0x3d   : > { %1773 = vmatpush1.bf16.msra.mxu0 %v2676_v61  ;;  %1548 = vmatprep.subr.bf16.mxu1 %v2677_v62  ;;  %v390_v61 = vld [vmem:[%s2994_s22 + $0x110] sm:$0xff]  ;;  %v2764_v47 = vld [vmem:[%s3437_s2 + $0x3c0] ss:$8 sps:$4 sm:$0xff]  }
  0x3e   : > { %1774 = vmatprep.subr.bf16.mxu0 %v2679_v63  ;;  %v394_v62 = vld [vmem:[%s2994_s22 + $0x130] sm:$0xff]  ;;  %v2728_v63 = vld [vmem:[%s3437_s2 + $0x360] ss:$8 sps:$4 sm:$0xff]  }
  0x40   : > { %1549 = vmatpush1.bf16.msra.mxu1 %v2681_v0  ;;  %v2733_v0 = vld [vmem:[%s3437_s2 + $0x174] ss:$8 sps:$4 sm:$0xff]  }
  0x41   : > { %1775 = vmatpush1.bf16.msra.mxu0 %v2682_v1  ;;  %1550 = vmatprep.subr.bf16.mxu1 %v2683_v2  ;;  %v2736_v1 = vld [vmem:[%s3437_s2 + $0x374] ss:$8 sps:$4 sm:$0xff]   ;;  %v2277_v2 = vcombine.high %v388_v57, %v392_v58 }
  0x42   : > { %1776 = vmatprep.subr.bf16.mxu0 %v2685_v3  ;;  %v2281_v3 = vcombine.high %v390_v61, %v394_v62 }
  0x44   : > { %1551 = vmatpush1.bf16.msra.mxu1 %v2687_v4  ;;  %v2731_v4 = vld [vmem:[%s3437_s2 + $0x170] ss:$8 sps:$4 sm:$0xff]  }
  0x45   : > { %1777 = vmatpush1.bf16.msra.mxu0 %v2688_v5  ;;  %1633 = vmatprep.subr.bf16.mxu1 %v2691_v6  ;;  %v2734_v5 = vld [vmem:[%s3437_s2 + $0x370] ss:$8 sps:$4 sm:$0xff]   ;;  %v2739_v6 = vld [vmem:[%s3437_s2 + $0x184] ss:$8 sps:$4 sm:$0xff]  }
  0x46   : > { %1859 = vmatprep.subr.bf16.mxu0 %v2694_v7  ;;  %v2742_v7 = vld [vmem:[%s3437_s2 + $0x384] ss:$8 sps:$4 sm:$0xff]  }
  0x47   : > { %1553 = vmatmul.mubr.bf16.vlgmr.msra.gmra.mrb[0].mxu1 %v2244_v11  ;;  %v2280_v11 = vcombine.low %v390_v61, %v394_v62  ;;  %v363_v61 = vld [vmem:[%s2994_s22 + $0x38] sm:$0xff]  ;;  %v2773_v62 = vld [vmem:[%s3437_s2 + $0x1e0] ss:$8 sps:$4 sm:$0xff]  }
  0x48   : > { %1779 = vmatmul.mubr.bf16.vlgmr.msra.gmra.mrb[0].mxu0 %v2248_v12  ;;  %1634 = vmatpush1.bf16.msra.mxu1 %v2689_v8  ;;  %v396_v8 = vld [vmem:[%s2994_s22 + $0x140] sm:$0xff]  ;;  %v398_v12 = vld [vmem:[%s2994_s22 + $0x150] sm:$0xff] }
  0x49   : > { %1860 = vmatpush1.bf16.msra.mxu0 %v2692_v9  ;;  %1635 = vmatprep.subr.bf16.mxu1 %v2697_v16  ;;  %v400_v9 = vld [vmem:[%s2994_s22 + $0x160] sm:$0xff]  ;;  %v2745_v16 = vld [vmem:[%s3437_s2 + $0x194] ss:$8 sps:$4 sm:$0xff]   ;;  %v2288_v26 = vcombine.low %v398_v12, %v402_v13 }
  0x4a   : > { %1861 = vmatprep.subr.bf16.mxu0 %v2700_v17  ;;  %1562 = vmatprep.mubr.bf16.mxu1 %v2253_v18  ;;  %v2748_v17 = vld [vmem:[%s3437_s2 + $0x394] ss:$8 sps:$4 sm:$0xff]   ;;  %v2285_v18 = vcombine.high %v396_v8, %v400_v9 }
  0x4b   : > { %1788 = vmatprep.mubr.bf16.mxu0 %v2257_v19  ;;  %v2289_v19 = vcombine.high %v398_v12, %v402_v13 }
  0x4c   : > { %1636 = vmatpush1.bf16.msra.mxu1 %v2695_v20  ;;  %v2743_v20 = vld [vmem:[%s3437_s2 + $0x190] ss:$8 sps:$4 sm:$0xff]  }
  0x4d   : > { %1862 = vmatpush1.bf16.msra.mxu0 %v2698_v21  ;;  %1637 = vmatprep.subr.bf16.mxu1 %v2703_v22  ;;  %v2746_v21 = vld [vmem:[%s3437_s2 + $0x390] ss:$8 sps:$4 sm:$0xff]   ;;  %v2751_v22 = vld [vmem:[%s3437_s2 + $0x1a4] ss:$8 sps:$4 sm:$0xff]  }
  0x4e   : > { %1863 = vmatprep.subr.bf16.mxu0 %v2706_v23  ;;  %v2754_v23 = vld [vmem:[%s3437_s2 + $0x3a4] ss:$8 sps:$4 sm:$0xff]  }
  0x4f   : > { %1563 = vmatmul.mubr.bf16.gmra.mrb[4].mxu1 %v2252_v28  ;;  %v406_v28 = vld [vmem:[%s2994_s22 + $0x190] sm:$0xff] }
  0x50   : > { %1789 = vmatmul.mubr.bf16.gmra.mrb[4].mxu0 %v2256_v29  ;;  %1638 = vmatpush1.bf16.msra.mxu1 %v2701_v24  ;;  %v404_v24 = vld [vmem:[%s2994_s22 + $0x180] sm:$0xff]  ;;  %v410_v29 = vld [vmem:[%s2994_s22 + $0x1b0] sm:$0xff] }
  0x51   : > { %1864 = vmatpush1.bf16.msra.mxu0 %v2704_v25  ;;  %1639 = vmatprep.subr.bf16.mxu1 %v2709_v32  ;;  %v2284_v25 = vcombine.low %v396_v8, %v400_v9  ;;  %v2757_v32 = vld [vmem:[%s3437_s2 + $0x1b4] ss:$8 sps:$4 sm:$0xff]   ;;  %v2296_v42 = vcombine.low %v406_v28, %v410_v29 }
  0x52   : > { %1865 = vmatprep.subr.bf16.mxu0 %v2712_v33  ;;  %1572 = vmatprep.mubr.bf16.mxu1 %v2261_v34  ;;  %v2760_v33 = vld [vmem:[%s3437_s2 + $0x3b4] ss:$8 sps:$4 sm:$0xff]   ;;  %v2293_v34 = vcombine.high %v404_v24, %v408_v27 }
  0x53   : > { %1798 = vmatprep.mubr.bf16.mxu0 %v2265_v35  ;;  %v2297_v35 = vcombine.high %v406_v28, %v410_v29  ;;  %v367_v8 = vld [vmem:[%s2994_s22 + $0x58] sm:$0xff] }
  0x54   : > { %1640 = vmatpush1.bf16.msra.mxu1 %v2707_v36  ;;  %v2755_v36 = vld [vmem:[%s3437_s2 + $0x1b0] ss:$8 sps:$4 sm:$0xff]  }
  0x55   : > { %1866 = vmatpush1.bf16.msra.mxu0 %v2710_v37  ;;  %1641 = vmatprep.subr.bf16.mxu1 %v2715_v38  ;;  %v2758_v37 = vld [vmem:[%s3437_s2 + $0x3b0] ss:$8 sps:$4 sm:$0xff]   ;;  %v2763_v38 = vld [vmem:[%s3437_s2 + $0x1c4] ss:$8 sps:$4 sm:$0xff]  }
  0x56   : > { %1867 = vmatprep.subr.bf16.mxu0 %v2718_v39  ;;  %v2766_v39 = vld [vmem:[%s3437_s2 + $0x3c4] ss:$8 sps:$4 sm:$0xff]   ;;  %v371_v9 = vld [vmem:[%s2994_s22 + $0x78] sm:$0xff] }
  0x57   : > { %1573 = vmatmul.mubr.bf16.gmra.mrb[8].mxu1 %v2260_v44  ;;  %v414_v44 = vld [vmem:[%s2994_s22 + $0x1d0] sm:$0xff]  ;;  %v2259_v13 = vcombine.high %v367_v8, %v371_v9 }
  0x58   : > { %1799 = vmatmul.mubr.bf16.gmra.mrb[8].mxu0 %v2264_v45  ;;  %1642 = vmatpush1.bf16.msra.mxu1 %v2713_v40  ;;  %v412_v40 = vld [vmem:[%s2994_s22 + $0x1c0] sm:$0xff]  ;;  %v418_v45 = vld [vmem:[%s2994_s22 + $0x1f0] sm:$0xff] }
  0x59   : > { %1868 = vmatpush1.bf16.msra.mxu0 %v2716_v41  ;;  %1643 = vmatprep.subr.bf16.mxu1 %v2721_v48  ;;  %v2292_v41 = vcombine.low %v404_v24, %v408_v27  ;;  %v2769_v48 = vld [vmem:[%s3437_s2 + $0x1d4] ss:$8 sps:$4 sm:$0xff]   ;;  %v2300_v57 = vcombine.low %v412_v40, %v416_v43  ;;  %v2304_v58 = vcombine.low %v414_v44, %v418_v45 }
  0x5a   : > { %1869 = vmatprep.subr.bf16.mxu0 %v2724_v49  ;;  %1582 = vmatprep.mubr.bf16.mxu1 %v2269_v50  ;;  %v2772_v49 = vld [vmem:[%s3437_s2 + $0x3d4] ss:$8 sps:$4 sm:$0xff]   ;;  %v2301_v50 = vcombine.high %v412_v40, %v416_v43 }
  0x5b   : > { %1808 = vmatprep.mubr.bf16.mxu0 %v2273_v51  ;;  %v2305_v51 = vcombine.high %v414_v44, %v418_v45  ;;  %v383_v24 = vld [vmem:[%s2994_s22 + $0xd8] sm:$0xff] }
  0x5c   : > { %1644 = vmatpush1.bf16.msra.mxu1 %v2719_v52  ;;  %v2767_v52 = vld [vmem:[%s3437_s2 + $0x1d0] ss:$8 sps:$4 sm:$0xff]  }
  0x5d   : > { %1870 = vmatpush1.bf16.msra.mxu0 %v2722_v53  ;;  %1645 = vmatprep.subr.bf16.mxu1 %v2727_v54  ;;  %v2770_v53 = vld [vmem:[%s3437_s2 + $0x3d0] ss:$8 sps:$4 sm:$0xff]   ;;  %v2775_v54 = vld [vmem:[%s3437_s2 + $0x1e4] ss:$8 sps:$4 sm:$0xff]  }
  0x5e   : > { %1871 = vmatprep.subr.bf16.mxu0 %v2730_v55  ;;  %v2778_v55 = vld [vmem:[%s3437_s2 + $0x3e4] ss:$8 sps:$4 sm:$0xff]   ;;  %v399_v40 = vld [vmem:[%s2994_s22 + $0x158] sm:$0xff] }
  0x5f   : > { %1583 = vmatmul.mubr.bf16.gmra.mrb[12].mxu1 %v2268_v59  ;;  %v361_v59 = vld [vmem:[%s2994_s22 + $0x28] sm:$0xff] }
  0x60   : > { %1809 = vmatmul.mubr.bf16.gmra.mrb[12].mxu0 %v2272_v60  ;;  %1646 = vmatpush1.bf16.msra.mxu1 %v2725_v56  ;;  %v357_v56 = vld [vmem:[%s2994_s22 + $0x8] sm:$0xff]  ;;  %v359_v60 = vld [vmem:[%s2994_s22 + $0x18] sm:$0xff] }
  0x61   : > { %1872 = vmatpush1.bf16.msra.mxu0 %v2728_v63  ;;  %1647 = vmatprep.subr.bf16.mxu1 %v2733_v0  ;;  %v2776_v63 = vld [vmem:[%s3437_s2 + $0x3e0] ss:$8 sps:$4 sm:$0xff]   ;;  %v2781_v0 = vld [vmem:[%s3437_s2 + $0x1f4] ss:$8 sps:$4 sm:$0xff]  }
  0x62   : > { %1873 = vmatprep.subr.bf16.mxu0 %v2736_v1  ;;  %1592 = vmatprep.mubr.bf16.mxu1 %v2277_v2  ;;  %v2784_v1 = vld [vmem:[%s3437_s2 + $0x3f4] ss:$8 sps:$4 sm:$0xff]   ;;  %v2247_v2 = vcombine.high %v357_v56, %v361_v59 }
  0x63   : > { %1818 = vmatprep.mubr.bf16.mxu0 %v2281_v3  ;;  %v2251_v3 = vcombine.high %v359_v60, %v363_v61 }
  0x64   : > { %1648 = vmatpush1.bf16.msra.mxu1 %v2731_v4  ;;  %v2779_v4 = vld [vmem:[%s3437_s2 + $0x1f0] ss:$8 sps:$4 sm:$0xff]  }
  0x65   : > { %1874 = vmatpush1.bf16.msra.mxu0 %v2734_v5  ;;  %1649 = vmatprep.subr.bf16.mxu1 %v2739_v6  ;;  %v2782_v5 = vld [vmem:[%s3437_s2 + $0x3f0] ss:$8 sps:$4 sm:$0xff]   ;;  %v365_v6 = vld [vmem:[%s2994_s22 + $0x48] sm:$0xff] }
  0x66   : > { %1875 = vmatprep.subr.bf16.mxu0 %v2742_v7  ;;  %v369_v7 = vld [vmem:[%s2994_s22 + $0x68] sm:$0xff] }
  0x67   : > { %1593 = vmatmul.mubr.bf16.gmra.mrb[16].mxu1 %v2276_v10  ;;  %v2246_v10 = vcombine.low %v357_v56, %v361_v59  ;;  %v2255_v12 = vcombine.high %v365_v6, %v369_v7  ;;  %v415_v56 = vld [vmem:[%s2994_s22 + $0x1d8] sm:$0xff] }
  0x68   : > { %1819 = vmatmul.mubr.bf16.gmra.mrb[16].mxu0 %v2280_v11  ;;  %1650 = vmatpush1.bf16.msra.mxu1 %v2737_v14  ;;  %v2250_v11 = vcombine.low %v359_v60, %v363_v61  ;;  %v373_v14 = vld [vmem:[%s2994_s22 + $0x88] sm:$0xff] }
  0x69   : > { %1876 = vmatpush1.bf16.msra.mxu0 %v2740_v15  ;;  %1651 = vmatprep.subr.bf16.mxu1 %v2745_v16  ;;  %v377_v15 = vld [vmem:[%s2994_s22 + $0xa8] sm:$0xff]  ;;  %v375_v16 = vld [vmem:[%s2994_s22 + $0x98] sm:$0xff] }
  0x6a   : > { %1877 = vmatprep.subr.bf16.mxu0 %v2748_v17  ;;  %1602 = vmatprep.mubr.bf16.mxu1 %v2285_v18  ;;  %v379_v17 = vld [vmem:[%s2994_s22 + $0xb8] sm:$0xff]  ;;  %v2254_v18 = vcombine.low %v365_v6, %v369_v7 }
  0x6b   : > { %1828 = vmatprep.mubr.bf16.mxu0 %v2289_v19  ;;  %v2258_v19 = vcombine.low %v367_v8, %v371_v9  ;;  %v2266_v27 = vcombine.low %v375_v16, %v379_v17 }
  0x6c   : > { %1652 = vmatpush1.bf16.msra.mxu1 %v2743_v20  ;;  %v2263_v20 = vcombine.high %v373_v14, %v377_v15 }
  0x6d   : > { %1878 = vmatpush1.bf16.msra.mxu0 %v2746_v21  ;;  %1653 = vmatprep.subr.bf16.mxu1 %v2751_v22  ;;  %v2267_v21 = vcombine.high %v375_v16, %v379_v17  ;;  %v381_v22 = vld [vmem:[%s2994_s22 + $0xc8] sm:$0xff] }
  0x6e   : > { %1879 = vmatprep.subr.bf16.mxu0 %v2754_v23  ;;  %v385_v23 = vld [vmem:[%s2994_s22 + $0xe8] sm:$0xff] }
  0x6f   : > { %1603 = vmatmul.mubr.bf16.gmra.mrb[20].mxu1 %v2284_v25  ;;  %v387_v25 = vld [vmem:[%s2994_s22 + $0xf8] sm:$0xff]  ;;  %v2271_v28 = vcombine.high %v381_v22, %v385_v23 }
  0x70   : > { %1829 = vmatmul.mubr.bf16.gmra.mrb[20].mxu0 %v2288_v26  ;;  %1654 = vmatpush1.bf16.msra.mxu1 %v2749_v30  ;;  %v2262_v26 = vcombine.low %v373_v14, %v377_v15  ;;  %v2275_v29 = vcombine.high %v383_v24, %v387_v25  ;;  %v389_v30 = vld [vmem:[%s2994_s22 + $0x108] sm:$0xff] }
  0x71   : > { %1880 = vmatpush1.bf16.msra.mxu0 %v2752_v31  ;;  %1655 = vmatprep.subr.bf16.mxu1 %v2757_v32  ;;  %v393_v31 = vld [vmem:[%s2994_s22 + $0x128] sm:$0xff]  ;;  %v391_v32 = vld [vmem:[%s2994_s22 + $0x118] sm:$0xff] }
  0x72   : > { %1881 = vmatprep.subr.bf16.mxu0 %v2760_v33  ;;  %1612 = vmatprep.mubr.bf16.mxu1 %v2293_v34  ;;  %v395_v33 = vld [vmem:[%s2994_s22 + $0x138] sm:$0xff]  ;;  %v2270_v34 = vcombine.low %v381_v22, %v385_v23 }
  0x73   : > { %1838 = vmatprep.mubr.bf16.mxu0 %v2297_v35  ;;  %v2274_v35 = vcombine.low %v383_v24, %v387_v25  ;;  %v2282_v43 = vcombine.low %v391_v32, %v395_v33 }
  0x74   : > { %1656 = vmatpush1.bf16.msra.mxu1 %v2755_v36  ;;  %v2279_v36 = vcombine.high %v389_v30, %v393_v31 }
  0x75   : > { %1882 = vmatpush1.bf16.msra.mxu0 %v2758_v37  ;;  %1657 = vmatprep.subr.bf16.mxu1 %v2763_v38  ;;  %v2283_v37 = vcombine.high %v391_v32, %v395_v33  ;;  %v397_v38 = vld [vmem:[%s2994_s22 + $0x148] sm:$0xff] }
  0x76   : > { %1883 = vmatprep.subr.bf16.mxu0 %v2766_v39  ;;  %v401_v39 = vld [vmem:[%s2994_s22 + $0x168] sm:$0xff] }
  0x77   : > { %1613 = vmatmul.mubr.bf16.gmra.mrb[24].mxu1 %v2292_v41  ;;  %v403_v41 = vld [vmem:[%s2994_s22 + $0x178] sm:$0xff]  ;;  %v2287_v44 = vcombine.high %v397_v38, %v401_v39 }
  0x78   : > { %1839 = vmatmul.mubr.bf16.gmra.mrb[24].mxu0 %v2296_v42  ;;  %1658 = vmatpush1.bf16.msra.mxu1 %v2761_v46  ;;  %v2278_v42 = vcombine.low %v389_v30, %v393_v31  ;;  %v2291_v45 = vcombine.high %v399_v40, %v403_v41  ;;  %v405_v46 = vld [vmem:[%s2994_s22 + $0x188] sm:$0xff] }
  0x79   : > { %1884 = vmatpush1.bf16.msra.mxu0 %v2764_v47  ;;  %1659 = vmatprep.subr.bf16.mxu1 %v2769_v48  ;;  %v409_v47 = vld [vmem:[%s2994_s22 + $0x1a8] sm:$0xff]  ;;  %v407_v48 = vld [vmem:[%s2994_s22 + $0x198] sm:$0xff] }
  0x7a   : > { %1885 = vmatprep.subr.bf16.mxu0 %v2772_v49  ;;  %1622 = vmatprep.mubr.bf16.mxu1 %v2301_v50  ;;  %v411_v49 = vld [vmem:[%s2994_s22 + $0x1b8] sm:$0xff]  ;;  %v2286_v50 = vcombine.low %v397_v38, %v401_v39 }
  0x7b   : > { %1848 = vmatprep.mubr.bf16.mxu0 %v2305_v51  ;;  %v2290_v51 = vcombine.low %v399_v40, %v403_v41  ;;  %v2298_v59 = vcombine.low %v407_v48, %v411_v49 }
  0x7c   : > { %1660 = vmatpush1.bf16.msra.mxu1 %v2767_v52  ;;  %v2295_v52 = vcombine.high %v405_v46, %v409_v47 }
  0x7d   : > { %1886 = vmatpush1.bf16.msra.mxu0 %v2770_v53  ;;  %1661 = vmatprep.subr.bf16.mxu1 %v2775_v54  ;;  %v2299_v53 = vcombine.high %v407_v48, %v411_v49  ;;  %v413_v54 = vld [vmem:[%s2994_s22 + $0x1c8] sm:$0xff] }
  0x7e   : > { %1887 = vmatprep.subr.bf16.mxu0 %v2778_v55  ;;  %v417_v55 = vld [vmem:[%s2994_s22 + $0x1e8] sm:$0xff] }
  0x7f   : > { %1623 = vmatmul.mubr.bf16.gmra.mrb[28].mxu1 %v2300_v57  ;;  %v419_v57 = vld [vmem:[%s2994_s22 + $0x1f8] sm:$0xff]  ;;  %v2303_v60 = vcombine.high %v413_v54, %v417_v55  ;;  %s2439_s22 = sshll.u32 %s3445_s15, 8 }
  0x80   : > { %1849 = vmatmul.mubr.bf16.gmra.mrb[28].mxu0 %v2304_v58  ;;  %1662 = vmatpush1.bf16.msra.mxu1 %v2773_v62  ;;  %v2294_v58 = vcombine.low %v405_v46, %v409_v47  ;;  %v2307_v61 = vcombine.high %v415_v56, %v419_v57  ;;  %v2302_v62 = vcombine.low %v413_v54, %v417_v55  ;;  %s3323_s27 = scalar_lea.vmem %s3436_s1, %s2439_s22  ;;  %s3333_s29 = scalar_lea.vmem %s3439_s4, %s2439_s22 }
  0x81   : > { %1888 = vmatpush1.bf16.msra.mxu0 %v2776_v63  ;;  %1663 = vmatprep.subr.bf16.mxu1 %v2781_v0  ;;  %v2306_v63 = vcombine.low %v415_v56, %v419_v57  ;;  %v550_v0 = vlaneseq  ;;  %v1973_v17 = vld [vmem:[%s3323_s27 + $0x8] sm:$0xff]  ;;  %v1974_v22 = vld [vmem:[%s3323_s27 + $0x10] sm:$0xff] }
  0x82   : > { %1889 = vmatprep.subr.bf16.mxu0 %v2784_v1  ;;  %1665 = vmatprep.mubr.bf16.mxu1 %v2247_v2  ;;  %v1977_v41 = vld [vmem:[%s3323_s27 + $0x28] sm:$0xff]  ;;  %v1978_v46 = vld [vmem:[%s3323_s27 + $0x30] sm:$0xff] }
  0x83   : > { %1891 = vmatprep.mubr.bf16.mxu0 %v2251_v3  ;;  %v551_v1 = vshrl.u32 %v550_v0, 7  ;;  %v548_v3 = vld [vmem:[%s3438_s3] sm:$0x3] }
  0x84   : > { %1664 = vmatpush1.bf16.msra.mxu1 %v2779_v4 }
  0x85   : > { %1890 = vmatpush1.bf16.msra.mxu0 %v2782_v5  ;;  %v552_v2 = vsub.s32 0, %v551_v1  ;;  %v556_v4 = vsub.s32 1, %v551_v1  ;;  %v1981_v1 = vld [vmem:[%s3323_s27 + $0x48] sm:$0xff] }
  0x87   : > { %1666 = vmatmul.mubr.bf16.vlgmr.msra.gmra.mrb[0].mxu1 %v2246_v10  ;;  %v3316_v5 = vrot.slane %v548_v3, %v552_v2  ;;  %v3318_v6 = vrot.slane %v548_v3, %v556_v4 }
  0x88   : > { %1892 = vmatmul.mubr.bf16.vlgmr.msra.gmra.mrb[0].mxu0 %v2250_v11  ;;  %1675 = vmatprep.mubr.bf16.mxu1 %v2255_v12  ;;  %v1972_v12 = vld [vmem:[%s3323_s27] sm:$0xff] }
  0x89   : > { %1901 = vmatprep.mubr.bf16.mxu0 %v2259_v13 }
  0x8f   : > { %1676 = vmatmul.mubr.bf16.gmra.mrb[4].mxu1 %v2254_v18 }
  0x90   : > { %1902 = vmatmul.mubr.bf16.gmra.mrb[4].mxu0 %v2258_v19  ;;  %1685 = vmatprep.mubr.bf16.mxu1 %v2263_v20 }
  0x91   : > { %1911 = vmatprep.mubr.bf16.mxu0 %v2267_v21 }
  0x97   : > { %1686 = vmatmul.mubr.bf16.gmra.mrb[8].mxu1 %v2262_v26  ;;  %v1975_v26 = vld [vmem:[%s3323_s27 + $0x18] sm:$0xff] }
  0x98   : > { %1912 = vmatmul.mubr.bf16.gmra.mrb[8].mxu0 %v2266_v27  ;;  %1695 = vmatprep.mubr.bf16.mxu1 %v2271_v28 }
  0x99   : > { %1921 = vmatprep.mubr.bf16.mxu0 %v2275_v29 }
  0x9f   : > { %1696 = vmatmul.mubr.bf16.gmra.mrb[12].mxu1 %v2270_v34 }
  0xa0   : > { %1922 = vmatmul.mubr.bf16.gmra.mrb[12].mxu0 %v2274_v35  ;;  %1705 = vmatprep.mubr.bf16.mxu1 %v2279_v36  ;;  %v1976_v36 = vld [vmem:[%s3323_s27 + $0x20] sm:$0xff] }
  0xa1   : > { %1931 = vmatprep.mubr.bf16.mxu0 %v2283_v37 }
  0xa7   : > { %1706 = vmatmul.mubr.bf16.gmra.mrb[16].mxu1 %v2278_v42 }
  0xa8   : > { %1932 = vmatmul.mubr.bf16.gmra.mrb[16].mxu0 %v2282_v43  ;;  %1715 = vmatprep.mubr.bf16.mxu1 %v2287_v44 }
  0xa9   : > { %1941 = vmatprep.mubr.bf16.mxu0 %v2291_v45 }
  0xaf   : > { %1716 = vmatmul.mubr.bf16.gmra.mrb[20].mxu1 %v2286_v50  ;;  %v1979_v50 = vld [vmem:[%s3323_s27 + $0x38] sm:$0xff] }
  0xb0   : > { %1942 = vmatmul.mubr.bf16.gmra.mrb[20].mxu0 %v2290_v51  ;;  %1725 = vmatprep.mubr.bf16.mxu1 %v2295_v52 }
  0xb1   : > { %1951 = vmatprep.mubr.bf16.mxu0 %v2299_v53 }
  0xb7   : > { %1726 = vmatmul.mubr.bf16.gmra.mrb[24].mxu1 %v2294_v58 }
  0xb8   : > { %1952 = vmatmul.mubr.bf16.gmra.mrb[24].mxu0 %v2298_v59  ;;  %1735 = vmatprep.mubr.bf16.mxu1 %v2303_v60  ;;  %v1980_v60 = vld [vmem:[%s3323_s27 + $0x40] sm:$0xff] }
  0xb9   : > { %1961 = vmatprep.mubr.bf16.mxu0 %v2307_v61 }
  0xbf   : > { %1736 = vmatmul.mubr.bf16.gmra.mrb[28].mxu1 %v2302_v62 }
  0xc0   : > { %1962 = vmatmul.mubr.bf16.gmra.mrb[28].mxu0 %v2306_v63 }
 0x15a   : > { %v1667_v7 = vpop.f32.mrb[0].mxu1 }
 0x15b   : > { %v1893_v8 = vpop.f32.mrb[0].mxu0  ;;  %v2441_v9 = vadd.f32 %v1667_v7, %v3316_v5  ;;  %v1669_v10 = vpop.f32.mrb[1].mxu1 }
 0x15c   : > { %v1895_v11 = vpop.f32.mrb[1].mxu0  ;;  %v2443_v13 = vadd.f32 %v1669_v10, %v3318_v6  ;;  %v1671_v14 = vpop.f32.mrb[2].mxu1 }
 0x15d   : > { %v1897_v15 = vpop.f32.mrb[2].mxu0  ;;  %v2442_v16 = vadd.f32 %v2441_v9, %v1893_v8  ;;  %v2445_v18 = vadd.f32 %v1671_v14, %v3316_v5  ;;  %v1673_v19 = vpop.f32.mrb[3].mxu1  ;;  %v1982_v8 = vld [vmem:[%s3323_s27 + $0x50] sm:$0xff] }
 0x15e   : > { %v1899_v20 = vpop.f32.mrb[3].mxu0  ;;  %v2444_v21 = vadd.f32 %v2443_v13, %v1895_v11  ;;  %v2447_v23 = vadd.f32 %v1673_v19, %v3318_v6 }
 0x15f   : > { %v2004_v24 = vadd.f32 %v2442_v16, %v1972_v12  ;;  %v2446_v25 = vadd.f32 %v2445_v18, %v1897_v15  ;;  %v1983_v12 = vld [vmem:[%s3323_s27 + $0x58] sm:$0xff] }
 0x160   : > { %v2005_v27 = vadd.f32 %v2444_v21, %v1973_v17  ;;  %v2448_v28 = vadd.f32 %v2447_v23, %v1899_v20 }
 0x161   : > { %2036 = vst [vmem:[%s3333_s29] sm:$0xff] %v2004_v24  ;;  %v2006_v29 = vadd.f32 %v2446_v25, %v1974_v22  ;;  %v1984_v22 = vld [vmem:[%s3323_s27 + $0x60] sm:$0xff] }
 0x162   : > { %2037 = vst [vmem:[%s3333_s29 + $0x8] sm:$0xff] %v2005_v27  ;;  %v2007_v30 = vadd.f32 %v2448_v28, %v1975_v26  ;;  %v1677_v31 = vpop.f32.mrb[4].mxu1  ;;  %v1985_v27 = vld [vmem:[%s3323_s27 + $0x68] sm:$0xff] }
 0x163   : > { %v1903_v32 = vpop.f32.mrb[4].mxu0  ;;  %2038 = vst [vmem:[%s3333_s29 + $0x10] sm:$0xff] %v2006_v29  ;;  %v2449_v33 = vadd.f32 %v1677_v31, %v3316_v5  ;;  %v1679_v34 = vpop.f32.mrb[5].mxu1 }
 0x164   : > { %v1905_v35 = vpop.f32.mrb[5].mxu0  ;;  %2039 = vst [vmem:[%s3333_s29 + $0x18] sm:$0xff] %v2007_v30  ;;  %v2451_v37 = vadd.f32 %v1679_v34, %v3318_v6  ;;  %v1681_v38 = vpop.f32.mrb[6].mxu1 }
 0x165   : > { %v1907_v39 = vpop.f32.mrb[6].mxu0  ;;  %v2450_v40 = vadd.f32 %v2449_v33, %v1903_v32  ;;  %v2453_v42 = vadd.f32 %v1681_v38, %v3316_v5  ;;  %v1683_v43 = vpop.f32.mrb[7].mxu1  ;;  %v1986_v32 = vld [vmem:[%s3323_s27 + $0x70] sm:$0xff] }
 0x166   : > { %v1909_v44 = vpop.f32.mrb[7].mxu0  ;;  %v2452_v45 = vadd.f32 %v2451_v37, %v1905_v35  ;;  %v2455_v47 = vadd.f32 %v1683_v43, %v3318_v6 }
 0x167   : > { %v2008_v48 = vadd.f32 %v2450_v40, %v1976_v36  ;;  %v2454_v49 = vadd.f32 %v2453_v42, %v1907_v39  ;;  %v1987_v36 = vld [vmem:[%s3323_s27 + $0x78] sm:$0xff] }
 0x168   : > { %v2009_v51 = vadd.f32 %v2452_v45, %v1977_v41  ;;  %v2456_v52 = vadd.f32 %v2455_v47, %v1909_v44 }
 0x169   : > { %2040 = vst [vmem:[%s3333_s29 + $0x20] sm:$0xff] %v2008_v48  ;;  %v2010_v53 = vadd.f32 %v2454_v49, %v1978_v46  ;;  %v1988_v46 = vld [vmem:[%s3323_s27 + $0x80] sm:$0xff] }
 0x16a   : > { %2041 = vst [vmem:[%s3333_s29 + $0x28] sm:$0xff] %v2009_v51  ;;  %v2011_v54 = vadd.f32 %v2456_v52, %v1979_v50  ;;  %v1687_v55 = vpop.f32.mrb[8].mxu1  ;;  %v1989_v51 = vld [vmem:[%s3323_s27 + $0x88] sm:$0xff] }
 0x16b   : > { %v1913_v56 = vpop.f32.mrb[8].mxu0  ;;  %2042 = vst [vmem:[%s3333_s29 + $0x30] sm:$0xff] %v2010_v53  ;;  %v2457_v57 = vadd.f32 %v1687_v55, %v3316_v5  ;;  %v1689_v58 = vpop.f32.mrb[9].mxu1 }
 0x16c   : > { %v1915_v59 = vpop.f32.mrb[9].mxu0  ;;  %2043 = vst [vmem:[%s3333_s29 + $0x38] sm:$0xff] %v2011_v54  ;;  %v2459_v61 = vadd.f32 %v1689_v58, %v3318_v6  ;;  %v1691_v62 = vpop.f32.mrb[10].mxu1 }
 0x16d   : > { %v1917_v63 = vpop.f32.mrb[10].mxu0  ;;  %v2458_v0 = vadd.f32 %v2457_v57, %v1913_v56  ;;  %v2461_v2 = vadd.f32 %v1691_v62, %v3316_v5  ;;  %v1693_v3 = vpop.f32.mrb[11].mxu1  ;;  %v1990_v56 = vld [vmem:[%s3323_s27 + $0x90] sm:$0xff] }
 0x16e   : > { %v1919_v4 = vpop.f32.mrb[11].mxu0  ;;  %v2460_v7 = vadd.f32 %v2459_v61, %v1915_v59  ;;  %v2463_v9 = vadd.f32 %v1693_v3, %v3318_v6 }
 0x16f   : > { %v2012_v10 = vadd.f32 %v2458_v0, %v1980_v60  ;;  %v2462_v11 = vadd.f32 %v2461_v2, %v1917_v63  ;;  %v1991_v60 = vld [vmem:[%s3323_s27 + $0x98] sm:$0xff] }
 0x170   : > { %v2013_v13 = vadd.f32 %v2460_v7, %v1981_v1  ;;  %v2464_v14 = vadd.f32 %v2463_v9, %v1919_v4 }
 0x171   : > { %2044 = vst [vmem:[%s3333_s29 + $0x40] sm:$0xff] %v2012_v10  ;;  %v2014_v15 = vadd.f32 %v2462_v11, %v1982_v8  ;;  %v1992_v8 = vld [vmem:[%s3323_s27 + $0xa0] sm:$0xff] }
 0x172   : > { %2045 = vst [vmem:[%s3333_s29 + $0x48] sm:$0xff] %v2013_v13  ;;  %v2015_v16 = vadd.f32 %v2464_v14, %v1983_v12  ;;  %v1697_v17 = vpop.f32.mrb[12].mxu1  ;;  %v1993_v13 = vld [vmem:[%s3323_s27 + $0xa8] sm:$0xff] }
 0x173   : > { %v1923_v18 = vpop.f32.mrb[12].mxu0  ;;  %2046 = vst [vmem:[%s3333_s29 + $0x50] sm:$0xff] %v2014_v15  ;;  %v2465_v19 = vadd.f32 %v1697_v17, %v3316_v5  ;;  %v1699_v20 = vpop.f32.mrb[13].mxu1 }
 0x174   : > { %v1925_v21 = vpop.f32.mrb[13].mxu0  ;;  %2047 = vst [vmem:[%s3333_s29 + $0x58] sm:$0xff] %v2015_v16  ;;  %v2467_v23 = vadd.f32 %v1699_v20, %v3318_v6  ;;  %v1701_v24 = vpop.f32.mrb[14].mxu1 }
 0x175   : > { %v1927_v25 = vpop.f32.mrb[14].mxu0  ;;  %v2466_v26 = vadd.f32 %v2465_v19, %v1923_v18  ;;  %v2469_v28 = vadd.f32 %v1701_v24, %v3316_v5  ;;  %v1703_v29 = vpop.f32.mrb[15].mxu1  ;;  %v1994_v18 = vld [vmem:[%s3323_s27 + $0xb0] sm:$0xff] }
 0x176   : > { %v1929_v30 = vpop.f32.mrb[15].mxu0  ;;  %v2468_v31 = vadd.f32 %v2467_v23, %v1925_v21  ;;  %v2471_v33 = vadd.f32 %v1703_v29, %v3318_v6 }
 0x177   : > { %v2016_v34 = vadd.f32 %v2466_v26, %v1984_v22  ;;  %v2470_v35 = vadd.f32 %v2469_v28, %v1927_v25  ;;  %v1995_v22 = vld [vmem:[%s3323_s27 + $0xb8] sm:$0xff] }
 0x178   : > { %v2017_v37 = vadd.f32 %v2468_v31, %v1985_v27  ;;  %v2472_v38 = vadd.f32 %v2471_v33, %v1929_v30 }
 0x179   : > { %2048 = vst [vmem:[%s3333_s29 + $0x60] sm:$0xff] %v2016_v34  ;;  %v2018_v39 = vadd.f32 %v2470_v35, %v1986_v32  ;;  %v1996_v32 = vld [vmem:[%s3323_s27 + $0xc0] sm:$0xff] }
 0x17a   : > { %2049 = vst [vmem:[%s3333_s29 + $0x68] sm:$0xff] %v2017_v37  ;;  %v2019_v40 = vadd.f32 %v2472_v38, %v1987_v36  ;;  %v1707_v41 = vpop.f32.mrb[16].mxu1  ;;  %v1997_v37 = vld [vmem:[%s3323_s27 + $0xc8] sm:$0xff] }
 0x17b   : > { %v1933_v42 = vpop.f32.mrb[16].mxu0  ;;  %2050 = vst [vmem:[%s3333_s29 + $0x70] sm:$0xff] %v2018_v39  ;;  %v2473_v43 = vadd.f32 %v1707_v41, %v3316_v5  ;;  %v1709_v44 = vpop.f32.mrb[17].mxu1 }
 0x17c   : > { %v1935_v45 = vpop.f32.mrb[17].mxu0  ;;  %2051 = vst [vmem:[%s3333_s29 + $0x78] sm:$0xff] %v2019_v40  ;;  %v2475_v47 = vadd.f32 %v1709_v44, %v3318_v6  ;;  %v1711_v48 = vpop.f32.mrb[18].mxu1 }
 0x17d   : > { %v1937_v49 = vpop.f32.mrb[18].mxu0  ;;  %v2474_v50 = vadd.f32 %v2473_v43, %v1933_v42  ;;  %v2477_v52 = vadd.f32 %v1711_v48, %v3316_v5  ;;  %v1713_v53 = vpop.f32.mrb[19].mxu1  ;;  %v1998_v42 = vld [vmem:[%s3323_s27 + $0xd0] sm:$0xff] }
 0x17e   : > { %v1939_v54 = vpop.f32.mrb[19].mxu0  ;;  %v2476_v55 = vadd.f32 %v2475_v47, %v1935_v45  ;;  %v2479_v57 = vadd.f32 %v1713_v53, %v3318_v6 }
 0x17f   : > { %v2020_v58 = vadd.f32 %v2474_v50, %v1988_v46  ;;  %v2478_v59 = vadd.f32 %v2477_v52, %v1937_v49  ;;  %v1999_v46 = vld [vmem:[%s3323_s27 + $0xd8] sm:$0xff] }
 0x180   : > { %v2021_v61 = vadd.f32 %v2476_v55, %v1989_v51  ;;  %v2480_v62 = vadd.f32 %v2479_v57, %v1939_v54 }
 0x181   : > { %2052 = vst [vmem:[%s3333_s29 + $0x80] sm:$0xff] %v2020_v58  ;;  %v2022_v63 = vadd.f32 %v2478_v59, %v1990_v56  ;;  %v2000_v56 = vld [vmem:[%s3323_s27 + $0xe0] sm:$0xff] }
 0x182   : > { %2053 = vst [vmem:[%s3333_s29 + $0x88] sm:$0xff] %v2021_v61  ;;  %v2023_v0 = vadd.f32 %v2480_v62, %v1991_v60  ;;  %v1717_v1 = vpop.f32.mrb[20].mxu1  ;;  %v2001_v61 = vld [vmem:[%s3323_s27 + $0xe8] sm:$0xff] }
 0x183   : > { %v1943_v2 = vpop.f32.mrb[20].mxu0  ;;  %2054 = vst [vmem:[%s3333_s29 + $0x90] sm:$0xff] %v2022_v63  ;;  %v2481_v3 = vadd.f32 %v1717_v1, %v3316_v5  ;;  %v1719_v4 = vpop.f32.mrb[21].mxu1 }
 0x184   : > { %v1945_v7 = vpop.f32.mrb[21].mxu0  ;;  %2055 = vst [vmem:[%s3333_s29 + $0x98] sm:$0xff] %v2023_v0  ;;  %v2483_v9 = vadd.f32 %v1719_v4, %v3318_v6  ;;  %v1721_v10 = vpop.f32.mrb[22].mxu1 }
 0x185   : > { %v1947_v11 = vpop.f32.mrb[22].mxu0  ;;  %v2482_v12 = vadd.f32 %v2481_v3, %v1943_v2  ;;  %v2485_v14 = vadd.f32 %v1721_v10, %v3316_v5  ;;  %v1723_v15 = vpop.f32.mrb[23].mxu1  ;;  %v2002_v2 = vld [vmem:[%s3323_s27 + $0xf0] sm:$0xff] }
 0x186   : > { %v1949_v16 = vpop.f32.mrb[23].mxu0  ;;  %v2484_v17 = vadd.f32 %v2483_v9, %v1945_v7  ;;  %v2487_v19 = vadd.f32 %v1723_v15, %v3318_v6 }
 0x187   : > { %v2024_v20 = vadd.f32 %v2482_v12, %v1992_v8  ;;  %v2486_v21 = vadd.f32 %v2485_v14, %v1947_v11  ;;  %v2003_v8 = vld [vmem:[%s3323_s27 + $0xf8] sm:$0xff] }
 0x188   : > { %v2025_v23 = vadd.f32 %v2484_v17, %v1993_v13  ;;  %v2488_v24 = vadd.f32 %v2487_v19, %v1949_v16 }
 0x189   : > { %2056 = vst [vmem:[%s3333_s29 + $0xa0] sm:$0xff] %v2024_v20  ;;  %v2026_v25 = vadd.f32 %v2486_v21, %v1994_v18 }
 0x18a   : > { %2057 = vst [vmem:[%s3333_s29 + $0xa8] sm:$0xff] %v2025_v23  ;;  %v2027_v26 = vadd.f32 %v2488_v24, %v1995_v22  ;;  %v1727_v27 = vpop.f32.mrb[24].mxu1 }
 0x18b   : > { %v1953_v28 = vpop.f32.mrb[24].mxu0  ;;  %2058 = vst [vmem:[%s3333_s29 + $0xb0] sm:$0xff] %v2026_v25  ;;  %v2489_v29 = vadd.f32 %v1727_v27, %v3316_v5  ;;  %v1729_v30 = vpop.f32.mrb[25].mxu1 }
 0x18c   : > { %v1955_v31 = vpop.f32.mrb[25].mxu0  ;;  %2059 = vst [vmem:[%s3333_s29 + $0xb8] sm:$0xff] %v2027_v26  ;;  %v2491_v33 = vadd.f32 %v1729_v30, %v3318_v6  ;;  %v1731_v34 = vpop.f32.mrb[26].mxu1 }
 0x18d   : > { %v1957_v35 = vpop.f32.mrb[26].mxu0  ;;  %v2490_v36 = vadd.f32 %v2489_v29, %v1953_v28  ;;  %v2493_v38 = vadd.f32 %v1731_v34, %v3316_v5  ;;  %v1733_v39 = vpop.f32.mrb[27].mxu1 }
 0x18e   : > { %v1959_v40 = vpop.f32.mrb[27].mxu0  ;;  %v2492_v41 = vadd.f32 %v2491_v33, %v1955_v31  ;;  %v2495_v43 = vadd.f32 %v1733_v39, %v3318_v6 }
 0x18f   : > { %v2028_v44 = vadd.f32 %v2490_v36, %v1996_v32  ;;  %v2494_v45 = vadd.f32 %v2493_v38, %v1957_v35 }
 0x190   : > { %v2029_v47 = vadd.f32 %v2492_v41, %v1997_v37  ;;  %v2496_v48 = vadd.f32 %v2495_v43, %v1959_v40 }
 0x191   : > { %2060 = vst [vmem:[%s3333_s29 + $0xc0] sm:$0xff] %v2028_v44  ;;  %v2030_v49 = vadd.f32 %v2494_v45, %v1998_v42 }
 0x192   : > { %2061 = vst [vmem:[%s3333_s29 + $0xc8] sm:$0xff] %v2029_v47  ;;  %v2031_v50 = vadd.f32 %v2496_v48, %v1999_v46  ;;  %v1737_v51 = vpop.f32.mrb[28].mxu1 }
 0x193   : > { %v1963_v52 = vpop.f32.mrb[28].mxu0  ;;  %2062 = vst [vmem:[%s3333_s29 + $0xd0] sm:$0xff] %v2030_v49  ;;  %v2497_v53 = vadd.f32 %v1737_v51, %v3316_v5  ;;  %v1739_v54 = vpop.f32.mrb[29].mxu1 }
 0x194   : > { %v1965_v55 = vpop.f32.mrb[29].mxu0  ;;  %2063 = vst [vmem:[%s3333_s29 + $0xd8] sm:$0xff] %v2031_v50  ;;  %v2499_v57 = vadd.f32 %v1739_v54, %v3318_v6  ;;  %v1741_v58 = vpop.f32.mrb[30].mxu1 }
 0x195   : > { %v1967_v59 = vpop.f32.mrb[30].mxu0  ;;  %v2498_v60 = vadd.f32 %v2497_v53, %v1963_v52  ;;  %v2501_v62 = vadd.f32 %v1741_v58, %v3316_v5  ;;  %v1743_v63 = vpop.f32.mrb[31].mxu1 }
 0x196   : > { %v1969_v0 = vpop.f32.mrb[31].mxu0  ;;  %v2500_v1 = vadd.f32 %v2499_v57, %v1965_v55  ;;  %v2503_v3 = vadd.f32 %v1743_v63, %v3318_v6 }
 0x197   : > { %v2032_v4 = vadd.f32 %v2498_v60, %v2000_v56  ;;  %v2502_v7 = vadd.f32 %v2501_v62, %v1967_v59 }
 0x198   : > { %v2033_v9 = vadd.f32 %v2500_v1, %v2001_v61  ;;  %v2504_v10 = vadd.f32 %v2503_v3, %v1969_v0 }
 0x199   : > { %2064 = vst [vmem:[%s3333_s29 + $0xe0] sm:$0xff] %v2032_v4  ;;  %v2034_v11 = vadd.f32 %v2502_v7, %v2002_v2 }
 0x19a   : > { %2065 = vst [vmem:[%s3333_s29 + $0xe8] sm:$0xff] %v2033_v9  ;;  %v2035_v12 = vadd.f32 %v2504_v10, %v2003_v8 }
 0x19b   : > { %2066 = vst [vmem:[%s3333_s29 + $0xf0] sm:$0xff] %v2034_v11 }
 0x19c   : > { %2067 = vst [vmem:[%s3333_s29 + $0xf8] sm:$0xff] %v2035_v12 }
 0x19d PF: > { %s14_s17 = sadd.s32 1, %s2807_s17   ;;  %s3440_s15 = smov %s2803_s16 }
 0x19e   : > { %p11_p5 = scmp.ge.s32.totalorder %s14_s17, 4   ;;  %s3441_s16 = smov %s3443_s18 }
 0x1a0   :  { %13 = sbr.rel (!%p11_p5) target bundleno = 2 (0x2), region = 75 }

</bundles_post_ra>
